<compile_context>
chip_gen: v5e
topology: v5e:2x2
jax: 0.10.0
libtpu: 0.0.40
codegen_flags: <defaults>
</compile_context>

<pallas_src>
import functools

import jax
import jax.numpy as jnp
from jax import lax
from jax.experimental import pallas as pl
from jax.experimental.pallas import tpu as pltpu

# ---------------- configuration (LTB with in_ch=4 on a 21x21 feature map) ----
B = 2
IN_CH = 4                      # CNN channels == transformer tokens (local FCU path)
PATCH = 21                     # rearrange patch size p1 = p2 = 21
DIM = PATCH * PATCH            # 441  (Block embedding dim)
NUM_HEADS = 9
HEAD_DIM = DIM // NUM_HEADS    # 49
MLP_HIDDEN = int(DIM * 4.0)    # 1764
EPS = 1e-6
SCALE = HEAD_DIM ** (-0.5)     # qk_scale=None -> head_dim ** -0.5
MATMUL_DTYPE = jnp.bfloat16    # MXU operand dtype (accumulation stays f32)
NEG_INF = -1e30                # block-diagonal attention mask value


def _ln(y, w, b):
    # One-pass statistics: mean and mean-of-squares reductions are independent.
    mu = jnp.mean(y, axis=-1, keepdims=True)
    msq = jnp.mean(y * y, axis=-1, keepdims=True)
    var = msq - mu * mu
    return (y - mu) * lax.rsqrt(var + EPS) * w + b


def _ltb_kernel(x_ref, convw_ref, convb_ref, ln0w_ref, ln0b_ref,
                ln1w_ref, ln1b_ref, wqkv_ref, wproj_ref, bproj_ref, mask_ref,
                ln2w_ref, ln2b_ref, w1_ref, b1_ref, w2_ref, b2_ref, o_ref,
                *, num_heads, head_dim, dim):
    x = x_ref[...]                                               # (N_tok=8, 441) f32 raw tokens

    # ---- FCUDown (local): block-diagonal 1x1 conv + LayerNorm(441) + GELU ----
    t = jnp.dot(convw_ref[...], x, preferred_element_type=jnp.float32) + convb_ref[...]
    t = _ln(t, ln0w_ref[...], ln0b_ref[...])
    t = jax.nn.gelu(t, approximate=True)                        # tanh GELU -> EUP

    # ---- Block: attention branch ----
    xn = _ln(t, ln1w_ref[...], ln1b_ref[...]).astype(MATMUL_DTYPE)
    # One fused QKV matmul (Q columns pre-scaled wrapper-side).
    qkv = jnp.dot(xn, wqkv_ref[...], preferred_element_type=jnp.float32)   # (8, 1323) f32
    mask = mask_ref[...]                                         # (8, 8) block-diag 0/-1e30
    heads = []
    for h in range(num_heads):                                   # static unroll, tiny bodies
        lo = h * head_dim
        qh = qkv[:, lo:lo + head_dim]                            # (8, 49)
        kh = qkv[:, dim + lo:dim + lo + head_dim]
        vh = qkv[:, 2 * dim + lo:2 * dim + lo + head_dim]
        s = lax.dot_general(qh, kh, (((1,), (1,)), ((), ())),
                            preferred_element_type=jnp.float32) + mask      # (8, 8)
        s = s - jnp.max(s, axis=-1, keepdims=True)
        p = jnp.exp(s)
        p = p * pl.reciprocal(jnp.sum(p, axis=-1, keepdims=True), approx=True)
        heads.append(jnp.dot(p, vh, preferred_element_type=jnp.float32))    # (8, 49)
    # Reassemble heads (cheap lane concat on an 8-row tensor), one fused projection matmul.
    oheads = jnp.concatenate(heads, axis=-1).astype(MATMUL_DTYPE)           # (8, 441)
    t = t + jnp.dot(oheads, wproj_ref[...],
                    preferred_element_type=jnp.float32) + bproj_ref[...]    # residual 1

    # ---- Block: MLP branch ----
    xn2 = _ln(t, ln2w_ref[...], ln2b_ref[...]).astype(MATMUL_DTYPE)
    h1 = jnp.dot(xn2, w1_ref[...], preferred_element_type=jnp.float32) + b1_ref[...]
    h1 = jax.nn.gelu(h1, approximate=True)
    h2 = jnp.dot(h1.astype(MATMUL_DTYPE), w2_ref[...],
                 preferred_element_type=jnp.float32) + b2_ref[...]
    t = t + h2                                                   # residual 2

    # ---- FCUUp (local) is a pure reshape; LTB residual fused into the single store ----
    o_ref[...] = x + t


def prepare_ltb_params(params, batch):
    """One-time weight prep (scale fold, bf16 casts, block-diag conv & attention mask).

    Call once and close over the result; keeps the transpose/cast XLA ops out of
    the per-forward path.
    """
    C = params["conv_w"].shape[0]
    dim = params["ln0_w"].shape[0]
    n_tok = batch * C
    f32 = jnp.float32

    # 1x1 conv acting on the folded (B*C, dim) slab == block-diagonal (B*C, B*C) matrix.
    convw_block = jnp.kron(jnp.eye(batch, dtype=f32), params["conv_w"].astype(f32))
    convb = jnp.tile(params["conv_b"].reshape(C, 1).astype(f32), (batch, 1))     # (B*C, 1)

    # Fused QKV weight, softmax scale folded into the Q columns.
    col_scale = jnp.concatenate([jnp.full((dim,), SCALE, f32), jnp.ones((2 * dim,), f32)])
    wqkv = (params["wqkv"].astype(f32) * col_scale[None, :]).astype(MATMUL_DTYPE)  # (441,1323)

    # Block-diagonal mask: folded batches must not attend to each other.
    ids = jnp.arange(n_tok) // C
    mask = jnp.where(ids[:, None] == ids[None, :], 0.0, NEG_INF).astype(f32)       # (8, 8)

    return (
        convw_block, convb,
        params["ln0_w"].reshape(1, dim).astype(f32), params["ln0_b"].reshape(1, dim).astype(f32),
        params["ln1_w"].reshape(1, dim).astype(f32), params["ln1_b"].reshape(1, dim).astype(f32),
        wqkv,
        params["wproj"].astype(MATMUL_DTYPE),                    # (441, 441)
        params["bproj"].reshape(1, dim).astype(f32),
        mask,
        params["ln2_w"].reshape(1, dim).astype(f32), params["ln2_b"].reshape(1, dim).astype(f32),
        params["w1"].astype(MATMUL_DTYPE), params["b1"].reshape(1, -1).astype(f32),
        params["w2"].astype(MATMUL_DTYPE), params["b2"].reshape(1, dim).astype(f32),
    )


def ltb_forward(x, prepped):
    """x: (B, IN_CH, 21, 21) float32. prepped: output of prepare_ltb_params."""
    Bx, Cc, Hh, Ww = x.shape
    dim = Hh * Ww
    n_tok = Bx * Cc
    x_tok = x.reshape(n_tok, dim)                                # lane-dense folded token slab

    def rep(shape):                                              # whole array, constant index
        return pl.BlockSpec(tuple(shape), lambda i: (0,) * len(shape))

    args = (x_tok,) + tuple(prepped)
    in_specs = [rep(a.shape) for a in args]

    kernel = functools.partial(_ltb_kernel, num_heads=NUM_HEADS,
                               head_dim=HEAD_DIM, dim=dim)
    out_tok = pl.pallas_call(
        kernel,
        out_shape=jax.ShapeDtypeStruct((n_tok, dim), jnp.float32),
        grid_spec=pltpu.PrefetchScalarGridSpec(
            num_scalar_prefetch=0,
            grid=(1,),                                           # single step: one weight fetch
            in_specs=in_specs,
            out_specs=rep((n_tok, dim)),
        ),
        compiler_params=pltpu.CompilerParams(
            dimension_semantics=("arbitrary",),                  # do not split across v7x TCs
            vmem_limit_bytes=32 * 1024 * 1024),
    )(*args)
    return out_tok.reshape(Bx, Cc, Hh, Ww)


# --------------------------- pure-JAX reference (f32, highest precision) ------
def ltb_reference(x, params):
    HI = jax.lax.Precision.HIGHEST

    def ln(y, w, b):
        mu = jnp.mean(y, axis=-1, keepdims=True)
        var = jnp.mean((y - mu) ** 2, axis=-1, keepdims=True)
        return (y - mu) / jnp.sqrt(var + EPS) * w + b

    Bx, Cc, Hh, Ww = x.shape
    res = x
    # FCUDown (local): conv1x1 + rearrange('b c (h p1)(w p2)->b (c h w)(p1 p2)') + LN + GELU
    t = jnp.einsum("oi,bihw->bohw", params["conv_w"], x, precision=HI)
    t = t + params["conv_b"][None, :, None, None]
    t = t.reshape(Bx, Cc, Hh * Ww)                               # (B, N=C, 441)
    t = ln(t, params["ln0_w"], params["ln0_b"])
    t = jax.nn.gelu(t, approximate=False)
    # Block(dim=441, num_heads=9)
    xn = ln(t, params["ln1_w"], params["ln1_b"])
    qkv = jnp.einsum("bnc,cd->bnd", xn, params["wqkv"], precision=HI)
    qkv = qkv.reshape(Bx, Cc, 3, NUM_HEADS, HEAD_DIM).transpose(2, 0, 3, 1, 4)
    q, k, v = qkv[0], qkv[1], qkv[2]                             # (B, H, N, hd)
    attn = jnp.einsum("bhnd,bhmd->bhnm", q, k, precision=HI) * SCALE
    attn = jax.nn.softmax(attn, axis=-1)
    out = jnp.einsum("bhnm,bhmd->bhnd", attn, v, precision=HI)
    out = out.transpose(0, 2, 1, 3).reshape(Bx, Cc, Hh * Ww)
    t = t + jnp.einsum("bnc,cd->bnd", out, params["wproj"], precision=HI) + params["bproj"]
    xn2 = ln(t, params["ln2_w"], params["ln2_b"])
    h1 = jax.nn.gelu(jnp.einsum("bnc,ch->bnh", xn2, params["w1"], precision=HI)
                     + params["b1"], approximate=False)
    t = t + jnp.einsum("bnh,hc->bnc", h1, params["w2"], precision=HI) + params["b2"]
    # FCUUp (local): rearrange back to (B, C, 21, 21); LTB residual
    return t.reshape(Bx, Cc, Hh, Ww) + res


# --------------------------------- main ---------------------------------------
if __name__ == "__main__":
    key = jax.random.PRNGKey(0)
    ks = jax.random.split(key, 16)

    params = {
        "conv_w": 0.5 * jax.random.normal(ks[0], (IN_CH, IN_CH), jnp.float32),
        "conv_b": 0.1 * jax.random.normal(ks[1], (IN_CH,), jnp.float32),
        "ln0_w": 1.0 + 0.1 * jax.random.normal(ks[2], (DIM,), jnp.float32),
        "ln0_b": 0.05 * jax.random.normal(ks[3], (DIM,), jnp.float32),
        "ln1_w": 1.0 + 0.1 * jax.random.normal(ks[4], (DIM,), jnp.float32),
        "ln1_b": 0.05 * jax.random.normal(ks[5], (DIM,), jnp.float32),
        "wqkv": 0.02 * jax.random.normal(ks[6], (DIM, 3 * DIM), jnp.float32),
        "wproj": 0.02 * jax.random.normal(ks[7], (DIM, DIM), jnp.float32),
        "bproj": 0.01 * jax.random.normal(ks[8], (DIM,), jnp.float32),
        "ln2_w": 1.0 + 0.1 * jax.random.normal(ks[9], (DIM,), jnp.float32),
        "ln2_b": 0.05 * jax.random.normal(ks[10], (DIM,), jnp.float32),
        "w1": 0.02 * jax.random.normal(ks[11], (DIM, MLP_HIDDEN), jnp.float32),
        "b1": 0.01 * jax.random.normal(ks[12], (MLP_HIDDEN,), jnp.float32),
        "w2": 0.02 * jax.random.normal(ks[13], (MLP_HIDDEN, DIM), jnp.float32),
        "b2": 0.01 * jax.random.normal(ks[14], (DIM,), jnp.float32),
    }
    # LTB's local FCUs require a 21x21 feature map (p1=p2=21 down, p1=p2=1 up).
    x = jax.random.normal(ks[15], (B, IN_CH, PATCH, PATCH), jnp.float32)

    prepped = jax.block_until_ready(prepare_ltb_params(params, B))   # one-time weight prep

    out = ltb_forward(x, prepped)
    jax.block_until_ready(out)

    ref = ltb_reference(x, params)
    assert out.shape == (B, IN_CH, PATCH, PATCH)
    max_err = float(jnp.max(jnp.abs(out - ref)))
    # bf16 MXU operands + approx reciprocal + tanh GELU -> loosened tolerance
    # vs the exact-erf f32 reference.
    assert jnp.allclose(out, ref, rtol=2e-2, atol=2e-2), max_err

    print("KERNEL_OK")
</pallas_src>

<mosaic_0001>
module attributes {stable_mosaic.version = 11 : i64} {
  func.func @_ltb_kernel(%arg0: i32, %arg1: memref<8x441xf32, #tpu.memory_space<vmem>>, %arg2: memref<8x8xf32, #tpu.memory_space<vmem>>, %arg3: memref<8x1xf32, #tpu.memory_space<vmem>>, %arg4: memref<1x441xf32, #tpu.memory_space<vmem>>, %arg5: memref<1x441xf32, #tpu.memory_space<vmem>>, %arg6: memref<1x441xf32, #tpu.memory_space<vmem>>, %arg7: memref<1x441xf32, #tpu.memory_space<vmem>>, %arg8: memref<441x1323xbf16, #tpu.memory_space<vmem>>, %arg9: memref<441x441xbf16, #tpu.memory_space<vmem>>, %arg10: memref<1x441xf32, #tpu.memory_space<vmem>>, %arg11: memref<8x8xf32, #tpu.memory_space<vmem>>, %arg12: memref<1x441xf32, #tpu.memory_space<vmem>>, %arg13: memref<1x441xf32, #tpu.memory_space<vmem>>, %arg14: memref<441x1764xbf16, #tpu.memory_space<vmem>>, %arg15: memref<1x1764xf32, #tpu.memory_space<vmem>>, %arg16: memref<1764x441xbf16, #tpu.memory_space<vmem>>, %arg17: memref<1x441xf32, #tpu.memory_space<vmem>>, %arg18: memref<8x441xf32, #tpu.memory_space<vmem>>) attributes {dimension_semantics = [#tpu.dimension_semantics<arbitrary>], iteration_bounds = array<i64: 1>, scalar_prefetch = 0 : i64, scratch_operands = 0 : i64, tpu.core_type = #tpu.core_type<tc>, window_params = [{pipeline_mode = #tpu.pipeline_mode<synchronous>, transform_indices = @transform_0, window_bounds = array<i64: 8, 441>}, {pipeline_mode = #tpu.pipeline_mode<synchronous>, transform_indices = @transform_1, window_bounds = array<i64: 8, 8>}, {pipeline_mode = #tpu.pipeline_mode<synchronous>, transform_indices = @transform_2, window_bounds = array<i64: 8, 1>}, {pipeline_mode = #tpu.pipeline_mode<synchronous>, transform_indices = @transform_3, window_bounds = array<i64: 1, 441>}, {pipeline_mode = #tpu.pipeline_mode<synchronous>, transform_indices = @transform_4, window_bounds = array<i64: 1, 441>}, {pipeline_mode = #tpu.pipeline_mode<synchronous>, transform_indices = @transform_5, window_bounds = array<i64: 1, 441>}, {pipeline_mode = #tpu.pipeline_mode<synchronous>, transform_indices = @transform_6, window_bounds = array<i64: 1, 441>}, {pipeline_mode = #tpu.pipeline_mode<synchronous>, transform_indices = @transform_7, window_bounds = array<i64: 441, 1323>}, {pipeline_mode = #tpu.pipeline_mode<synchronous>, transform_indices = @transform_8, window_bounds = array<i64: 441, 441>}, {pipeline_mode = #tpu.pipeline_mode<synchronous>, transform_indices = @transform_9, window_bounds = array<i64: 1, 441>}, {pipeline_mode = #tpu.pipeline_mode<synchronous>, transform_indices = @transform_10, window_bounds = array<i64: 8, 8>}, {pipeline_mode = #tpu.pipeline_mode<synchronous>, transform_indices = @transform_11, window_bounds = array<i64: 1, 441>}, {pipeline_mode = #tpu.pipeline_mode<synchronous>, transform_indices = @transform_12, window_bounds = array<i64: 1, 441>}, {pipeline_mode = #tpu.pipeline_mode<synchronous>, transform_indices = @transform_13, window_bounds = array<i64: 441, 1764>}, {pipeline_mode = #tpu.pipeline_mode<synchronous>, transform_indices = @transform_14, window_bounds = array<i64: 1, 1764>}, {pipeline_mode = #tpu.pipeline_mode<synchronous>, transform_indices = @transform_15, window_bounds = array<i64: 1764, 441>}, {pipeline_mode = #tpu.pipeline_mode<synchronous>, transform_indices = @transform_16, window_bounds = array<i64: 1, 441>}, {pipeline_mode = #tpu.pipeline_mode<synchronous>, transform_indices = @transform_17, window_bounds = array<i64: 8, 441>}]} {
    %c0 = arith.constant 0 : index
    %c0_0 = arith.constant 0 : index
    %0 = vector.load %arg1[%c0, %c0_0] : memref<8x441xf32, #tpu.memory_space<vmem>>, vector<8x441xf32>
    %c0_1 = arith.constant 0 : index
    %c0_2 = arith.constant 0 : index
    %1 = vector.load %arg2[%c0_1, %c0_2] : memref<8x8xf32, #tpu.memory_space<vmem>>, vector<8x8xf32>
    %cst = arith.constant dense<0.000000e+00> : vector<8x441xf32>
    %2 = tpu.matmul %1, %0, %cst {dimension_numbers = #tpu.dot_dimension_numbers<[1], [0], [0], [1], [0, 0, 1, 1], [], []>} : vector<8x8xf32>, vector<8x441xf32>, vector<8x441xf32> -> vector<8x441xf32>
    %c0_3 = arith.constant 0 : index
    %c0_4 = arith.constant 0 : index
    %3 = vector.load %arg3[%c0_3, %c0_4] : memref<8x1xf32, #tpu.memory_space<vmem>>, vector<8x1xf32>
    %4 = vector.broadcast %3 : vector<8x1xf32> to vector<8x441xf32>
    %5 = arith.addf %2, %4 : vector<8x441xf32>
    %c0_5 = arith.constant 0 : index
    %c0_6 = arith.constant 0 : index
    %6 = vector.load %arg4[%c0_5, %c0_6] : memref<1x441xf32, #tpu.memory_space<vmem>>, vector<1x441xf32>
    %c0_7 = arith.constant 0 : index
    %c0_8 = arith.constant 0 : index
    %7 = vector.load %arg5[%c0_7, %c0_8] : memref<1x441xf32, #tpu.memory_space<vmem>>, vector<1x441xf32>
    %cst_9 = arith.constant dense<0.000000e+00> : vector<8xf32>
    %8 = vector.multi_reduction <add>, %5, %cst_9 [1] : vector<8x441xf32> to vector<8xf32>
    %9 = vector.shape_cast %8 : vector<8xf32> to vector<8x1xf32>
    %cst_10 = arith.constant 4.410000e+02 : f32
    %10 = vector.broadcast %cst_10 : f32 to vector<8x1xf32>
    %11 = arith.divf %9, %10 : vector<8x1xf32>
    %12 = arith.mulf %5, %5 : vector<8x441xf32>
    %cst_11 = arith.constant dense<0.000000e+00> : vector<8xf32>
    %13 = vector.multi_reduction <add>, %12, %cst_11 [1] : vector<8x441xf32> to vector<8xf32>
    %14 = vector.shape_cast %13 : vector<8xf32> to vector<8x1xf32>
    %cst_12 = arith.constant 4.410000e+02 : f32
    %15 = vector.broadcast %cst_12 : f32 to vector<8x1xf32>
    %16 = arith.divf %14, %15 : vector<8x1xf32>
    %17 = arith.mulf %11, %11 : vector<8x1xf32>
    %18 = arith.subf %16, %17 : vector<8x1xf32>
    %19 = vector.broadcast %11 : vector<8x1xf32> to vector<8x441xf32>
    %20 = arith.subf %5, %19 : vector<8x441xf32>
    %cst_13 = arith.constant 9.99999997E-7 : f32
    %21 = vector.broadcast %cst_13 : f32 to vector<8x1xf32>
    %22 = arith.addf %18, %21 : vector<8x1xf32>
    %23 = math.rsqrt %22 : vector<8x1xf32>
    %24 = vector.broadcast %23 : vector<8x1xf32> to vector<8x441xf32>
    %25 = arith.mulf %20, %24 : vector<8x441xf32>
    %26 = vector.broadcast %6 : vector<1x441xf32> to vector<8x441xf32>
    %27 = arith.mulf %25, %26 : vector<8x441xf32>
    %28 = vector.broadcast %7 : vector<1x441xf32> to vector<8x441xf32>
    %29 = arith.addf %27, %28 : vector<8x441xf32>
    %30 = arith.mulf %29, %29 : vector<8x441xf32>
    %31 = arith.mulf %29, %30 : vector<8x441xf32>
    %cst_14 = arith.constant 4.471500e-02 : f32
    %32 = vector.broadcast %cst_14 : f32 to vector<8x441xf32>
    %33 = arith.mulf %32, %31 : vector<8x441xf32>
    %34 = arith.addf %29, %33 : vector<8x441xf32>
    %cst_15 = arith.constant 0.797884583 : f32
    %35 = vector.broadcast %cst_15 : f32 to vector<8x441xf32>
    %36 = arith.mulf %35, %34 : vector<8x441xf32>
    %37 = math.tanh %36 : vector<8x441xf32>
    %cst_16 = arith.constant 1.000000e+00 : f32
    %38 = vector.broadcast %cst_16 : f32 to vector<8x441xf32>
    %39 = arith.addf %38, %37 : vector<8x441xf32>
    %cst_17 = arith.constant 5.000000e-01 : f32
    %40 = vector.broadcast %cst_17 : f32 to vector<8x441xf32>
    %41 = arith.mulf %40, %39 : vector<8x441xf32>
    %42 = arith.mulf %29, %41 : vector<8x441xf32>
    %c0_18 = arith.constant 0 : index
    %c0_19 = arith.constant 0 : index
    %43 = vector.load %arg6[%c0_18, %c0_19] : memref<1x441xf32, #tpu.memory_space<vmem>>, vector<1x441xf32>
    %c0_20 = arith.constant 0 : index
    %c0_21 = arith.constant 0 : index
    %44 = vector.load %arg7[%c0_20, %c0_21] : memref<1x441xf32, #tpu.memory_space<vmem>>, vector<1x441xf32>
    %cst_22 = arith.constant dense<0.000000e+00> : vector<8xf32>
    %45 = vector.multi_reduction <add>, %42, %cst_22 [1] : vector<8x441xf32> to vector<8xf32>
    %46 = vector.shape_cast %45 : vector<8xf32> to vector<8x1xf32>
    %cst_23 = arith.constant 4.410000e+02 : f32
    %47 = vector.broadcast %cst_23 : f32 to vector<8x1xf32>
    %48 = arith.divf %46, %47 : vector<8x1xf32>
    %49 = arith.mulf %42, %42 : vector<8x441xf32>
    %cst_24 = arith.constant dense<0.000000e+00> : vector<8xf32>
    %50 = vector.multi_reduction <add>, %49, %cst_24 [1] : vector<8x441xf32> to vector<8xf32>
    %51 = vector.shape_cast %50 : vector<8xf32> to vector<8x1xf32>
    %cst_25 = arith.constant 4.410000e+02 : f32
    %52 = vector.broadcast %cst_25 : f32 to vector<8x1xf32>
    %53 = arith.divf %51, %52 : vector<8x1xf32>
    %54 = arith.mulf %48, %48 : vector<8x1xf32>
    %55 = arith.subf %53, %54 : vector<8x1xf32>
    %56 = vector.broadcast %48 : vector<8x1xf32> to vector<8x441xf32>
    %57 = arith.subf %42, %56 : vector<8x441xf32>
    %cst_26 = arith.constant 9.99999997E-7 : f32
    %58 = vector.broadcast %cst_26 : f32 to vector<8x1xf32>
    %59 = arith.addf %55, %58 : vector<8x1xf32>
    %60 = math.rsqrt %59 : vector<8x1xf32>
    %61 = vector.broadcast %60 : vector<8x1xf32> to vector<8x441xf32>
    %62 = arith.mulf %57, %61 : vector<8x441xf32>
    %63 = vector.broadcast %43 : vector<1x441xf32> to vector<8x441xf32>
    %64 = arith.mulf %62, %63 : vector<8x441xf32>
    %65 = vector.broadcast %44 : vector<1x441xf32> to vector<8x441xf32>
    %66 = arith.addf %64, %65 : vector<8x441xf32>
    %67 = arith.truncf %66 : vector<8x441xf32> to vector<8x441xbf16>
    %c0_27 = arith.constant 0 : index
    %c0_28 = arith.constant 0 : index
    %68 = vector.load %arg8[%c0_27, %c0_28] : memref<441x1323xbf16, #tpu.memory_space<vmem>>, vector<441x1323xbf16>
    %cst_29 = arith.constant dense<0.000000e+00> : vector<8x1323xf32>
    %69 = tpu.matmul %67, %68, %cst_29 {dimension_numbers = #tpu.dot_dimension_numbers<[1], [0], [0], [1], [0, 0, 1, 1], [], []>} : vector<8x441xbf16>, vector<441x1323xbf16>, vector<8x1323xf32> -> vector<8x1323xf32>
    %c0_30 = arith.constant 0 : index
    %c0_31 = arith.constant 0 : index
    %70 = vector.load %arg11[%c0_30, %c0_31] : memref<8x8xf32, #tpu.memory_space<vmem>>, vector<8x8xf32>
    %71 = vector.extract_strided_slice %69 {offsets = [0, 0], sizes = [8, 49], strides = [1, 1]} : vector<8x1323xf32> to vector<8x49xf32>
    %72 = vector.extract_strided_slice %69 {offsets = [0, 441], sizes = [8, 49], strides = [1, 1]} : vector<8x1323xf32> to vector<8x49xf32>
    %73 = vector.extract_strided_slice %69 {offsets = [0, 882], sizes = [8, 49], strides = [1, 1]} : vector<8x1323xf32> to vector<8x49xf32>
    %cst_32 = arith.constant dense<0.000000e+00> : vector<8x8xf32>
    %74 = tpu.matmul %71, %72, %cst_32 {dimension_numbers = #tpu.dot_dimension_numbers<[1], [1], [0], [0], [0, 0, 1, 0], [], []>} : vector<8x49xf32>, vector<8x49xf32>, vector<8x8xf32> -> vector<8x8xf32>
    %75 = arith.addf %74, %70 : vector<8x8xf32>
    %cst_33 = arith.constant dense<0xFF800000> : vector<8xf32>
    %76 = vector.multi_reduction <maximumf>, %75, %cst_33 [1] : vector<8x8xf32> to vector<8xf32>
    %77 = vector.shape_cast %76 : vector<8xf32> to vector<8x1xf32>
    %78 = vector.broadcast %77 : vector<8x1xf32> to vector<8x8xf32>
    %79 = arith.subf %75, %78 : vector<8x8xf32>
    %80 = math.exp %79 : vector<8x8xf32>
    %cst_34 = arith.constant dense<0.000000e+00> : vector<8xf32>
    %81 = vector.multi_reduction <add>, %80, %cst_34 [1] : vector<8x8xf32> to vector<8xf32>
    %82 = vector.shape_cast %81 : vector<8xf32> to vector<8x1xf32>
    %83 = tpu.reciprocal %82 {approx = true} : vector<8x1xf32> -> vector<8x1xf32>
    %84 = vector.broadcast %83 : vector<8x1xf32> to vector<8x8xf32>
    %85 = arith.mulf %80, %84 : vector<8x8xf32>
    %cst_35 = arith.constant dense<0.000000e+00> : vector<8x49xf32>
    %86 = tpu.matmul %85, %73, %cst_35 {dimension_numbers = #tpu.dot_dimension_numbers<[1], [0], [0], [1], [0, 0, 1, 1], [], []>} : vector<8x8xf32>, vector<8x49xf32>, vector<8x49xf32> -> vector<8x49xf32>
    %87 = vector.extract_strided_slice %69 {offsets = [0, 49], sizes = [8, 49], strides = [1, 1]} : vector<8x1323xf32> to vector<8x49xf32>
    %88 = vector.extract_strided_slice %69 {offsets = [0, 490], sizes = [8, 49], strides = [1, 1]} : vector<8x1323xf32> to vector<8x49xf32>
    %89 = vector.extract_strided_slice %69 {offsets = [0, 931], sizes = [8, 49], strides = [1, 1]} : vector<8x1323xf32> to vector<8x49xf32>
    %cst_36 = arith.constant dense<0.000000e+00> : vector<8x8xf32>
    %90 = tpu.matmul %87, %88, %cst_36 {dimension_numbers = #tpu.dot_dimension_numbers<[1], [1], [0], [0], [0, 0, 1, 0], [], []>} : vector<8x49xf32>, vector<8x49xf32>, vector<8x8xf32> -> vector<8x8xf32>
    %91 = arith.addf %90, %70 : vector<8x8xf32>
    %cst_37 = arith.constant dense<0xFF800000> : vector<8xf32>
    %92 = vector.multi_reduction <maximumf>, %91, %cst_37 [1] : vector<8x8xf32> to vector<8xf32>
    %93 = vector.shape_cast %92 : vector<8xf32> to vector<8x1xf32>
    %94 = vector.broadcast %93 : vector<8x1xf32> to vector<8x8xf32>
    %95 = arith.subf %91, %94 : vector<8x8xf32>
    %96 = math.exp %95 : vector<8x8xf32>
    %cst_38 = arith.constant dense<0.000000e+00> : vector<8xf32>
    %97 = vector.multi_reduction <add>, %96, %cst_38 [1] : vector<8x8xf32> to vector<8xf32>
    %98 = vector.shape_cast %97 : vector<8xf32> to vector<8x1xf32>
    %99 = tpu.reciprocal %98 {approx = true} : vector<8x1xf32> -> vector<8x1xf32>
    %100 = vector.broadcast %99 : vector<8x1xf32> to vector<8x8xf32>
    %101 = arith.mulf %96, %100 : vector<8x8xf32>
    %cst_39 = arith.constant dense<0.000000e+00> : vector<8x49xf32>
    %102 = tpu.matmul %101, %89, %cst_39 {dimension_numbers = #tpu.dot_dimension_numbers<[1], [0], [0], [1], [0, 0, 1, 1], [], []>} : vector<8x8xf32>, vector<8x49xf32>, vector<8x49xf32> -> vector<8x49xf32>
    %103 = vector.extract_strided_slice %69 {offsets = [0, 98], sizes = [8, 49], strides = [1, 1]} : vector<8x1323xf32> to vector<8x49xf32>
    %104 = vector.extract_strided_slice %69 {offsets = [0, 539], sizes = [8, 49], strides = [1, 1]} : vector<8x1323xf32> to vector<8x49xf32>
    %105 = vector.extract_strided_slice %69 {offsets = [0, 980], sizes = [8, 49], strides = [1, 1]} : vector<8x1323xf32> to vector<8x49xf32>
    %cst_40 = arith.constant dense<0.000000e+00> : vector<8x8xf32>
    %106 = tpu.matmul %103, %104, %cst_40 {dimension_numbers = #tpu.dot_dimension_numbers<[1], [1], [0], [0], [0, 0, 1, 0], [], []>} : vector<8x49xf32>, vector<8x49xf32>, vector<8x8xf32> -> vector<8x8xf32>
    %107 = arith.addf %106, %70 : vector<8x8xf32>
    %cst_41 = arith.constant dense<0xFF800000> : vector<8xf32>
    %108 = vector.multi_reduction <maximumf>, %107, %cst_41 [1] : vector<8x8xf32> to vector<8xf32>
    %109 = vector.shape_cast %108 : vector<8xf32> to vector<8x1xf32>
    %110 = vector.broadcast %109 : vector<8x1xf32> to vector<8x8xf32>
    %111 = arith.subf %107, %110 : vector<8x8xf32>
    %112 = math.exp %111 : vector<8x8xf32>
    %cst_42 = arith.constant dense<0.000000e+00> : vector<8xf32>
    %113 = vector.multi_reduction <add>, %112, %cst_42 [1] : vector<8x8xf32> to vector<8xf32>
    %114 = vector.shape_cast %113 : vector<8xf32> to vector<8x1xf32>
    %115 = tpu.reciprocal %114 {approx = true} : vector<8x1xf32> -> vector<8x1xf32>
    %116 = vector.broadcast %115 : vector<8x1xf32> to vector<8x8xf32>
    %117 = arith.mulf %112, %116 : vector<8x8xf32>
    %cst_43 = arith.constant dense<0.000000e+00> : vector<8x49xf32>
    %118 = tpu.matmul %117, %105, %cst_43 {dimension_numbers = #tpu.dot_dimension_numbers<[1], [0], [0], [1], [0, 0, 1, 1], [], []>} : vector<8x8xf32>, vector<8x49xf32>, vector<8x49xf32> -> vector<8x49xf32>
    %119 = vector.extract_strided_slice %69 {offsets = [0, 147], sizes = [8, 49], strides = [1, 1]} : vector<8x1323xf32> to vector<8x49xf32>
    %120 = vector.extract_strided_slice %69 {offsets = [0, 588], sizes = [8, 49], strides = [1, 1]} : vector<8x1323xf32> to vector<8x49xf32>
    %121 = vector.extract_strided_slice %69 {offsets = [0, 1029], sizes = [8, 49], strides = [1, 1]} : vector<8x1323xf32> to vector<8x49xf32>
    %cst_44 = arith.constant dense<0.000000e+00> : vector<8x8xf32>
    %122 = tpu.matmul %119, %120, %cst_44 {dimension_numbers = #tpu.dot_dimension_numbers<[1], [1], [0], [0], [0, 0, 1, 0], [], []>} : vector<8x49xf32>, vector<8x49xf32>, vector<8x8xf32> -> vector<8x8xf32>
    %123 = arith.addf %122, %70 : vector<8x8xf32>
    %cst_45 = arith.constant dense<0xFF800000> : vector<8xf32>
    %124 = vector.multi_reduction <maximumf>, %123, %cst_45 [1] : vector<8x8xf32> to vector<8xf32>
    %125 = vector.shape_cast %124 : vector<8xf32> to vector<8x1xf32>
    %126 = vector.broadcast %125 : vector<8x1xf32> to vector<8x8xf32>
    %127 = arith.subf %123, %126 : vector<8x8xf32>
    %128 = math.exp %127 : vector<8x8xf32>
    %cst_46 = arith.constant dense<0.000000e+00> : vector<8xf32>
    %129 = vector.multi_reduction <add>, %128, %cst_46 [1] : vector<8x8xf32> to vector<8xf32>
    %130 = vector.shape_cast %129 : vector<8xf32> to vector<8x1xf32>
    %131 = tpu.reciprocal %130 {approx = true} : vector<8x1xf32> -> vector<8x1xf32>
    %132 = vector.broadcast %131 : vector<8x1xf32> to vector<8x8xf32>
    %133 = arith.mulf %128, %132 : vector<8x8xf32>
    %cst_47 = arith.constant dense<0.000000e+00> : vector<8x49xf32>
    %134 = tpu.matmul %133, %121, %cst_47 {dimension_numbers = #tpu.dot_dimension_numbers<[1], [0], [0], [1], [0, 0, 1, 1], [], []>} : vector<8x8xf32>, vector<8x49xf32>, vector<8x49xf32> -> vector<8x49xf32>
    %135 = vector.extract_strided_slice %69 {offsets = [0, 196], sizes = [8, 49], strides = [1, 1]} : vector<8x1323xf32> to vector<8x49xf32>
    %136 = vector.extract_strided_slice %69 {offsets = [0, 637], sizes = [8, 49], strides = [1, 1]} : vector<8x1323xf32> to vector<8x49xf32>
    %137 = vector.extract_strided_slice %69 {offsets = [0, 1078], sizes = [8, 49], strides = [1, 1]} : vector<8x1323xf32> to vector<8x49xf32>
    %cst_48 = arith.constant dense<0.000000e+00> : vector<8x8xf32>
    %138 = tpu.matmul %135, %136, %cst_48 {dimension_numbers = #tpu.dot_dimension_numbers<[1], [1], [0], [0], [0, 0, 1, 0], [], []>} : vector<8x49xf32>, vector<8x49xf32>, vector<8x8xf32> -> vector<8x8xf32>
    %139 = arith.addf %138, %70 : vector<8x8xf32>
    %cst_49 = arith.constant dense<0xFF800000> : vector<8xf32>
    %140 = vector.multi_reduction <maximumf>, %139, %cst_49 [1] : vector<8x8xf32> to vector<8xf32>
    %141 = vector.shape_cast %140 : vector<8xf32> to vector<8x1xf32>
    %142 = vector.broadcast %141 : vector<8x1xf32> to vector<8x8xf32>
    %143 = arith.subf %139, %142 : vector<8x8xf32>
    %144 = math.exp %143 : vector<8x8xf32>
    %cst_50 = arith.constant dense<0.000000e+00> : vector<8xf32>
    %145 = vector.multi_reduction <add>, %144, %cst_50 [1] : vector<8x8xf32> to vector<8xf32>
    %146 = vector.shape_cast %145 : vector<8xf32> to vector<8x1xf32>
    %147 = tpu.reciprocal %146 {approx = true} : vector<8x1xf32> -> vector<8x1xf32>
    %148 = vector.broadcast %147 : vector<8x1xf32> to vector<8x8xf32>
    %149 = arith.mulf %144, %148 : vector<8x8xf32>
    %cst_51 = arith.constant dense<0.000000e+00> : vector<8x49xf32>
    %150 = tpu.matmul %149, %137, %cst_51 {dimension_numbers = #tpu.dot_dimension_numbers<[1], [0], [0], [1], [0, 0, 1, 1], [], []>} : vector<8x8xf32>, vector<8x49xf32>, vector<8x49xf32> -> vector<8x49xf32>
    %151 = vector.extract_strided_slice %69 {offsets = [0, 245], sizes = [8, 49], strides = [1, 1]} : vector<8x1323xf32> to vector<8x49xf32>
    %152 = vector.extract_strided_slice %69 {offsets = [0, 686], sizes = [8, 49], strides = [1, 1]} : vector<8x1323xf32> to vector<8x49xf32>
    %153 = vector.extract_strided_slice %69 {offsets = [0, 1127], sizes = [8, 49], strides = [1, 1]} : vector<8x1323xf32> to vector<8x49xf32>
    %cst_52 = arith.constant dense<0.000000e+00> : vector<8x8xf32>
    %154 = tpu.matmul %151, %152, %cst_52 {dimension_numbers = #tpu.dot_dimension_numbers<[1], [1], [0], [0], [0, 0, 1, 0], [], []>} : vector<8x49xf32>, vector<8x49xf32>, vector<8x8xf32> -> vector<8x8xf32>
    %155 = arith.addf %154, %70 : vector<8x8xf32>
    %cst_53 = arith.constant dense<0xFF800000> : vector<8xf32>
    %156 = vector.multi_reduction <maximumf>, %155, %cst_53 [1] : vector<8x8xf32> to vector<8xf32>
    %157 = vector.shape_cast %156 : vector<8xf32> to vector<8x1xf32>
    %158 = vector.broadcast %157 : vector<8x1xf32> to vector<8x8xf32>
    %159 = arith.subf %155, %158 : vector<8x8xf32>
    %160 = math.exp %159 : vector<8x8xf32>
    %cst_54 = arith.constant dense<0.000000e+00> : vector<8xf32>
    %161 = vector.multi_reduction <add>, %160, %cst_54 [1] : vector<8x8xf32> to vector<8xf32>
    %162 = vector.shape_cast %161 : vector<8xf32> to vector<8x1xf32>
    %163 = tpu.reciprocal %162 {approx = true} : vector<8x1xf32> -> vector<8x1xf32>
    %164 = vector.broadcast %163 : vector<8x1xf32> to vector<8x8xf32>
    %165 = arith.mulf %160, %164 : vector<8x8xf32>
    %cst_55 = arith.constant dense<0.000000e+00> : vector<8x49xf32>
    %166 = tpu.matmul %165, %153, %cst_55 {dimension_numbers = #tpu.dot_dimension_numbers<[1], [0], [0], [1], [0, 0, 1, 1], [], []>} : vector<8x8xf32>, vector<8x49xf32>, vector<8x49xf32> -> vector<8x49xf32>
    %167 = vector.extract_strided_slice %69 {offsets = [0, 294], sizes = [8, 49], strides = [1, 1]} : vector<8x1323xf32> to vector<8x49xf32>
    %168 = vector.extract_strided_slice %69 {offsets = [0, 735], sizes = [8, 49], strides = [1, 1]} : vector<8x1323xf32> to vector<8x49xf32>
    %169 = vector.extract_strided_slice %69 {offsets = [0, 1176], sizes = [8, 49], strides = [1, 1]} : vector<8x1323xf32> to vector<8x49xf32>
    %cst_56 = arith.constant dense<0.000000e+00> : vector<8x8xf32>
    %170 = tpu.matmul %167, %168, %cst_56 {dimension_numbers = #tpu.dot_dimension_numbers<[1], [1], [0], [0], [0, 0, 1, 0], [], []>} : vector<8x49xf32>, vector<8x49xf32>, vector<8x8xf32> -> vector<8x8xf32>
    %171 = arith.addf %170, %70 : vector<8x8xf32>
    %cst_57 = arith.constant dense<0xFF800000> : vector<8xf32>
    %172 = vector.multi_reduction <maximumf>, %171, %cst_57 [1] : vector<8x8xf32> to vector<8xf32>
    %173 = vector.shape_cast %172 : vector<8xf32> to vector<8x1xf32>
    %174 = vector.broadcast %173 : vector<8x1xf32> to vector<8x8xf32>
    %175 = arith.subf %171, %174 : vector<8x8xf32>
    %176 = math.exp %175 : vector<8x8xf32>
    %cst_58 = arith.constant dense<0.000000e+00> : vector<8xf32>
    %177 = vector.multi_reduction <add>, %176, %cst_58 [1] : vector<8x8xf32> to vector<8xf32>
    %178 = vector.shape_cast %177 : vector<8xf32> to vector<8x1xf32>
    %179 = tpu.reciprocal %178 {approx = true} : vector<8x1xf32> -> vector<8x1xf32>
    %180 = vector.broadcast %179 : vector<8x1xf32> to vector<8x8xf32>
    %181 = arith.mulf %176, %180 : vector<8x8xf32>
    %cst_59 = arith.constant dense<0.000000e+00> : vector<8x49xf32>
    %182 = tpu.matmul %181, %169, %cst_59 {dimension_numbers = #tpu.dot_dimension_numbers<[1], [0], [0], [1], [0, 0, 1, 1], [], []>} : vector<8x8xf32>, vector<8x49xf32>, vector<8x49xf32> -> vector<8x49xf32>
    %183 = vector.extract_strided_slice %69 {offsets = [0, 343], sizes = [8, 49], strides = [1, 1]} : vector<8x1323xf32> to vector<8x49xf32>
    %184 = vector.extract_strided_slice %69 {offsets = [0, 784], sizes = [8, 49], strides = [1, 1]} : vector<8x1323xf32> to vector<8x49xf32>
    %185 = vector.extract_strided_slice %69 {offsets = [0, 1225], sizes = [8, 49], strides = [1, 1]} : vector<8x1323xf32> to vector<8x49xf32>
    %cst_60 = arith.constant dense<0.000000e+00> : vector<8x8xf32>
    %186 = tpu.matmul %183, %184, %cst_60 {dimension_numbers = #tpu.dot_dimension_numbers<[1], [1], [0], [0], [0, 0, 1, 0], [], []>} : vector<8x49xf32>, vector<8x49xf32>, vector<8x8xf32> -> vector<8x8xf32>
    %187 = arith.addf %186, %70 : vector<8x8xf32>
    %cst_61 = arith.constant dense<0xFF800000> : vector<8xf32>
    %188 = vector.multi_reduction <maximumf>, %187, %cst_61 [1] : vector<8x8xf32> to vector<8xf32>
    %189 = vector.shape_cast %188 : vector<8xf32> to vector<8x1xf32>
    %190 = vector.broadcast %189 : vector<8x1xf32> to vector<8x8xf32>
    %191 = arith.subf %187, %190 : vector<8x8xf32>
    %192 = math.exp %191 : vector<8x8xf32>
    %cst_62 = arith.constant dense<0.000000e+00> : vector<8xf32>
    %193 = vector.multi_reduction <add>, %192, %cst_62 [1] : vector<8x8xf32> to vector<8xf32>
    %194 = vector.shape_cast %193 : vector<8xf32> to vector<8x1xf32>
    %195 = tpu.reciprocal %194 {approx = true} : vector<8x1xf32> -> vector<8x1xf32>
    %196 = vector.broadcast %195 : vector<8x1xf32> to vector<8x8xf32>
    %197 = arith.mulf %192, %196 : vector<8x8xf32>
    %cst_63 = arith.constant dense<0.000000e+00> : vector<8x49xf32>
    %198 = tpu.matmul %197, %185, %cst_63 {dimension_numbers = #tpu.dot_dimension_numbers<[1], [0], [0], [1], [0, 0, 1, 1], [], []>} : vector<8x8xf32>, vector<8x49xf32>, vector<8x49xf32> -> vector<8x49xf32>
    %199 = vector.extract_strided_slice %69 {offsets = [0, 392], sizes = [8, 49], strides = [1, 1]} : vector<8x1323xf32> to vector<8x49xf32>
    %200 = vector.extract_strided_slice %69 {offsets = [0, 833], sizes = [8, 49], strides = [1, 1]} : vector<8x1323xf32> to vector<8x49xf32>
    %201 = vector.extract_strided_slice %69 {offsets = [0, 1274], sizes = [8, 49], strides = [1, 1]} : vector<8x1323xf32> to vector<8x49xf32>
    %cst_64 = arith.constant dense<0.000000e+00> : vector<8x8xf32>
    %202 = tpu.matmul %199, %200, %cst_64 {dimension_numbers = #tpu.dot_dimension_numbers<[1], [1], [0], [0], [0, 0, 1, 0], [], []>} : vector<8x49xf32>, vector<8x49xf32>, vector<8x8xf32> -> vector<8x8xf32>
    %203 = arith.addf %202, %70 : vector<8x8xf32>
    %cst_65 = arith.constant dense<0xFF800000> : vector<8xf32>
    %204 = vector.multi_reduction <maximumf>, %203, %cst_65 [1] : vector<8x8xf32> to vector<8xf32>
    %205 = vector.shape_cast %204 : vector<8xf32> to vector<8x1xf32>
    %206 = vector.broadcast %205 : vector<8x1xf32> to vector<8x8xf32>
    %207 = arith.subf %203, %206 : vector<8x8xf32>
    %208 = math.exp %207 : vector<8x8xf32>
    %cst_66 = arith.constant dense<0.000000e+00> : vector<8xf32>
    %209 = vector.multi_reduction <add>, %208, %cst_66 [1] : vector<8x8xf32> to vector<8xf32>
    %210 = vector.shape_cast %209 : vector<8xf32> to vector<8x1xf32>
    %211 = tpu.reciprocal %210 {approx = true} : vector<8x1xf32> -> vector<8x1xf32>
    %212 = vector.broadcast %211 : vector<8x1xf32> to vector<8x8xf32>
    %213 = arith.mulf %208, %212 : vector<8x8xf32>
    %cst_67 = arith.constant dense<0.000000e+00> : vector<8x49xf32>
    %214 = tpu.matmul %213, %201, %cst_67 {dimension_numbers = #tpu.dot_dimension_numbers<[1], [0], [0], [1], [0, 0, 1, 1], [], []>} : vector<8x8xf32>, vector<8x49xf32>, vector<8x49xf32> -> vector<8x49xf32>
    %215 = tpu.concatenate %86, %102, %118, %134, %150, %166, %182, %198, %214 in 1 : vector<8x49xf32>, vector<8x49xf32>, vector<8x49xf32>, vector<8x49xf32>, vector<8x49xf32>, vector<8x49xf32>, vector<8x49xf32>, vector<8x49xf32>, vector<8x49xf32> -> vector<8x441xf32>
    %216 = arith.truncf %215 : vector<8x441xf32> to vector<8x441xbf16>
    %c0_68 = arith.constant 0 : index
    %c0_69 = arith.constant 0 : index
    %217 = vector.load %arg9[%c0_68, %c0_69] : memref<441x441xbf16, #tpu.memory_space<vmem>>, vector<441x441xbf16>
    %cst_70 = arith.constant dense<0.000000e+00> : vector<8x441xf32>
    %218 = tpu.matmul %216, %217, %cst_70 {dimension_numbers = #tpu.dot_dimension_numbers<[1], [0], [0], [1], [0, 0, 1, 1], [], []>} : vector<8x441xbf16>, vector<441x441xbf16>, vector<8x441xf32> -> vector<8x441xf32>
    %219 = arith.addf %42, %218 : vector<8x441xf32>
    %c0_71 = arith.constant 0 : index
    %c0_72 = arith.constant 0 : index
    %220 = vector.load %arg10[%c0_71, %c0_72] : memref<1x441xf32, #tpu.memory_space<vmem>>, vector<1x441xf32>
    %221 = vector.broadcast %220 : vector<1x441xf32> to vector<8x441xf32>
    %222 = arith.addf %219, %221 : vector<8x441xf32>
    %c0_73 = arith.constant 0 : index
    %c0_74 = arith.constant 0 : index
    %223 = vector.load %arg12[%c0_73, %c0_74] : memref<1x441xf32, #tpu.memory_space<vmem>>, vector<1x441xf32>
    %c0_75 = arith.constant 0 : index
    %c0_76 = arith.constant 0 : index
    %224 = vector.load %arg13[%c0_75, %c0_76] : memref<1x441xf32, #tpu.memory_space<vmem>>, vector<1x441xf32>
    %cst_77 = arith.constant dense<0.000000e+00> : vector<8xf32>
    %225 = vector.multi_reduction <add>, %222, %cst_77 [1] : vector<8x441xf32> to vector<8xf32>
    %226 = vector.shape_cast %225 : vector<8xf32> to vector<8x1xf32>
    %cst_78 = arith.constant 4.410000e+02 : f32
    %227 = vector.broadcast %cst_78 : f32 to vector<8x1xf32>
    %228 = arith.divf %226, %227 : vector<8x1xf32>
    %229 = arith.mulf %222, %222 : vector<8x441xf32>
    %cst_79 = arith.constant dense<0.000000e+00> : vector<8xf32>
    %230 = vector.multi_reduction <add>, %229, %cst_79 [1] : vector<8x441xf32> to vector<8xf32>
    %231 = vector.shape_cast %230 : vector<8xf32> to vector<8x1xf32>
    %cst_80 = arith.constant 4.410000e+02 : f32
    %232 = vector.broadcast %cst_80 : f32 to vector<8x1xf32>
    %233 = arith.divf %231, %232 : vector<8x1xf32>
    %234 = arith.mulf %228, %228 : vector<8x1xf32>
    %235 = arith.subf %233, %234 : vector<8x1xf32>
    %236 = vector.broadcast %228 : vector<8x1xf32> to vector<8x441xf32>
    %237 = arith.subf %222, %236 : vector<8x441xf32>
    %cst_81 = arith.constant 9.99999997E-7 : f32
    %238 = vector.broadcast %cst_81 : f32 to vector<8x1xf32>
    %239 = arith.addf %235, %238 : vector<8x1xf32>
    %240 = math.rsqrt %239 : vector<8x1xf32>
    %241 = vector.broadcast %240 : vector<8x1xf32> to vector<8x441xf32>
    %242 = arith.mulf %237, %241 : vector<8x441xf32>
    %243 = vector.broadcast %223 : vector<1x441xf32> to vector<8x441xf32>
    %244 = arith.mulf %242, %243 : vector<8x441xf32>
    %245 = vector.broadcast %224 : vector<1x441xf32> to vector<8x441xf32>
    %246 = arith.addf %244, %245 : vector<8x441xf32>
    %247 = arith.truncf %246 : vector<8x441xf32> to vector<8x441xbf16>
    %c0_82 = arith.constant 0 : index
    %c0_83 = arith.constant 0 : index
    %248 = vector.load %arg14[%c0_82, %c0_83] : memref<441x1764xbf16, #tpu.memory_space<vmem>>, vector<441x1764xbf16>
    %cst_84 = arith.constant dense<0.000000e+00> : vector<8x1764xf32>
    %249 = tpu.matmul %247, %248, %cst_84 {dimension_numbers = #tpu.dot_dimension_numbers<[1], [0], [0], [1], [0, 0, 1, 1], [], []>} : vector<8x441xbf16>, vector<441x1764xbf16>, vector<8x1764xf32> -> vector<8x1764xf32>
    %c0_85 = arith.constant 0 : index
    %c0_86 = arith.constant 0 : index
    %250 = vector.load %arg15[%c0_85, %c0_86] : memref<1x1764xf32, #tpu.memory_space<vmem>>, vector<1x1764xf32>
    %251 = vector.broadcast %250 : vector<1x1764xf32> to vector<8x1764xf32>
    %252 = arith.addf %249, %251 : vector<8x1764xf32>
    %253 = arith.mulf %252, %252 : vector<8x1764xf32>
    %254 = arith.mulf %252, %253 : vector<8x1764xf32>
    %cst_87 = arith.constant 4.471500e-02 : f32
    %255 = vector.broadcast %cst_87 : f32 to vector<8x1764xf32>
    %256 = arith.mulf %255, %254 : vector<8x1764xf32>
    %257 = arith.addf %252, %256 : vector<8x1764xf32>
    %cst_88 = arith.constant 0.797884583 : f32
    %258 = vector.broadcast %cst_88 : f32 to vector<8x1764xf32>
    %259 = arith.mulf %258, %257 : vector<8x1764xf32>
    %260 = math.tanh %259 : vector<8x1764xf32>
    %cst_89 = arith.constant 1.000000e+00 : f32
    %261 = vector.broadcast %cst_89 : f32 to vector<8x1764xf32>
    %262 = arith.addf %261, %260 : vector<8x1764xf32>
    %cst_90 = arith.constant 5.000000e-01 : f32
    %263 = vector.broadcast %cst_90 : f32 to vector<8x1764xf32>
    %264 = arith.mulf %263, %262 : vector<8x1764xf32>
    %265 = arith.mulf %252, %264 : vector<8x1764xf32>
    %266 = arith.truncf %265 : vector<8x1764xf32> to vector<8x1764xbf16>
    %c0_91 = arith.constant 0 : index
    %c0_92 = arith.constant 0 : index
    %267 = vector.load %arg16[%c0_91, %c0_92] : memref<1764x441xbf16, #tpu.memory_space<vmem>>, vector<1764x441xbf16>
    %cst_93 = arith.constant dense<0.000000e+00> : vector<8x441xf32>
    %268 = tpu.matmul %266, %267, %cst_93 {dimension_numbers = #tpu.dot_dimension_numbers<[1], [0], [0], [1], [0, 0, 1, 1], [], []>} : vector<8x1764xbf16>, vector<1764x441xbf16>, vector<8x441xf32> -> vector<8x441xf32>
    %c0_94 = arith.constant 0 : index
    %c0_95 = arith.constant 0 : index
    %269 = vector.load %arg17[%c0_94, %c0_95] : memref<1x441xf32, #tpu.memory_space<vmem>>, vector<1x441xf32>
    %270 = vector.broadcast %269 : vector<1x441xf32> to vector<8x441xf32>
    %271 = arith.addf %268, %270 : vector<8x441xf32>
    %272 = arith.addf %222, %271 : vector<8x441xf32>
    %273 = arith.addf %0, %272 : vector<8x441xf32>
    %c0_96 = arith.constant 0 : index
    %c0_97 = arith.constant 0 : index
    %274 = vector.load %arg18[%c0_96, %c0_97] : memref<8x441xf32, #tpu.memory_space<vmem>>, vector<8x441xf32>
    tpu.vector_store %arg18[%c0_96, %c0_97], %273 {strides = array<i32>} : memref<8x441xf32, #tpu.memory_space<vmem>>, vector<8x441xf32>,
    return
  }
  func.func @transform_0(%arg0: i32) -> (i32, i32) {
    %c0_i32 = arith.constant 0 : i32
    %c0_i32_0 = arith.constant 0 : i32
    %c0_i32_1 = arith.constant 0 : i32
    return %c0_i32, %c0_i32_0 : i32, i32
  }
  func.func @transform_1(%arg0: i32) -> (i32, i32) {
    %c0_i32 = arith.constant 0 : i32
    %c0_i32_0 = arith.constant 0 : i32
    %c0_i32_1 = arith.constant 0 : i32
    return %c0_i32, %c0_i32_0 : i32, i32
  }
  func.func @transform_2(%arg0: i32) -> (i32, i32) {
    %c0_i32 = arith.constant 0 : i32
    %c0_i32_0 = arith.constant 0 : i32
    %c0_i32_1 = arith.constant 0 : i32
    return %c0_i32, %c0_i32_0 : i32, i32
  }
  func.func @transform_3(%arg0: i32) -> (i32, i32) {
    %c0_i32 = arith.constant 0 : i32
    %c0_i32_0 = arith.constant 0 : i32
    %c0_i32_1 = arith.constant 0 : i32
    return %c0_i32, %c0_i32_0 : i32, i32
  }
  func.func @transform_4(%arg0: i32) -> (i32, i32) {
    %c0_i32 = arith.constant 0 : i32
    %c0_i32_0 = arith.constant 0 : i32
    %c0_i32_1 = arith.constant 0 : i32
    return %c0_i32, %c0_i32_0 : i32, i32
  }
  func.func @transform_5(%arg0: i32) -> (i32, i32) {
    %c0_i32 = arith.constant 0 : i32
    %c0_i32_0 = arith.constant 0 : i32
    %c0_i32_1 = arith.constant 0 : i32
    return %c0_i32, %c0_i32_0 : i32, i32
  }
  func.func @transform_6(%arg0: i32) -> (i32, i32) {
    %c0_i32 = arith.constant 0 : i32
    %c0_i32_0 = arith.constant 0 : i32
    %c0_i32_1 = arith.constant 0 : i32
    return %c0_i32, %c0_i32_0 : i32, i32
  }
  func.func @transform_7(%arg0: i32) -> (i32, i32) {
    %c0_i32 = arith.constant 0 : i32
    %c0_i32_0 = arith.constant 0 : i32
    %c0_i32_1 = arith.constant 0 : i32
    return %c0_i32, %c0_i32_0 : i32, i32
  }
  func.func @transform_8(%arg0: i32) -> (i32, i32) {
    %c0_i32 = arith.constant 0 : i32
    %c0_i32_0 = arith.constant 0 : i32
    %c0_i32_1 = arith.constant 0 : i32
    return %c0_i32, %c0_i32_0 : i32, i32
  }
  func.func @transform_9(%arg0: i32) -> (i32, i32) {
    %c0_i32 = arith.constant 0 : i32
    %c0_i32_0 = arith.constant 0 : i32
    %c0_i32_1 = arith.constant 0 : i32
    return %c0_i32, %c0_i32_0 : i32, i32
  }
  func.func @transform_10(%arg0: i32) -> (i32, i32) {
    %c0_i32 = arith.constant 0 : i32
    %c0_i32_0 = arith.constant 0 : i32
    %c0_i32_1 = arith.constant 0 : i32
    return %c0_i32, %c0_i32_0 : i32, i32
  }
  func.func @transform_11(%arg0: i32) -> (i32, i32) {
    %c0_i32 = arith.constant 0 : i32
    %c0_i32_0 = arith.constant 0 : i32
    %c0_i32_1 = arith.constant 0 : i32
    return %c0_i32, %c0_i32_0 : i32, i32
  }
  func.func @transform_12(%arg0: i32) -> (i32, i32) {
    %c0_i32 = arith.constant 0 : i32
    %c0_i32_0 = arith.constant 0 : i32
    %c0_i32_1 = arith.constant 0 : i32
    return %c0_i32, %c0_i32_0 : i32, i32
  }
  func.func @transform_13(%arg0: i32) -> (i32, i32) {
    %c0_i32 = arith.constant 0 : i32
    %c0_i32_0 = arith.constant 0 : i32
    %c0_i32_1 = arith.constant 0 : i32
    return %c0_i32, %c0_i32_0 : i32, i32
  }
  func.func @transform_14(%arg0: i32) -> (i32, i32) {
    %c0_i32 = arith.constant 0 : i32
    %c0_i32_0 = arith.constant 0 : i32
    %c0_i32_1 = arith.constant 0 : i32
    return %c0_i32, %c0_i32_0 : i32, i32
  }
  func.func @transform_15(%arg0: i32) -> (i32, i32) {
    %c0_i32 = arith.constant 0 : i32
    %c0_i32_0 = arith.constant 0 : i32
    %c0_i32_1 = arith.constant 0 : i32
    return %c0_i32, %c0_i32_0 : i32, i32
  }
  func.func @transform_16(%arg0: i32) -> (i32, i32) {
    %c0_i32 = arith.constant 0 : i32
    %c0_i32_0 = arith.constant 0 : i32
    %c0_i32_1 = arith.constant 0 : i32
    return %c0_i32, %c0_i32_0 : i32, i32
  }
  func.func @transform_17(%arg0: i32) -> (i32, i32) {
    %c0_i32 = arith.constant 0 : i32
    %c0_i32_0 = arith.constant 0 : i32
    %c0_i32_1 = arith.constant 0 : i32
    return %c0_i32, %c0_i32_0 : i32, i32
  }
}

</mosaic_0001>

<bundles_post_ra>
// kernel: tpu_custom_call.1
= control target key start
LH: loop header
LB: loop body
LE: loop exit
PB: predicated region body
PF: predicated region fallthrough
CT: control target
= control target key end

     0   :  { %s26311_s0 = inlined_call_operand.vmem [shape: f32[8,441], index: 0, kind: input, shape index: {}]   ;;  %s26312_s1 = inlined_call_operand.vmem [shape: f32[8,8], index: 1, kind: input, shape index: {}]   ;;  %s26313_s2 = inlined_call_operand.vmem [shape: f32[8,1], index: 2, kind: input, shape index: {}]   ;;  %s26314_s3 = inlined_call_operand.vmem [shape: f32[1,441], index: 3, kind: input, shape index: {}]   ;;  %s26315_s4 = inlined_call_operand.vmem [shape: f32[1,441], index: 4, kind: input, shape index: {}]   ;;  %s26316_s5 = inlined_call_operand.vmem [shape: f32[1,441], index: 5, kind: input, shape index: {}]   ;;  %s26317_s6 = inlined_call_operand.vmem [shape: f32[1,441], index: 6, kind: input, shape index: {}]   ;;  %s26318_s7 = inlined_call_operand.vmem [shape: bf16[441,1323], index: 7, kind: input, shape index: {}]   ;;  %s26319_s8 = inlined_call_operand.vmem [shape: bf16[441,441], index: 8, kind: input, shape index: {}]   ;;  %s26320_s9 = inlined_call_operand.vmem [shape: f32[1,441], index: 9, kind: input, shape index: {}]   ;;  %s26321_s10 = inlined_call_operand.vmem [shape: f32[8,8], index: 10, kind: input, shape index: {}]   ;;  %s26322_s11 = inlined_call_operand.vmem [shape: f32[1,441], index: 11, kind: input, shape index: {}]   ;;  %s26323_s12 = inlined_call_operand.vmem [shape: f32[1,441], index: 12, kind: input, shape index: {}]   ;;  %s26324_s13 = inlined_call_operand.vmem [shape: bf16[441,1764], index: 13, kind: input, shape index: {}]   ;;  %s26325_s14 = inlined_call_operand.vmem [shape: f32[1,1764], index: 14, kind: input, shape index: {}]   ;;  %s26326_s15 = inlined_call_operand.vmem [shape: bf16[1764,441], index: 15, kind: input, shape index: {}]   ;;  %s26327_s16 = inlined_call_operand.vmem [shape: f32[1,441], index: 16, kind: input, shape index: {}]   ;;  %s26328_s17 = inlined_call_operand.hbm [shape: f32[8,441], index: 17, kind: output, shape index: {}]  }
   0x1   :  { %26330 = sst [smem:[#allocation5_spill]] %s26311_s0 }
   0x2   :  { %26331 = sst [smem:[#allocation6_spill]] %s26312_s1 }
   0x3   :  { %s26332_s26 = sld [smem:[#allocation5_spill]]  ;;  %vm69_vm0 = vcmask 64512  }
   0x4   :  { %s26333_s30 = sld [smem:[#allocation6_spill]] }
   0x9   :  { %v60_v0 = vld [vmem:[%s26332_s26 + $0x10] sm:$0xff]  ;;  %v61_v1 = vld [vmem:[%s26332_s26 + $0x18] sm:$0xff]  ;;  %v58_v3 = vld [vmem:[%s26332_s26] sm:$0xff] }
   0xa   :  { %v62_v2 = vld [vmem:[%s26333_s30] sm:$0xff]  ;;  %128 = vmatpush.msra.mxu2 %v60_v0  ;;  %148 = vmatpush.msra.mxu3 %v61_v1  ;;  %v59_v4 = vld [vmem:[%s26332_s26 + $0x8] sm:$0xff] }
   0xb   :  { %11226 = vmatmul.msk.f32.vlgmr.msra.gmra.mxu2 %vm69_vm0, %v62_v2  ;;  %11227 = vmatmul.msk.f32.vlgmr.msra.gmra.mxu3 %vm69_vm0, %v62_v2 }
   0xc   :  { %22 = vsyncpa [#allocation3], 0  ;;  %88 = vmatpush.msra.mxu0 %v58_v3  ;;  %108 = vmatpush.msra.mxu1 %v59_v4  ;;  %v63_v5 = vld [vmem:[%s26313_s2] sm:$0xff]  ;;  %v17720_v6 = vmov 0   ;;  %vm157_vm1 = vcmask 465920   ;;  %v17721_v28 = vmov 441.0  }
   0xd   :  { %11224 = vmatmul.msk.f32.vlgmr.msra.gmra.mxu0 %vm69_vm0, %v62_v2  ;;  %11225 = vmatmul.msk.f32.vlgmr.msra.gmra.mxu1 %vm69_vm0, %v62_v2  ;;  %17607 = vrcp.f32 %v17721_v28  ;;  %v153_v45 = vld [vmem:[%s26314_s3] sm:$0xf]  ;;  %vm2231_vm6 = vcmask 1043456   ;;  %vm2232_vm7 = vcmask 1044480   ;;  %s17723_s3 = smov 79   ;;  %s17724_s29 = smov 71  }
   0xe   :  { %17586 = vset.pattern.permute.xlu0 %v17720_v6  ;;  %v154_v47 = vld [vmem:[%s26315_s4] sm:$0xf]  ;;  %v203_v49 = vperm.slane %v153_v45, 0  ;;  %v204_v50 = vperm.slane %v153_v45, 1  ;;  %v205_v51 = vperm.slane %v153_v45, 2  ;;  %v206_v52 = vperm.slane %v153_v45, 3 }
   0xf   :  { %66 = vperm.xlu0 %17586, %v63_v5   ;;  %v216_v53 = vperm.slane %v154_v47, 0  ;;  %v217_v59 = vperm.slane %v154_v47, 1  ;;  %v218_v60 = vperm.slane %v154_v47, 2  ;;  %v219_v62 = vperm.slane %v154_v47, 3  ;;  %v12242_v47 = vld [vmem:[%s26318_s7 + $0x7e8] sm:$0xf] }
  0x10   :  { %s17725_s2 = smov 30   ;;  %s17727_s20 = smov 52   ;;  %vm2844_vm11 = vcmask 400384   ;;  %vm2988_vm12 = vcmask 244736   ;;  %vm2920_vm13 = vcmask 179200   ;;  %vm3130_vm14 = vcmask 23552  }
  0x11   :  { %s17728_s21 = smov 101   ;;  %s17730_s22 = smov 109   ;;  %vm3274_vm15 = vcmask 269312  }
  0x12   :  { %s17731_s23 = smov 33   ;;  %s17732_s24 = smov 63  }
  0x13   :  { %v17608_v29 = vpop.eup %17607  ;;  %s17733_s25 = smov 11   ;;  %s17735_s4 = smov 41  }
  0x14   :  { %v163_v30 = vmul.f32 441.0, %v17608_v29  ;;  %vm167_vm2 = vweird.f32 %v17608_v29  ;;  %s17736_s27 = smov 14   ;;  %s17737_s0 = smov 60  }
  0x15   :  { %s17739_s30 = smov 120   ;;  %s17742_s18 = smov 93  }
  0x16   :  { %v164_v31 = vsub.f32 1.0, %v163_v30  ;;  %v11450_v30 = vld [vmem:[%s26318_s7 + $0x1b8] sm:$0xf]  ;;  %s17743_s19 = smov 44   ;;  %s17744_s1 = smov 6  }
  0x17   :  { %s17756_s28 = smov 68  }
  0x18   :  { %v165_v32 = vmul.f32 %v17608_v29, %v164_v31  ;;  %v16356_v31 = vld [vmem:[%s26318_s7 + $0x1e0] sm:$0xf0] }
  0x19   :  { %v11451_v45 = vor.u32 %v16356_v31, %v11450_v30 }
  0x1a   :  { %v166_v33 = vadd.f32 %v17608_v29, %v165_v32 }
  0x1c   :  { %v17882_v34 = vsel %vm167_vm2, %v17608_v29, %v166_v33  ;;  %vm3198_vm2 = vcmask 89088  }
  0x81   :  { %v67_v7 = vpop.permute.xlu0 %66 }
  0x8a   :  { %v90_v8 = vpop.f32.mrf.mxu0  ;;  %v110_v9 = vpop.f32.mrf.mxu1 }
  0x8b   :  { %v17870_v10 = vadd.f32 %v90_v8, %v67_v7  ;;  %v17872_v11 = vadd.f32 %v110_v9, %v67_v7 }
  0x8d   :  { %v155_v12 = vadd.f32 %v17872_v11, %v17870_v10  ;;  %v170_v13 = vmul.f32 %v17870_v10, %v17870_v10  ;;  %v171_v14 = vmul.f32 %v17872_v11, %v17872_v11 }
  0x8e   :  { %v130_v15 = vpop.f32.mrf.mxu2  ;;  %v150_v16 = vpop.f32.mrf.mxu3 }
  0x8f   :  { %v131_v17 = vadd.f32 %v130_v15, %v67_v7  ;;  %v151_v18 = vadd.f32 %v150_v16, %v67_v7  ;;  %v174_v19 = vadd.f32 %v171_v14, %v170_v13  ;;  %v11538_v15 = vld [vmem:[%s26318_s7 + $0x268] sm:$0xf]  ;;  %v16378_v16 = vld [vmem:[%s26318_s7 + $0x290] sm:$0xf0] }
  0x91   :  { %v156_v20 = vadd.f32 %v155_v12, %v131_v17  ;;  %v158_v21 = vsel %vm157_vm1, %v151_v18, 0.0  ;;  %v172_v22 = vmul.f32 %v131_v17, %v131_v17  ;;  %v173_v23 = vmul.f32 %v151_v18, %v151_v18 }
  0x93   :  { %v159_v24 = vadd.f32 %v158_v21, %v156_v20  ;;  %v175_v25 = vadd.f32 %v174_v19, %v172_v22  ;;  %v176_v26 = vsel %vm157_vm1, %v173_v23, 0.0  ;;  %v16466_v19 = vld [vmem:[%s26318_s7 + $0x550] sm:$0xf0]  ;;  %v11494_v20 = vld [vmem:[%s26318_s7 + $0x210] sm:$0xf] }
  0x94   :  { %v16367_v21 = vld [vmem:[%s26318_s7 + $0x238] sm:$0xf0] }
  0x95   :  { %160 = vadd.xlane.f32.xlu0 %v159_v24  ;;  %v177_v27 = vadd.f32 %v176_v26, %v175_v25  ;;  %v11846_v26 = vld [vmem:[%s26318_s7 + $0x4d0] sm:$0xf]  ;;  %v11495_v29 = vor.u32 %v16367_v21, %v11494_v20 }
  0x97   :  { %178 = vadd.xlane.f32.xlu1 %v177_v27  ;;  %v16455_v27 = vld [vmem:[%s26318_s7 + $0x4f8] sm:$0xf0] }
 0x108   :  { %v161_v35 = vpop.xlane.xlu0 %160 }
 0x109   :  { %v169_v36 = vmul.f32 %v17882_v34, %v161_v35 }
 0x10a   :  { %v179_v37 = vpop.xlane.xlu1 %178 }
 0x10b   :  { %v180_v38 = vmul.f32 %v179_v37, %v17882_v34  ;;  %v181_v39 = vmul.f32 %v169_v36, %v169_v36  ;;  %v183_v55 = vsub.f32 %v17870_v10, %v169_v36  ;;  %v184_v56 = vsub.f32 %v17872_v11, %v169_v36 }
 0x10c   :  { %v185_v57 = vsub.f32 %v131_v17, %v169_v36  ;;  %v186_v58 = vsub.f32 %v151_v18, %v169_v36  ;;  %v11890_v17 = vld [vmem:[%s26318_s7 + $0x528] sm:$0xf]  ;;  %v11539_v18 = vor.u32 %v16378_v16, %v11538_v15  ;;  %v11847_v37 = vor.u32 %v16455_v27, %v11846_v26  ;;  %v16411_v26 = vld [vmem:[%s26318_s7 + $0x398] sm:$0xf0] }
 0x10d   :  { %v182_v40 = vsub.f32 %v180_v38, %v181_v39  ;;  %v11891_v28 = vor.u32 %v16466_v19, %v11890_v17  ;;  %v11318_v17 = vld [vmem:[%s26318_s7 + $0xb0] sm:$0xf] }
 0x10e   :  { %2268 = vmatpush.bf16.msrb.mxu0 %v11539_v18  ;;  %v16323_v18 = vld [vmem:[%s26318_s7 + $0xd8] sm:$0xf0] }
 0x10f   :  { %v187_v41 = vadd.f32 1e-06, %v182_v40  ;;  %2281 = vmatpush.bf16.msrb.mxu1 %v11891_v28  ;;  %v11319_v30 = vor.u32 %v16323_v18, %v11318_v17  ;;  %v11582_v17 = vld [vmem:[%s26318_s7 + $0x2c0] sm:$0xf]  ;;  %v16389_v18 = vld [vmem:[%s26318_s7 + $0x2e8] sm:$0xf0] }
 0x111   :  { %17609 = vrsqrt.f32 %v187_v41  ;;  %vm194_vm4 = vweird.f32 %v187_v41 }
 0x112   :  { %2269 = vmatpush.bf16.msrb.mxu0 %v11495_v29 }
 0x113   :  { %2282 = vmatpush.bf16.msrb.mxu1 %v11847_v37 }
 0x116   :  { %2270 = vmatpush.bf16.msrb.mxu0 %v11451_v45 }
 0x117   :  { %v17610_v42 = vpop.eup %17609 }
 0x118   :  { %v189_v43 = vmul.f32 %v17610_v42, %v187_v41  ;;  %vm195_vm3 = vweird.f32 %v17610_v42  ;;  %v11802_v41 = vld [vmem:[%s26318_s7 + $0x478] sm:$0xf] }
 0x119   :  { %vm196_vm5 = vmor %vm194_vm4, %vm195_vm3  ;;  %vm2887_vm3 = vcmask 113664   ;;  %vm3341_vm4 = vcmask 334848  }
 0x11a   :  { %v190_v44 = vmul.f32 %v17610_v42, %v189_v43  ;;  %v11406_v43 = vld [vmem:[%s26318_s7 + $0x160] sm:$0xf] }
 0x11c   :  { %v191_v46 = vmul.f32 0.5, %v190_v44 }
 0x11e   :  { %v192_v48 = vsub.f32 1.5, %v191_v46  ;;  %v16345_v46 = vld [vmem:[%s26318_s7 + $0x188] sm:$0xf0] }
 0x120   :  { %v193_v54 = vmul.f32 %v17610_v42, %v192_v48  ;;  %v16554_v48 = vld [vmem:[%s26318_s7 + $0x810] sm:$0xf0] }
 0x122   :  { %v197_v61 = vsel %vm196_vm5, %v17610_v42, %v193_v54  ;;  %v16444_v42 = vld [vmem:[%s26318_s7 + $0x4a0] sm:$0xf0]  ;;  %v12243_v54 = vor.u32 %v16554_v48, %v12242_v47  ;;  %vm3032_vm5 = vcmask 359424  }
 0x123   :  { %v198_v63 = vmul.f32 %v197_v61, %v183_v55  ;;  %v199_v0 = vmul.f32 %v197_v61, %v184_v56  ;;  %v200_v1 = vmul.f32 %v197_v61, %v185_v57  ;;  %v201_v2 = vmul.f32 %v197_v61, %v186_v58  ;;  %v12418_v55 = vld [vmem:[%s26318_s7 + $0x948] sm:$0xf]  ;;  %v16598_v56 = vld [vmem:[%s26318_s7 + $0x970] sm:$0x10]  ;;  %v11758_v57 = vld [vmem:[%s26318_s7 + $0x420] sm:$0xf] }
 0x124   :  { %v16433_v58 = vld [vmem:[%s26318_s7 + $0x448] sm:$0xf0]  ;;  %v11362_v61 = vld [vmem:[%s26318_s7 + $0x108] sm:$0xf]  ;;  %2294 = vmatpush.bf16.msrb.mxu2 %v12243_v54  ;;  %v12330_v54 = vld [vmem:[%s26318_s7 + $0x898] sm:$0xf] }
 0x125   :  { %v211_v3 = vmul.f32 %v203_v49, %v198_v63  ;;  %v212_v4 = vmul.f32 %v204_v50, %v199_v0  ;;  %v213_v5 = vmul.f32 %v205_v51, %v200_v1  ;;  %v214_v6 = vmul.f32 %v206_v52, %v201_v2  ;;  %v12198_v1 = vld [vmem:[%s26318_s7 + $0x790] sm:$0xf]  ;;  %v16543_v2 = vld [vmem:[%s26318_s7 + $0x7b8] sm:$0xf0] }
 0x126   :  { %v17722_v63 = vmov 65535  }
 0x127   :  { %v17894_v7 = vadd.f32 %v216_v53, %v211_v3  ;;  %v17896_v8 = vadd.f32 %v217_v59, %v212_v4  ;;  %v17898_v9 = vadd.f32 %v218_v60, %v213_v5  ;;  %v17900_v10 = vadd.f32 %v219_v62, %v214_v6  ;;  %v16334_v62 = vld [vmem:[%s26318_s7 + $0x130] sm:$0xf0]  ;;  %v12374_v6 = vld [vmem:[%s26318_s7 + $0x8f0] sm:$0xf] }
 0x128   :  { %v11803_v53 = vor.u32 %v16444_v42, %v11802_v41  ;;  %v12419_v59 = vor.u32 %v16598_v56, %v12418_v55  ;;  %v11407_v60 = vor.u32 %v16345_v46, %v11406_v43  ;;  %v2233_v0 = vsel %vm2231_vm6, 4294967295, %v17722_v63  ;;  %v16576_v55 = vld [vmem:[%s26318_s7 + $0x8c0] sm:$0xf0]  ;;  %v12110_v63 = vld [vmem:[%s26318_s7 + $0x6e0] sm:$0xf] }
 0x129   :  { %v228_v11 = vmul.f32 %v17894_v7, %v17894_v7  ;;  %v229_v12 = vmul.f32 %v17896_v8, %v17896_v8  ;;  %v230_v13 = vmul.f32 %v17898_v9, %v17898_v9  ;;  %v231_v14 = vmul.f32 %v17900_v10, %v17900_v10 }
 0x12a   :  { %2283 = vmatpush.bf16.msrb.mxu1 %v11803_v53  ;;  %v11759_v3 = vor.u32 %v16433_v58, %v11758_v57  ;;  %v17990_v4 = vsel %vm2232_vm7, %v2233_v0, 0  ;;  %v12199_v5 = vor.u32 %v16543_v2, %v12198_v1  ;;  %2271 = vmatpush.bf16.msrb.mxu0 %v11407_v60  ;;  %v11363_v15 = vor.u32 %v16334_v62, %v11362_v61  ;;  %v16532_v53 = vld [vmem:[%s26318_s7 + $0x760] sm:$0xf0]  ;;  %v11626_v58 = vld [vmem:[%s26318_s7 + $0x318] sm:$0xf] }
 0x12b   :  { %v232_v22 = vmul.f32 %v228_v11, %v17894_v7  ;;  %v233_v23 = vmul.f32 %v229_v12, %v17896_v8  ;;  %v234_v24 = vmul.f32 %v230_v13, %v17898_v9  ;;  %v235_v25 = vmul.f32 %v231_v14, %v17900_v10  ;;  %v16587_v11 = vld [vmem:[%s26318_s7 + $0x918] sm:$0xf0]  ;;  %v11714_v13 = vld [vmem:[%s26318_s7 + $0x3c8] sm:$0xf]  ;;  %v16422_v14 = vld [vmem:[%s26318_s7 + $0x3f0] sm:$0xf0] }
 0x12c   :  { %v2236_v12 = vand.u32 %v12419_v59, %v17990_v4  ;;  %2295 = vmatpush.bf16.msrb.mxu2 %v12199_v5  ;;  %v12375_v19 = vor.u32 %v16587_v11, %v12374_v6  ;;  %v12331_v57 = vor.u32 %v16576_v55, %v12330_v54  ;;  %v16400_v59 = vld [vmem:[%s26318_s7 + $0x340] sm:$0xf0]  ;;  %v11230_v60 = vld [vmem:[%s26318_s7] sm:$0xf]  ;;  %v16301_v62 = vld [vmem:[%s26318_s7 + $0x28] sm:$0xf0] }
 0x12d   :  { %v236_v32 = vmul.f32 0.044715, %v232_v22  ;;  %v237_v33 = vmul.f32 0.044715, %v233_v23  ;;  %v238_v35 = vmul.f32 0.044715, %v234_v24  ;;  %v11715_v22 = vor.u32 %v16422_v14, %v11714_v13 }
 0x12e   :  { %v239_v36 = vmul.f32 0.044715, %v235_v25  ;;  %2311 = vmatpush.bf16.msrb.mxu3 %v2236_v12  ;;  %2284 = vmatpush.bf16.msrb.mxu1 %v11759_v3  ;;  %v11670_v25 = vld [vmem:[%s26318_s7 + $0x370] sm:$0xf]  ;;  %v11627_v61 = vor.u32 %v16400_v59, %v11626_v58  ;;  %v16521_v0 = vld [vmem:[%s26318_s7 + $0x708] sm:$0xf0]  ;;  %v11231_v1 = vor.u32 %v16301_v62, %v11230_v60 }
 0x12f   :  { %v240_v38 = vadd.f32 %v236_v32, %v17894_v7  ;;  %v241_v39 = vadd.f32 %v237_v33, %v17896_v8  ;;  %v242_v40 = vadd.f32 %v238_v35, %v17898_v9  ;;  %2272 = vmatpush.bf16.msrb.mxu0 %v11363_v15  ;;  %v12111_v2 = vor.u32 %v16521_v0, %v12110_v63  ;;  %v12286_v3 = vld [vmem:[%s26318_s7 + $0x840] sm:$0xf]  ;;  %v16565_v5 = vld [vmem:[%s26318_s7 + $0x868] sm:$0xf0]  ;;  %v11540_v12 = vld [vmem:[%s26318_s7 + $0x294] sm:$0xf0] }
 0x130   :  { %v243_v44 = vadd.f32 %v239_v36, %v17900_v10  ;;  %v11671_v36 = vor.u32 %v16411_v26, %v11670_v25  ;;  %v16373_v6 = vld [vmem:[%s26318_s7 + $0x26c] sm:$0xf]  ;;  %v12287_v11 = vor.u32 %v16565_v5, %v12286_v3  ;;  %v11892_v14 = vld [vmem:[%s26318_s7 + $0x554] sm:$0xf0]  ;;  %v16362_v26 = vld [vmem:[%s26318_s7 + $0x214] sm:$0xf] }
 0x131   :  { %v244_v49 = vmul.f32 0.7978846, %v240_v38  ;;  %v245_v50 = vmul.f32 0.7978846, %v241_v39  ;;  %v246_v51 = vmul.f32 0.7978846, %v242_v40  ;;  %v11543_v15 = vor.u32 %v16373_v6, %v11540_v12 }
 0x132   :  { %v247_v52 = vmul.f32 0.7978846, %v243_v44  ;;  %2312 = vmatpush.bf16.msrb.mxu3 %v12375_v19  ;;  %2285 = vmatpush.bf16.msrb.mxu1 %v11715_v22  ;;  %v16461_v13 = vld [vmem:[%s26318_s7 + $0x52c] sm:$0xf]  ;;  %v12066_v19 = vld [vmem:[%s26318_s7 + $0x688] sm:$0xf] }
 0x133   :  { %17611 = vtanh.f32 %v244_v49  ;;  %2273 = vmatpush.bf16.msrb.mxu0 %v11319_v30  ;;  %v11274_v49 = vld [vmem:[%s26318_s7 + $0x58] sm:$0xf]  ;;  %v16549_v22 = vld [vmem:[%s26318_s7 + $0x7ec] sm:$0xf]  ;;  %v11848_v30 = vld [vmem:[%s26318_s7 + $0x4fc] sm:$0xf0] }
 0x134   :  { %17613 = vtanh.f32 %v245_v50  ;;  %v16312_v50 = vld [vmem:[%s26318_s7 + $0x80] sm:$0xf0]  ;;  %v11760_v54 = vld [vmem:[%s26318_s7 + $0x44c] sm:$0xf0]  ;;  %v12420_v58 = vld [vmem:[%s26318_s7 + $0x974] sm:$0x10] }
 0x135   :  { %17615 = vtanh.f32 %v246_v51  ;;  %v12154_v51 = vld [vmem:[%s26318_s7 + $0x738] sm:$0xf]  ;;  %v11934_v59 = vld [vmem:[%s26318_s7 + $0x580] sm:$0xf]  ;;  %v16477_v60 = vld [vmem:[%s26318_s7 + $0x5a8] sm:$0xf0] }
 0x136   :  { %17617 = vtanh.f32 %v247_v52  ;;  %2286 = vmatpush.bf16.msrb.mxu1 %v11671_v36  ;;  %v11275_v52 = vor.u32 %v16312_v50, %v11274_v49  ;;  %v12155_v56 = vor.u32 %v16532_v53, %v12154_v51  ;;  %2313 = vmatpush.bf16.msrb.mxu3 %v12331_v57  ;;  %v12156_v49 = vld [vmem:[%s26318_s7 + $0x764] sm:$0xf0]  ;;  %v16340_v50 = vld [vmem:[%s26318_s7 + $0x164] sm:$0xf]  ;;  %v11408_v51 = vld [vmem:[%s26318_s7 + $0x18c] sm:$0xf0]  ;;  %v11935_v63 = vor.u32 %v16477_v60, %v11934_v59 }
 0x137   :  { %v16428_v53 = vld [vmem:[%s26318_s7 + $0x424] sm:$0xf]  ;;  %v11411_v55 = vor.u32 %v16340_v50, %v11408_v51  ;;  %v16593_v57 = vld [vmem:[%s26318_s7 + $0x94c] sm:$0xf]  ;;  %v12112_v0 = vld [vmem:[%s26318_s7 + $0x70c] sm:$0xf0] }
 0x138   :  { %2274 = vmatpush.bf16.msrb.mxu0 %v11275_v52  ;;  %2296 = vmatpush.bf16.msrb.mxu2 %v12155_v56  ;;  %v11763_v56 = vor.u32 %v16428_v53, %v11760_v54  ;;  %v12423_v62 = vor.u32 %v16593_v57, %v12420_v58  ;;  %v16417_v5 = vld [vmem:[%s26318_s7 + $0x3cc] sm:$0xf]  ;;  %v11716_v6 = vld [vmem:[%s26318_s7 + $0x3f4] sm:$0xf0]  ;;  %v12288_v50 = vld [vmem:[%s26318_s7 + $0x86c] sm:$0xf0] }
 0x139   :  { %v17612_v16 = vpop.eup %17611  ;;  %v16472_v57 = vld [vmem:[%s26318_s7 + $0x584] sm:$0xf]  ;;  %v11936_v58 = vld [vmem:[%s26318_s7 + $0x5ac] sm:$0xf0]  ;;  %vm3450_vm6 = vcmask 48128   ;;  %vm3242_vm7 = vcmask 203776  }
 0x13a   :  { %v17614_v20 = vpop.eup %17613  ;;  %v252_v21 = vadd.f32 1.0, %v17612_v16  ;;  %2287 = vmatpush.bf16.msrb.mxu1 %v11627_v61  ;;  %v11895_v16 = vor.u32 %v16461_v13, %v11892_v14  ;;  %2314 = vmatpush.bf16.msrb.mxu3 %v12287_v11  ;;  %v16516_v61 = vld [vmem:[%s26318_s7 + $0x6e4] sm:$0xf]  ;;  %v2239_v11 = vand.u32 %v12423_v62, %v17990_v4  ;;  %v11719_v13 = vor.u32 %v16417_v5, %v11716_v6  ;;  %v16505_v14 = vld [vmem:[%s26318_s7 + $0x68c] sm:$0xf] }
 0x13b   :  { %v17616_v23 = vpop.eup %17615  ;;  %v253_v24 = vadd.f32 1.0, %v17614_v20  ;;  %v11583_v20 = vor.u32 %v16389_v18, %v11582_v17  ;;  %v12115_v3 = vor.u32 %v16516_v61, %v12112_v0  ;;  %v16318_v17 = vld [vmem:[%s26318_s7 + $0xb4] sm:$0xf]  ;;  %v11320_v18 = vld [vmem:[%s26318_s7 + $0xdc] sm:$0xf0]  ;;  %v11939_v59 = vor.u32 %v16472_v57, %v11936_v58 }
 0x13c   :  { %v17618_v27 = vpop.eup %17617  ;;  %v254_v28 = vadd.f32 1.0, %v17616_v23  ;;  %v256_v29 = vmul.f32 0.5, %v252_v21  ;;  %2275 = vmatpush.bf16.msrb.mxu0 %v11231_v1  ;;  %2297 = vmatpush.bf16.msrb.mxu2 %v12111_v2  ;;  %v16510_v21 = vld [vmem:[%s26318_s7 + $0x6b0] sm:$0xf0]  ;;  %v12244_v23 = vld [vmem:[%s26318_s7 + $0x814] sm:$0xf0] }
 0x13d   :  { %v255_v31 = vadd.f32 1.0, %v17618_v27  ;;  %v257_v32 = vmul.f32 0.5, %v253_v24  ;;  %v12067_v24 = vor.u32 %v16510_v21, %v12066_v19  ;;  %v12247_v25 = vor.u32 %v16549_v22, %v12244_v23  ;;  %v11496_v27 = vld [vmem:[%s26318_s7 + $0x23c] sm:$0xf0]  ;;  %v16329_v1 = vld [vmem:[%s26318_s7 + $0x10c] sm:$0xf] }
 0x13e   :  { %v258_v33 = vmul.f32 0.5, %v254_v28  ;;  %v18018_v35 = vmul.f32 %v256_v29, %v17894_v7  ;;  %2320 = vmatpush.bf16.msra.mxu3 %v11543_v15  ;;  %v16450_v28 = vld [vmem:[%s26318_s7 + $0x4d4] sm:$0xf]  ;;  %2288 = vmatpush.bf16.msrb.mxu1 %v11583_v20  ;;  %v11499_v29 = vor.u32 %v16362_v26, %v11496_v27  ;;  %v11364_v2 = vld [vmem:[%s26318_s7 + $0x134] sm:$0xf0]  ;;  %v11323_v23 = vor.u32 %v16318_v17, %v11320_v18 }
 0x13f   :  { %v259_v37 = vmul.f32 0.5, %v255_v31  ;;  %v18021_v38 = vmul.f32 %v257_v32, %v17896_v8  ;;  %v12022_v31 = vld [vmem:[%s26318_s7 + $0x630] sm:$0xf]  ;;  %v16499_v32 = vld [vmem:[%s26318_s7 + $0x658] sm:$0xf0]  ;;  %v11367_v12 = vor.u32 %v16329_v1, %v11364_v2 }
 0x140   :  { %v18024_v39 = vmul.f32 %v258_v33, %v17898_v9  ;;  %v273_v40 = vmul.f32 %v18018_v35, %v18018_v35  ;;  %2333 = vmatpush.bf16.msra.mxu0 %v11895_v16  ;;  %2298 = vmatpush.bf16.msrb.mxu2 %v12067_v24  ;;  %v11851_v33 = vor.u32 %v16450_v28, %v11848_v30  ;;  %v12068_v15 = vld [vmem:[%s26318_s7 + $0x6b4] sm:$0xf0]  ;;  %v16406_v19 = vld [vmem:[%s26318_s7 + $0x374] sm:$0xf]  ;;  %v11672_v20 = vld [vmem:[%s26318_s7 + $0x39c] sm:$0xf0] }
 0x141   :  { %v18029_v41 = vmul.f32 %v259_v37, %v17900_v10  ;;  %v266_v7 = vadd.f32 %v18021_v38, %v18018_v35  ;;  %v274_v42 = vmul.f32 %v18021_v38, %v18021_v38  ;;  %v12023_v36 = vor.u32 %v16499_v32, %v12022_v31  ;;  %v16538_v37 = vld [vmem:[%s26318_s7 + $0x794] sm:$0xf]  ;;  %v12376_v22 = vld [vmem:[%s26318_s7 + $0x91c] sm:$0xf0]  ;;  %v11276_v30 = vld [vmem:[%s26318_s7 + $0x84] sm:$0xf0] }
 0x142   :  { %v275_v9 = vmul.f32 %v18024_v39, %v18024_v39  ;;  %2346 = vmatpush.bf16.msra.mxu1 %v12247_v25  ;;  %2321 = vmatpush.bf16.msra.mxu3 %v11499_v29  ;;  %v12071_v16 = vor.u32 %v16505_v14, %v12068_v15  ;;  %v16582_v21 = vld [vmem:[%s26318_s7 + $0x8f4] sm:$0xf]  ;;  %v11675_v24 = vor.u32 %v16406_v19, %v11672_v20  ;;  %v12024_v27 = vld [vmem:[%s26318_s7 + $0x65c] sm:$0xf0]  ;;  %v16307_v29 = vld [vmem:[%s26318_s7 + $0x5c] sm:$0xf] }
 0x143   :  { %v267_v8 = vadd.f32 %v266_v7, %v18024_v39  ;;  %v276_v43 = vmul.f32 %v18029_v41, %v18029_v41  ;;  %v277_v44 = vadd.f32 %v274_v42, %v273_v40  ;;  %v268_v10 = vsel %vm157_vm1, %v18029_v41, 0.0  ;;  %v12200_v40 = vld [vmem:[%s26318_s7 + $0x7bc] sm:$0xf0]  ;;  %v16351_v7 = vld [vmem:[%s26318_s7 + $0x1bc] sm:$0xf] }
 0x144   :  { %v12203_v42 = vor.u32 %v16538_v37, %v12200_v40  ;;  %2334 = vmatpush.bf16.msra.mxu0 %v11851_v33  ;;  %2299 = vmatpush.bf16.msrb.mxu2 %v12023_v36  ;;  %v12379_v25 = vor.u32 %v16582_v21, %v12376_v22  ;;  %v16494_v26 = vld [vmem:[%s26318_s7 + $0x634] sm:$0xf]  ;;  %v16395_v31 = vld [vmem:[%s26318_s7 + $0x31c] sm:$0xf]  ;;  %v11628_v32 = vld [vmem:[%s26318_s7 + $0x344] sm:$0xf0]  ;;  %v11279_v37 = vor.u32 %v16307_v29, %v11276_v30 }
 0x145   :  { %v269_v45 = vadd.f32 %v268_v10, %v267_v8  ;;  %v278_v46 = vadd.f32 %v277_v44, %v275_v9  ;;  %v279_v47 = vsel %vm157_vm1, %v276_v43, 0.0  ;;  %v11452_v8 = vld [vmem:[%s26318_s7 + $0x1e4] sm:$0xf0]  ;;  %v16439_v9 = vld [vmem:[%s26318_s7 + $0x47c] sm:$0xf]  ;;  %v12027_v28 = vor.u32 %v16494_v26, %v12024_v27 }
 0x146   :  { %v11804_v43 = vld [vmem:[%s26318_s7 + $0x4a4] sm:$0xf0]  ;;  %v11455_v44 = vor.u32 %v16351_v7, %v11452_v8  ;;  %2347 = vmatpush.bf16.msra.mxu1 %v12203_v42  ;;  %v16571_v33 = vld [vmem:[%s26318_s7 + $0x89c] sm:$0xf]  ;;  %v11631_v42 = vor.u32 %v16395_v31, %v11628_v32  ;;  %v264_v0 = vld [vmem:[%s26316_s5] sm:$0xf] }
 0x147   :  { %270 = vadd.xlane.f32.xlu1 %v269_v45  ;;  %v280_v48 = vadd.f32 %v279_v47, %v278_v46  ;;  %v11807_v10 = vor.u32 %v16439_v9, %v11804_v43  ;;  %v11978_v45 = vld [vmem:[%s26318_s7 + $0x5d8] sm:$0xf]  ;;  %v16488_v46 = vld [vmem:[%s26318_s7 + $0x600] sm:$0xf0]  ;;  %v16527_v47 = vld [vmem:[%s26318_s7 + $0x73c] sm:$0xf] }
 0x148   :  { %v12159_v52 = vor.u32 %v16527_v47, %v12156_v49  ;;  %2322 = vmatpush.bf16.msra.mxu3 %v11455_v44  ;;  %v12332_v36 = vld [vmem:[%s26318_s7 + $0x8c4] sm:$0xf0]  ;;  %v16483_v8 = vld [vmem:[%s26318_s7 + $0x5dc] sm:$0xf]  ;;  %v16560_v49 = vld [vmem:[%s26318_s7 + $0x844] sm:$0xf] }
 0x149   :  { %281 = vadd.xlane.f32.xlu2 %v280_v48  ;;  %v11979_v48 = vor.u32 %v16488_v46, %v11978_v45  ;;  %2335 = vmatpush.bf16.msra.mxu0 %v11807_v10  ;;  %v12335_v40 = vor.u32 %v16571_v33, %v12332_v36  ;;  %v11980_v9 = vld [vmem:[%s26318_s7 + $0x604] sm:$0xf0]  ;;  %v16296_v10 = vld [vmem:[%s26318_s7 + $0x4] sm:$0xf]  ;;  %v11232_v45 = vld [vmem:[%s26318_s7 + $0x2c] sm:$0xf0] }
 0x14a   :  { %2348 = vmatpush.bf16.msra.mxu1 %v12159_v52  ;;  %v11983_v44 = vor.u32 %v16483_v8, %v11980_v9  ;;  %v16384_v46 = vld [vmem:[%s26318_s7 + $0x2c4] sm:$0xf]  ;;  %v11235_v51 = vor.u32 %v16296_v10, %v11232_v45  ;;  %v265_v2 = vld [vmem:[%s26317_s6] sm:$0xf]  ;;  %v306_v5 = vperm.slane %v264_v0, 0  ;;  %v307_v6 = vperm.slane %v264_v0, 1 }
 0x14b   :  { %2300 = vmatpush.bf16.msrb.mxu2 %v11979_v48  ;;  %v11584_v48 = vld [vmem:[%s26318_s7 + $0x2ec] sm:$0xf0]  ;;  %v320_v19 = vperm.slane %v265_v2, 1  ;;  %v321_v20 = vperm.slane %v265_v2, 2  ;;  %v322_v21 = vperm.slane %v265_v2, 3  ;;  %s17740_s5 = smov 112  }
 0x14c   :  { %2323 = vmatpush.bf16.msra.mxu3 %v11411_v55  ;;  %v11587_v54 = vor.u32 %v16384_v46, %v11584_v48  ;;  %v12291_v55 = vor.u32 %v16560_v49, %v12288_v50  ;;  %v12426_v27 = vld [vmem:[%s26318_s7 + $0x950] sm:$0xf]  ;;  %v16379_v36 = vld [vmem:[%s26318_s7 + $0x298] sm:$0xf0]  ;;  %v12206_v57 = vld [vmem:[%s26318_s7 + $0x798] sm:$0xf] }
 0x14d   :  { %2336 = vmatpush.bf16.msra.mxu0 %v11763_v56  ;;  %v11546_v29 = vld [vmem:[%s26318_s7 + $0x270] sm:$0xf]  ;;  %v16555_v10 = vld [vmem:[%s26318_s7 + $0x818] sm:$0xf0]  ;;  %v16544_v58 = vld [vmem:[%s26318_s7 + $0x7c0] sm:$0xf0] }
 0x14e   :  { %2349 = vmatpush.bf16.msra.mxu1 %v12115_v3  ;;  %v11547_v45 = vor.u32 %v16379_v36, %v11546_v29  ;;  %v16335_v29 = vld [vmem:[%s26318_s7 + $0x138] sm:$0xf0]  ;;  %v12074_v36 = vld [vmem:[%s26318_s7 + $0x690] sm:$0xf]  ;;  %s17741_s6 = smov 74  }
 0x14f   :  { %2301 = vmatpush.bf16.msrb.mxu2 %v11935_v63 }
 0x150   :  { %2324 = vmatpush.bf16.msra.mxu3 %v11367_v12  ;;  %v309_v12 = vperm.slane %v264_v0, 3 }
 0x151   :  { %2337 = vmatpush.bf16.msra.mxu0 %v11719_v13  ;;  %v319_v13 = vperm.slane %v265_v2, 0 }
 0x152   :  { %2350 = vmatpush.bf16.msra.mxu1 %v12071_v16 }
 0x153   :  { %2363 = vmatpush.bf16.msra.mxu2 %v2239_v11  ;;  %v308_v11 = vperm.slane %v264_v0, 2  ;;  %v16357_v0 = vld [vmem:[%s26318_s7 + $0x1e8] sm:$0xf0] }
 0x154   :  { %2325 = vmatpush.bf16.msra.mxu3 %v11323_v23 }
 0x155   :  { %2338 = vmatpush.bf16.msra.mxu0 %v11675_v24 }
 0x156   :  { %2351 = vmatpush.bf16.msra.mxu1 %v12027_v28  ;;  %v16599_v28 = vld [vmem:[%s26318_s7 + $0x978] sm:$0x10] }
 0x157   :  { %2364 = vmatpush.bf16.msra.mxu2 %v12379_v25 }
 0x158   :  { %2326 = vmatpush.bf16.msra.mxu3 %v11279_v37  ;;  %v11898_v37 = vld [vmem:[%s26318_s7 + $0x530] sm:$0xf] }
 0x159   :  { %2339 = vmatpush.bf16.msra.mxu0 %v11631_v42 }
 0x15a   :  { %2352 = vmatpush.bf16.msra.mxu1 %v11983_v44  ;;  %v12250_v44 = vld [vmem:[%s26318_s7 + $0x7f0] sm:$0xf] }
 0x15b   :  { %2365 = vmatpush.bf16.msra.mxu2 %v12335_v40  ;;  %v16467_v40 = vld [vmem:[%s26318_s7 + $0x558] sm:$0xf0] }
 0x15c   :  { %2327 = vmatpush.bf16.msra.mxu3 %v11235_v51  ;;  %v11899_v46 = vor.u32 %v16467_v40, %v11898_v37  ;;  %v11502_v51 = vld [vmem:[%s26318_s7 + $0x218] sm:$0xf]  ;;  %v16511_v37 = vld [vmem:[%s26318_s7 + $0x6b8] sm:$0xf0]  ;;  %v16374_v40 = vld [vmem:[%s26318_s7 + $0x274] sm:$0xf] }
 0x15d   :  { %2340 = vmatpush.bf16.msra.mxu0 %v11587_v54 }
 0x15e   :  { %2353 = vmatpush.bf16.msra.mxu1 %v11939_v59  ;;  %v12382_v59 = vld [vmem:[%s26318_s7 + $0x8f8] sm:$0xf] }
 0x15f   :  { %2366 = vmatpush.bf16.msra.mxu2 %v12291_v55  ;;  %v11854_v55 = vld [vmem:[%s26318_s7 + $0x4d8] sm:$0xf] }
 0x1ba   :  { %v271_v7 = vpop.xlane.xlu1 %270 }
 0x1bb   :  { %v272_v43 = vmul.f32 %v271_v7, %v17882_v34  ;;  %v12427_v7 = vor.u32 %v16599_v28, %v12426_v27  ;;  %v11370_v28 = vld [vmem:[%s26318_s7 + $0x110] sm:$0xf] }
 0x1bc   :  { %v282_v47 = vpop.xlane.xlu2 %281 }
 0x1bd   :  { %v283_v52 = vmul.f32 %v282_v47, %v17882_v34  ;;  %v284_v53 = vmul.f32 %v272_v43, %v272_v43  ;;  %v286_v15 = vsub.f32 %v18018_v35, %v272_v43  ;;  %v287_v16 = vsub.f32 %v18021_v38, %v272_v43 }
 0x1be   :  { %v288_v17 = vsub.f32 %v18024_v39, %v272_v43  ;;  %v289_v18 = vsub.f32 %v18029_v41, %v272_v43  ;;  %v2242_v54 = vand.u32 %v12427_v7, %v17990_v4  ;;  %v11548_v7 = vld [vmem:[%s26318_s7 + $0x29c] sm:$0xf0] }
 0x1bf   :  { %v285_v56 = vsub.f32 %v283_v52, %v284_v53  ;;  %v16368_v52 = vld [vmem:[%s26318_s7 + $0x240] sm:$0xf0]  ;;  %v12251_v53 = vor.u32 %v16555_v10, %v12250_v44  ;;  %v12075_v44 = vor.u32 %v16511_v37, %v12074_v36  ;;  %v11551_v10 = vor.u32 %v16374_v40, %v11548_v7  ;;  %v11372_v36 = vld [vmem:[%s26318_s7 + $0x13c] sm:$0xf0]  ;;  %v16451_v40 = vld [vmem:[%s26318_s7 + $0x4dc] sm:$0xf] }
 0x1c0   :  { %v11856_v7 = vld [vmem:[%s26318_s7 + $0x504] sm:$0xf0] }
 0x1c1   :  { %v290_v60 = vadd.f32 1e-06, %v285_v56  ;;  %v16456_v56 = vld [vmem:[%s26318_s7 + $0x500] sm:$0xf0] }
 0x1c3   :  { %17619 = vrsqrt.f32 %v290_v60  ;;  %vm297_vm9 = vweird.f32 %v290_v60 }
 0x1c9   :  { %v17620_v61 = vpop.eup %17619 }
 0x1ca   :  { %v292_v62 = vmul.f32 %v17620_v61, %v290_v60  ;;  %vm298_vm8 = vweird.f32 %v17620_v61  ;;  %v16588_v60 = vld [vmem:[%s26318_s7 + $0x920] sm:$0xf0] }
 0x1cb   :  { %vm299_vm10 = vmor %vm297_vm9, %vm298_vm8  ;;  %v12383_v2 = vor.u32 %v16588_v60, %v12382_v59  ;;  %vm3519_vm8 = vcmask 711680   ;;  %vm3509_vm9 = vcmask 801792  }
 0x1cc   :  { %v293_v63 = vmul.f32 %v17620_v61, %v292_v62  ;;  %v11855_v62 = vor.u32 %v16456_v56, %v11854_v55 }
 0x1ce   :  { %v294_v1 = vmul.f32 0.5, %v293_v63  ;;  %v11458_v63 = vld [vmem:[%s26318_s7 + $0x1c0] sm:$0xf] }
 0x1d0   :  { %v295_v3 = vsub.f32 1.5, %v294_v1  ;;  %v12207_v1 = vor.u32 %v16544_v58, %v12206_v57  ;;  %v11282_v57 = vld [vmem:[%s26318_s7 + $0x60] sm:$0xf]  ;;  %v16313_v58 = vld [vmem:[%s26318_s7 + $0x88] sm:$0xf0] }
 0x1d2   :  { %v296_v14 = vmul.f32 %v17620_v61, %v295_v3  ;;  %v11810_v3 = vld [vmem:[%s26318_s7 + $0x480] sm:$0xf] }
 0x1d4   :  { %v300_v22 = vsel %vm299_vm10, %v17620_v61, %v296_v14  ;;  %v11503_v61 = vor.u32 %v16368_v52, %v11502_v51  ;;  %v11459_v14 = vor.u32 %v16357_v0, %v11458_v63  ;;  %v12030_v51 = vld [vmem:[%s26318_s7 + $0x638] sm:$0xf]  ;;  %v16500_v52 = vld [vmem:[%s26318_s7 + $0x660] sm:$0xf0]  ;;  %v11986_v63 = vld [vmem:[%s26318_s7 + $0x5e0] sm:$0xf] }
 0x1d5   :  { %v301_v23 = vmul.f32 %v300_v22, %v286_v15  ;;  %v302_v24 = vmul.f32 %v300_v22, %v287_v16  ;;  %v303_v25 = vmul.f32 %v300_v22, %v288_v17  ;;  %v304_v26 = vmul.f32 %v300_v22, %v289_v18  ;;  %v11414_v16 = vld [vmem:[%s26318_s7 + $0x168] sm:$0xf]  ;;  %v16346_v17 = vld [vmem:[%s26318_s7 + $0x190] sm:$0xf0]  ;;  %v16489_v0 = vld [vmem:[%s26318_s7 + $0x608] sm:$0xf0] }
 0x1d6   :  { %v12118_v22 = vld [vmem:[%s26318_s7 + $0x6e8] sm:$0xf]  ;;  %v12031_v59 = vor.u32 %v16500_v52, %v12030_v51  ;;  %vm3511_vm10 = vcmask 154624  }
 0x1d7   :  { %v314_v30 = vmul.f32 %v306_v5, %v301_v23  ;;  %v315_v31 = vmul.f32 %v307_v6, %v302_v24  ;;  %v316_v32 = vmul.f32 %v308_v11, %v303_v25  ;;  %v317_v33 = vmul.f32 %v309_v12, %v304_v26  ;;  %v16445_v5 = vld [vmem:[%s26318_s7 + $0x4a8] sm:$0xf0]  ;;  %v12162_v6 = vld [vmem:[%s26318_s7 + $0x740] sm:$0xf]  ;;  %v16522_v23 = vld [vmem:[%s26318_s7 + $0x710] sm:$0xf0] }
 0x1d8   :  { %v16533_v11 = vld [vmem:[%s26318_s7 + $0x768] sm:$0xf0]  ;;  %v12338_v12 = vld [vmem:[%s26318_s7 + $0x8a0] sm:$0xf]  ;;  %v11811_v15 = vor.u32 %v16445_v5, %v11810_v3  ;;  %v12294_v24 = vld [vmem:[%s26318_s7 + $0x848] sm:$0xf]  ;;  %v11415_v26 = vor.u32 %v16346_v17, %v11414_v16 }
 0x1d9   :  { %v327_v42 = vadd.f32 %v319_v13, %v314_v30  ;;  %v328_v8 = vadd.f32 %v320_v19, %v315_v31  ;;  %v329_v9 = vadd.f32 %v321_v20, %v316_v32  ;;  %v330_v43 = vadd.f32 %v322_v21, %v317_v33  ;;  %v16577_v13 = vld [vmem:[%s26318_s7 + $0x8c8] sm:$0xf0]  ;;  %v11766_v20 = vld [vmem:[%s26318_s7 + $0x428] sm:$0xf]  ;;  %v16434_v21 = vld [vmem:[%s26318_s7 + $0x450] sm:$0xf0] }
 0x1da   :  { %v12163_v18 = vor.u32 %v16533_v11, %v12162_v6  ;;  %v12339_v19 = vor.u32 %v16577_v13, %v12338_v12  ;;  %v16566_v25 = vld [vmem:[%s26318_s7 + $0x870] sm:$0xf0]  ;;  %v11767_v27 = vor.u32 %v16434_v21, %v11766_v20  ;;  %v12119_v30 = vor.u32 %v16522_v23, %v12118_v22  ;;  %v11722_v32 = vld [vmem:[%s26318_s7 + $0x3d0] sm:$0xf]  ;;  %v16423_v33 = vld [vmem:[%s26318_s7 + $0x3f8] sm:$0xf0] }
 0x1db   :  { %v18320_v47 = vpack.c.bf16 %v327_v42, %v327_v42  ;;  %v18322_v48 = vpack.c.bf16 %v328_v8, %v328_v8  ;;  %v18324_v49 = vpack.c.bf16 %v329_v9, %v329_v9  ;;  %v18326_v50 = vpack.c.bf16 %v330_v43, %v330_v43  ;;  %v11326_v9 = vld [vmem:[%s26318_s7 + $0xb8] sm:$0xf]  ;;  %v16324_v43 = vld [vmem:[%s26318_s7 + $0xe0] sm:$0xf0]  ;;  %v11238_v3 = vld [vmem:[%s26318_s7 + $0x8] sm:$0xf] }
 0x1dc   :  { %v12295_v31 = vor.u32 %v16566_v25, %v12294_v24  ;;  %v11371_v42 = vor.u32 %v16335_v29, %v11370_v28  ;;  %v11723_v8 = vor.u32 %v16423_v33, %v11722_v32  ;;  %v11327_v55 = vor.u32 %v16324_v43, %v11326_v9  ;;  %v16302_v5 = vld [vmem:[%s26318_s7 + $0x30] sm:$0xf0]  ;;  %v11590_v12 = vld [vmem:[%s26318_s7 + $0x2c8] sm:$0xf]  ;;  %v16341_v20 = vld [vmem:[%s26318_s7 + $0x16c] sm:$0xf] }
 0x1dd   :  { %2276 = vmatmul.bf16.vlgmr.msrb.gmra.mxu0 %v18320_v47  ;;  %2289 = vmatmul.bf16.vlgmr.msrb.gmra.mxu1 %v18322_v48  ;;  %v11283_v6 = vor.u32 %v16313_v58, %v11282_v57  ;;  %v16594_v13 = vld [vmem:[%s26318_s7 + $0x954] sm:$0xf]  ;;  %v11416_v21 = vld [vmem:[%s26318_s7 + $0x194] sm:$0xf0]  ;;  %v11900_v23 = vld [vmem:[%s26318_s7 + $0x55c] sm:$0xf0] }
 0x1de   :  { %2302 = vmatmul.bf16.vlgmr.msrb.gmra.mxu2 %v18324_v49  ;;  %12460 = vmatmul.msk.bf16.vlgmr.msrb.gmra.mxu3 %vm157_vm1, %v18326_v50  ;;  %v16390_v17 = vld [vmem:[%s26318_s7 + $0x2f0] sm:$0xf0]  ;;  %v12252_v25 = vld [vmem:[%s26318_s7 + $0x81c] sm:$0xf0]  ;;  %v16583_v9 = vld [vmem:[%s26318_s7 + $0x8fc] sm:$0xf] }
 0x1df   :  { %2372 = vmatpush.bf16.msrb.mxu2 %v11547_v45  ;;  %2385 = vmatpush.bf16.msrb.mxu3 %v11899_v46  ;;  %v11678_v45 = vld [vmem:[%s26318_s7 + $0x378] sm:$0xf]  ;;  %v16412_v46 = vld [vmem:[%s26318_s7 + $0x3a0] sm:$0xf0]  ;;  %v16462_v22 = vld [vmem:[%s26318_s7 + $0x534] sm:$0xf]  ;;  %v11591_v28 = vor.u32 %v16390_v17, %v11590_v12 }
 0x1e0   :  { %2398 = vmatpush.bf16.msrb.mxu0 %v12251_v53  ;;  %2415 = vmatpush.bf16.msrb.mxu1 %v2242_v54  ;;  %v16363_v53 = vld [vmem:[%s26318_s7 + $0x21c] sm:$0xf]  ;;  %v11504_v54 = vld [vmem:[%s26318_s7 + $0x244] sm:$0xf0]  ;;  %v11679_v56 = vor.u32 %v16412_v46, %v11678_v45  ;;  %v16550_v24 = vld [vmem:[%s26318_s7 + $0x7f4] sm:$0xf] }
 0x1e1   :  { %v11507_v60 = vor.u32 %v16363_v53, %v11504_v54  ;;  %v12255_v32 = vor.u32 %v16550_v24, %v12252_v25  ;;  %v16330_v33 = vld [vmem:[%s26318_s7 + $0x114] sm:$0xf]  ;;  %v12384_v43 = vld [vmem:[%s26318_s7 + $0x924] sm:$0xf0]  ;;  %v16319_v45 = vld [vmem:[%s26318_s7 + $0xbc] sm:$0xf] }
 0x1e2   :  { %v11328_v46 = vld [vmem:[%s26318_s7 + $0xe4] sm:$0xf0]  ;;  %v12387_v52 = vor.u32 %v16583_v9, %v12384_v43  ;;  %v16440_v53 = vld [vmem:[%s26318_s7 + $0x484] sm:$0xf]  ;;  %v11812_v54 = vld [vmem:[%s26318_s7 + $0x4ac] sm:$0xf0] }
 0x1e3   :  { %2373 = vmatpush.bf16.msrb.mxu2 %v11503_v61  ;;  %2386 = vmatpush.bf16.msrb.mxu3 %v11855_v62  ;;  %v11634_v61 = vld [vmem:[%s26318_s7 + $0x320] sm:$0xf]  ;;  %v16401_v62 = vld [vmem:[%s26318_s7 + $0x348] sm:$0xf0]  ;;  %v16572_v57 = vld [vmem:[%s26318_s7 + $0x8a4] sm:$0xf] }
 0x1e4   :  { %2399 = vmatpush.bf16.msrb.mxu0 %v12207_v1  ;;  %2416 = vmatpush.bf16.msrb.mxu1 %v12383_v2  ;;  %v16352_v1 = vld [vmem:[%s26318_s7 + $0x1c4] sm:$0xf]  ;;  %v11460_v2 = vld [vmem:[%s26318_s7 + $0x1ec] sm:$0xf0]  ;;  %v11635_v11 = vor.u32 %v16401_v62, %v11634_v61  ;;  %v11554_v12 = vld [vmem:[%s26318_s7 + $0x278] sm:$0xf] }
 0x1e5   :  { %v11463_v16 = vor.u32 %v16352_v1, %v11460_v2  ;;  %v12340_v58 = vld [vmem:[%s26318_s7 + $0x8cc] sm:$0xf0]  ;;  %v16308_v61 = vld [vmem:[%s26318_s7 + $0x64] sm:$0xf]  ;;  %v16429_v1 = vld [vmem:[%s26318_s7 + $0x42c] sm:$0xf] }
 0x1e6   :  { %v11284_v62 = vld [vmem:[%s26318_s7 + $0x8c] sm:$0xf0]  ;;  %v11768_v2 = vld [vmem:[%s26318_s7 + $0x454] sm:$0xf0]  ;;  %v12076_v24 = vld [vmem:[%s26318_s7 + $0x6bc] sm:$0xf0] }
 0x1e7   :  { %2374 = vmatpush.bf16.msrb.mxu2 %v11459_v14  ;;  %2387 = vmatpush.bf16.msrb.mxu3 %v11811_v15  ;;  %v12428_v14 = vld [vmem:[%s26318_s7 + $0x97c] sm:$0x10]  ;;  %v11987_v15 = vor.u32 %v16489_v0, %v11986_v63  ;;  %v12343_v0 = vor.u32 %v16572_v57, %v12340_v58  ;;  %v11240_v17 = vld [vmem:[%s26318_s7 + $0x34] sm:$0xf0]  ;;  %v11466_v9 = vld [vmem:[%s26318_s7 + $0x1c8] sm:$0xf] }
 0x1e8   :  { %2400 = vmatpush.bf16.msrb.mxu0 %v12163_v18  ;;  %2417 = vmatpush.bf16.msrb.mxu1 %v12339_v19  ;;  %v11942_v18 = vld [vmem:[%s26318_s7 + $0x588] sm:$0xf]  ;;  %v16478_v19 = vld [vmem:[%s26318_s7 + $0x5b0] sm:$0xf0]  ;;  %v11906_v25 = vld [vmem:[%s26318_s7 + $0x538] sm:$0xf] }
 0x1e9   :  { %v11943_v29 = vor.u32 %v16478_v19, %v11942_v18  ;;  %v16358_v43 = vld [vmem:[%s26318_s7 + $0x1f0] sm:$0xf0]  ;;  %v11422_v57 = vld [vmem:[%s26318_s7 + $0x170] sm:$0xf]  ;;  %v16347_v58 = vld [vmem:[%s26318_s7 + $0x198] sm:$0xf0] }
 0x1eb   :  { %2375 = vmatpush.bf16.msrb.mxu2 %v11415_v26  ;;  %2388 = vmatpush.bf16.msrb.mxu3 %v11767_v27  ;;  %v12431_v26 = vor.u32 %v16594_v13, %v12428_v14  ;;  %v11239_v27 = vor.u32 %v16302_v5, %v11238_v3  ;;  %v16517_v3 = vld [vmem:[%s26318_s7 + $0x6ec] sm:$0xf]  ;;  %v12120_v5 = vld [vmem:[%s26318_s7 + $0x714] sm:$0xf0]  ;;  %v16380_v13 = vld [vmem:[%s26318_s7 + $0x2a0] sm:$0xf0]  ;;  %v11287_v14 = vor.u32 %v16308_v61, %v11284_v62 }
 0x1ec   :  { %2401 = vmatpush.bf16.msrb.mxu0 %v12119_v30  ;;  %2418 = vmatpush.bf16.msrb.mxu1 %v12295_v31  ;;  %v11419_v30 = vor.u32 %v16341_v20, %v11416_v21  ;;  %v11903_v31 = vor.u32 %v16462_v22, %v11900_v23  ;;  %v12123_v18 = vor.u32 %v16517_v3, %v12120_v5  ;;  %v16418_v20 = vld [vmem:[%s26318_s7 + $0x3d4] sm:$0xf]  ;;  %v11724_v21 = vld [vmem:[%s26318_s7 + $0x3fc] sm:$0xf0]  ;;  %v12434_v61 = vld [vmem:[%s26318_s7 + $0x958] sm:$0xf] }
 0x1ed   :  { %2341 = vmatmul.bf16.vlgmr.msra.gmra.mxu0 %v18322_v48  ;;  %2354 = vmatmul.bf16.vlgmr.msra.gmra.mxu1 %v18324_v49  ;;  %v2245_v37 = vand.u32 %v12431_v26, %v17990_v4  ;;  %v16506_v22 = vld [vmem:[%s26318_s7 + $0x694] sm:$0xf]  ;;  %v11555_v23 = vor.u32 %v16380_v13, %v11554_v12  ;;  %v16468_v26 = vld [vmem:[%s26318_s7 + $0x560] sm:$0xf0]  ;;  %v11944_v3 = vld [vmem:[%s26318_s7 + $0x5b4] sm:$0xf0]  ;;  %v11423_v5 = vor.u32 %v16347_v58, %v11422_v57 }
 0x1ee   :  { %2328 = vmatmul.bf16.vlgmr.msra.gmra.mxu3 %v18320_v47  ;;  %12461 = vmatmul.msk.bf16.vlgmr.msra.gmra.mxu2 %vm157_vm1, %v18326_v50  ;;  %v16600_v62 = vld [vmem:[%s26318_s7 + $0x980] sm:$0x10]  ;;  %v11378_v12 = vld [vmem:[%s26318_s7 + $0x118] sm:$0xf]  ;;  %v16523_v57 = vld [vmem:[%s26318_s7 + $0x718] sm:$0xf0] }
 0x1ef   :  { %2376 = vmatpush.bf16.msrb.mxu2 %v11371_v42  ;;  %2389 = vmatpush.bf16.msrb.mxu3 %v11723_v8  ;;  %v16539_v42 = vld [vmem:[%s26318_s7 + $0x79c] sm:$0xf]  ;;  %v12208_v8 = vld [vmem:[%s26318_s7 + $0x7c4] sm:$0xf0]  ;;  %v16336_v13 = vld [vmem:[%s26318_s7 + $0x140] sm:$0xf0] }
 0x1f0   :  { %2402 = vmatpush.bf16.msrb.mxu0 %v12075_v44  ;;  %2424 = vmatpush.bf16.msra.mxu1 %v11551_v10  ;;  %v11375_v44 = vor.u32 %v16330_v33, %v11372_v36  ;;  %v11859_v10 = vor.u32 %v16451_v40, %v11856_v7  ;;  %v12211_v51 = vor.u32 %v16539_v42, %v12208_v8  ;;  %v16407_v33 = vld [vmem:[%s26318_s7 + $0x37c] sm:$0xf]  ;;  %v11680_v36 = vld [vmem:[%s26318_s7 + $0x3a4] sm:$0xf0]  ;;  %v11862_v42 = vld [vmem:[%s26318_s7 + $0x4e0] sm:$0xf] }
 0x1f1   :  { %v12032_v7 = vld [vmem:[%s26318_s7 + $0x664] sm:$0xf0]  ;;  %v16457_v8 = vld [vmem:[%s26318_s7 + $0x508] sm:$0xf0]  ;;  %v12302_v58 = vld [vmem:[%s26318_s7 + $0x850] sm:$0xf] }
 0x1f3   :  { %2377 = vmatpush.bf16.msrb.mxu2 %v11327_v55  ;;  %2390 = vmatpush.bf16.msrb.mxu3 %v11679_v56  ;;  %v16528_v55 = vld [vmem:[%s26318_s7 + $0x744] sm:$0xf]  ;;  %v12164_v56 = vld [vmem:[%s26318_s7 + $0x76c] sm:$0xf0] }
 0x1f4   :  { %2403 = vmatpush.bf16.msrb.mxu0 %v12031_v59  ;;  %2425 = vmatpush.bf16.msra.mxu1 %v11507_v60  ;;  %v11331_v59 = vor.u32 %v16319_v45, %v11328_v46  ;;  %v11815_v60 = vor.u32 %v16440_v53, %v11812_v54  ;;  %v12167_v63 = vor.u32 %v16528_v55, %v12164_v56  ;;  %v16396_v46 = vld [vmem:[%s26318_s7 + $0x324] sm:$0xf]  ;;  %v11988_v54 = vld [vmem:[%s26318_s7 + $0x60c] sm:$0xf0]  ;;  %v11818_v55 = vld [vmem:[%s26318_s7 + $0x488] sm:$0xf] }
 0x1f5   :  { %v11863_v45 = vor.u32 %v16457_v8, %v11862_v42  ;;  %v11467_v53 = vor.u32 %v16358_v43, %v11466_v9  ;;  %v16446_v56 = vld [vmem:[%s26318_s7 + $0x4b0] sm:$0xf0]  ;;  %v12170_v8 = vld [vmem:[%s26318_s7 + $0x748] sm:$0xf] }
 0x1f6   :  { %v16314_v42 = vld [vmem:[%s26318_s7 + $0x90] sm:$0xf0]  ;;  %v12346_v43 = vld [vmem:[%s26318_s7 + $0x8a8] sm:$0xf] }
 0x1f7   :  { %2378 = vmatpush.bf16.msrb.mxu2 %v11283_v6  ;;  %2391 = vmatpush.bf16.msrb.mxu3 %v11635_v11  ;;  %v16561_v6 = vld [vmem:[%s26318_s7 + $0x84c] sm:$0xf]  ;;  %v12296_v11 = vld [vmem:[%s26318_s7 + $0x874] sm:$0xf0]  ;;  %v16534_v9 = vld [vmem:[%s26318_s7 + $0x770] sm:$0xf0] }
 0x1f8   :  { %2404 = vmatpush.bf16.msrb.mxu0 %v11987_v15  ;;  %2426 = vmatpush.bf16.msra.mxu1 %v11463_v16  ;;  %v11771_v15 = vor.u32 %v16429_v1, %v11768_v2  ;;  %v16297_v16 = vld [vmem:[%s26318_s7 + $0xc] sm:$0xf]  ;;  %v12299_v19 = vor.u32 %v16561_v6, %v12296_v11  ;;  %v11592_v1 = vld [vmem:[%s26318_s7 + $0x2f4] sm:$0xf0]  ;;  %v11774_v6 = vld [vmem:[%s26318_s7 + $0x430] sm:$0xf] }
 0x1f9   :  { %v16473_v2 = vld [vmem:[%s26318_s7 + $0x58c] sm:$0xf]  ;;  %v16435_v11 = vld [vmem:[%s26318_s7 + $0x458] sm:$0xf0] }
 0x1fb   :  { %2379 = vmatpush.bf16.msrb.mxu2 %v11239_v27  ;;  %2392 = vmatpush.bf16.msrb.mxu3 %v11591_v28  ;;  %v11510_v27 = vld [vmem:[%s26318_s7 + $0x220] sm:$0xf]  ;;  %v16369_v28 = vld [vmem:[%s26318_s7 + $0x248] sm:$0xf0] }
 0x1fc   :  { %2405 = vmatpush.bf16.msrb.mxu0 %v11943_v29  ;;  %2427 = vmatpush.bf16.msra.mxu1 %v11419_v30  ;;  %v11243_v29 = vor.u32 %v16297_v16, %v11240_v17  ;;  %v11727_v30 = vor.u32 %v16418_v20, %v11724_v21  ;;  %v11511_v40 = vor.u32 %v16369_v28, %v11510_v27  ;;  %v12214_v27 = vld [vmem:[%s26318_s7 + $0x7a0] sm:$0xf]  ;;  %v16545_v28 = vld [vmem:[%s26318_s7 + $0x7c8] sm:$0xf0] }
 0x1fd   :  { %12462 = vmatmul.msk.bf16.vlgmr.msrb.gmra.mxu1 %vm157_vm1, %v18326_v50  ;;  %v12435_v16 = vor.u32 %v16600_v62, %v12434_v61  ;;  %v11379_v20 = vor.u32 %v16336_v13, %v11378_v12  ;;  %v11908_v61 = vld [vmem:[%s26318_s7 + $0x564] sm:$0xf0]  ;;  %v16512_v13 = vld [vmem:[%s26318_s7 + $0x6c0] sm:$0xf0] }
 0x1fe   :  { %2380 = vmatmul.bf16.vlgmr.msrb.gmra.mxu2 %v18320_v47  ;;  %2393 = vmatmul.bf16.vlgmr.msrb.gmra.mxu3 %v18322_v48 }
 0x1ff   :  { %2437 = vmatpush.bf16.msra.mxu2 %v11903_v31  ;;  %2450 = vmatpush.bf16.msra.mxu3 %v12255_v32  ;;  %v12079_v31 = vor.u32 %v16506_v22, %v12076_v24  ;;  %v11907_v32 = vor.u32 %v16468_v26, %v11906_v25  ;;  %v11730_v22 = vld [vmem:[%s26318_s7 + $0x3d8] sm:$0xf]  ;;  %v11334_v24 = vld [vmem:[%s26318_s7 + $0xc0] sm:$0xf]  ;;  %v2248_v25 = vand.u32 %v12435_v16, %v17990_v4  ;;  %v16325_v26 = vld [vmem:[%s26318_s7 + $0xe8] sm:$0xf0] }
 0x200   :  { %2467 = vmatpush.bf16.msra.mxu0 %v2245_v37  ;;  %2428 = vmatpush.bf16.msra.mxu1 %v11375_v44  ;;  %v16495_v37 = vld [vmem:[%s26318_s7 + $0x63c] sm:$0xf]  ;;  %v11683_v44 = vor.u32 %v16407_v33, %v11680_v36  ;;  %v12215_v33 = vor.u32 %v16545_v28, %v12214_v27  ;;  %v11686_v36 = vld [vmem:[%s26318_s7 + $0x380] sm:$0xf]  ;;  %v16540_v27 = vld [vmem:[%s26318_s7 + $0x7a4] sm:$0xf] }
 0x201   :  { %2406 = vmatmul.bf16.vlgmr.msrb.gmra.mxu0 %v18324_v49  ;;  %v12216_v28 = vld [vmem:[%s26318_s7 + $0x7cc] sm:$0xf0] }
 0x203   :  { %2438 = vmatpush.bf16.msra.mxu2 %v11859_v10  ;;  %2451 = vmatpush.bf16.msra.mxu3 %v12211_v51  ;;  %v12035_v10 = vor.u32 %v16495_v37, %v12032_v7  ;;  %v11636_v51 = vld [vmem:[%s26318_s7 + $0x34c] sm:$0xf0]  ;;  %v16413_v37 = vld [vmem:[%s26318_s7 + $0x3a8] sm:$0xf0] }
 0x204   :  { %2468 = vmatpush.bf16.msra.mxu0 %v12387_v52  ;;  %2429 = vmatpush.bf16.msra.mxu1 %v11331_v59  ;;  %v16484_v52 = vld [vmem:[%s26318_s7 + $0x5e4] sm:$0xf]  ;;  %v11639_v59 = vor.u32 %v16396_v46, %v11636_v51  ;;  %v12171_v51 = vor.u32 %v16534_v9, %v12170_v8  ;;  %v16529_v8 = vld [vmem:[%s26318_s7 + $0x74c] sm:$0xf]  ;;  %v12172_v9 = vld [vmem:[%s26318_s7 + $0x774] sm:$0xf0] }
 0x207   :  { %2439 = vmatpush.bf16.msra.mxu2 %v11815_v60  ;;  %2452 = vmatpush.bf16.msra.mxu3 %v12167_v63  ;;  %v16385_v60 = vld [vmem:[%s26318_s7 + $0x2cc] sm:$0xf]  ;;  %v11991_v63 = vor.u32 %v16484_v52, %v11988_v54  ;;  %v16402_v52 = vld [vmem:[%s26318_s7 + $0x350] sm:$0xf0]  ;;  %v16303_v54 = vld [vmem:[%s26318_s7 + $0x38] sm:$0xf0] }
 0x208   :  { %2469 = vmatpush.bf16.msra.mxu0 %v12343_v0  ;;  %2430 = vmatpush.bf16.msra.mxu1 %v11287_v14  ;;  %v11819_v0 = vor.u32 %v16446_v56, %v11818_v55  ;;  %v12258_v14 = vld [vmem:[%s26318_s7 + $0x7f8] sm:$0xf]  ;;  %v11595_v17 = vor.u32 %v16385_v60, %v11592_v1  ;;  %v12126_v56 = vld [vmem:[%s26318_s7 + $0x6f0] sm:$0xf]  ;;  %v16463_v60 = vld [vmem:[%s26318_s7 + $0x53c] sm:$0xf] }
 0x209   :  { %v11911_v12 = vor.u32 %v16463_v60, %v11908_v61 }
 0x20b   :  { %2440 = vmatpush.bf16.msra.mxu2 %v11771_v15  ;;  %2453 = vmatpush.bf16.msra.mxu3 %v12123_v18  ;;  %v16556_v15 = vld [vmem:[%s26318_s7 + $0x820] sm:$0xf0]  ;;  %v11947_v18 = vor.u32 %v16473_v2, %v11944_v3  ;;  %v12127_v2 = vor.u32 %v16523_v57, %v12126_v56  ;;  %v11598_v3 = vld [vmem:[%s26318_s7 + $0x2d0] sm:$0xf]  ;;  %v16479_v57 = vld [vmem:[%s26318_s7 + $0x5b8] sm:$0xf0] }
 0x20c   :  { %2470 = vmatpush.bf16.msra.mxu0 %v12299_v19  ;;  %2431 = vmatpush.bf16.msra.mxu1 %v11243_v29  ;;  %v11775_v19 = vor.u32 %v16435_v11, %v11774_v6  ;;  %v12259_v21 = vor.u32 %v16556_v15, %v12258_v14  ;;  %v12390_v29 = vld [vmem:[%s26318_s7 + $0x900] sm:$0xf]  ;;  %v12082_v6 = vld [vmem:[%s26318_s7 + $0x698] sm:$0xf]  ;;  %v16551_v14 = vld [vmem:[%s26318_s7 + $0x7fc] sm:$0xf] }
 0x20d   :  { %v12260_v15 = vld [vmem:[%s26318_s7 + $0x824] sm:$0xf0] }
 0x20f   :  { %2441 = vmatpush.bf16.msra.mxu2 %v11727_v30  ;;  %2454 = vmatpush.bf16.msra.mxu3 %v12079_v31  ;;  %v16589_v30 = vld [vmem:[%s26318_s7 + $0x928] sm:$0xf0] }
 0x210   :  { %2476 = vmatpush.bf16.msrb.mxu0 %v11555_v23  ;;  %2489 = vmatpush.bf16.msrb.mxu1 %v11907_v32  ;;  %v16424_v23 = vld [vmem:[%s26318_s7 + $0x400] sm:$0xf0]  ;;  %v11335_v32 = vor.u32 %v16325_v26, %v11334_v24  ;;  %v12391_v7 = vor.u32 %v16589_v30, %v12390_v29  ;;  %v12038_v24 = vld [vmem:[%s26318_s7 + $0x640] sm:$0xf]  ;;  %v16501_v26 = vld [vmem:[%s26318_s7 + $0x668] sm:$0xf0] }
 0x211   :  { %2432 = vmatmul.bf16.vlgmr.msra.gmra.mxu1 %v18320_v47  ;;  %12463 = vmatmul.msk.bf16.vlgmr.msra.gmra.mxu0 %vm157_vm1, %v18326_v50  ;;  %v11731_v31 = vor.u32 %v16424_v23, %v11730_v22  ;;  %v12083_v22 = vor.u32 %v16512_v13, %v12082_v6  ;;  %v12263_v23 = vor.u32 %v16551_v14, %v12260_v15  ;;  %v16441_v30 = vld [vmem:[%s26318_s7 + $0x48c] sm:$0xf]  ;;  %v16408_v13 = vld [vmem:[%s26318_s7 + $0x384] sm:$0xf]  ;;  %v11688_v15 = vld [vmem:[%s26318_s7 + $0x3ac] sm:$0xf0] }
 0x213   :  { %2442 = vmatpush.bf16.msra.mxu2 %v11683_v44  ;;  %2455 = vmatpush.bf16.msra.mxu3 %v12035_v10  ;;  %v16578_v44 = vld [vmem:[%s26318_s7 + $0x8d0] sm:$0xf0]  ;;  %v11687_v10 = vor.u32 %v16413_v37, %v11686_v36  ;;  %v12039_v36 = vor.u32 %v16501_v26, %v12038_v24  ;;  %v12219_v37 = vor.u32 %v16540_v27, %v12216_v28  ;;  %v12040_v24 = vld [vmem:[%s26318_s7 + $0x66c] sm:$0xf0]  ;;  %v11644_v27 = vld [vmem:[%s26318_s7 + $0x354] sm:$0xf0] }
 0x214   :  { %2477 = vmatpush.bf16.msrb.mxu0 %v11511_v40  ;;  %2490 = vmatpush.bf16.msrb.mxu1 %v11863_v45  ;;  %v11290_v40 = vld [vmem:[%s26318_s7 + $0x68] sm:$0xf]  ;;  %v12347_v55 = vor.u32 %v16578_v44, %v12346_v43  ;;  %v16430_v43 = vld [vmem:[%s26318_s7 + $0x434] sm:$0xf]  ;;  %v16573_v28 = vld [vmem:[%s26318_s7 + $0x8ac] sm:$0xf] }
 0x215   :  { %v11642_v45 = vld [vmem:[%s26318_s7 + $0x328] sm:$0xf]  ;;  %v11291_v46 = vor.u32 %v16314_v42, %v11290_v40 }
 0x216   :  { %v11643_v62 = vor.u32 %v16402_v52, %v11642_v45  ;;  %v11994_v40 = vld [vmem:[%s26318_s7 + $0x5e8] sm:$0xf]  ;;  %v16595_v45 = vld [vmem:[%s26318_s7 + $0x95c] sm:$0xf]  ;;  %v11424_v52 = vld [vmem:[%s26318_s7 + $0x19c] sm:$0xf0] }
 0x217   :  { %2443 = vmatpush.bf16.msra.mxu2 %v11639_v59  ;;  %2456 = vmatpush.bf16.msra.mxu3 %v11991_v63  ;;  %v16567_v59 = vld [vmem:[%s26318_s7 + $0x878] sm:$0xf0] }
 0x218   :  { %2478 = vmatpush.bf16.msrb.mxu0 %v11467_v53  ;;  %2491 = vmatpush.bf16.msrb.mxu1 %v11819_v0  ;;  %v11246_v53 = vld [vmem:[%s26318_s7 + $0x10] sm:$0xf]  ;;  %v16375_v63 = vld [vmem:[%s26318_s7 + $0x27c] sm:$0xf]  ;;  %v11556_v0 = vld [vmem:[%s26318_s7 + $0x2a4] sm:$0xf0]  ;;  %v12303_v11 = vor.u32 %v16567_v59, %v12302_v58 }
 0x219   :  { %v11247_v1 = vor.u32 %v16303_v54, %v11246_v53  ;;  %v11559_v16 = vor.u32 %v16375_v63, %v11556_v0  ;;  %v12175_v54 = vor.u32 %v16529_v8, %v12172_v9  ;;  %v16518_v58 = vld [vmem:[%s26318_s7 + $0x6f4] sm:$0xf]  ;;  %v12128_v59 = vld [vmem:[%s26318_s7 + $0x71c] sm:$0xf0]  ;;  %v11732_v63 = vld [vmem:[%s26318_s7 + $0x404] sm:$0xf0] }
 0x21a   :  { %v16331_v0 = vld [vmem:[%s26318_s7 + $0x11c] sm:$0xf]  ;;  %v16386_v8 = vld [vmem:[%s26318_s7 + $0x2d4] sm:$0xf]  ;;  %v11600_v9 = vld [vmem:[%s26318_s7 + $0x2fc] sm:$0xf0] }
 0x21b   :  { %2444 = vmatpush.bf16.msra.mxu2 %v11595_v17  ;;  %2457 = vmatpush.bf16.msra.mxu3 %v11947_v18  ;;  %v16452_v17 = vld [vmem:[%s26318_s7 + $0x4e4] sm:$0xf]  ;;  %v11864_v18 = vld [vmem:[%s26318_s7 + $0x50c] sm:$0xf0] }
 0x21c   :  { %2479 = vmatpush.bf16.msrb.mxu0 %v11423_v5  ;;  %2492 = vmatpush.bf16.msrb.mxu1 %v11775_v19  ;;  %v16391_v5 = vld [vmem:[%s26318_s7 + $0x2f8] sm:$0xf0] }
 0x21d   :  { %v11599_v19 = vor.u32 %v16391_v5, %v11598_v3  ;;  %v12131_v3 = vor.u32 %v16518_v58, %v12128_v59  ;;  %v11603_v58 = vor.u32 %v16386_v8, %v11600_v9  ;;  %v12310_v9 = vld [vmem:[%s26318_s7 + $0x858] sm:$0xf] }
 0x21e   :  { %2445 = vmatmul.bf16.vlgmr.msra.gmra.mxu2 %v18322_v48  ;;  %2458 = vmatmul.bf16.vlgmr.msra.gmra.mxu3 %v18324_v49 }
 0x21f   :  { %2502 = vmatpush.bf16.msrb.mxu2 %v12259_v21  ;;  %2519 = vmatpush.bf16.msrb.mxu3 %v2248_v25  ;;  %v11512_v21 = vld [vmem:[%s26318_s7 + $0x24c] sm:$0xf0]  ;;  %v11867_v25 = vor.u32 %v16452_v17, %v11864_v18  ;;  %v16320_v18 = vld [vmem:[%s26318_s7 + $0xc4] sm:$0xf] }
 0x220   :  { %2480 = vmatpush.bf16.msrb.mxu0 %v11379_v20  ;;  %2493 = vmatpush.bf16.msrb.mxu1 %v11731_v31  ;;  %v16364_v20 = vld [vmem:[%s26318_s7 + $0x224] sm:$0xf]  ;;  %v11820_v31 = vld [vmem:[%s26318_s7 + $0x4b4] sm:$0xf0]  ;;  %v12392_v17 = vld [vmem:[%s26318_s7 + $0x92c] sm:$0xf0] }
 0x221   :  { %v11515_v29 = vor.u32 %v16364_v20, %v11512_v21  ;;  %v11823_v42 = vor.u32 %v16441_v30, %v11820_v31  ;;  %v11691_v21 = vor.u32 %v16408_v13, %v11688_v15  ;;  %v16309_v30 = vld [vmem:[%s26318_s7 + $0x6c] sm:$0xf]  ;;  %v11292_v31 = vld [vmem:[%s26318_s7 + $0x94] sm:$0xf0]  ;;  %v12222_v13 = vld [vmem:[%s26318_s7 + $0x7a8] sm:$0xf] }
 0x223   :  { %2503 = vmatpush.bf16.msrb.mxu2 %v12215_v33  ;;  %2520 = vmatpush.bf16.msrb.mxu3 %v12391_v7  ;;  %v11468_v33 = vld [vmem:[%s26318_s7 + $0x1f4] sm:$0xf0]  ;;  %v16490_v7 = vld [vmem:[%s26318_s7 + $0x610] sm:$0xf0] }
 0x224   :  { %2481 = vmatpush.bf16.msrb.mxu0 %v11335_v32  ;;  %2494 = vmatpush.bf16.msrb.mxu1 %v11687_v10  ;;  %v16353_v32 = vld [vmem:[%s26318_s7 + $0x1cc] sm:$0xf]  ;;  %v11776_v10 = vld [vmem:[%s26318_s7 + $0x45c] sm:$0xf0]  ;;  %v11995_v53 = vor.u32 %v16490_v7, %v11994_v40  ;;  %v16298_v7 = vld [vmem:[%s26318_s7 + $0x14] sm:$0xf] }
 0x225   :  { %v11471_v44 = vor.u32 %v16353_v32, %v11468_v33  ;;  %v11779_v56 = vor.u32 %v16430_v43, %v11776_v10  ;;  %v16485_v33 = vld [vmem:[%s26318_s7 + $0x5ec] sm:$0xf]  ;;  %v16562_v43 = vld [vmem:[%s26318_s7 + $0x854] sm:$0xf]  ;;  %v12304_v10 = vld [vmem:[%s26318_s7 + $0x87c] sm:$0xf0] }
 0x226   :  { %v12307_v59 = vor.u32 %v16562_v43, %v12304_v10  ;;  %v11386_v10 = vld [vmem:[%s26318_s7 + $0x120] sm:$0xf] }
 0x227   :  { %2504 = vmatpush.bf16.msrb.mxu2 %v12171_v51  ;;  %2521 = vmatpush.bf16.msrb.mxu3 %v12347_v55  ;;  %v16342_v51 = vld [vmem:[%s26318_s7 + $0x174] sm:$0xf]  ;;  %v11950_v55 = vld [vmem:[%s26318_s7 + $0x590] sm:$0xf] }
 0x228   :  { %2482 = vmatpush.bf16.msrb.mxu0 %v11291_v46  ;;  %2495 = vmatpush.bf16.msrb.mxu1 %v11643_v62  ;;  %v12436_v46 = vld [vmem:[%s26318_s7 + $0x984] sm:$0x10]  ;;  %v11427_v61 = vor.u32 %v16342_v51, %v11424_v52  ;;  %v16419_v62 = vld [vmem:[%s26318_s7 + $0x3dc] sm:$0xf]  ;;  %v11562_v51 = vld [vmem:[%s26318_s7 + $0x280] sm:$0xf] }
 0x229   :  { %v12439_v60 = vor.u32 %v16595_v45, %v12436_v46  ;;  %v11735_v5 = vor.u32 %v16419_v62, %v11732_v63  ;;  %v12442_v45 = vld [vmem:[%s26318_s7 + $0x960] sm:$0xf]  ;;  %v16601_v46 = vld [vmem:[%s26318_s7 + $0x988] sm:$0x10] }
 0x22a   :  { %v16381_v52 = vld [vmem:[%s26318_s7 + $0x2a8] sm:$0xf0]  ;;  %v12443_v62 = vor.u32 %v16601_v46, %v12442_v45 }
 0x22b   :  { %2505 = vmatpush.bf16.msrb.mxu2 %v12127_v2  ;;  %2522 = vmatpush.bf16.msrb.mxu3 %v12303_v11  ;;  %v11951_v2 = vor.u32 %v16479_v57, %v11950_v55  ;;  %v2251_v6 = vand.u32 %v12439_v60, %v17990_v4  ;;  %v16507_v11 = vld [vmem:[%s26318_s7 + $0x69c] sm:$0xf]  ;;  %v16469_v55 = vld [vmem:[%s26318_s7 + $0x568] sm:$0xf0]  ;;  %v16474_v60 = vld [vmem:[%s26318_s7 + $0x594] sm:$0xf] }
 0x22c   :  { %2483 = vmatpush.bf16.msrb.mxu0 %v11247_v1  ;;  %2496 = vmatpush.bf16.msrb.mxu1 %v11599_v19  ;;  %v11380_v1 = vld [vmem:[%s26318_s7 + $0x144] sm:$0xf0]  ;;  %v11336_v19 = vld [vmem:[%s26318_s7 + $0xec] sm:$0xf0]  ;;  %v16557_v57 = vld [vmem:[%s26318_s7 + $0x828] sm:$0xf0]  ;;  %v2254_v15 = vand.u32 %v12443_v62, %v17990_v4 }
 0x22d   :  { %v11383_v14 = vor.u32 %v16331_v0, %v11380_v1  ;;  %v11339_v26 = vor.u32 %v16320_v18, %v11336_v19  ;;  %v11563_v0 = vor.u32 %v16381_v52, %v11562_v51  ;;  %v16590_v18 = vld [vmem:[%s26318_s7 + $0x930] sm:$0xf0]  ;;  %v16337_v45 = vld [vmem:[%s26318_s7 + $0x148] sm:$0xf0]  ;;  %v11738_v52 = vld [vmem:[%s26318_s7 + $0x3e0] sm:$0xf] }
 0x22e   :  { %12464 = vmatmul.msk.bf16.vlgmr.msrb.gmra.mxu3 %vm157_vm1, %v18326_v50  ;;  %v16326_v62 = vld [vmem:[%s26318_s7 + $0xf0] sm:$0xf0] }
 0x22f   :  { %2528 = vmatpush.bf16.msra.mxu3 %v11559_v16  ;;  %2484 = vmatmul.bf16.vlgmr.msrb.gmra.mxu0 %v18320_v47  ;;  %v16584_v16 = vld [vmem:[%s26318_s7 + $0x904] sm:$0xf] }
 0x230   :  { %2541 = vmatpush.bf16.msra.mxu0 %v11911_v12  ;;  %2506 = vmatpush.bf16.msrb.mxu2 %v12083_v22  ;;  %v12084_v12 = vld [vmem:[%s26318_s7 + $0x6c4] sm:$0xf0]  ;;  %v12395_v22 = vor.u32 %v16584_v16, %v12392_v17 }
 0x231   :  { %2554 = vmatpush.bf16.msra.mxu1 %v12263_v23  ;;  %v12087_v20 = vor.u32 %v16507_v11, %v12084_v12  ;;  %v16496_v23 = vld [vmem:[%s26318_s7 + $0x644] sm:$0xf]  ;;  %v16458_v12 = vld [vmem:[%s26318_s7 + $0x510] sm:$0xf0]  ;;  %v12398_v17 = vld [vmem:[%s26318_s7 + $0x908] sm:$0xf] }
 0x232   :  { %2497 = vmatmul.bf16.vlgmr.msrb.gmra.mxu1 %v18322_v48  ;;  %v12043_v32 = vor.u32 %v16496_v23, %v12040_v24  ;;  %v11826_v23 = vld [vmem:[%s26318_s7 + $0x490] sm:$0xf]  ;;  %v16447_v24 = vld [vmem:[%s26318_s7 + $0x4b8] sm:$0xf0] }
 0x233   :  { %2529 = vmatpush.bf16.msra.mxu3 %v11515_v29  ;;  %v12348_v29 = vld [vmem:[%s26318_s7 + $0x8d4] sm:$0xf0] }
 0x234   :  { %2542 = vmatpush.bf16.msra.mxu0 %v11867_v25  ;;  %2507 = vmatpush.bf16.msrb.mxu2 %v12039_v36  ;;  %v16397_v25 = vld [vmem:[%s26318_s7 + $0x32c] sm:$0xf]  ;;  %v11996_v36 = vld [vmem:[%s26318_s7 + $0x614] sm:$0xf0]  ;;  %v12351_v40 = vor.u32 %v16573_v28, %v12348_v29  ;;  %v12354_v29 = vld [vmem:[%s26318_s7 + $0x8b0] sm:$0xf] }
 0x235   :  { %2555 = vmatpush.bf16.msra.mxu1 %v12219_v37  ;;  %v11647_v37 = vor.u32 %v16397_v25, %v11644_v27  ;;  %v12178_v25 = vld [vmem:[%s26318_s7 + $0x750] sm:$0xf]  ;;  %v12399_v27 = vor.u32 %v16590_v18, %v12398_v17 }
 0x236   :  { %v11650_v18 = vld [vmem:[%s26318_s7 + $0x330] sm:$0xf] }
 0x237   :  { %2530 = vmatpush.bf16.msra.mxu3 %v11471_v44  ;;  %v11295_v44 = vor.u32 %v16309_v30, %v11292_v31  ;;  %v16579_v30 = vld [vmem:[%s26318_s7 + $0x8d8] sm:$0xf0]  ;;  %v11827_v31 = vor.u32 %v16447_v24, %v11826_v23  ;;  %v11254_v24 = vld [vmem:[%s26318_s7 + $0x18] sm:$0xf] }
 0x238   :  { %2543 = vmatpush.bf16.msra.mxu0 %v11823_v42  ;;  %2508 = vmatpush.bf16.msrb.mxu2 %v11995_v53  ;;  %v11248_v42 = vld [vmem:[%s26318_s7 + $0x3c] sm:$0xf0]  ;;  %v12355_v8 = vor.u32 %v16579_v30, %v12354_v29  ;;  %v16491_v23 = vld [vmem:[%s26318_s7 + $0x618] sm:$0xf0]  ;;  %v16596_v29 = vld [vmem:[%s26318_s7 + $0x964] sm:$0xf] }
 0x239   :  { %2556 = vmatpush.bf16.msra.mxu1 %v12175_v54  ;;  %v11914_v53 = vld [vmem:[%s26318_s7 + $0x540] sm:$0xf]  ;;  %v11999_v54 = vor.u32 %v16485_v33, %v11996_v36  ;;  %v11251_v63 = vor.u32 %v16298_v7, %v11248_v42  ;;  %v11430_v33 = vld [vmem:[%s26318_s7 + $0x178] sm:$0xf]  ;;  %v16348_v36 = vld [vmem:[%s26318_s7 + $0x1a0] sm:$0xf0] }
 0x23a   :  { %v11915_v1 = vor.u32 %v16469_v55, %v11914_v53  ;;  %v12134_v7 = vld [vmem:[%s26318_s7 + $0x6f8] sm:$0xf]  ;;  %v16524_v42 = vld [vmem:[%s26318_s7 + $0x720] sm:$0xf0]  ;;  %v11431_v43 = vor.u32 %v16348_v36, %v11430_v33  ;;  %v16425_v55 = vld [vmem:[%s26318_s7 + $0x408] sm:$0xf0] }
 0x23b   :  { %2531 = vmatpush.bf16.msra.mxu3 %v11427_v61  ;;  %v11952_v61 = vld [vmem:[%s26318_s7 + $0x5bc] sm:$0xf0]  ;;  %v12135_v51 = vor.u32 %v16524_v42, %v12134_v7  ;;  %v16376_v53 = vld [vmem:[%s26318_s7 + $0x284] sm:$0xf]  ;;  %v12444_v30 = vld [vmem:[%s26318_s7 + $0x98c] sm:$0x10] }
 0x23c   :  { %2544 = vmatpush.bf16.msra.mxu0 %v11779_v56  ;;  %2509 = vmatpush.bf16.msrb.mxu2 %v11951_v2  ;;  %v12266_v56 = vld [vmem:[%s26318_s7 + $0x800] sm:$0xf]  ;;  %v11955_v11 = vor.u32 %v16474_v60, %v11952_v61  ;;  %v11342_v61 = vld [vmem:[%s26318_s7 + $0xc8] sm:$0xf]  ;;  %v11958_v42 = vld [vmem:[%s26318_s7 + $0x598] sm:$0xf] }
 0x23d   :  { %2557 = vmatpush.bf16.msra.mxu1 %v12131_v3  ;;  %v12267_v2 = vor.u32 %v16557_v57, %v12266_v56  ;;  %v11518_v3 = vld [vmem:[%s26318_s7 + $0x228] sm:$0xf]  ;;  %v12090_v56 = vld [vmem:[%s26318_s7 + $0x6a0] sm:$0xf]  ;;  %v16513_v57 = vld [vmem:[%s26318_s7 + $0x6c8] sm:$0xf0] }
 0x23e   :  { %v11432_v7 = vld [vmem:[%s26318_s7 + $0x1a4] sm:$0xf0] }
 0x23f   :  { %2532 = vmatpush.bf16.msra.mxu3 %v11383_v14  ;;  %2510 = vmatmul.bf16.vlgmr.msrb.gmra.mxu2 %v18324_v49  ;;  %v16546_v14 = vld [vmem:[%s26318_s7 + $0x7d0] sm:$0xf0] }
 0x240   :  { %2545 = vmatpush.bf16.msra.mxu0 %v11735_v5  ;;  %2571 = vmatpush.bf16.msra.mxu2 %v2251_v6  ;;  %v16370_v5 = vld [vmem:[%s26318_s7 + $0x250] sm:$0xf0]  ;;  %v11870_v6 = vld [vmem:[%s26318_s7 + $0x4e8] sm:$0xf] }
 0x241   :  { %2558 = vmatpush.bf16.msra.mxu1 %v12087_v20  ;;  %v11519_v16 = vor.u32 %v16370_v5, %v11518_v3  ;;  %v11871_v19 = vor.u32 %v16458_v12, %v11870_v6  ;;  %v12223_v20 = vor.u32 %v16546_v14, %v12222_v13  ;;  %v11520_v3 = vld [vmem:[%s26318_s7 + $0x254] sm:$0xf0]  ;;  %v16414_v5 = vld [vmem:[%s26318_s7 + $0x3b0] sm:$0xf0]  ;;  %v12046_v6 = vld [vmem:[%s26318_s7 + $0x648] sm:$0xf]  ;;  %v11343_v12 = vor.u32 %v16326_v62, %v11342_v61 }
 0x242   :  { %v11298_v14 = vld [vmem:[%s26318_s7 + $0x70] sm:$0xf]  ;;  %v11872_v61 = vld [vmem:[%s26318_s7 + $0x514] sm:$0xf0]  ;;  %v16541_v62 = vld [vmem:[%s26318_s7 + $0x7ac] sm:$0xf] }
 0x243   :  { %2533 = vmatpush.bf16.msra.mxu3 %v11339_v26  ;;  %v16535_v26 = vld [vmem:[%s26318_s7 + $0x778] sm:$0xf0] }
 0x244   :  { %2546 = vmatpush.bf16.msra.mxu0 %v11691_v21  ;;  %2572 = vmatpush.bf16.msra.mxu2 %v12395_v22  ;;  %v11474_v21 = vld [vmem:[%s26318_s7 + $0x1d0] sm:$0xf]  ;;  %v16359_v22 = vld [vmem:[%s26318_s7 + $0x1f8] sm:$0xf0] }
 0x245   :  { %2559 = vmatpush.bf16.msra.mxu1 %v12043_v32  ;;  %v11475_v28 = vor.u32 %v16359_v22, %v11474_v21  ;;  %v12179_v32 = vor.u32 %v16535_v26, %v12178_v25  ;;  %v16403_v21 = vld [vmem:[%s26318_s7 + $0x358] sm:$0xf0]  ;;  %v12002_v22 = vld [vmem:[%s26318_s7 + $0x5f0] sm:$0xf]  ;;  %v16304_v25 = vld [vmem:[%s26318_s7 + $0x40] sm:$0xf0] }
 0x247   :  { %2534 = vmatpush.bf16.msra.mxu3 %v11295_v44  ;;  %v16568_v44 = vld [vmem:[%s26318_s7 + $0x880] sm:$0xf0] }
 0x248   :  { %2547 = vmatpush.bf16.msra.mxu0 %v11647_v37  ;;  %2573 = vmatpush.bf16.msra.mxu2 %v12351_v40  ;;  %v11782_v37 = vld [vmem:[%s26318_s7 + $0x438] sm:$0xf]  ;;  %v16436_v40 = vld [vmem:[%s26318_s7 + $0x460] sm:$0xf0] }
 0x249   :  { %2560 = vmatpush.bf16.msra.mxu1 %v11999_v54  ;;  %v11783_v46 = vor.u32 %v16436_v40, %v11782_v37  ;;  %v11564_v54 = vld [vmem:[%s26318_s7 + $0x2ac] sm:$0xf0]  ;;  %v16392_v37 = vld [vmem:[%s26318_s7 + $0x300] sm:$0xf0]  ;;  %v16343_v40 = vld [vmem:[%s26318_s7 + $0x17c] sm:$0xf] }
 0x24a   :  { %v11567_v60 = vor.u32 %v16376_v53, %v11564_v54 }
 0x24b   :  { %2535 = vmatpush.bf16.msra.mxu3 %v11251_v63  ;;  %v11739_v63 = vor.u32 %v16425_v55, %v11738_v52 }
 0x24c   :  { %2548 = vmatpush.bf16.msra.mxu0 %v11603_v58  ;;  %2574 = vmatpush.bf16.msra.mxu2 %v12307_v59  ;;  %v12311_v58 = vor.u32 %v16568_v44, %v12310_v9  ;;  %v11387_v59 = vor.u32 %v16337_v45, %v11386_v10  ;;  %v16464_v9 = vld [vmem:[%s26318_s7 + $0x544] sm:$0xf]  ;;  %v12268_v10 = vld [vmem:[%s26318_s7 + $0x82c] sm:$0xf0]  ;;  %v12447_v45 = vor.u32 %v16596_v29, %v12444_v30  ;;  %v11300_v29 = vld [vmem:[%s26318_s7 + $0x9c] sm:$0xf0] }
 0x24d   :  { %2561 = vmatpush.bf16.msra.mxu1 %v11955_v11  ;;  %v16502_v11 = vld [vmem:[%s26318_s7 + $0x670] sm:$0xf0]  ;;  %v16552_v44 = vld [vmem:[%s26318_s7 + $0x804] sm:$0xf]  ;;  %v16431_v30 = vld [vmem:[%s26318_s7 + $0x43c] sm:$0xf] }
 0x24e   :  { %2536 = vmatmul.bf16.vlgmr.msra.gmra.mxu3 %v18320_v47  ;;  %v12047_v17 = vor.u32 %v16502_v11, %v12046_v6  ;;  %v12271_v55 = vor.u32 %v16552_v44, %v12268_v10  ;;  %v11570_v44 = vld [vmem:[%s26318_s7 + $0x288] sm:$0xf]  ;;  %v16382_v10 = vld [vmem:[%s26318_s7 + $0x2b0] sm:$0xf0] }
 0x24f   :  { %2593 = vmatpush.bf16.msrb.mxu3 %v11915_v1  ;;  %2549 = vmatmul.bf16.vlgmr.msra.gmra.mxu0 %v18322_v48  ;;  %v11694_v1 = vld [vmem:[%s26318_s7 + $0x388] sm:$0xf] }
 0x250   :  { %2580 = vmatpush.bf16.msrb.mxu2 %v11563_v0  ;;  %2606 = vmatpush.bf16.msrb.mxu0 %v12267_v2  ;;  %v12091_v0 = vor.u32 %v16513_v57, %v12090_v56  ;;  %v16365_v2 = vld [vmem:[%s26318_s7 + $0x22c] sm:$0xf]  ;;  %v16332_v56 = vld [vmem:[%s26318_s7 + $0x124] sm:$0xf]  ;;  %v11388_v57 = vld [vmem:[%s26318_s7 + $0x14c] sm:$0xf0] }
 0x251   :  { %2623 = vmatpush.bf16.msrb.mxu1 %v2254_v15  ;;  %12465 = vmatmul.msk.bf16.vlgmr.msra.gmra.mxu2 %vm157_vm1, %v18326_v50  ;;  %v11523_v13 = vor.u32 %v16365_v2, %v11520_v3  ;;  %v16315_v15 = vld [vmem:[%s26318_s7 + $0x98] sm:$0xf0]  ;;  %v16585_v2 = vld [vmem:[%s26318_s7 + $0x90c] sm:$0xf]  ;;  %v12400_v3 = vld [vmem:[%s26318_s7 + $0x934] sm:$0xf0]  ;;  %v11391_v6 = vor.u32 %v16332_v56, %v11388_v57 }
 0x252   :  { %2562 = vmatmul.bf16.vlgmr.msra.gmra.mxu1 %v18324_v49  ;;  %v11299_v26 = vor.u32 %v16315_v15, %v11298_v14  ;;  %v16321_v15 = vld [vmem:[%s26318_s7 + $0xcc] sm:$0xf]  ;;  %v16508_v56 = vld [vmem:[%s26318_s7 + $0x6a4] sm:$0xf]  ;;  %v12092_v57 = vld [vmem:[%s26318_s7 + $0x6cc] sm:$0xf0] }
 0x253   :  { %2594 = vmatpush.bf16.msrb.mxu3 %v11871_v19  ;;  %v16354_v19 = vld [vmem:[%s26318_s7 + $0x1d4] sm:$0xf] }
 0x254   :  { %2581 = vmatpush.bf16.msrb.mxu2 %v11519_v16  ;;  %2607 = vmatpush.bf16.msrb.mxu0 %v12223_v20  ;;  %v11695_v16 = vor.u32 %v16414_v5, %v11694_v1  ;;  %v11476_v20 = vld [vmem:[%s26318_s7 + $0x1fc] sm:$0xf0] }
 0x255   :  { %2624 = vmatpush.bf16.msrb.mxu1 %v12399_v27  ;;  %v11479_v27 = vor.u32 %v16354_v19, %v11476_v20  ;;  %v12403_v19 = vor.u32 %v16585_v2, %v12400_v3  ;;  %v11828_v20 = vld [vmem:[%s26318_s7 + $0x4bc] sm:$0xf0]  ;;  %v16409_v2 = vld [vmem:[%s26318_s7 + $0x38c] sm:$0xf] }
 0x257   :  { %2595 = vmatpush.bf16.msrb.mxu3 %v11827_v31  ;;  %v11651_v31 = vor.u32 %v16403_v21, %v11650_v18  ;;  %v16530_v21 = vld [vmem:[%s26318_s7 + $0x754] sm:$0xf] }
 0x258   :  { %2582 = vmatpush.bf16.msrb.mxu2 %v11475_v28  ;;  %2608 = vmatpush.bf16.msrb.mxu0 %v12179_v32  ;;  %v11606_v28 = vld [vmem:[%s26318_s7 + $0x2d8] sm:$0xf]  ;;  %v12003_v32 = vor.u32 %v16491_v23, %v12002_v22  ;;  %v12180_v22 = vld [vmem:[%s26318_s7 + $0x77c] sm:$0xf0]  ;;  %v16574_v23 = vld [vmem:[%s26318_s7 + $0x8b4] sm:$0xf] }
 0x259   :  { %2625 = vmatpush.bf16.msrb.mxu1 %v12355_v8  ;;  %v16480_v8 = vld [vmem:[%s26318_s7 + $0x5c0] sm:$0xf0]  ;;  %v11607_v52 = vor.u32 %v16392_v37, %v11606_v28  ;;  %v16310_v28 = vld [vmem:[%s26318_s7 + $0x74] sm:$0xf] }
 0x25a   :  { %v2277_v33 = vpop.f32.mrf.mxu0  ;;  %v2290_v36 = vpop.f32.mrf.mxu1  ;;  %v11959_v53 = vor.u32 %v16480_v8, %v11958_v42  ;;  %v12312_v42 = vld [vmem:[%s26318_s7 + $0x884] sm:$0xf0]  ;;  %v11303_v8 = vor.u32 %v16310_v28, %v11300_v29  ;;  %v11652_v28 = vld [vmem:[%s26318_s7 + $0x35c] sm:$0xf0]  ;;  %v16486_v29 = vld [vmem:[%s26318_s7 + $0x5f4] sm:$0xf] }
 0x25b   :  { %2596 = vmatpush.bf16.msrb.mxu3 %v11783_v46  ;;  %v11255_v46 = vor.u32 %v16304_v25, %v11254_v24  ;;  %v12356_v24 = vld [vmem:[%s26318_s7 + $0x8dc] sm:$0xf0] }
 0x25c   :  { %2583 = vmatpush.bf16.msrb.mxu2 %v11431_v43  ;;  %2609 = vmatpush.bf16.msrb.mxu0 %v12135_v51  ;;  %v11916_v43 = vld [vmem:[%s26318_s7 + $0x56c] sm:$0xf0]  ;;  %v11435_v51 = vor.u32 %v16343_v40, %v11432_v7  ;;  %v16563_v7 = vld [vmem:[%s26318_s7 + $0x85c] sm:$0xf] }
 0x25d   :  { %2626 = vmatpush.bf16.msrb.mxu1 %v12311_v58  ;;  %v11919_v54 = vor.u32 %v16464_v9, %v11916_v43  ;;  %v16453_v58 = vld [vmem:[%s26318_s7 + $0x4ec] sm:$0xf] }
 0x25f   :  { %2597 = vmatpush.bf16.msrb.mxu3 %v11739_v63  ;;  %v12224_v63 = vld [vmem:[%s26318_s7 + $0x7d4] sm:$0xf0] }
 0x260   :  { %2584 = vmatpush.bf16.msrb.mxu2 %v11387_v59  ;;  %2610 = vmatpush.bf16.msrb.mxu0 %v12091_v0  ;;  %v2291_v59 = vadd.f32 %v2290_v36, %v2277_v33  ;;  %v12227_v14 = vor.u32 %v16541_v62, %v12224_v63  ;;  %v16519_v33 = vld [vmem:[%s26318_s7 + $0x6fc] sm:$0xf]  ;;  %v12136_v36 = vld [vmem:[%s26318_s7 + $0x724] sm:$0xf0]  ;;  %v11526_v62 = vld [vmem:[%s26318_s7 + $0x230] sm:$0xf] }
 0x261   :  { %2632 = vmatpush.bf16.msra.mxu1 %v11567_v60  ;;  %v2257_v60 = vand.u32 %v12447_v45, %v17990_v4  ;;  %v2303_v0 = vpop.f32.mrf.mxu2  ;;  %v2316_v1 = vpop.f32.mrf.mxu3  ;;  %v16371_v63 = vld [vmem:[%s26318_s7 + $0x258] sm:$0xf0] }
 0x262   :  { %12466 = vmatmul.msk.bf16.vlgmr.msrb.gmra.mxu1 %vm157_vm1, %v18326_v50  ;;  %v2304_v5 = vadd.f32 %v2303_v0, %v2291_v59  ;;  %v2279_v11 = vpop.f32.mrf.mxu0  ;;  %v11922_v59 = vld [vmem:[%s26318_s7 + $0x548] sm:$0xf] }
 0x263   :  { %2598 = vmatpush.bf16.msrb.mxu3 %v11695_v16  ;;  %v11344_v16 = vld [vmem:[%s26318_s7 + $0xf4] sm:$0xf0] }
 0x264   :  { %2585 = vmatpush.bf16.msrb.mxu2 %v11343_v12  ;;  %2611 = vmatpush.bf16.msrb.mxu0 %v12047_v17  ;;  %v2292_v12 = vpop.f32.mrf.mxu1  ;;  %v16442_v17 = vld [vmem:[%s26318_s7 + $0x494] sm:$0xf]  ;;  %v19257_v18 = vadd.f32 %v2316_v1, %v2304_v5  ;;  %v11347_v25 = vor.u32 %v16321_v15, %v11344_v16  ;;  %v12095_v1 = vor.u32 %v16508_v56, %v12092_v57  ;;  %v11696_v5 = vld [vmem:[%s26318_s7 + $0x3b4] sm:$0xf0]  ;;  %v11878_v15 = vld [vmem:[%s26318_s7 + $0x4f0] sm:$0xf] }
 0x265   :  { %2633 = vmatpush.bf16.msra.mxu1 %v11523_v13  ;;  %v11875_v13 = vor.u32 %v16453_v58, %v11872_v61  ;;  %v11571_v58 = vor.u32 %v16382_v10, %v11570_v44  ;;  %v12048_v11 = vld [vmem:[%s26318_s7 + $0x674] sm:$0xf0]  ;;  %v11527_v12 = vor.u32 %v16371_v63, %v11526_v62  ;;  %v16459_v16 = vld [vmem:[%s26318_s7 + $0x518] sm:$0xf0]  ;;  %v16558_v56 = vld [vmem:[%s26318_s7 + $0x830] sm:$0xf0] }
 0x266   :  { %2913 = vrot.lane.b32.xlu1 %v19257_v18, %s17723_s3  ;;  %v16475_v10 = vld [vmem:[%s26318_s7 + $0x59c] sm:$0xf]  ;;  %s17734_s3 = smov 82  }
 0x267   :  { %2599 = vmatpush.bf16.msrb.mxu3 %v11651_v31  ;;  %v12359_v31 = vor.u32 %v16574_v23, %v12356_v24  ;;  %v11699_v23 = vor.u32 %v16409_v2, %v11696_v5  ;;  %v16426_v2 = vld [vmem:[%s26318_s7 + $0x410] sm:$0xf0] }
 0x268   :  { %2586 = vmatpush.bf16.msrb.mxu2 %v11299_v26  ;;  %2612 = vmatpush.bf16.msrb.mxu0 %v12003_v32  ;;  %v11831_v26 = vor.u32 %v16442_v17, %v11828_v20  ;;  %v11784_v32 = vld [vmem:[%s26318_s7 + $0x464] sm:$0xf0] }
 0x269   :  { %2634 = vmatpush.bf16.msra.mxu1 %v11479_v27  ;;  %v12183_v27 = vor.u32 %v16530_v21, %v12180_v22  ;;  %v2305_v37 = vpop.f32.mrf.mxu2  ;;  %v2318_v40 = vpop.f32.mrf.mxu3  ;;  %v11787_v45 = vor.u32 %v16431_v30, %v11784_v32  ;;  %v11482_v21 = vld [vmem:[%s26318_s7 + $0x1d8] sm:$0xf]  ;;  %v16360_v22 = vld [vmem:[%s26318_s7 + $0x200] sm:$0xf0]  ;;  %v12004_v30 = vld [vmem:[%s26318_s7 + $0x61c] sm:$0xf0] }
 0x26a   :  { %v2342_v9 = vpop.f32.mrf.mxu0  ;;  %v11834_v32 = vld [vmem:[%s26318_s7 + $0x498] sm:$0xf]  ;;  %v16349_v37 = vld [vmem:[%s26318_s7 + $0x1a8] sm:$0xf0]  ;;  %v12450_v40 = vld [vmem:[%s26318_s7 + $0x968] sm:$0xf] }
 0x26b   :  { %2600 = vmatpush.bf16.msrb.mxu3 %v11607_v52  ;;  %v11256_v52 = vld [vmem:[%s26318_s7 + $0x44] sm:$0xf0] }
 0x26c   :  { %2587 = vmatpush.bf16.msrb.mxu2 %v11255_v46  ;;  %2613 = vmatpush.bf16.msrb.mxu0 %v11959_v53  ;;  %v2355_v43 = vpop.f32.mrf.mxu1  ;;  %v12139_v46 = vor.u32 %v16519_v33, %v12136_v36  ;;  %v16420_v53 = vld [vmem:[%s26318_s7 + $0x3e4] sm:$0xf]  ;;  %v11438_v36 = vld [vmem:[%s26318_s7 + $0x180] sm:$0xf] }
 0x26d   :  { %2635 = vmatpush.bf16.msra.mxu1 %v11435_v51  ;;  %v16299_v51 = vld [vmem:[%s26318_s7 + $0x1c] sm:$0xf]  ;;  %v16448_v33 = vld [vmem:[%s26318_s7 + $0x4c0] sm:$0xf0] }
 0x26e   :  { %2601 = vmatmul.bf16.vlgmr.msrb.gmra.mxu3 %v18322_v48  ;;  %v11259_v61 = vor.u32 %v16299_v51, %v11256_v52  ;;  %v11835_v44 = vor.u32 %v16448_v33, %v11834_v32  ;;  %v11439_v51 = vor.u32 %v16349_v37, %v11438_v36  ;;  %v12362_v32 = vld [vmem:[%s26318_s7 + $0x8b8] sm:$0xf]  ;;  %v16580_v33 = vld [vmem:[%s26318_s7 + $0x8e0] sm:$0xf0] }
 0x26f   :  { %2658 = vmatpush.bf16.msra.mxu3 %v12271_v55  ;;  %2588 = vmatmul.bf16.vlgmr.msrb.gmra.mxu2 %v18320_v47  ;;  %v11740_v55 = vld [vmem:[%s26318_s7 + $0x40c] sm:$0xf0] }
 0x270   :  { %2645 = vmatpush.bf16.msra.mxu2 %v11919_v54  ;;  %2675 = vmatpush.bf16.msra.mxu0 %v2257_v60  ;;  %v12315_v54 = vor.u32 %v16563_v7, %v12312_v42  ;;  %v16470_v60 = vld [vmem:[%s26318_s7 + $0x570] sm:$0xf0]  ;;  %v11743_v0 = vor.u32 %v16420_v53, %v11740_v55  ;;  %v12274_v55 = vld [vmem:[%s26318_s7 + $0x808] sm:$0xf] }
 0x271   :  { %2614 = vmatmul.bf16.vlgmr.msrb.gmra.mxu0 %v18324_v49  ;;  %2636 = vmatpush.bf16.msra.mxu1 %v11391_v6  ;;  %v11923_v3 = vor.u32 %v16470_v60, %v11922_v59  ;;  %v16497_v6 = vld [vmem:[%s26318_s7 + $0x64c] sm:$0xf]  ;;  %v16602_v7 = vld [vmem:[%s26318_s7 + $0x990] sm:$0x10] }
 0x272   :  { %v12051_v24 = vor.u32 %v16497_v6, %v12048_v11  ;;  %v12451_v57 = vor.u32 %v16602_v7, %v12450_v40  ;;  %v16338_v59 = vld [vmem:[%s26318_s7 + $0x150] sm:$0xf0]  ;;  %v11350_v11 = vld [vmem:[%s26318_s7 + $0xd0] sm:$0xf] }
 0x273   :  { %2659 = vmatpush.bf16.msra.mxu3 %v12227_v14  ;;  %v19350_v14 = vpop.f32.mrf.mxu2 }
 0x274   :  { %2646 = vmatpush.bf16.msra.mxu2 %v11875_v13  ;;  %2676 = vmatpush.bf16.msra.mxu0 %v12403_v19  ;;  %v2329_v13 = vpop.f32.mrf.mxu3  ;;  %v2344_v19 = vpop.f32.mrf.mxu0  ;;  %v2260_v6 = vand.u32 %v12451_v57, %v17990_v4  ;;  %v16465_v57 = vld [vmem:[%s26318_s7 + $0x54c] sm:$0xf] }
 0x275   :  { %2637 = vmatpush.bf16.msra.mxu1 %v11347_v25  ;;  %v2343_v17 = vadd.f32 %v2342_v9, %v2329_v13  ;;  %v2357_v20 = vpop.f32.mrf.mxu1  ;;  %v16398_v25 = vld [vmem:[%s26318_s7 + $0x334] sm:$0xf]  ;;  %v16387_v9 = vld [vmem:[%s26318_s7 + $0x2dc] sm:$0xf] }
 0x276   :  { %v11655_v42 = vor.u32 %v16398_v25, %v11652_v28  ;;  %v16547_v13 = vld [vmem:[%s26318_s7 + $0x7d8] sm:$0xf0]  ;;  %v12186_v28 = vld [vmem:[%s26318_s7 + $0x758] sm:$0xf] }
 0x277   :  { %2660 = vmatpush.bf16.msra.mxu3 %v12183_v27  ;;  %v11879_v27 = vor.u32 %v16459_v16, %v11878_v15  ;;  %v16327_v15 = vld [vmem:[%s26318_s7 + $0xf8] sm:$0xf0]  ;;  %v12406_v16 = vld [vmem:[%s26318_s7 + $0x910] sm:$0xf] }
 0x278   :  { %2647 = vmatpush.bf16.msra.mxu2 %v11831_v26  ;;  %2677 = vmatpush.bf16.msra.mxu0 %v12359_v31  ;;  %v19367_v26 = vadd.f32 %v2355_v43, %v2343_v17  ;;  %v11483_v31 = vor.u32 %v16360_v22, %v11482_v21  ;;  %v11608_v43 = vld [vmem:[%s26318_s7 + $0x304] sm:$0xf0]  ;;  %v16591_v17 = vld [vmem:[%s26318_s7 + $0x938] sm:$0xf0]  ;;  %v11702_v21 = vld [vmem:[%s26318_s7 + $0x390] sm:$0xf] }
 0x279   :  { %2638 = vmatpush.bf16.msra.mxu1 %v11303_v8  ;;  %v12007_v8 = vor.u32 %v16486_v29, %v12004_v30  ;;  %v11611_v60 = vor.u32 %v16387_v9, %v11608_v43  ;;  %v16415_v22 = vld [vmem:[%s26318_s7 + $0x3b8] sm:$0xf0]  ;;  %v16536_v29 = vld [vmem:[%s26318_s7 + $0x780] sm:$0xf0]  ;;  %v11262_v9 = vld [vmem:[%s26318_s7 + $0x20] sm:$0xf] }
 0x27a   :  { %v11703_v40 = vor.u32 %v16415_v22, %v11702_v21  ;;  %v12187_v7 = vor.u32 %v16536_v29, %v12186_v28  ;;  %v16503_v28 = vld [vmem:[%s26318_s7 + $0x678] sm:$0xf0] }
 0x27b   :  { %2661 = vmatpush.bf16.msra.mxu3 %v12139_v46  ;;  %v11790_v46 = vld [vmem:[%s26318_s7 + $0x440] sm:$0xf]  ;;  %v2370_v53 = vpop.f32.mrf.mxu2 }
 0x27c   :  { %2648 = vmatpush.bf16.msra.mxu2 %v11787_v45  ;;  %2678 = vmatpush.bf16.msra.mxu0 %v12315_v54  ;;  %v11960_v45 = vld [vmem:[%s26318_s7 + $0x5c4] sm:$0xf0]  ;;  %v2331_v52 = vpop.f32.mrf.mxu3  ;;  %v16437_v54 = vld [vmem:[%s26318_s7 + $0x468] sm:$0xf0]  ;;  %v12318_v53 = vld [vmem:[%s26318_s7 + $0x860] sm:$0xf] }
 0x27d   :  { %2639 = vmatpush.bf16.msra.mxu1 %v11259_v61  ;;  %v11963_v61 = vor.u32 %v16475_v10, %v11960_v45  ;;  %v11791_v63 = vor.u32 %v16437_v54, %v11790_v46  ;;  %v12363_v45 = vor.u32 %v16580_v33, %v12362_v32  ;;  %v16305_v46 = vld [vmem:[%s26318_s7 + $0x48] sm:$0xf0]  ;;  %v12232_v32 = vld [vmem:[%s26318_s7 + $0x7dc] sm:$0xf0]  ;;  %v16355_v33 = vld [vmem:[%s26318_s7 + $0x1dc] sm:$0xf] }
 0x27e   :  { %v2407_v62 = vpop.f32.mrf.mxu0  ;;  %v16525_v52 = vld [vmem:[%s26318_s7 + $0x728] sm:$0xf0] }
 0x27f   :  { %2662 = vmatpush.bf16.msra.mxu3 %v12095_v1  ;;  %v11746_v1 = vld [vmem:[%s26318_s7 + $0x3e8] sm:$0xf]  ;;  %v16569_v54 = vld [vmem:[%s26318_s7 + $0x888] sm:$0xf0] }
 0x280   :  { %2684 = vmatpush.bf16.msrb.mxu0 %v11571_v58  ;;  %2649 = vmatpush.bf16.msra.mxu2 %v11743_v0  ;;  %v11394_v58 = vld [vmem:[%s26318_s7 + $0x128] sm:$0xf]  ;;  %v12275_v0 = vor.u32 %v16558_v56, %v12274_v55  ;;  %v11747_v19 = vor.u32 %v16426_v2, %v11746_v1  ;;  %v16377_v55 = vld [vmem:[%s26318_s7 + $0x28c] sm:$0xf]  ;;  %v11572_v56 = vld [vmem:[%s26318_s7 + $0x2b4] sm:$0xf0] }
 0x281   :  { %2697 = vmatpush.bf16.msrb.mxu1 %v11923_v3  ;;  %12467 = vmatmul.msk.bf16.vlgmr.msra.gmra.mxu0 %vm157_vm1, %v18326_v50  ;;  %v2420_v3 = vpop.f32.mrf.mxu1  ;;  %v11395_v5 = vor.u32 %v16338_v59, %v11394_v58  ;;  %v11924_v58 = vld [vmem:[%s26318_s7 + $0x574] sm:$0xf0]  ;;  %v16393_v2 = vld [vmem:[%s26318_s7 + $0x308] sm:$0xf0] }
 0x282   :  { %2640 = vmatmul.bf16.vlgmr.msra.gmra.mxu1 %v18320_v47 }
 0x283   :  { %2663 = vmatpush.bf16.msra.mxu3 %v12051_v24  ;;  %v12407_v24 = vor.u32 %v16591_v17, %v12406_v16  ;;  %v2381_v25 = vpop.f32.mrf.mxu2  ;;  %v16366_v16 = vld [vmem:[%s26318_s7 + $0x234] sm:$0xf]  ;;  %v11528_v17 = vld [vmem:[%s26318_s7 + $0x25c] sm:$0xf0] }
 0x284   :  { %2685 = vmatpush.bf16.msrb.mxu0 %v11527_v12  ;;  %2650 = vmatpush.bf16.msra.mxu2 %v11699_v23  ;;  %v12230_v12 = vld [vmem:[%s26318_s7 + $0x7b0] sm:$0xf]  ;;  %v11351_v23 = vor.u32 %v16327_v15, %v11350_v11  ;;  %v2394_v30 = vpop.f32.mrf.mxu3  ;;  %v11575_v11 = vor.u32 %v16377_v55, %v11572_v56  ;;  %v12276_v15 = vld [vmem:[%s26318_s7 + $0x834] sm:$0xf0]  ;;  %v11531_v29 = vor.u32 %v16366_v16, %v11528_v17 }
 0x285   :  { %2698 = vmatpush.bf16.msrb.mxu1 %v11879_v27  ;;  %v12231_v20 = vor.u32 %v16547_v13, %v12230_v12  ;;  %v11306_v27 = vld [vmem:[%s26318_s7 + $0x78] sm:$0xf]  ;;  %v2395_v36 = vadd.f32 %v2394_v30, %v2381_v25  ;;  %v11927_v12 = vor.u32 %v16465_v57, %v11924_v58  ;;  %v16553_v13 = vld [vmem:[%s26318_s7 + $0x80c] sm:$0xf] }
 0x286   :  { %v2409_v37 = vpop.f32.mrf.mxu0  ;;  %v12279_v25 = vor.u32 %v16553_v13, %v12276_v15  ;;  %v12452_v55 = vld [vmem:[%s26318_s7 + $0x994] sm:$0x10] }
 0x287   :  { %2664 = vmatpush.bf16.msra.mxu3 %v12007_v8  ;;  %v16404_v8 = vld [vmem:[%s26318_s7 + $0x360] sm:$0xf0]  ;;  %v2408_v43 = vadd.f32 %v2407_v62, %v2395_v36  ;;  %v11614_v62 = vld [vmem:[%s26318_s7 + $0x2e0] sm:$0xf]  ;;  %v11484_v36 = vld [vmem:[%s26318_s7 + $0x204] sm:$0xf0] }
 0x288   :  { %2686 = vmatpush.bf16.msrb.mxu0 %v11483_v31  ;;  %2651 = vmatpush.bf16.msra.mxu2 %v11655_v42  ;;  %v16316_v31 = vld [vmem:[%s26318_s7 + $0xa0] sm:$0xf0]  ;;  %v11658_v42 = vld [vmem:[%s26318_s7 + $0x338] sm:$0xf]  ;;  %v11615_v21 = vor.u32 %v16393_v2, %v11614_v62  ;;  %v16443_v37 = vld [vmem:[%s26318_s7 + $0x49c] sm:$0xf] }
 0x289   :  { %2699 = vmatpush.bf16.msrb.mxu1 %v11835_v44  ;;  %v2422_v44 = vpop.f32.mrf.mxu1  ;;  %v11307_v10 = vor.u32 %v16316_v31, %v11306_v27  ;;  %v19516_v59 = vadd.f32 %v2420_v3, %v2408_v43  ;;  %v12098_v3 = vld [vmem:[%s26318_s7 + $0x6a8] sm:$0xf]  ;;  %v12054_v27 = vld [vmem:[%s26318_s7 + $0x650] sm:$0xf]  ;;  %v16542_v31 = vld [vmem:[%s26318_s7 + $0x7b4] sm:$0xf]  ;;  %v11487_v43 = vor.u32 %v16355_v33, %v11484_v36 }
 0x28a   :  { %v16481_v62 = vld [vmem:[%s26318_s7 + $0x5c8] sm:$0xf0]  ;;  %v12144_v2 = vld [vmem:[%s26318_s7 + $0x72c] sm:$0xf0]  ;;  %v16498_v36 = vld [vmem:[%s26318_s7 + $0x654] sm:$0xf] }
 0x28b   :  { %2665 = vmatpush.bf16.msra.mxu3 %v11963_v61  ;;  %v2383_v1 = vpop.f32.mrf.mxu2 }
 0x28c   :  { %2687 = vmatpush.bf16.msrb.mxu0 %v11439_v51  ;;  %2652 = vmatpush.bf16.msra.mxu2 %v11611_v60  ;;  %v12142_v51 = vld [vmem:[%s26318_s7 + $0x700] sm:$0xf]  ;;  %v11659_v60 = vor.u32 %v16404_v8, %v11658_v42  ;;  %v12235_v42 = vor.u32 %v16542_v31, %v12232_v32  ;;  %v12010_v8 = vld [vmem:[%s26318_s7 + $0x5f8] sm:$0xf]  ;;  %v16520_v1 = vld [vmem:[%s26318_s7 + $0x704] sm:$0xf] }
 0x28d   :  { %2700 = vmatpush.bf16.msrb.mxu1 %v11791_v63  ;;  %v12143_v61 = vor.u32 %v16525_v52, %v12142_v51  ;;  %v11263_v63 = vor.u32 %v16305_v46, %v11262_v9  ;;  %v16492_v9 = vld [vmem:[%s26318_s7 + $0x620] sm:$0xf0]  ;;  %v11440_v51 = vld [vmem:[%s26318_s7 + $0x1ac] sm:$0xf0]  ;;  %v12147_v15 = vor.u32 %v16520_v1, %v12144_v2 }
 0x28e   :  { %2666 = vmatmul.bf16.vlgmr.msra.gmra.mxu3 %v18324_v49  ;;  %v16344_v46 = vld [vmem:[%s26318_s7 + $0x184] sm:$0xf]  ;;  %v12011_v58 = vor.u32 %v16492_v9, %v12010_v8  ;;  %v11308_v8 = vld [vmem:[%s26318_s7 + $0xa4] sm:$0xf0]  ;;  %v16399_v9 = vld [vmem:[%s26318_s7 + $0x33c] sm:$0xf] }
 0x28f   :  { %2727 = vmatpush.bf16.msrb.mxu3 %v2260_v6  ;;  %2653 = vmatmul.bf16.vlgmr.msra.gmra.mxu2 %v18322_v48  ;;  %v2396_v6 = vpop.f32.mrf.mxu3  ;;  %v16432_v52 = vld [vmem:[%s26318_s7 + $0x444] sm:$0xf]  ;;  %v11930_v1 = vld [vmem:[%s26318_s7 + $0x550] sm:$0xf] }
 0x290   :  { %2710 = vmatpush.bf16.msrb.mxu2 %v12275_v0  ;;  %2688 = vmatpush.bf16.msrb.mxu0 %v11395_v5  ;;  %v12319_v0 = vor.u32 %v16569_v54, %v12318_v53  ;;  %v16514_v5 = vld [vmem:[%s26318_s7 + $0x6d0] sm:$0xf0]  ;;  %v11792_v53 = vld [vmem:[%s26318_s7 + $0x46c] sm:$0xf0]  ;;  %v16597_v54 = vld [vmem:[%s26318_s7 + $0x96c] sm:$0xf] }
 0x291   :  { %2701 = vmatpush.bf16.msrb.mxu1 %v11747_v19  ;;  %v16454_v19 = vld [vmem:[%s26318_s7 + $0x4f4] sm:$0xf]  ;;  %v19548_v22 = vpop.f32.mrf.mxu1  ;;  %v16421_v6 = vld [vmem:[%s26318_s7 + $0x3ec] sm:$0xf] }
 0x293   :  { %2728 = vmatpush.bf16.msrb.mxu3 %v12407_v24  ;;  %v12099_v24 = vor.u32 %v16514_v5, %v12098_v3  ;;  %v16333_v3 = vld [vmem:[%s26318_s7 + $0x12c] sm:$0xf]  ;;  %v11396_v5 = vld [vmem:[%s26318_s7 + $0x154] sm:$0xf0] }
 0x294   :  { %2711 = vmatpush.bf16.msrb.mxu2 %v12231_v20  ;;  %2689 = vmatpush.bf16.msrb.mxu0 %v11351_v23  ;;  %v11880_v20 = vld [vmem:[%s26318_s7 + $0x51c] sm:$0xf0]  ;;  %v19550_v23 = vpop.f32.mrf.mxu0  ;;  %v11399_v16 = vor.u32 %v16333_v3, %v11396_v5  ;;  %v16471_v3 = vld [vmem:[%s26318_s7 + $0x578] sm:$0xf0]  ;;  %v12458_v5 = vld [vmem:[%s26318_s7 + $0x970] sm:$0xf] }
 0x295   :  { %2702 = vmatpush.bf16.msrb.mxu1 %v11703_v40  ;;  %v11883_v30 = vor.u32 %v16454_v19, %v11880_v20  ;;  %v11836_v40 = vld [vmem:[%s26318_s7 + $0x4c4] sm:$0xf0]  ;;  %v16509_v19 = vld [vmem:[%s26318_s7 + $0x6ac] sm:$0xf]  ;;  %v12100_v20 = vld [vmem:[%s26318_s7 + $0x6d4] sm:$0xf0] }
 0x296   :  { %v11839_v44 = vor.u32 %v16443_v37, %v11836_v40  ;;  %v12103_v31 = vor.u32 %v16509_v19, %v12100_v20  ;;  %v12056_v37 = vld [vmem:[%s26318_s7 + $0x67c] sm:$0xf0]  ;;  %v16311_v40 = vld [vmem:[%s26318_s7 + $0x7c] sm:$0xf] }
 0x297   :  { %2729 = vmatpush.bf16.msrb.mxu3 %v12363_v45  ;;  %v12188_v45 = vld [vmem:[%s26318_s7 + $0x784] sm:$0xf0] }
 0x298   :  { %2712 = vmatpush.bf16.msrb.mxu2 %v12187_v7  ;;  %2690 = vmatpush.bf16.msrb.mxu0 %v11307_v10  ;;  %v12055_v7 = vor.u32 %v16503_v28, %v12054_v27  ;;  %v16531_v10 = vld [vmem:[%s26318_s7 + $0x75c] sm:$0xf]  ;;  %v16410_v27 = vld [vmem:[%s26318_s7 + $0x394] sm:$0xf]  ;;  %v11704_v28 = vld [vmem:[%s26318_s7 + $0x3bc] sm:$0xf0] }
 0x299   :  { %2703 = vmatpush.bf16.msrb.mxu1 %v11659_v60  ;;  %v2435_v56 = vpop.f32.mrf.mxu1  ;;  %v12191_v60 = vor.u32 %v16531_v10, %v12188_v45  ;;  %v11707_v33 = vor.u32 %v16410_v27, %v11704_v28  ;;  %v16575_v45 = vld [vmem:[%s26318_s7 + $0x8bc] sm:$0xf] }
 0x29a   :  { %v11311_v56 = vor.u32 %v16311_v40, %v11308_v8  ;;  %v16548_v40 = vld [vmem:[%s26318_s7 + $0x7e0] sm:$0xf0] }
 0x29b   :  { %2730 = vmatpush.bf16.msrb.mxu3 %v12319_v0  ;;  %v11795_v0 = vor.u32 %v16432_v52, %v11792_v53  ;;  %v12059_v52 = vor.u32 %v16498_v36, %v12056_v37  ;;  %v12012_v53 = vld [vmem:[%s26318_s7 + $0x624] sm:$0xf0]  ;;  %v16372_v36 = vld [vmem:[%s26318_s7 + $0x260] sm:$0xf0]  ;;  %v12238_v37 = vld [vmem:[%s26318_s7 + $0x7b8] sm:$0xf] }
 0x29c   :  { %2713 = vmatpush.bf16.msrb.mxu2 %v12143_v61  ;;  %2691 = vmatpush.bf16.msrb.mxu0 %v11263_v63  ;;  %v2474_v57 = vpop.f32.mrf.mxu0  ;;  %v11966_v61 = vld [vmem:[%s26318_s7 + $0x5a0] sm:$0xf]  ;;  %v11443_v63 = vor.u32 %v16344_v46, %v11440_v51  ;;  %v12364_v46 = vld [vmem:[%s26318_s7 + $0x8e4] sm:$0xf0]  ;;  %v16487_v51 = vld [vmem:[%s26318_s7 + $0x5fc] sm:$0xf] }
 0x29d   :  { %2704 = vmatpush.bf16.msrb.mxu1 %v11615_v21  ;;  %v11967_v13 = vor.u32 %v16481_v62, %v11966_v61  ;;  %v16322_v21 = vld [vmem:[%s26318_s7 + $0xd4] sm:$0xf]  ;;  %v16564_v61 = vld [vmem:[%s26318_s7 + $0x864] sm:$0xf]  ;;  %v12367_v62 = vor.u32 %v16575_v45, %v12364_v46  ;;  %v12239_v45 = vor.u32 %v16548_v40, %v12238_v37  ;;  %v16449_v46 = vld [vmem:[%s26318_s7 + $0x4c8] sm:$0xf0] }
 0x29e   :  { %12468 = vmatmul.msk.bf16.vlgmr.msrb.gmra.mxu3 %vm157_vm1, %v18326_v50  ;;  %v11358_v37 = vld [vmem:[%s26318_s7 + $0xd8] sm:$0xf] }
 0x29f   :  { %2736 = vmatpush.bf16.msra.mxu3 %v11575_v11  ;;  %2692 = vmatmul.bf16.vlgmr.msrb.gmra.mxu0 %v18320_v47  ;;  %v11748_v11 = vld [vmem:[%s26318_s7 + $0x414] sm:$0xf0] }
 0x2a0   :  { %2749 = vmatpush.bf16.msra.mxu0 %v11927_v12  ;;  %2714 = vmatpush.bf16.msrb.mxu2 %v12099_v24  ;;  %v12455_v12 = vor.u32 %v16597_v54, %v12452_v55  ;;  %v11751_v17 = vor.u32 %v16421_v6, %v11748_v11  ;;  %v11264_v54 = vld [vmem:[%s26318_s7 + $0x4c] sm:$0xf0]  ;;  %v16603_v6 = vld [vmem:[%s26318_s7 + $0x998] sm:$0x10]  ;;  %v12015_v11 = vor.u32 %v16487_v51, %v12012_v53  ;;  %v12414_v51 = vld [vmem:[%s26318_s7 + $0x918] sm:$0xf] }
 0x2a1   :  { %2762 = vmatpush.bf16.msra.mxu1 %v12279_v25  ;;  %v11352_v25 = vld [vmem:[%s26318_s7 + $0xfc] sm:$0xf0]  ;;  %v2459_v10 = vpop.f32.mrf.mxu3  ;;  %v12459_v27 = vor.u32 %v16603_v6, %v12458_v5  ;;  %v16361_v53 = vld [vmem:[%s26318_s7 + $0x208] sm:$0xf0]  ;;  %v16350_v5 = vld [vmem:[%s26318_s7 + $0x1b0] sm:$0xf0] }
 0x2a2   :  { %2705 = vmatmul.bf16.vlgmr.msrb.gmra.mxu1 %v18322_v48  ;;  %v2263_v24 = vand.u32 %v12455_v12, %v17990_v4  ;;  %v11355_v32 = vor.u32 %v16322_v21, %v11352_v25  ;;  %v16383_v12 = vld [vmem:[%s26318_s7 + $0x2b8] sm:$0xf0]  ;;  %v11931_v21 = vor.u32 %v16471_v3, %v11930_v1  ;;  %v11968_v25 = vld [vmem:[%s26318_s7 + $0x5cc] sm:$0xf0]  ;;  %v16581_v1 = vld [vmem:[%s26318_s7 + $0x8e8] sm:$0xf0] }
 0x2a3   :  { %2737 = vmatpush.bf16.msra.mxu3 %v11531_v29  ;;  %v16586_v29 = vld [vmem:[%s26318_s7 + $0x914] sm:$0xf]  ;;  %v12150_v6 = vld [vmem:[%s26318_s7 + $0x708] sm:$0xf]  ;;  %v11710_v40 = vld [vmem:[%s26318_s7 + $0x398] sm:$0xf] }
 0x2a4   :  { %2750 = vmatpush.bf16.msra.mxu0 %v11883_v30  ;;  %2715 = vmatpush.bf16.msrb.mxu2 %v12055_v7  ;;  %v12408_v30 = vld [vmem:[%s26318_s7 + $0x93c] sm:$0xf0]  ;;  %v2446_v7 = vpop.f32.mrf.mxu2 }
 0x2a5   :  { %2763 = vmatpush.bf16.msra.mxu1 %v12235_v42  ;;  %v12411_v42 = vor.u32 %v16586_v29, %v12408_v30 }
 0x2a7   :  { %2738 = vmatpush.bf16.msra.mxu3 %v11487_v43  ;;  %v11660_v43 = vld [vmem:[%s26318_s7 + $0x364] sm:$0xf0] }
 0x2a8   :  { %2751 = vmatpush.bf16.msra.mxu0 %v11839_v44  ;;  %2716 = vmatpush.bf16.msrb.mxu2 %v12011_v58  ;;  %v2447_v44 = vadd.f32 %v2446_v7, %v19548_v22  ;;  %v16300_v22 = vld [vmem:[%s26318_s7 + $0x24] sm:$0xf]  ;;  %v11663_v57 = vor.u32 %v16399_v9, %v11660_v43  ;;  %v2266_v9 = vand.u32 %v12459_v27, %v17990_v4  ;;  %v11490_v43 = vld [vmem:[%s26318_s7 + $0x1e0] sm:$0xf]  ;;  %v16339_v27 = vld [vmem:[%s26318_s7 + $0x158] sm:$0xf0] }
 0x2a9   :  { %2764 = vmatpush.bf16.msra.mxu1 %v12191_v60  ;;  %v16388_v58 = vld [vmem:[%s26318_s7 + $0x2e4] sm:$0xf]  ;;  %v11616_v60 = vld [vmem:[%s26318_s7 + $0x30c] sm:$0xf0]  ;;  %v2461_v28 = vpop.f32.mrf.mxu3 }
 0x2aa   :  { %v2460_v55 = vadd.f32 %v2459_v10, %v2447_v44  ;;  %v11842_v44 = vld [vmem:[%s26318_s7 + $0x4a0] sm:$0xf]  ;;  %v12106_v28 = vld [vmem:[%s26318_s7 + $0x6b0] sm:$0xf] }
 0x2ab   :  { %2739 = vmatpush.bf16.msra.mxu3 %v11443_v63  ;;  %v12320_v63 = vld [vmem:[%s26318_s7 + $0x88c] sm:$0xf0] }
 0x2ac   :  { %2752 = vmatpush.bf16.msra.mxu0 %v11795_v0  ;;  %2717 = vmatpush.bf16.msrb.mxu2 %v11967_v13  ;;  %v11578_v0 = vld [vmem:[%s26318_s7 + $0x290] sm:$0xf]  ;;  %v19716_v2 = vadd.f32 %v19550_v23, %v2460_v55  ;;  %v16559_v13 = vld [vmem:[%s26318_s7 + $0x838] sm:$0xf0]  ;;  %v2448_v19 = vpop.f32.mrf.mxu2  ;;  %v12323_v20 = vor.u32 %v16564_v61, %v12320_v63  ;;  %v11491_v61 = vor.u32 %v16361_v53, %v11490_v43  ;;  %v16438_v63 = vld [vmem:[%s26318_s7 + $0x470] sm:$0xf0] }
 0x2ad   :  { %2765 = vmatpush.bf16.msra.mxu1 %v12147_v15  ;;  %v12282_v23 = vld [vmem:[%s26318_s7 + $0x810] sm:$0xf]  ;;  %v11267_v15 = vor.u32 %v16300_v22, %v11264_v54  ;;  %v11579_v29 = vor.u32 %v16383_v12, %v11578_v0  ;;  %v12194_v22 = vld [vmem:[%s26318_s7 + $0x760] sm:$0xf]  ;;  %v16537_v54 = vld [vmem:[%s26318_s7 + $0x788] sm:$0xf0] }
 0x2ae   :  { %2842 = vrot.lane.b32.xlu2 %v19716_v2, %s17724_s29  ;;  %v12283_v30 = vor.u32 %v16559_v13, %v12282_v23  ;;  %v12370_v0 = vld [vmem:[%s26318_s7 + $0x8c0] sm:$0xf] }
 0x2af   :  { %2740 = vmatpush.bf16.msra.mxu3 %v11399_v16  ;;  %2718 = vmatmul.bf16.vlgmr.msrb.gmra.mxu2 %v18324_v49  ;;  %v11619_v16 = vor.u32 %v16388_v58, %v11616_v60  ;;  %v19763_v7 = vpop.f32.mrf.mxu1  ;;  %v11446_v58 = vld [vmem:[%s26318_s7 + $0x188] sm:$0xf]  ;;  %v12371_v13 = vor.u32 %v16581_v1, %v12370_v0  ;;  %v16482_v1 = vld [vmem:[%s26318_s7 + $0x5d0] sm:$0xf0] }
 0x2b0   :  { %2753 = vmatpush.bf16.msra.mxu0 %v11751_v17  ;;  %2779 = vmatpush.bf16.msra.mxu2 %v2263_v24  ;;  %v19736_v17 = vpop.f32.mrf.mxu0  ;;  %v16476_v24 = vld [vmem:[%s26318_s7 + $0x5a4] sm:$0xf]  ;;  %v11798_v60 = vld [vmem:[%s26318_s7 + $0x448] sm:$0xf]  ;;  %v11447_v19 = vor.u32 %v16350_v5, %v11446_v58 }
 0x2b1   :  { %2766 = vmatpush.bf16.msra.mxu1 %v12103_v31  ;;  %v11534_v31 = vld [vmem:[%s26318_s7 + $0x238] sm:$0xf]  ;;  %v2524_v3 = vpop.f32.mrf.mxu3  ;;  %v11799_v23 = vor.u32 %v16438_v63, %v11798_v60  ;;  %v11270_v60 = vld [vmem:[%s26318_s7 + $0x28] sm:$0xf]  ;;  %v16306_v63 = vld [vmem:[%s26318_s7 + $0x50] sm:$0xf0] }
 0x2b2   :  { %v11535_v10 = vor.u32 %v16372_v36, %v11534_v31  ;;  %v11974_v0 = vld [vmem:[%s26318_s7 + $0x5a8] sm:$0xf]  ;;  %v11271_v5 = vor.u32 %v16306_v63, %v11270_v60 }
 0x2b3   :  { %2741 = vmatpush.bf16.msra.mxu3 %v11355_v32  ;;  %v11886_v32 = vld [vmem:[%s26318_s7 + $0x4f8] sm:$0xf] }
 0x2b4   :  { %2754 = vmatpush.bf16.msra.mxu0 %v11707_v33  ;;  %2780 = vmatpush.bf16.msra.mxu2 %v12411_v42  ;;  %v16460_v33 = vld [vmem:[%s26318_s7 + $0x520] sm:$0xf0]  ;;  %v11971_v42 = vor.u32 %v16476_v24, %v11968_v25  ;;  %v12326_v24 = vld [vmem:[%s26318_s7 + $0x868] sm:$0xf]  ;;  %v16570_v25 = vld [vmem:[%s26318_s7 + $0x890] sm:$0xf0] }
 0x2b5   :  { %2767 = vmatpush.bf16.msra.mxu1 %v12059_v52  ;;  %v11887_v8 = vor.u32 %v16460_v33, %v11886_v32  ;;  %v16592_v52 = vld [vmem:[%s26318_s7 + $0x940] sm:$0xf0]  ;;  %v12327_v31 = vor.u32 %v16570_v25, %v12326_v24  ;;  %v19847_v32 = vadd.f32 %v19350_v14, %v19367_v26  ;;  %v12062_v26 = vld [vmem:[%s26318_s7 + $0x658] sm:$0xf] }
 0x2b6   :  { %2984 = vrot.lane.b32.xlu2 %v19257_v18, %s17725_s2  ;;  %v16328_v14 = vld [vmem:[%s26318_s7 + $0x100] sm:$0xf0] }
 0x2b7   :  { %2742 = vmatpush.bf16.msra.mxu3 %v11311_v56  ;;  %v11843_v56 = vor.u32 %v16449_v46, %v11842_v44  ;;  %v2500_v12 = vpop.f32.mrf.mxu1  ;;  %v2499_v44 = vadd.f32 %v19763_v7, %v19736_v17  ;;  %v11314_v46 = vld [vmem:[%s26318_s7 + $0x80] sm:$0xf]  ;;  %v16317_v17 = vld [vmem:[%s26318_s7 + $0xa8] sm:$0xf0] }
 0x2b8   :  { %2755 = vmatpush.bf16.msra.mxu0 %v11663_v57  ;;  %2781 = vmatpush.bf16.msra.mxu2 %v12367_v62  ;;  %v2487_v55 = vpop.f32.mrf.mxu0  ;;  %v12415_v57 = vor.u32 %v16592_v52, %v12414_v51  ;;  %v12195_v62 = vor.u32 %v16537_v54, %v12194_v22  ;;  %v11666_v51 = vld [vmem:[%s26318_s7 + $0x340] sm:$0xf]  ;;  %v16405_v52 = vld [vmem:[%s26318_s7 + $0x368] sm:$0xf0] }
 0x2b9   :  { %2768 = vmatpush.bf16.msra.mxu1 %v12015_v11  ;;  %v16526_v11 = vld [vmem:[%s26318_s7 + $0x730] sm:$0xf0]  ;;  %v12018_v7 = vld [vmem:[%s26318_s7 + $0x600] sm:$0xf]  ;;  %v16493_v22 = vld [vmem:[%s26318_s7 + $0x628] sm:$0xf0]  ;;  %v11667_v55 = vor.u32 %v16405_v52, %v11666_v51 }
 0x2ba   :  { %v12019_v58 = vor.u32 %v16493_v22, %v12018_v7 }
 0x2bb   :  { %2743 = vmatpush.bf16.msra.mxu3 %v11267_v15  ;;  %v11402_v15 = vld [vmem:[%s26318_s7 + $0x130] sm:$0xf] }
 0x2bc   :  { %2756 = vmatpush.bf16.msra.mxu0 %v11619_v16  ;;  %2782 = vmatpush.bf16.msra.mxu2 %v12323_v20  ;;  %v11754_v16 = vld [vmem:[%s26318_s7 + $0x3f0] sm:$0xf]  ;;  %v12151_v20 = vor.u32 %v16526_v11, %v12150_v6  ;;  %v11403_v33 = vor.u32 %v16339_v27, %v11402_v15  ;;  %v11975_v6 = vor.u32 %v16482_v1, %v11974_v0 }
 0x2bd   :  { %2769 = vmatpush.bf16.msra.mxu1 %v11971_v42  ;;  %v16416_v42 = vld [vmem:[%s26318_s7 + $0x3c0] sm:$0xf0] }
 0x2be   :  { %2744 = vmatmul.bf16.vlgmr.msra.gmra.mxu3 %v18320_v47  ;;  %2986 = vrot.lane.b32.xlu2 %v19847_v32, %s17725_s2  ;;  %v11711_v43 = vor.u32 %v16416_v42, %v11710_v40  ;;  %s17726_s2 = smov 22  }
 0x2bf   :  { %2801 = vmatpush.bf16.msrb.mxu3 %v11931_v21  ;;  %2757 = vmatmul.bf16.vlgmr.msra.gmra.mxu0 %v18322_v48  ;;  %v16427_v21 = vld [vmem:[%s26318_s7 + $0x418] sm:$0xf0] }
 0x2c0   :  { %2788 = vmatpush.bf16.msrb.mxu2 %v11579_v29  ;;  %2814 = vmatpush.bf16.msrb.mxu0 %v12283_v30  ;;  %v16515_v29 = vld [vmem:[%s26318_s7 + $0x6d8] sm:$0xf0]  ;;  %v11755_v30 = vor.u32 %v16427_v21, %v11754_v16 }
 0x2c1   :  { %2831 = vmatpush.bf16.msrb.mxu1 %v2266_v9  ;;  %12469 = vmatmul.msk.bf16.vlgmr.msra.gmra.mxu2 %vm157_vm1, %v18326_v50  ;;  %v12107_v36 = vor.u32 %v16515_v29, %v12106_v28  ;;  %v16504_v9 = vld [vmem:[%s26318_s7 + $0x680] sm:$0xf0] }
 0x2c2   :  { %2770 = vmatmul.bf16.vlgmr.msra.gmra.mxu1 %v18324_v49  ;;  %v2511_v53 = vpop.f32.mrf.mxu2 }
 0x2c3   :  { %2802 = vmatpush.bf16.msrb.mxu3 %v11887_v8  ;;  %v2526_v8 = vpop.f32.mrf.mxu3  ;;  %v2512_v54 = vadd.f32 %v2511_v53, %v2499_v44 }
 0x2c4   :  { %2789 = vmatpush.bf16.msrb.mxu2 %v11535_v10  ;;  %2815 = vmatpush.bf16.msrb.mxu0 %v12239_v45  ;;  %v11359_v10 = vor.u32 %v16328_v14, %v11358_v37  ;;  %v12063_v45 = vor.u32 %v16504_v9, %v12062_v26 }
 0x2c5   :  { %2832 = vmatpush.bf16.msrb.mxu1 %v12415_v57  ;;  %v11315_v57 = vor.u32 %v16317_v17, %v11314_v46 }
 0x2c6   :  { %2916 = vrot.lane.b32.xlu2 %v19716_v2, %s17726_s2 }
 0x2c7   :  { %2803 = vmatpush.bf16.msrb.mxu3 %v11843_v56  ;;  %v2525_v56 = vadd.f32 %v2524_v3, %v2512_v54 }
 0x2c8   :  { %2790 = vmatpush.bf16.msrb.mxu2 %v11491_v61  ;;  %2816 = vmatpush.bf16.msrb.mxu0 %v12195_v62  ;;  %v11622_v61 = vld [vmem:[%s26318_s7 + $0x2e8] sm:$0xf]  ;;  %v16394_v62 = vld [vmem:[%s26318_s7 + $0x310] sm:$0xf0]  ;;  %s17729_s7 = smov 3  }
 0x2c9   :  { %2833 = vmatpush.bf16.msrb.mxu1 %v12371_v13  ;;  %2918 = vrot.lane.b32.xlu1 %v2525_v56, %s17726_s2  ;;  %s17745_s2 = smov 55  }
 0x2ca   :  { %3060 = vrot.lane.b32.xlu0 %v2525_v56, %s17727_s20  ;;  %v2513_v11 = vpop.f32.mrf.mxu2  ;;  %s17746_s20 = smov 123  }
 0x2cb   :  { %2804 = vmatpush.bf16.msrb.mxu3 %v11799_v23 }
 0x2cc   :  { %2791 = vmatpush.bf16.msrb.mxu2 %v11447_v19  ;;  %2817 = vmatpush.bf16.msrb.mxu0 %v12151_v20  ;;  %v2550_v3 = vpop.f32.mrf.mxu0 }
 0x2cd   :  { %2834 = vmatpush.bf16.msrb.mxu1 %v12327_v31 }
 0x2ce   :  { %2990 = vrot.lane.b32.xlu2 %v2525_v56, %s17728_s21  ;;  %s17747_s21 = smov 104  }
 0x2cf   :  { %2805 = vmatpush.bf16.msrb.mxu3 %v11755_v30  ;;  %v2563_v12 = vpop.f32.mrf.mxu1 }
 0x2d0   :  { %2792 = vmatpush.bf16.msrb.mxu2 %v11403_v33  ;;  %2818 = vmatpush.bf16.msrb.mxu0 %v12107_v36 }
 0x2d1   :  { %v2537_v23 = vpop.f32.mrf.mxu3 }
 0x2d2   :  { %12470 = vmatmul.msk.bf16.vlgmr.msrb.gmra.mxu1 %vm157_vm1, %v18326_v50  ;;  %v11623_v50 = vor.u32 %v16394_v62, %v11622_v61  ;;  %v2551_v13 = vadd.f32 %v2550_v3, %v2537_v23  ;;  %3126 = vrot.lane.b32.xlu0 %v2525_v56, %s17729_s7 }
 0x2d3   :  { %2806 = vmatpush.bf16.msrb.mxu3 %v11711_v43 }
 0x2d4   :  { %2793 = vmatpush.bf16.msrb.mxu2 %v11359_v10  ;;  %2819 = vmatpush.bf16.msrb.mxu0 %v12063_v45  ;;  %v2552_v15 = vpop.f32.mrf.mxu0  ;;  %v2564_v16 = vadd.f32 %v2563_v12, %v2551_v13  ;;  %v2576_v19 = vpop.f32.mrf.mxu2 }
 0x2d6   :  { %v2577_v20 = vadd.f32 %v2576_v19, %v2564_v16  ;;  %3058 = vrot.lane.b32.xlu2 %v19847_v32, %s17730_s22  ;;  %s17749_s22 = smov 117  }
 0x2d7   :  { %2807 = vmatpush.bf16.msrb.mxu3 %v11667_v55  ;;  %v2565_v21 = vpop.f32.mrf.mxu1 }
 0x2d8   :  { %2794 = vmatpush.bf16.msrb.mxu2 %v11315_v57  ;;  %2820 = vmatpush.bf16.msrb.mxu0 %v12019_v58  ;;  %v2914_v3 = vpop.permute.xlu1 %2913 }
 0x2d9   :  { %v2539_v24 = vpop.f32.mrf.mxu3 }
 0x2da   :  { %3270 = vrot.lane.b32.xlu0 %v2577_v20, %s17731_s23 }
 0x2db   :  { %2808 = vmatpush.bf16.msrb.mxu3 %v11623_v50 }
 0x2dc   :  { %2795 = vmatpush.bf16.msrb.mxu2 %v11271_v5  ;;  %2821 = vmatpush.bf16.msrb.mxu0 %v11975_v6 }
 0x2de   :  { %2809 = vmatmul.bf16.vlgmr.msrb.gmra.mxu3 %v18322_v48  ;;  %v2578_v48 = vpop.f32.mrf.mxu2  ;;  %3128 = vrot.lane.b32.xlu2 %v2577_v20, %s17729_s7  ;;  %s17748_s7 = smov 25  }
 0x2df   :  { %2796 = vmatmul.bf16.vlgmr.msrb.gmra.mxu2 %v18320_v47  ;;  %2822 = vmatmul.bf16.vlgmr.msrb.gmra.mxu0 %v18324_v49  ;;  %v2628_v25 = vpop.f32.mrf.mxu1 }
 0x2e7   :  { %v2630_v47 = vpop.f32.mrf.mxu1 }
 0x2ee   :  { %v2615_v49 = vpop.f32.mrf.mxu0 }
 0x2f1   :  { %v2602_v28 = vpop.f32.mrf.mxu3 }
 0x2f2   :  { %v2589_v27 = vpop.f32.mrf.mxu2 }
 0x2f3   :  { %v2603_v29 = vadd.f32 %v2602_v28, %v2589_v27 }
 0x2f5   :  { %v2616_v31 = vadd.f32 %v2615_v49, %v2603_v29 }
 0x2f6   :  { %v2617_v30 = vpop.f32.mrf.mxu0 }
 0x2f7   :  { %v19914_v33 = vadd.f32 %v2628_v25, %v2616_v31 }
 0x2f9   :  { %3408 = vrot.lane.b32.xlu0 %v19914_v33, %s17732_s24  ;;  %3272 = vrot.lane.b32.xlu2 %v19914_v33, %s17731_s23  ;;  %v2604_v37 = vpop.f32.mrf.mxu3  ;;  %s17750_s23 = smov 19   ;;  %s17751_s24 = smov 49  }
 0x2fa   :  { %v2591_v36 = vpop.f32.mrf.mxu2 }
 0x2fe   :  { %v2680_v42 = vpop.f32.mrf.mxu0 }
 0x2ff   :  { %v2641_v40 = vpop.f32.mrf.mxu1 }
 0x301   :  { %3194 = vrot.lane.b32.xlu0 %v19847_v32, %s17733_s25  ;;  %3200 = vrot.lane.b32.xlu2 %v2577_v20, %s17734_s3  ;;  %s17753_s3 = smov 87  }
 0x306   :  { %v2682_v14 = vpop.f32.mrf.mxu0 }
 0x307   :  { %v2643_v8 = vpop.f32.mrf.mxu1 }
 0x308   :  { %v2843_v26 = vpop.permute.xlu2 %2842 }
 0x309   :  { %3337 = vrot.lane.b32.xlu0 %v19516_v59, %s17735_s4  ;;  %3196 = vrot.lane.b32.xlu2 %v19516_v59, %s17733_s25  ;;  %s17752_s25 = smov 8  }
 0x30a   :  { %12471 = vmatpush.xpose.msk.msra.mxu3 %vm2844_vm11, %v2843_v26 }
 0x30d   :  { %12472 = vmatmul.msk.f32.vlgmr.msra.gmra.mxu3 %vm2844_vm11, %v19257_v18 }
 0x310   :  { %v2985_v46 = vpop.permute.xlu2 %2984 }
 0x311   :  { %v2667_v43 = vpop.f32.mrf.mxu3  ;;  %3339 = vrot.lane.b32.xlu2 %v19716_v2, %s17735_s4  ;;  %s17754_s4 = smov 38  }
 0x312   :  { %v2654_v9 = vpop.f32.mrf.mxu2 }
 0x313   :  { %v2655_v44 = vadd.f32 %v2654_v9, %v2641_v40 }
 0x315   :  { %v2668_v10 = vadd.f32 %v2667_v43, %v2655_v44 }
 0x317   :  { %v19925_v45 = vadd.f32 %v2680_v42, %v2668_v10 }
 0x318   :  { %v2987_v54 = vpop.permute.xlu2 %2986 }
 0x319   :  { %v17587_v51 = vpack.i.bf16 %v19925_v45, %v19914_v33  ;;  %v2669_v17 = vpop.f32.mrf.mxu3  ;;  %v19929_v18 = vsel %vm2988_vm12, %v2985_v46, %v2987_v54  ;;  %vm3515_vm12 = vcmask 957440  }
 0x31a   :  { %v2656_v53 = vpop.f32.mrf.mxu2 }
 0x31b   :  { %17588 = vrot.lane.b32.xlu1 %v17587_v51, %s17736_s27  ;;  %s17755_s27 = smov 98  }
 0x31c   :  { %v2693_v52 = vpop.f32.mrf.mxu0 }
 0x31f   :  { %v2706_v7 = vpop.f32.mrf.mxu1 }
 0x320   :  { %v2707_v22 = vadd.f32 %v2706_v7, %v2693_v52  ;;  %v2917_v60 = vpop.permute.xlu2 %2916 }
 0x321   :  { %v2732_v56 = vpop.f32.mrf.mxu3 }
 0x324   :  { %v2695_v55 = vpop.f32.mrf.mxu0 }
 0x325   :  { %v19955_v55 = vld [vmem:[%s26321_s10] sm:$0xff]  ;;  %s17738_s10 = smov 90  }
 0x327   :  { %v2708_v57 = vpop.f32.mrf.mxu1 }
 0x328   :  { %v2991_v0 = vpop.permute.xlu2 %2990 }
 0x329   :  { %v2734_v58 = vpop.f32.mrf.mxu3 }
 0x330   :  { %v19933_v23 = vpop.permute.xlu2 %3058 }
 0x332   :  { %v2719_v61 = vpop.f32.mrf.mxu2 }
 0x333   :  { %v2720_v62 = vadd.f32 %v2719_v61, %v2707_v22 }
 0x335   :  { %v19931_v63 = vadd.f32 %v2732_v56, %v2720_v62 }
 0x338   :  { %v3129_v47 = vpop.permute.xlu2 %3128 }
 0x33a   :  { %v2721_v50 = vpop.f32.mrf.mxu2 }
 0x33b   :  { %v2919_v19 = vpop.permute.xlu1 %2918 }
 0x33c   :  { %v2758_v1 = vpop.f32.mrf.mxu0  ;;  %v19937_v20 = vpop.permute.xlu0 %3060  ;;  %v2921_v24 = vsel %vm2920_vm13, %v2917_v60, %v2919_v19 }
 0x33d   :  { %12474 = vmatpush.xpose.msk.msrb.mxu3 %vm2844_vm11, %v2921_v24 }
 0x33f   :  { %v2771_v5 = vpop.f32.mrf.mxu1 }
 0x340   :  { %12475 = vmatmul.msk.f32.vlgmr.msrb.gmra.mxu3 %vm2844_vm11, %v2914_v3 }
 0x341   :  { %v2745_v6 = vpop.f32.mrf.mxu3 }
 0x342   :  { %v2759_v11 = vadd.f32 %v2758_v1, %v2745_v6 }
 0x344   :  { %v2760_v12 = vpop.f32.mrf.mxu0  ;;  %v2772_v13 = vadd.f32 %v2771_v5, %v2759_v11  ;;  %v2784_v15 = vpop.f32.mrf.mxu2 }
 0x345   :  { %v3127_v27 = vpop.permute.xlu0 %3126 }
 0x346   :  { %v19935_v16 = vadd.f32 %v2784_v15, %v2772_v13  ;;  %v19941_v28 = vsel %vm3130_vm14, %v3127_v27, %v3129_v47 }
 0x347   :  { %v2773_v21 = vpop.f32.mrf.mxu1 }
 0x349   :  { %v2747_v48 = vpop.f32.mrf.mxu3 }
 0x34c   :  { %v2786_v25 = vpop.f32.mrf.mxu2 }
 0x34d   :  { %v3271_v31 = vpop.permute.xlu0 %3270 }
 0x34f   :  { %v2836_v49 = vpop.f32.mrf.mxu1 }
 0x353   :  { %v3273_v36 = vpop.permute.xlu2 %3272 }
 0x354   :  { %v19943_v37 = vsel %vm3274_vm15, %v3271_v31, %v3273_v36 }
 0x357   :  { %v2838_v29 = vpop.f32.mrf.mxu1 }
 0x35b   :  { %v3201_v9 = vpop.permute.xlu2 %3200 }
 0x35c   :  { %v2823_v30 = vpop.f32.mrf.mxu0  ;;  %12486 = vmatpush.xpose.msk.msra.mxu0 %vm2844_vm11, %v3201_v9 }
 0x361   :  { %v2810_v40 = vpop.f32.mrf.mxu3 }
 0x362   :  { %v2797_v42 = vpop.f32.mrf.mxu2 }
 0x363   :  { %v2811_v8 = vadd.f32 %v2810_v40, %v2797_v42  ;;  %v3197_v51 = vpop.permute.xlu2 %3196 }
 0x364   :  { %v2825_v14 = vpop.f32.mrf.mxu0 }
 0x365   :  { %v2824_v26 = vadd.f32 %v2823_v30, %v2811_v8 }
 0x367   :  { %v19946_v43 = vadd.f32 %v2836_v49, %v2824_v26 }
 0x369   :  { %v2812_v44 = vpop.f32.mrf.mxu3 }
 0x36a   :  { %v2799_v10 = vpop.f32.mrf.mxu2 }
 0x36b   :  { %v19948_v46 = vpop.permute.xlu0 %3408 }
 0x373   :  { %v3195_v52 = vpop.permute.xlu0 %3194 }
 0x374   :  { %v3199_v53 = vsel %vm3198_vm2, %v3195_v52, %v3197_v51  ;;  %vm10455_vm2 = vcmask 1041408  }
 0x375   :  { %12487 = vmatmul.msk.f32.vlgmr.msra.gmra.mxu0 %vm2844_vm11, %v3199_v53 }
 0x37b   :  { %v3338_v12 = vpop.permute.xlu0 %3337 }
 0x38d   :  { %v17589_v17 = vpop.permute.xlu1 %17588 }
 0x38e   :  { %v17591_v7 = vunpack.i.h.bf16 %v17589_v17  ;;  %v17590_v22 = vunpack.i.l.bf16 %v17589_v17 }
 0x390   :  { %v2888_v54 = vsel %vm2887_vm3, %v17590_v22, %v17591_v7  ;;  %v2867_v56 = vpop.f32.mrf.mxu3  ;;  %vm10451_vm3 = vcmask 818176  }
 0x391   :  { %2908 = vmatpush.msra.mxu2 %v2888_v54  ;;  %v2868_v57 = vadd.f32 %v2867_v56, %v19955_v55 }
 0x393   :  { %12477 = vmatpush.xpose.msk.msrb.mxu2 %vm2844_vm11, %v2991_v0  ;;  %v2870_v58 = vsel %vm69_vm0, %v2868_v57, -inf }
 0x394   :  { %2871 = vmax.xlane.f32.xlu1 %v2870_v58 }
 0x3ad   :  { %3123 = vrot.lane.b32.xlu1 %v19847_v32, %s17737_s0 }
 0x3c3   :  { %v2943_v60 = vpop.f32.mrf.mxu3 }
 0x3c4   :  { %v2944_v61 = vadd.f32 %v2943_v60, %v19955_v55 }
 0x3c6   :  { %v2946_v62 = vsel %vm69_vm0, %v2944_v61, -inf }
 0x3c7   :  { %2947 = vmax.xlane.f32.xlu0 %v2946_v62 }
 0x3f2   :  { %v3223_v0 = vpop.f32.mrf.mxu0 }
 0x3f3   :  { %v19963_v1 = vadd.f32 %v3223_v0, %v19955_v55 }
 0x3f5   :  { %v3226_v50 = vsel %vm69_vm0, %v19963_v1, -inf }
 0x3f6   :  { %3227 = vmax.xlane.f32.xlu2 %v3226_v50 }
 0x407   :  { %v2872_v3 = vpop.xlane.xlu1 %2871 }
 0x408   :  { %v2873_v5 = vsub.f32 %v2868_v57, %v2872_v3  ;;  %v17602_v57 = vpack.i.bf16 %v19946_v43, %v19935_v16 }
 0x40a   :  { %v2874_v6 = vmul.f32 1.442695, %v2873_v5 }
 0x40c   :  { %17621 = vpow2.f32 %v2874_v6 }
 0x412   :  { %v17622_v11 = vpop.eup %17621 }
 0x413   :  { %v2876_v32 = vsel %vm69_vm0, %v17622_v11, 0.0 }
 0x414   :  { %2877 = vadd.xlane.f32.xlu1 %v2876_v32 }
 0x41f   :  { %v3124_v48 = vpop.permute.xlu1 %3123 }
 0x42d   :  { %3268 = vrot.lane.b32.xlu1 %v19516_v59, %s17738_s10 }
 0x435   :  { %3406 = vrot.lane.b32.xlu1 %v19716_v2, %s17739_s30 }
 0x43a   :  { %v2948_v13 = vpop.xlane.xlu0 %2947 }
 0x43b   :  { %v2949_v15 = vsub.f32 %v2944_v61, %v2948_v13 }
 0x43d   :  { %3343 = vrot.lane.b32.xlu1 %v19914_v33, %s17740_s5  ;;  %v2950_v19 = vmul.f32 1.442695, %v2949_v15 }
 0x43f   :  { %17623 = vpow2.f32 %v2950_v19 }
 0x445   :  { %v19971_v21 = vpop.eup %17623 }
 0x446   :  { %v2952_v24 = vsel %vm69_vm0, %v19971_v21, 0.0 }
 0x467   :  { %2953 = vadd.xlane.f32.xlu1 %v2952_v24 }
 0x487   :  { %v2878_v25 = vpop.xlane.xlu1 %2877 }
 0x488   :  { %17625 = vrcp.f32 %v2878_v25 }
 0x48e   :  { %v17626_v59 = vpop.eup %17625 }
 0x48f   :  { %v2880_v47 = vmul.f32 %v17626_v59, %v17622_v11 }
 0x491   :  { %12473 = vmatmul.msk.f32.vlgmr.msra.gmra.mxu2 %vm69_vm0, %v2880_v47 }
 0x492   :  { %12480 = vmatpush.xpose.msk.msra.mxu2 %vm2844_vm11, %v19937_v20 }
 0x499   :  { %12478 = vmatmul.msk.f32.vlgmr.msrb.gmra.mxu2 %vm2844_vm11, %v19929_v18  ;;  %v3340_v18 = vpop.permute.xlu2 %3339 }
 0x49a   :  { %12483 = vmatpush.xpose.msk.msrb.mxu2 %vm2844_vm11, %v19941_v28  ;;  %v3342_v49 = vsel %vm3341_vm4, %v3338_v12, %v3340_v18 }
 0x49f   :  { %v3269_v2 = vpop.permute.xlu1 %3268 }
 0x4a1   :  { %12481 = vmatmul.msk.f32.vlgmr.msra.gmra.mxu2 %vm2844_vm11, %v19933_v23  ;;  %v3228_v52 = vpop.xlane.xlu2 %3227 }
 0x4a2   :  { %12489 = vmatpush.xpose.msk.msra.mxu2 %vm2844_vm11, %v19943_v37  ;;  %v3229_v17 = vsub.f32 %v19963_v1, %v3228_v52 }
 0x4a4   :  { %v3230_v22 = vmul.f32 1.442695, %v3229_v17 }
 0x4a6   :  { %17627 = vpow2.f32 %v3230_v22 }
 0x4a7   :  { %v3407_v33 = vpop.permute.xlu1 %3406 }
 0x4a9   :  { %12484 = vmatmul.msk.f32.vlgmr.msrb.gmra.mxu2 %vm2844_vm11, %v3124_v48 }
 0x4aa   :  { %12495 = vmatpush.xpose.msk.msrb.mxu2 %vm2844_vm11, %v19948_v46  ;;  %v17592_v46 = vpack.i.bf16 %v19931_v63, %v19925_v45 }
 0x4ac   :  { %v20018_v54 = vpop.eup %17627 }
 0x4af   :  { %v3344_v20 = vpop.permute.xlu1 %3343 }
 0x4b0   :  { %12492 = vmatpush.xpose.msk.msrb.mxu0 %vm2844_vm11, %v3344_v20 }
 0x4b1   :  { %12490 = vmatmul.msk.f32.vlgmr.msra.gmra.mxu2 %vm2844_vm11, %v3269_v2 }
 0x4b3   :  { %12493 = vmatmul.msk.f32.vlgmr.msrb.gmra.mxu0 %vm2844_vm11, %v3342_v49 }
 0x4b9   :  { %12496 = vmatmul.msk.f32.vlgmr.msrb.gmra.mxu2 %vm2844_vm11, %v3407_v33 }
 0x4da   :  { %v2954_v56 = vpop.xlane.xlu1 %2953 }
 0x514   :  { %v19993_v23 = vpop.f32.mrf.mxu2 }
 0x51c   :  { %v3013_v27 = vpop.f32.mrf.mxu2 }
 0x51d   :  { %v3014_v28 = vadd.f32 %v3013_v27, %v19955_v55  ;;  %v17597_v27 = vpack.i.bf16 %v19935_v16, %v19931_v63 }
 0x51f   :  { %v3016_v29 = vsel %vm69_vm0, %v3014_v28, -inf }
 0x520   :  { %3017 = vmax.xlane.f32.xlu1 %v3016_v29 }
 0x524   :  { %v3083_v30 = vpop.f32.mrf.mxu2 }
 0x525   :  { %v3084_v31 = vadd.f32 %v3083_v30, %v19955_v55 }
 0x527   :  { %v3086_v36 = vsel %vm69_vm0, %v3084_v31, -inf }
 0x528   :  { %3087 = vmax.xlane.f32.xlu1 %v3086_v36 }
 0x52c   :  { %v3153_v37 = vpop.f32.mrf.mxu2 }
 0x52d   :  { %v3154_v40 = vadd.f32 %v3153_v37, %v19955_v55 }
 0x52f   :  { %v3156_v42 = vsel %vm69_vm0, %v3154_v40, -inf }
 0x530   :  { %3157 = vmax.xlane.f32.xlu2 %v3156_v42  ;;  %v3366_v8 = vpop.f32.mrf.mxu0 }
 0x531   :  { %v20002_v14 = vadd.f32 %v3366_v8, %v19955_v55 }
 0x533   :  { %v3369_v26 = vsel %vm69_vm0, %v20002_v14, -inf }
 0x534   :  { %v3297_v9 = vpop.f32.mrf.mxu2  ;;  %3370 = vmax.xlane.f32.xlu0 %v3369_v26 }
 0x535   :  { %v3298_v44 = vadd.f32 %v3297_v9, %v19955_v55 }
 0x537   :  { %v3300_v10 = vsel %vm69_vm0, %v3298_v44, -inf }
 0x53c   :  { %3301 = vmax.xlane.f32.xlu0 %v3300_v10  ;;  %v3431_v51 = vpop.f32.mrf.mxu2 }
 0x53d   :  { %v20013_v53 = vadd.f32 %v3431_v51, %v19955_v55 }
 0x53f   :  { %v3434_v7 = vsel %vm69_vm0, %v20013_v53, -inf }
 0x541   :  { %3167 = vrot.lane.b32.xlu1 %v19931_v63, %s17741_s6 }
 0x548   :  { %2957 = vrot.lane.b32.xlu2 %v19925_v45, %s17742_s18  ;;  %v3232_v45 = vsel %vm69_vm0, %v20018_v54, 0.0 }
 0x550   :  { %17593 = vrot.lane.b32.xlu0 %v17592_v46, %s17743_s19 }
 0x56b   :  { %3435 = vmax.xlane.f32.xlu1 %v3434_v7 }
 0x57a   :  { %3233 = vadd.xlane.f32.xlu0 %v3232_v45 }
 0x58e   :  { %17603 = vrot.lane.b32.xlu0 %v17602_v57, %s17744_s1 }
 0x593   :  { %v3018_v55 = vpop.xlane.xlu1 %3017 }
 0x594   :  { %v3019_v58 = vsub.f32 %v3014_v28, %v3018_v55 }
 0x596   :  { %v3020_v60 = vmul.f32 1.442695, %v3019_v58  ;;  %3380 = vrot.lane.b32.xlu0 %v19935_v16, %s17745_s2 }
 0x598   :  { %17629 = vpow2.f32 %v3020_v60 }
 0x59b   :  { %v3088_v61 = vpop.xlane.xlu1 %3087 }
 0x59c   :  { %v3089_v62 = vsub.f32 %v3084_v31, %v3088_v61 }
 0x59e   :  { %v17630_v0 = vpop.eup %17629  ;;  %v3090_v1 = vmul.f32 1.442695, %v3089_v62 }
 0x59f   :  { %v3022_v50 = vsel %vm69_vm0, %v17630_v0, 0.0 }
 0x5a0   :  { %17631 = vpow2.f32 %v3090_v1  ;;  %3023 = vadd.xlane.f32.xlu2 %v3022_v50 }
 0x5a1   :  { %17633 = vrcp.f32 %v2954_v56 }
 0x5a3   :  { %v3158_v3 = vpop.xlane.xlu2 %3157 }
 0x5a4   :  { %v3159_v43 = vsub.f32 %v3154_v40, %v3158_v3 }
 0x5a6   :  { %v17632_v5 = vpop.eup %17631  ;;  %v3160_v6 = vmul.f32 1.442695, %v3159_v43 }
 0x5a7   :  { %v3371_v11 = vpop.xlane.xlu0 %3370  ;;  %v3092_v32 = vsel %vm69_vm0, %v17632_v5, 0.0  ;;  %v17634_v12 = vpop.eup %17633 }
 0x5a8   :  { %17635 = vpow2.f32 %v3160_v6  ;;  %3093 = vadd.xlane.f32.xlu1 %v3092_v32  ;;  %v2956_v13 = vmul.f32 %v17634_v12, %v19971_v21  ;;  %v3372_v37 = vsub.f32 %v20002_v14, %v3371_v11 }
 0x5aa   :  { %v3373_v40 = vmul.f32 1.442695, %v3372_v37  ;;  %v12868_v37 = vld [vmem:[%s26319_s8 + $0x2e0] sm:$0xf] }
 0x5ab   :  { %v2958_v15 = vpop.permute.xlu2 %2957 }
 0x5ac   :  { %2978 = vmatpush.msra.mxu1 %v2958_v15 }
 0x5ad   :  { %12476 = vmatmul.msk.f32.vlgmr.msra.gmra.mxu1 %vm69_vm0, %v2956_v13 }
 0x5ae   :  { %v17636_v19 = vpop.eup %17635 }
 0x5af   :  { %v3302_v24 = vpop.xlane.xlu0 %3301  ;;  %v3162_v48 = vsel %vm69_vm0, %v17636_v19, 0.0 }
 0x5b0   :  { %v3303_v25 = vsub.f32 %v3298_v44, %v3302_v24  ;;  %3163 = vadd.xlane.f32.xlu2 %v3162_v48 }
 0x5b2   :  { %v3304_v59 = vmul.f32 1.442695, %v3303_v25 }
 0x5b3   :  { %v3168_v49 = vpop.permute.xlu1 %3167 }
 0x5b4   :  { %17637 = vpow2.f32 %v3304_v59 }
 0x5ba   :  { %v17638_v47 = vpop.eup %17637 }
 0x5bb   :  { %v3306_v2 = vsel %vm69_vm0, %v17638_v47, 0.0 }
 0x5bc   :  { %3307 = vadd.xlane.f32.xlu1 %v3306_v2  ;;  %v16714_v2 = vld [vmem:[%s26319_s8 + $0x36c] sm:$0x10] }
 0x5c2   :  { %v17594_v33 = vpop.permute.xlu0 %17593 }
 0x5c3   :  { %v17596_v20 = vunpack.i.h.bf16 %v17594_v33  ;;  %v17595_v21 = vunpack.i.l.bf16 %v17594_v33  ;;  %v12612_v33 = vld [vmem:[%s26319_s8 + $0xe0] sm:$0xf] }
 0x5c5   :  { %v3033_v18 = vsel %vm3032_vm5, %v17595_v21, %v17596_v20  ;;  %v16634_v21 = vld [vmem:[%s26319_s8 + $0xec] sm:$0xf0] }
 0x5c6   :  { %3053 = vmatpush.msra.mxu3 %v3033_v18  ;;  %v12916_v18 = vld [vmem:[%s26319_s8 + $0x340] sm:$0xf] }
 0x5c8   :  { %3188 = vmatpush.msrb.mxu3 %v3168_v49  ;;  %3097 = vrot.lane.b32.xlu2 %v19931_v63, %s17746_s20  ;;  %v12613_v49 = vor.u32 %v16634_v21, %v12612_v33  ;;  %v12516_v21 = vld [vmem:[%s26319_s8 + $0x20] sm:$0xf] }
 0x5ca   :  { %4209 = vmatpush.bf16.msra.mxu0 %v12613_v49  ;;  %v12692_v49 = vld [vmem:[%s26319_s8 + $0x180] sm:$0xf] }
 0x5d5   :  { %3311 = vrot.lane.b32.xlu1 %v19935_v16, %s17747_s21 }
 0x5dd   :  { %17598 = vrot.lane.b32.xlu1 %v17597_v27, %s17748_s7  ;;  %v16710_v27 = vld [vmem:[%s26319_s8 + $0x34c] sm:$0xf0] }
 0x5de   :  { %v3436_v28 = vpop.xlane.xlu1 %3435 }
 0x5df   :  { %v3437_v29 = vsub.f32 %v20013_v53, %v3436_v28  ;;  %v12596_v28 = vld [vmem:[%s26319_s8 + $0xc0] sm:$0xf] }
 0x5e1   :  { %v3438_v30 = vmul.f32 1.442695, %v3437_v29  ;;  %v16630_v29 = vld [vmem:[%s26319_s8 + $0xcc] sm:$0xf0] }
 0x5e3   :  { %17639 = vpow2.f32 %v3438_v30 }
 0x5e4   :  { %17641 = vpow2.f32 %v3373_v40  ;;  %v16698_v40 = vld [vmem:[%s26319_s8 + $0x2ec] sm:$0xf0] }
 0x5e9   :  { %v17640_v31 = vpop.eup %17639 }
 0x5ea   :  { %v3440_v36 = vsel %vm69_vm0, %v17640_v31, 0.0  ;;  %v17642_v42 = vpop.eup %17641 }
 0x5eb   :  { %v3375_v8 = vsel %vm69_vm0, %v17642_v42, 0.0 }
 0x5ed   :  { %v3234_v53 = vpop.xlane.xlu0 %3233 }
 0x5f1   :  { %3441 = vadd.xlane.f32.xlu2 %v3440_v36  ;;  %v12900_v36 = vld [vmem:[%s26319_s8 + $0x320] sm:$0xf] }
 0x600   :  { %v17604_v7 = vpop.permute.xlu0 %17603 }
 0x601   :  { %v17606_v45 = vunpack.i.h.bf16 %v17604_v7  ;;  %v17605_v56 = vunpack.i.l.bf16 %v17604_v7  ;;  %v12724_v7 = vld [vmem:[%s26319_s8 + $0x1c0] sm:$0xf] }
 0x603   :  { %v3451_v58 = vsel %vm3450_vm6, %v17605_v56, %v17606_v45  ;;  %v16662_v45 = vld [vmem:[%s26319_s8 + $0x1cc] sm:$0xf0]  ;;  %v12836_v56 = vld [vmem:[%s26319_s8 + $0x2a0] sm:$0xf] }
 0x607   :  { %3376 = vadd.xlane.f32.xlu1 %v3375_v8  ;;  %v16706_v8 = vld [vmem:[%s26319_s8 + $0x32c] sm:$0xf0] }
 0x608   :  { %v3381_v3 = vpop.permute.xlu0 %3380 }
 0x613   :  { %v3024_v63 = vpop.xlane.xlu2 %3023 }
 0x614   :  { %17643 = vrcp.f32 %v3024_v63  ;;  %v12580_v63 = vld [vmem:[%s26319_s8 + $0xa0] sm:$0xf] }
 0x61a   :  { %v17644_v16 = vpop.eup %17643 }
 0x61b   :  { %v3026_v26 = vmul.f32 %v17644_v16, %v17630_v0  ;;  %v3094_v9 = vpop.xlane.xlu1 %3093  ;;  %v16626_v16 = vld [vmem:[%s26319_s8 + $0xac] sm:$0xf0] }
 0x61c   :  { %17645 = vrcp.f32 %v3094_v9  ;;  %v12740_v9 = vld [vmem:[%s26319_s8 + $0x1e0] sm:$0xf] }
 0x61d   :  { %12479 = vmatmul.msk.f32.vlgmr.msra.gmra.mxu3 %vm69_vm0, %v3026_v26  ;;  %v12869_v26 = vor.u32 %v16698_v40, %v12868_v37  ;;  %v16620_v37 = vld [vmem:[%s26319_s8 + $0x84] sm:$0xf]  ;;  %v12566_v40 = vld [vmem:[%s26319_s8 + $0x90] sm:$0xf0] }
 0x61f   :  { %4235 = vmatpush.bf16.msra.mxu2 %v12869_v26  ;;  %v16650_v26 = vld [vmem:[%s26319_s8 + $0x16c] sm:$0xf0] }
 0x622   :  { %v17646_v10 = vpop.eup %17645 }
 0x623   :  { %v3164_v44 = vpop.xlane.xlu2 %3163  ;;  %v3096_v51 = vmul.f32 %v17646_v10, %v17632_v5  ;;  %v12852_v10 = vld [vmem:[%s26319_s8 + $0x2c0] sm:$0xf] }
 0x624   :  { %17647 = vrcp.f32 %v3164_v44  ;;  %v16666_v44 = vld [vmem:[%s26319_s8 + $0x1ec] sm:$0xf0] }
 0x62a   :  { %v17648_v46 = vpop.eup %17647  ;;  %v2980_v13 = vpop.f32.mrf.mxu1 }
 0x62b   :  { %v3166_v14 = vmul.f32 %v17648_v46, %v17636_v19  ;;  %v3098_v52 = vpop.permute.xlu2 %3097  ;;  %v12741_v46 = vor.u32 %v16666_v44, %v12740_v9 }
 0x62c   :  { %3118 = vmatpush.msrb.mxu1 %v3098_v52  ;;  %v12564_v52 = vld [vmem:[%s26319_s8 + $0x80] sm:$0xf] }
 0x62d   :  { %12482 = vmatmul.msk.f32.vlgmr.msrb.gmra.mxu1 %vm69_vm0, %v3096_v51  ;;  %12485 = vmatmul.msk.f32.vlgmr.msrb.gmra.mxu3 %vm69_vm0, %v3166_v14  ;;  %v16694_v51 = vld [vmem:[%s26319_s8 + $0x2cc] sm:$0xf0]  ;;  %v12581_v14 = vor.u32 %v16626_v16, %v12580_v63  ;;  %v12676_v16 = vld [vmem:[%s26319_s8 + $0x160] sm:$0xf] }
 0x62e   :  { %v16606_v63 = vld [vmem:[%s26319_s8 + $0xc] sm:$0xf0]  ;;  %v12677_v44 = vor.u32 %v16650_v26, %v12676_v16  ;;  %v12678_v16 = vld [vmem:[%s26319_s8 + $0x170] sm:$0xf0]  ;;  %v16692_v26 = vld [vmem:[%s26319_s8 + $0x2c4] sm:$0xf] }
 0x62f   :  { %v3308_v17 = vpop.xlane.xlu1 %3307 }
 0x630   :  { %17649 = vrcp.f32 %v3308_v17  ;;  %v12853_v17 = vor.u32 %v16694_v51, %v12852_v10  ;;  %v12788_v10 = vld [vmem:[%s26319_s8 + $0x240] sm:$0xf]  ;;  %v16616_v51 = vld [vmem:[%s26319_s8 + $0x64] sm:$0xf] }
 0x631   :  { %17651 = vrcp.f32 %v3234_v53  ;;  %v16622_v53 = vld [vmem:[%s26319_s8 + $0x8c] sm:$0xf0] }
 0x632   :  { %4236 = vmatpush.bf16.msra.mxu2 %v12853_v17  ;;  %v12742_v17 = vld [vmem:[%s26319_s8 + $0x1f0] sm:$0xf0] }
 0x636   :  { %v17650_v22 = vpop.eup %17649 }
 0x637   :  { %v3310_v57 = vmul.f32 %v17650_v22, %v17638_v47  ;;  %v17652_v60 = vpop.eup %17651  ;;  %v12932_v47 = vld [vmem:[%s26319_s8 + $0x360] sm:$0xf]  ;;  %v12901_v22 = vor.u32 %v16706_v8, %v12900_v36  ;;  %v12569_v8 = vor.u32 %v16620_v37, %v12566_v40  ;;  %v16708_v37 = vld [vmem:[%s26319_s8 + $0x344] sm:$0xf]  ;;  %v12918_v40 = vld [vmem:[%s26319_s8 + $0x350] sm:$0xf0] }
 0x638   :  { %v3236_v1 = vmul.f32 %v17652_v60, %v20018_v54  ;;  %v12933_v20 = vor.u32 %v16714_v2, %v12932_v47  ;;  %v16632_v60 = vld [vmem:[%s26319_s8 + $0xe4] sm:$0xf]  ;;  %v12582_v2 = vld [vmem:[%s26319_s8 + $0xb0] sm:$0xf0] }
 0x639   :  { %v16624_v47 = vld [vmem:[%s26319_s8 + $0xa4] sm:$0xf] }
 0x63a   :  { %v4198_v30 = vand.u32 %v12933_v20, %v17990_v4  ;;  %v12585_v20 = vor.u32 %v16624_v47, %v12582_v2 }
 0x647   :  { %v3312_v55 = vpop.permute.xlu1 %3311 }
 0x648   :  { %3332 = vmatpush.msra.mxu3 %v3312_v55  ;;  %v12884_v55 = vld [vmem:[%s26319_s8 + $0x300] sm:$0xf] }
 0x649   :  { %12491 = vmatmul.msk.f32.vlgmr.msra.gmra.mxu3 %vm69_vm0, %v3310_v57  ;;  %v16690_v57 = vld [vmem:[%s26319_s8 + $0x2ac] sm:$0xf0] }
 0x64a   :  { %3471 = vmatpush.msrb.mxu3 %v3451_v58  ;;  %v16702_v58 = vld [vmem:[%s26319_s8 + $0x30c] sm:$0xf0] }
 0x64c   :  { %4252 = vmatpush.bf16.msra.mxu3 %v4198_v30  ;;  %v16682_v30 = vld [vmem:[%s26319_s8 + $0x26c] sm:$0xf0] }
 0x64f   :  { %v17599_v61 = vpop.permute.xlu1 %17598 }
 0x650   :  { %v17601_v62 = vunpack.i.h.bf16 %v17599_v61  ;;  %v17600_v0 = vunpack.i.l.bf16 %v17599_v61  ;;  %v12725_v61 = vor.u32 %v16662_v45, %v12724_v7  ;;  %v12660_v45 = vld [vmem:[%s26319_s8 + $0x140] sm:$0xf] }
 0x652   :  { %v3243_v50 = vsel %vm3242_vm7, %v17600_v0, %v17601_v62  ;;  %v12614_v62 = vld [vmem:[%s26319_s8 + $0xf0] sm:$0xf0]  ;;  %v12837_v0 = vor.u32 %v16690_v57, %v12836_v56  ;;  %v16646_v56 = vld [vmem:[%s26319_s8 + $0x14c] sm:$0xf0]  ;;  %v12772_v57 = vld [vmem:[%s26319_s8 + $0x220] sm:$0xf] }
 0x653   :  { %3263 = vmatpush.msra.mxu1 %v3243_v50  ;;  %v16658_v50 = vld [vmem:[%s26319_s8 + $0x1ac] sm:$0xf0] }
 0x654   :  { %12488 = vmatmul.msk.f32.vlgmr.msra.gmra.mxu1 %vm69_vm0, %v3236_v1  ;;  %v12708_v1 = vld [vmem:[%s26319_s8 + $0x1a0] sm:$0xf]  ;;  %4237 = vmatpush.bf16.msra.mxu2 %v12837_v0  ;;  %v16660_v0 = vld [vmem:[%s26319_s8 + $0x1c4] sm:$0xf] }
 0x655   :  { %3401 = vmatpush.msrb.mxu1 %v3381_v3  ;;  %v12565_v3 = vor.u32 %v16622_v53, %v12564_v52  ;;  %v12550_v52 = vld [vmem:[%s26319_s8 + $0x70] sm:$0xf0]  ;;  %v16664_v53 = vld [vmem:[%s26319_s8 + $0x1e4] sm:$0xf] }
 0x656   :  { %v12553_v7 = vor.u32 %v16616_v51, %v12550_v52  ;;  %v12902_v51 = vld [vmem:[%s26319_s8 + $0x330] sm:$0xf0]  ;;  %v16644_v52 = vld [vmem:[%s26319_s8 + $0x144] sm:$0xf] }
 0x657   :  { %4222 = vmatpush.bf16.msra.mxu1 %v12741_v46  ;;  %v16678_v46 = vld [vmem:[%s26319_s8 + $0x24c] sm:$0xf0] }
 0x65b   :  { %4223 = vmatpush.bf16.msra.mxu1 %v12725_v61  ;;  %v12661_v61 = vor.u32 %v16646_v56, %v12660_v45  ;;  %v16700_v45 = vld [vmem:[%s26319_s8 + $0x304] sm:$0xf]  ;;  %v12886_v56 = vld [vmem:[%s26319_s8 + $0x310] sm:$0xf0] }
 0x664   :  { %v3442_v43 = vpop.xlane.xlu2 %3441 }
 0x665   :  { %17653 = vrcp.f32 %v3442_v43  ;;  %v12820_v43 = vld [vmem:[%s26319_s8 + $0x280] sm:$0xf] }
 0x66b   :  { %v17654_v5 = vpop.eup %17653 }
 0x66c   :  { %v3444_v6 = vmul.f32 %v17654_v5, %v17640_v31  ;;  %v12597_v31 = vor.u32 %v16630_v29, %v12596_v28  ;;  %v16686_v5 = vld [vmem:[%s26319_s8 + $0x28c] sm:$0xf0]  ;;  %v12804_v29 = vld [vmem:[%s26319_s8 + $0x260] sm:$0xf] }
 0x66d   :  { %v16654_v28 = vld [vmem:[%s26319_s8 + $0x18c] sm:$0xf0]  ;;  %v12805_v36 = vor.u32 %v16682_v30, %v12804_v29  ;;  %v12694_v29 = vld [vmem:[%s26319_s8 + $0x190] sm:$0xf0]  ;;  %v16696_v30 = vld [vmem:[%s26319_s8 + $0x2e4] sm:$0xf] }
 0x66e   :  { %12497 = vmatmul.msk.f32.vlgmr.msrb.gmra.mxu3 %vm69_vm0, %v3444_v6  ;;  %4210 = vmatpush.bf16.msra.mxu0 %v12597_v31  ;;  %v12885_v6 = vor.u32 %v16702_v58, %v12884_v55  ;;  %v12693_v31 = vor.u32 %v16654_v28, %v12692_v49  ;;  %v16674_v55 = vld [vmem:[%s26319_s8 + $0x22c] sm:$0xf0]  ;;  %v16612_v58 = vld [vmem:[%s26319_s8 + $0x44] sm:$0xf]  ;;  %v12502_v49 = vld [vmem:[%s26319_s8 + $0x10] sm:$0xf0] }
 0x66f   :  { %v16652_v28 = vld [vmem:[%s26319_s8 + $0x184] sm:$0xf] }
 0x672   :  { %4211 = vmatpush.bf16.msra.mxu0 %v12581_v14  ;;  %v12789_v14 = vor.u32 %v16678_v46, %v12788_v10  ;;  %v16704_v46 = vld [vmem:[%s26319_s8 + $0x324] sm:$0xf] }
 0x676   :  { %4212 = vmatpush.bf16.msra.mxu0 %v12565_v3 }
 0x67a   :  { %v3377_v11 = vpop.xlane.xlu1 %3376 }
 0x67b   :  { %17655 = vrcp.f32 %v3377_v11  ;;  %v12548_v11 = vld [vmem:[%s26319_s8 + $0x60] sm:$0xf] }
 0x681   :  { %v17656_v32 = vpop.eup %17655 }
 0x682   :  { %v3379_v12 = vmul.f32 %v17656_v32, %v17642_v42  ;;  %v12917_v42 = vor.u32 %v16710_v27, %v12916_v18  ;;  %v16618_v32 = vld [vmem:[%s26319_s8 + $0x6c] sm:$0xf0] }
 0x683   :  { %v16610_v18 = vld [vmem:[%s26319_s8 + $0x2c] sm:$0xf0] }
 0x684   :  { %12494 = vmatmul.msk.f32.vlgmr.msrb.gmra.mxu1 %vm69_vm0, %v3379_v12  ;;  %4253 = vmatpush.bf16.msra.mxu3 %v12917_v42  ;;  %v12709_v12 = vor.u32 %v16658_v50, %v12708_v1  ;;  %v12517_v27 = vor.u32 %v16610_v18, %v12516_v21  ;;  %v12500_v42 = vld [vmem:[%s26319_s8] sm:$0xf]  ;;  %v12726_v1 = vld [vmem:[%s26319_s8 + $0x1d0] sm:$0xf0]  ;;  %v16604_v21 = vld [vmem:[%s26319_s8 + $0x4] sm:$0xf] }
 0x685   :  { %v12501_v9 = vor.u32 %v16606_v63, %v12500_v42  ;;  %v12644_v50 = vld [vmem:[%s26319_s8 + $0x120] sm:$0xf]  ;;  %v16648_v63 = vld [vmem:[%s26319_s8 + $0x164] sm:$0xf] }
 0x686   :  { %4224 = vmatpush.bf16.msra.mxu1 %v12709_v12  ;;  %v12518_v12 = vld [vmem:[%s26319_s8 + $0x30] sm:$0xf0] }
 0x688   :  { %4254 = vmatpush.bf16.msra.mxu3 %v12901_v22  ;;  %v12745_v22 = vor.u32 %v16664_v53, %v12742_v17  ;;  %v12662_v53 = vld [vmem:[%s26319_s8 + $0x150] sm:$0xf0]  ;;  %v16688_v17 = vld [vmem:[%s26319_s8 + $0x2a4] sm:$0xf] }
 0x68a   :  { %4225 = vmatpush.bf16.msra.mxu1 %v12693_v31  ;;  %v12697_v31 = vor.u32 %v16652_v28, %v12694_v29  ;;  %v16663_v28 = vld [vmem:[%s26319_s8 + $0x1d4] sm:$0xf0] }
 0x68c   :  { %4255 = vmatpush.bf16.msra.mxu3 %v12885_v6  ;;  %v12756_v6 = vld [vmem:[%s26319_s8 + $0x200] sm:$0xf] }
 0x68e   :  { %4226 = vmatpush.bf16.msra.mxu1 %v12677_v44  ;;  %v12681_v44 = vor.u32 %v16648_v63, %v12678_v16 }
 0x692   :  { %4227 = vmatpush.bf16.msra.mxu1 %v12661_v61 }
 0x6a0   :  { %v3055_v19 = vpop.f32.mrf.mxu3 }
 0x6aa   :  { %v3120_v54 = vpop.f32.mrf.mxu1 }
 0x6b0   :  { %v3190_v24 = vpop.f32.mrf.mxu3 }
 0x6cc   :  { %v3334_v48 = vpop.f32.mrf.mxu3 }
 0x6d1   :  { %v3265_v15 = vpop.f32.mrf.mxu1 }
 0x6d2   :  { %3493 = vrot.lane.b32.xlu2 %v3265_v15, %s17749_s22  ;;  %v12598_v15 = vld [vmem:[%s26319_s8 + $0xd0] sm:$0xf0]  ;;  %s17757_s22 = smov [#allocation2]  }
 0x6da   :  { %3485 = vrot.lane.b32.xlu2 %v3120_v54, %s17750_s23  ;;  %v16628_v54 = vld [vmem:[%s26319_s8 + $0xc4] sm:$0xf]  ;;  %s11213_s23 = sshll.u32 %s17757_s22, 4  ;;  %s11214_s23 = int_to_ptr.vmem [resolvable:$true] %s11213_s23 }
 0x6e2   :  { %3477 = vrot.lane.b32.xlu2 %v2980_v13, %s17751_s24  ;;  %v12617_v13 = vor.u32 %v16632_v60, %v12614_v62  ;;  %v12534_v60 = vld [vmem:[%s26319_s8 + $0x50] sm:$0xf0]  ;;  %v12773_v62 = vor.u32 %v16674_v55, %v12772_v57  ;;  %v12889_v55 = vor.u32 %v16700_v45, %v12886_v56  ;;  %v16699_v45 = vld [vmem:[%s26319_s8 + $0x2f4] sm:$0xf0]  ;;  %v12588_v56 = vld [vmem:[%s26319_s8 + $0xa8] sm:$0xf] }
 0x6e3   :  { %v12537_v3 = vor.u32 %v16612_v58, %v12534_v60  ;;  %v16640_v58 = vld [vmem:[%s26319_s8 + $0x124] sm:$0xf]  ;;  %v12646_v60 = vld [vmem:[%s26319_s8 + $0x130] sm:$0xf0] }
 0x6e4   :  { %4261 = vmatpush.bf16.msrb.mxu3 %v12617_v13  ;;  %v16656_v13 = vld [vmem:[%s26319_s8 + $0x1a4] sm:$0xf]  ;;  %v12649_v61 = vor.u32 %v16640_v58, %v12646_v60 }
 0x6f1   :  { %v3473_v25 = vpop.f32.mrf.mxu3 }
 0x6f2   :  { %3505 = vrot.lane.b32.xlu1 %v3473_v25, %s17752_s25  ;;  %v16614_v25 = vld [vmem:[%s26319_s8 + $0x4c] sm:$0xf0] }
 0x701   :  { %v3403_v59 = vpop.f32.mrf.mxu1 }
 0x702   :  { %3501 = vrot.lane.b32.xlu0 %v3403_v59, %s17753_s3  ;;  %v12601_v59 = vor.u32 %v16628_v54, %v12598_v15  ;;  %v12710_v54 = vld [vmem:[%s26319_s8 + $0x1b0] sm:$0xf0]  ;;  %v16712_v15 = vld [vmem:[%s26319_s8 + $0x364] sm:$0xf]  ;;  %s11215_s3 = sshll.u32 %s26328_s17, 4  ;;  %s11216_s3 = int_to_ptr.hbm [resolvable:$true] %s11215_s3 }
 0x703   :  { %v12713_v47 = vor.u32 %v16656_v13, %v12710_v54 }
 0x704   :  { %4262 = vmatpush.bf16.msrb.mxu3 %v12601_v59 }
 0x708   :  { %4263 = vmatpush.bf16.msrb.mxu3 %v12585_v20  ;;  %v16638_v20 = vld [vmem:[%s26319_s8 + $0x10c] sm:$0xf0] }
 0x70a   :  { %3497 = vrot.lane.b32.xlu0 %v3334_v48, %s17754_s4  ;;  %v12532_v48 = vld [vmem:[%s26319_s8 + $0x40] sm:$0xf] }
 0x70b   :  { %v12533_v33 = vor.u32 %v16614_v25, %v12532_v48 }
 0x70c   :  { %4264 = vmatpush.bf16.msrb.mxu3 %v12569_v8  ;;  %v12921_v8 = vor.u32 %v16708_v37, %v12918_v40  ;;  %v12620_v37 = vld [vmem:[%s26319_s8 + $0xe8] sm:$0xf]  ;;  %v16635_v40 = vld [vmem:[%s26319_s8 + $0xf4] sm:$0xf0] }
 0x710   :  { %4265 = vmatpush.bf16.msrb.mxu3 %v12553_v7  ;;  %v12665_v7 = vor.u32 %v16644_v52, %v12662_v53  ;;  %v12684_v53 = vld [vmem:[%s26319_s8 + $0x168] sm:$0xf] }
 0x712   :  { %3481 = vrot.lane.b32.xlu0 %v3055_v19, %s17755_s27  ;;  %v12821_v19 = vor.u32 %v16686_v5, %v12820_v43  ;;  %v12729_v43 = vor.u32 %v16660_v0, %v12726_v1  ;;  %v16642_v5 = vld [vmem:[%s26319_s8 + $0x12c] sm:$0xf0]  ;;  %v12822_v0 = vld [vmem:[%s26319_s8 + $0x290] sm:$0xf0] }
 0x714   :  { %4238 = vmatpush.bf16.msra.mxu2 %v12821_v19  ;;  %v12934_v19 = vld [vmem:[%s26319_s8 + $0x370] sm:$0x10]  ;;  %4266 = vmatpush.bf16.msrb.mxu3 %v12537_v3 }
 0x715   :  { %v12937_v25 = vor.u32 %v16712_v15, %v12934_v19  ;;  %v12630_v3 = vld [vmem:[%s26319_s8 + $0x110] sm:$0xf0]  ;;  %v16672_v15 = vld [vmem:[%s26319_s8 + $0x224] sm:$0xf] }
 0x716   :  { %v12774_v19 = vld [vmem:[%s26319_s8 + $0x230] sm:$0xf0] }
 0x717   :  { %v4201_v2 = vand.u32 %v12937_v25, %v17990_v4  ;;  %v16667_v25 = vld [vmem:[%s26319_s8 + $0x1f4] sm:$0xf0] }
 0x718   :  { %4239 = vmatpush.bf16.msra.mxu2 %v12805_v36  ;;  %v12870_v36 = vld [vmem:[%s26319_s8 + $0x2f0] sm:$0xf0] }
 0x719   :  { %v12873_v42 = vor.u32 %v16696_v30, %v12870_v36  ;;  %v16659_v36 = vld [vmem:[%s26319_s8 + $0x1b4] sm:$0xf0] }
 0x71a   :  { %3489 = vrot.lane.b32.xlu0 %v3190_v24, %s17756_s28  ;;  %v12549_v24 = vor.u32 %v16618_v32, %v12548_v11  ;;  %v16670_v11 = vld [vmem:[%s26319_s8 + $0x20c] sm:$0xf0]  ;;  %v16608_v32 = vld [vmem:[%s26319_s8 + $0x24] sm:$0xf] }
 0x71b   :  { %v12757_v48 = vor.u32 %v16670_v11, %v12756_v6  ;;  %v12521_v59 = vor.u32 %v16608_v32, %v12518_v12  ;;  %v12806_v6 = vld [vmem:[%s26319_s8 + $0x270] sm:$0xf0]  ;;  %v16676_v32 = vld [vmem:[%s26319_s8 + $0x244] sm:$0xf] }
 0x71c   :  { %4213 = vmatpush.bf16.msra.mxu0 %v12549_v24  ;;  %4240 = vmatpush.bf16.msra.mxu2 %v12789_v14  ;;  %v12645_v24 = vor.u32 %v16642_v5, %v12644_v50  ;;  %v12905_v14 = vor.u32 %v16704_v46, %v12902_v51  ;;  %v16636_v50 = vld [vmem:[%s26319_s8 + $0x104] sm:$0xf]  ;;  %v12790_v12 = vld [vmem:[%s26319_s8 + $0x250] sm:$0xf0]  ;;  %v12604_v46 = vld [vmem:[%s26319_s8 + $0xc8] sm:$0xf] }
 0x71d   :  { %4267 = vmatpush.bf16.msrb.mxu3 %v12521_v59  ;;  %v12633_v5 = vor.u32 %v16636_v50, %v12630_v3  ;;  %v12793_v13 = vor.u32 %v16676_v32, %v12790_v12  ;;  %v16668_v59 = vld [vmem:[%s26319_s8 + $0x204] sm:$0xf]  ;;  %v16631_v51 = vld [vmem:[%s26319_s8 + $0xd4] sm:$0xf0] }
 0x71e   :  { %4228 = vmatpush.bf16.msra.mxu1 %v12645_v24  ;;  %v12777_v24 = vor.u32 %v16672_v15, %v12774_v19  ;;  %v16647_v3 = vld [vmem:[%s26319_s8 + $0x154] sm:$0xf0]  ;;  %v12652_v19 = vld [vmem:[%s26319_s8 + $0x128] sm:$0xf] }
 0x71f   :  { %v16715_v32 = vld [vmem:[%s26319_s8 + $0x374] sm:$0x10] }
 0x720   :  { %4214 = vmatpush.bf16.msra.mxu0 %v12533_v33  ;;  %4241 = vmatpush.bf16.msra.mxu2 %v12773_v62  ;;  %v12628_v33 = vld [vmem:[%s26319_s8 + $0x100] sm:$0xf]  ;;  %v16684_v62 = vld [vmem:[%s26319_s8 + $0x284] sm:$0xf] }
 0x721   :  { %v12629_v18 = vor.u32 %v16638_v20, %v12628_v33  ;;  %v12825_v1 = vor.u32 %v16684_v62, %v12822_v0  ;;  %v12668_v0 = vld [vmem:[%s26319_s8 + $0x148] sm:$0xf] }
 0x722   :  { %v12669_v12 = vor.u32 %v16647_v3, %v12668_v0 }
 0x723   :  { %4229 = vmatpush.bf16.msra.mxu1 %v12629_v18 }
 0x724   :  { %4215 = vmatpush.bf16.msra.mxu0 %v12517_v27  ;;  %4242 = vmatpush.bf16.msra.mxu2 %v12757_v48  ;;  %v12505_v27 = vor.u32 %v16604_v21, %v12502_v49  ;;  %v12748_v48 = vld [vmem:[%s26319_s8 + $0x1e8] sm:$0xf] }
 0x725   :  { %v12749_v18 = vor.u32 %v16667_v25, %v12748_v48  ;;  %v12844_v48 = vld [vmem:[%s26319_s8 + $0x2a8] sm:$0xf]  ;;  %v16691_v25 = vld [vmem:[%s26319_s8 + $0x2b4] sm:$0xf0] }
 0x726   :  { %4268 = vmatpush.bf16.msrb.mxu3 %v12505_v27  ;;  %v12732_v27 = vld [vmem:[%s26319_s8 + $0x1c8] sm:$0xf] }
 0x727   :  { %4287 = vmatpush.bf16.msrb.mxu1 %v12873_v42  ;;  %v12733_v30 = vor.u32 %v16663_v28, %v12732_v27  ;;  %v12636_v27 = vld [vmem:[%s26319_s8 + $0x108] sm:$0xf] }
 0x728   :  { %4216 = vmatpush.bf16.msra.mxu0 %v12501_v9  ;;  %4304 = vmatpush.bf16.msrb.mxu2 %v4201_v2  ;;  %v12854_v9 = vld [vmem:[%s26319_s8 + $0x2d0] sm:$0xf0] }
 0x729   :  { %v12857_v10 = vor.u32 %v16692_v26, %v12854_v9  ;;  %v12621_v26 = vor.u32 %v16635_v40, %v12620_v37  ;;  %v12700_v9 = vld [vmem:[%s26319_s8 + $0x188] sm:$0xf] }
 0x72b   :  { %4288 = vmatpush.bf16.msrb.mxu1 %v12857_v10 }
 0x72c   :  { %4274 = vmatpush.bf16.msrb.mxu0 %v12745_v22  ;;  %4305 = vmatpush.bf16.msrb.mxu2 %v12921_v8  ;;  %v12838_v22 = vld [vmem:[%s26319_s8 + $0x2b0] sm:$0xf0]  ;;  %v20373_v54 = vpop.permute.xlu2 %3493 }
 0x72d   :  { %v12841_v57 = vor.u32 %v16688_v17, %v12838_v22  ;;  %v12605_v17 = vor.u32 %v16631_v51, %v12604_v46  ;;  %v12876_v22 = vld [vmem:[%s26319_s8 + $0x2e8] sm:$0xf] }
 0x72e   :  { %v12877_v62 = vor.u32 %v16699_v45, %v12876_v22  ;;  %v16693_v22 = vld [vmem:[%s26319_s8 + $0x2cc] sm:$0xf]  ;;  %v12862_v45 = vld [vmem:[%s26319_s8 + $0x2d8] sm:$0xf0] }
 0x72f   :  { %4289 = vmatpush.bf16.msrb.mxu1 %v12841_v57  ;;  %v16627_v57 = vld [vmem:[%s26319_s8 + $0xb4] sm:$0xf0] }
 0x730   :  { %4275 = vmatpush.bf16.msrb.mxu0 %v12729_v43  ;;  %4306 = vmatpush.bf16.msrb.mxu2 %v12905_v14  ;;  %v16680_v43 = vld [vmem:[%s26319_s8 + $0x264] sm:$0xf]  ;;  %v12589_v50 = vor.u32 %v16627_v57, %v12588_v56  ;;  %v16611_v56 = vld [vmem:[%s26319_s8 + $0x34] sm:$0xf0]  ;;  %v12908_v57 = vld [vmem:[%s26319_s8 + $0x328] sm:$0xf] }
 0x731   :  { %v12809_v11 = vor.u32 %v16680_v43, %v12806_v6  ;;  %v16695_v43 = vld [vmem:[%s26319_s8 + $0x2d4] sm:$0xf0] }
 0x732   :  { %v16623_v6 = vld [vmem:[%s26319_s8 + $0x94] sm:$0xf0] }
 0x733   :  { %4290 = vmatpush.bf16.msrb.mxu1 %v12825_v1 }
 0x734   :  { %4276 = vmatpush.bf16.msrb.mxu0 %v12713_v47  ;;  %4307 = vmatpush.bf16.msrb.mxu2 %v12889_v55  ;;  %v12758_v47 = vld [vmem:[%s26319_s8 + $0x210] sm:$0xf0]  ;;  %v20402_v29 = vpop.permute.xlu2 %3485 }
 0x735   :  { %v12761_v20 = vor.u32 %v16668_v59, %v12758_v47 }
 0x737   :  { %4291 = vmatpush.bf16.msrb.mxu1 %v12809_v11  ;;  %v12940_v11 = vld [vmem:[%s26319_s8 + $0x368] sm:$0xf] }
 0x738   :  { %4277 = vmatpush.bf16.msrb.mxu0 %v12697_v31  ;;  %v12716_v31 = vld [vmem:[%s26319_s8 + $0x1a8] sm:$0xf]  ;;  %v12941_v59 = vor.u32 %v16715_v32, %v12940_v11  ;;  %v16703_v11 = vld [vmem:[%s26319_s8 + $0x314] sm:$0xf0]  ;;  %v16665_v32 = vld [vmem:[%s26319_s8 + $0x1ec] sm:$0xf] }
 0x739   :  { %v12717_v63 = vor.u32 %v16659_v36, %v12716_v31  ;;  %v12540_v31 = vld [vmem:[%s26319_s8 + $0x48] sm:$0xf] }
 0x73a   :  { %v12828_v36 = vld [vmem:[%s26319_s8 + $0x288] sm:$0xf] }
 0x73b   :  { %4292 = vmatpush.bf16.msrb.mxu1 %v12793_v13 }
 0x73c   :  { %4278 = vmatpush.bf16.msrb.mxu0 %v12681_v44  ;;  %v16655_v44 = vld [vmem:[%s26319_s8 + $0x194] sm:$0xf0]  ;;  %v3478_v14 = vpop.permute.xlu2 %3477 }
 0x73d   :  { %v12701_v52 = vor.u32 %v16655_v44, %v12700_v9  ;;  %v3508_v55 = vsel %vm2844_vm11, %v19993_v23, %v3478_v14  ;;  %v12860_v23 = vld [vmem:[%s26319_s8 + $0x2c8] sm:$0xf]  ;;  %vm3513_vm11 = vcmask 556032   ;;  %v16711_v9 = vld [vmem:[%s26319_s8 + $0x354] sm:$0xf0] }
 0x73e   :  { %v12861_v13 = vor.u32 %v16695_v43, %v12860_v23  ;;  %v12524_v14 = vld [vmem:[%s26319_s8 + $0x28] sm:$0xf]  ;;  %v16689_v23 = vld [vmem:[%s26319_s8 + $0x2ac] sm:$0xf]  ;;  %v12846_v43 = vld [vmem:[%s26319_s8 + $0x2b8] sm:$0xf0] }
 0x73f   :  { %4293 = vmatpush.bf16.msrb.mxu1 %v12777_v24  ;;  %v16643_v24 = vld [vmem:[%s26319_s8 + $0x134] sm:$0xf0]  ;;  %v12525_v0 = vor.u32 %v16611_v56, %v12524_v14  ;;  %v16653_v56 = vld [vmem:[%s26319_s8 + $0x18c] sm:$0xf] }
 0x740   :  { %4279 = vmatpush.bf16.msrb.mxu0 %v12665_v7  ;;  %v16651_v7 = vld [vmem:[%s26319_s8 + $0x174] sm:$0xf0] }
 0x743   :  { %4294 = vmatpush.bf16.msrb.mxu1 %v12761_v20  ;;  %v16619_v20 = vld [vmem:[%s26319_s8 + $0x74] sm:$0xf0] }
 0x744   :  { %4280 = vmatpush.bf16.msrb.mxu0 %v12649_v61  ;;  %v12685_v61 = vor.u32 %v16651_v7, %v12684_v53 }
 0x748   :  { %4281 = vmatpush.bf16.msrb.mxu0 %v12633_v5  ;;  %v12572_v5 = vld [vmem:[%s26319_s8 + $0x88] sm:$0xf] }
 0x749   :  { %v12573_v15 = vor.u32 %v16623_v6, %v12572_v5  ;;  %v16607_v5 = vld [vmem:[%s26319_s8 + $0x14] sm:$0xf0]  ;;  %v12892_v6 = vld [vmem:[%s26319_s8 + $0x308] sm:$0xf] }
 0x764   :  { %v3506_v2 = vpop.permute.xlu1 %3505 }
 0x774   :  { %v3502_v33 = vpop.permute.xlu0 %3501 }
 0x775   :  { %v3521_v21 = vsel %vm69_vm0, %v3502_v33, %v3506_v2  ;;  %vm3517_vm0 = vcmask 310272  }
 0x776   :  { %v20394_v49 = vpack.c.bf16 %v3521_v21, %v3521_v21 }
 0x778   :  { %12946 = vmatmul.msk.bf16.vlgmr.msra.gmra.mxu3 %vm157_vm1, %v20394_v49 }
 0x779   :  { %4326 = vmatpush.bf16.msra.mxu3 %v12749_v18  ;;  %v12653_v18 = vor.u32 %v16643_v24, %v12652_v19  ;;  %v12780_v19 = vld [vmem:[%s26319_s8 + $0x228] sm:$0xf] }
 0x77c   :  { %v3498_v42 = vpop.permute.xlu0 %3497 }
 0x77d   :  { %v3518_v8 = vsel %vm3517_vm0, %v20373_v54, %v3498_v42  ;;  %4327 = vmatpush.bf16.msra.mxu3 %v12733_v30  ;;  %v16639_v30 = vld [vmem:[%s26319_s8 + $0x114] sm:$0xf0]  ;;  %v4204_v42 = vand.u32 %v12941_v59, %v17990_v4  ;;  %v16685_v59 = vld [vmem:[%s26319_s8 + $0x28c] sm:$0xf] }
 0x77e   :  { %v3520_v16 = vsel %vm3519_vm8, %v3518_v8, %v3502_v33  ;;  %v12556_v33 = vld [vmem:[%s26319_s8 + $0x68] sm:$0xf]  ;;  %v16697_v8 = vld [vmem:[%s26319_s8 + $0x2ec] sm:$0xf]  ;;  %v12637_v44 = vor.u32 %v16639_v30, %v12636_v27 }
 0x77f   :  { %v20425_v10 = vpack.c.bf16 %v3520_v16, %v3520_v16  ;;  %v12557_v40 = vor.u32 %v16619_v20, %v12556_v33  ;;  %v16615_v16 = vld [vmem:[%s26319_s8 + $0x54] sm:$0xf0]  ;;  %v16633_v33 = vld [vmem:[%s26319_s8 + $0xec] sm:$0xf]  ;;  %v12622_v20 = vld [vmem:[%s26319_s8 + $0xf8] sm:$0xf0] }
 0x780   :  { %v12541_v53 = vor.u32 %v16615_v16, %v12540_v31  ;;  %v16713_v27 = vld [vmem:[%s26319_s8 + $0x36c] sm:$0xf]  ;;  %v12625_v31 = vor.u32 %v16633_v33, %v12622_v20  ;;  %v12606_v16 = vld [vmem:[%s26319_s8 + $0xd8] sm:$0xf0] }
 0x781   :  { %4328 = vmatpush.bf16.msra.mxu3 %v12717_v63  ;;  %4243 = vmatmul.bf16.vlgmr.msra.gmra.mxu2 %v20425_v10  ;;  %v12878_v63 = vld [vmem:[%s26319_s8 + $0x2f8] sm:$0xf0]  ;;  %v16701_v33 = vld [vmem:[%s26319_s8 + $0x30c] sm:$0xf] }
 0x782   :  { %4313 = vmatpush.bf16.msra.mxu2 %v12621_v26  ;;  %v12924_v26 = vld [vmem:[%s26319_s8 + $0x348] sm:$0xf]  ;;  %v12881_v51 = vor.u32 %v16697_v8, %v12878_v63  ;;  %v12814_v8 = vld [vmem:[%s26319_s8 + $0x278] sm:$0xf0]  ;;  %v16629_v63 = vld [vmem:[%s26319_s8 + $0xcc] sm:$0xf] }
 0x783   :  { %v12925_v7 = vor.u32 %v16711_v9, %v12924_v26  ;;  %v16657_v9 = vld [vmem:[%s26319_s8 + $0x1ac] sm:$0xf]  ;;  %v12609_v14 = vor.u32 %v16629_v63, %v12606_v16  ;;  %v12894_v20 = vld [vmem:[%s26319_s8 + $0x318] sm:$0xf0] }
 0x784   :  { %v3482_v58 = vpop.permute.xlu0 %3481  ;;  %v16637_v63 = vld [vmem:[%s26319_s8 + $0x10c] sm:$0xf]  ;;  %v12638_v16 = vld [vmem:[%s26319_s8 + $0x118] sm:$0xf0] }
 0x785   :  { %v3510_v60 = vsel %vm3509_vm9, %v3508_v55, %v3482_v58  ;;  %4329 = vmatpush.bf16.msra.mxu3 %v12701_v52  ;;  %v3512_v47 = vsel %vm3511_vm10, %v3482_v58, %v20402_v29  ;;  %v12845_v29 = vor.u32 %v16691_v25, %v12844_v48  ;;  %v12812_v52 = vld [vmem:[%s26319_s8 + $0x268] sm:$0xf]  ;;  %v16707_v55 = vld [vmem:[%s26319_s8 + $0x334] sm:$0xf0]  ;;  %v12893_v25 = vor.u32 %v16703_v11, %v12892_v6  ;;  %v12686_v6 = vld [vmem:[%s26319_s8 + $0x178] sm:$0xf0] }
 0x786   :  { %v20457_v1 = vpack.c.bf16 %v3510_v60, %v3510_v60  ;;  %4314 = vmatpush.bf16.msra.mxu2 %v12605_v17  ;;  %v16683_v17 = vld [vmem:[%s26319_s8 + $0x274] sm:$0xf0]  ;;  %v12865_v60 = vor.u32 %v16693_v22, %v12862_v45  ;;  %v12909_v3 = vor.u32 %v16707_v55, %v12908_v57  ;;  %v16625_v22 = vld [vmem:[%s26319_s8 + $0xac] sm:$0xf]  ;;  %v12590_v45 = vld [vmem:[%s26319_s8 + $0xb8] sm:$0xf0] }
 0x787   :  { %v12813_v58 = vor.u32 %v16683_v17, %v12812_v52  ;;  %v16675_v48 = vld [vmem:[%s26319_s8 + $0x234] sm:$0xf0]  ;;  %v16677_v52 = vld [vmem:[%s26319_s8 + $0x24c] sm:$0xf]  ;;  %v12702_v57 = vld [vmem:[%s26319_s8 + $0x198] sm:$0xf0] }
 0x788   :  { %4217 = vmatmul.bf16.vlgmr.msra.gmra.mxu0 %v20457_v1  ;;  %4269 = vmatmul.bf16.vlgmr.msrb.gmra.mxu3 %v20457_v1  ;;  %v16709_v55 = vld [vmem:[%s26319_s8 + $0x34c] sm:$0xf] }
 0x789   :  { %4330 = vmatpush.bf16.msra.mxu3 %v12685_v61  ;;  %4339 = vmatpush.bf16.msra.mxu0 %v12877_v62  ;;  %v12508_v61 = vld [vmem:[%s26319_s8 + $0x8] sm:$0xf]  ;;  %v16705_v11 = vld [vmem:[%s26319_s8 + $0x32c] sm:$0xf] }
 0x78a   :  { %4315 = vmatpush.bf16.msra.mxu2 %v12589_v50  ;;  %v12796_v62 = vld [vmem:[%s26319_s8 + $0x248] sm:$0xf]  ;;  %v16679_v50 = vld [vmem:[%s26319_s8 + $0x254] sm:$0xf0]  ;;  %v12509_v24 = vor.u32 %v16607_v5, %v12508_v61  ;;  %v12593_v61 = vor.u32 %v16625_v22, %v12590_v45  ;;  %v16649_v5 = vld [vmem:[%s26319_s8 + $0x16c] sm:$0xf] }
 0x78c   :  { %v3490_v2 = vpop.permute.xlu0 %3489 }
 0x78d   :  { %v3514_v21 = vsel %vm3513_vm11, %v3512_v47, %v3490_v2  ;;  %4331 = vmatpush.bf16.msra.mxu3 %v12669_v12  ;;  %4340 = vmatpush.bf16.msra.mxu0 %v12861_v13  ;;  %v12750_v12 = vld [vmem:[%s26319_s8 + $0x1f8] sm:$0xf0]  ;;  %v12797_v13 = vor.u32 %v16679_v50, %v12796_v62  ;;  %v16673_v62 = vld [vmem:[%s26319_s8 + $0x22c] sm:$0xf]  ;;  %v12705_v50 = vor.u32 %v16653_v56, %v12702_v57 }
 0x78e   :  { %v3516_v28 = vsel %vm3515_vm12, %v3514_v21, %v20373_v54  ;;  %4316 = vmatpush.bf16.msra.mxu2 %v12573_v15  ;;  %v16687_v54 = vld [vmem:[%s26319_s8 + $0x294] sm:$0xf0]  ;;  %v12849_v15 = vor.u32 %v16689_v23, %v12846_v43  ;;  %v12830_v47 = vld [vmem:[%s26319_s8 + $0x298] sm:$0xf0]  ;;  %v12753_v2 = vor.u32 %v16665_v32, %v12750_v12  ;;  %v16661_v21 = vld [vmem:[%s26319_s8 + $0x1cc] sm:$0xf] }
 0x78f   :  { %v20514_v37 = vpack.c.bf16 %v3516_v28, %v3516_v28  ;;  %v12829_v46 = vor.u32 %v16687_v54, %v12828_v36  ;;  %v12942_v28 = vld [vmem:[%s26319_s8 + $0x378] sm:$0x10]  ;;  %v12833_v30 = vor.u32 %v16685_v59, %v12830_v47  ;;  %v12764_v36 = vld [vmem:[%s26319_s8 + $0x208] sm:$0xf]  ;;  %v16681_v54 = vld [vmem:[%s26319_s8 + $0x26c] sm:$0xf] }
 0x790   :  { %v12945_v26 = vor.u32 %v16713_v27, %v12942_v28  ;;  %v16621_v23 = vld [vmem:[%s26319_s8 + $0x8c] sm:$0xf]  ;;  %v12574_v43 = vld [vmem:[%s26319_s8 + $0x98] sm:$0xf0]  ;;  %v12897_v28 = vor.u32 %v16701_v33, %v12894_v20 }
 0x791   :  { %4332 = vmatpush.bf16.msra.mxu3 %v12653_v18  ;;  %4230 = vmatmul.bf16.vlgmr.msra.gmra.mxu1 %v20514_v37  ;;  %v12734_v18 = vld [vmem:[%s26319_s8 + $0x1d8] sm:$0xf0]  ;;  %v16645_v47 = vld [vmem:[%s26319_s8 + $0x14c] sm:$0xf] }
 0x792   :  { %12947 = vmatmul.msk.bf16.vlgmr.msrb.gmra.mxu2 %vm157_vm1, %v20394_v49  ;;  %4341 = vmatpush.bf16.msra.mxu0 %v12845_v29  ;;  %v12781_v29 = vor.u32 %v16675_v48, %v12780_v19  ;;  %v12910_v32 = vld [vmem:[%s26319_s8 + $0x338] sm:$0xf0] }
 0x793   :  { %4317 = vmatpush.bf16.msra.mxu2 %v12557_v40  ;;  %4356 = vmatpush.bf16.msra.mxu1 %v4204_v42  ;;  %v16671_v40 = vld [vmem:[%s26319_s8 + $0x214] sm:$0xf0]  ;;  %v12737_v42 = vor.u32 %v16661_v21, %v12734_v18  ;;  %v12766_v19 = vld [vmem:[%s26319_s8 + $0x218] sm:$0xf0]  ;;  %v12913_v48 = vor.u32 %v16705_v11, %v12910_v32  ;;  %v13792_v11 = vld [vmem:[%s26324_s13 + $0x690] sm:$0xf] }
 0x794   :  { %v12558_v59 = vld [vmem:[%s26319_s8 + $0x78] sm:$0xf0] }
 0x795   :  { %4333 = vmatpush.bf16.msra.mxu3 %v12637_v44  ;;  %v12718_v44 = vld [vmem:[%s26319_s8 + $0x1b8] sm:$0xf0] }
 0x796   :  { %4342 = vmatpush.bf16.msra.mxu0 %v12829_v46  ;;  %v12765_v46 = vor.u32 %v16671_v40, %v12764_v36  ;;  %v12721_v17 = vor.u32 %v16657_v9, %v12718_v44  ;;  %v12654_v36 = vld [vmem:[%s26319_s8 + $0x138] sm:$0xf0]  ;;  %v12641_v9 = vor.u32 %v16637_v63, %v12638_v16  ;;  %v16605_v44 = vld [vmem:[%s26319_s8 + $0xc] sm:$0xf]  ;;  %v13176_v63 = vld [vmem:[%s26324_s13 + $0x1c0] sm:$0xf] }
 0x797   :  { %4318 = vmatpush.bf16.msra.mxu2 %v12541_v53  ;;  %4357 = vmatpush.bf16.msra.mxu1 %v12925_v7  ;;  %v12798_v53 = vld [vmem:[%s26319_s8 + $0x258] sm:$0xf0]  ;;  %v4207_v7 = vand.u32 %v12945_v26, %v17990_v4  ;;  %v16779_v16 = vld [vmem:[%s26324_s13 + $0x1f4] sm:$0xf0] }
 0x798   :  { %4282 = vmatmul.bf16.vlgmr.msrb.gmra.mxu0 %v20514_v37  ;;  %4334 = vmatmul.bf16.vlgmr.msra.gmra.mxu3 %v20514_v37 }
 0x799   :  { %4391 = vmatpush.bf16.msrb.mxu3 %v12881_v51  ;;  %v12817_v51 = vor.u32 %v16681_v54, %v12814_v8  ;;  %v12526_v8 = vld [vmem:[%s26319_s8 + $0x38] sm:$0xf0] }
 0x79a   :  { %4343 = vmatpush.bf16.msra.mxu0 %v12813_v58  ;;  %v12926_v58 = vld [vmem:[%s26319_s8 + $0x358] sm:$0xf0] }
 0x79b   :  { %4319 = vmatpush.bf16.msra.mxu2 %v12525_v0  ;;  %4358 = vmatpush.bf16.msra.mxu1 %v12909_v3  ;;  %v12782_v0 = vld [vmem:[%s26319_s8 + $0x238] sm:$0xf0]  ;;  %v12929_v3 = vor.u32 %v16709_v55, %v12926_v58 }
 0x79c   :  { %v12785_v12 = vor.u32 %v16673_v62, %v12782_v0 }
 0x79d   :  { %4392 = vmatpush.bf16.msrb.mxu3 %v12865_v60  ;;  %v12801_v60 = vor.u32 %v16677_v52, %v12798_v53 }
 0x79e   :  { %4344 = vmatpush.bf16.msra.mxu0 %v12797_v13  ;;  %v12577_v13 = vor.u32 %v16621_v23, %v12574_v43 }
 0x79f   :  { %4320 = vmatpush.bf16.msra.mxu2 %v12509_v24  ;;  %4359 = vmatpush.bf16.msra.mxu1 %v12893_v25  ;;  %v12689_v24 = vor.u32 %v16649_v5, %v12686_v6  ;;  %v16617_v25 = vld [vmem:[%s26319_s8 + $0x6c] sm:$0xf]  ;;  %v13344_v5 = vld [vmem:[%s26324_s13 + $0x310] sm:$0xf]  ;;  %v16821_v6 = vld [vmem:[%s26324_s13 + $0x344] sm:$0xf0] }
 0x7a0   :  { %v12561_v18 = vor.u32 %v16617_v25, %v12558_v59  ;;  %v13345_v32 = vor.u32 %v16821_v6, %v13344_v5 }
 0x7a1   :  { %4393 = vmatpush.bf16.msrb.mxu3 %v12849_v15  ;;  %4295 = vmatmul.bf16.vlgmr.msrb.gmra.mxu1 %v20425_v10  ;;  %v16669_v15 = vld [vmem:[%s26319_s8 + $0x20c] sm:$0xf] }
 0x7a2   :  { %4321 = vmatmul.bf16.vlgmr.msra.gmra.mxu2 %v20457_v1  ;;  %4345 = vmatpush.bf16.msra.mxu0 %v12781_v29  ;;  %v12769_v21 = vor.u32 %v16669_v15, %v12766_v19  ;;  %v16613_v29 = vld [vmem:[%s26319_s8 + $0x4c] sm:$0xf]  ;;  %v16807_v15 = vld [vmem:[%s26324_s13 + $0x2d4] sm:$0xf0] }
 0x7a3   :  { %4378 = vmatpush.bf16.msrb.mxu2 %v12753_v2  ;;  %4365 = vmatpush.bf16.msrb.mxu1 %v12625_v31  ;;  %v12670_v2 = vld [vmem:[%s26319_s8 + $0x158] sm:$0xf0]  ;;  %v16641_v31 = vld [vmem:[%s26319_s8 + $0x12c] sm:$0xf] }
 0x7a4   :  { %v12673_v27 = vor.u32 %v16645_v47, %v12670_v2  ;;  %v12657_v54 = vor.u32 %v16641_v31, %v12654_v36  ;;  %v14240_v31 = vld [vmem:[%s26324_s13 + $0xa10] sm:$0xf]  ;;  %v17045_v36 = vld [vmem:[%s26324_s13 + $0xa44] sm:$0xf0] }
 0x7a5   :  { %4394 = vmatpush.bf16.msrb.mxu3 %v12833_v30  ;;  %v12542_v30 = vld [vmem:[%s26319_s8 + $0x58] sm:$0xf0] }
 0x7a6   :  { %4346 = vmatpush.bf16.msra.mxu0 %v12765_v46  ;;  %v12545_v40 = vor.u32 %v16613_v29, %v12542_v30  ;;  %v12510_v46 = vld [vmem:[%s26319_s8 + $0x18] sm:$0xf0] }
 0x7a7   :  { %4379 = vmatpush.bf16.msrb.mxu2 %v12737_v42  ;;  %4366 = vmatpush.bf16.msrb.mxu1 %v12609_v14  ;;  %v16609_v42 = vld [vmem:[%s26319_s8 + $0x2c] sm:$0xf] }
 0x7a8   :  { %v12529_v26 = vor.u32 %v16609_v42, %v12526_v8 }
 0x7a9   :  { %4395 = vmatpush.bf16.msrb.mxu3 %v12817_v51  ;;  %4347 = vmatmul.bf16.vlgmr.msra.gmra.mxu0 %v20425_v10  ;;  %v12513_v51 = vor.u32 %v16605_v44, %v12510_v46  ;;  %v13624_v46 = vld [vmem:[%s26324_s13 + $0x540] sm:$0xf] }
 0x7aa   :  { %4408 = vmatpush.bf16.msrb.mxu0 %v4207_v7 }
 0x7ab   :  { %4380 = vmatpush.bf16.msrb.mxu2 %v12721_v17  ;;  %4367 = vmatpush.bf16.msrb.mxu1 %v12593_v61 }
 0x7ad   :  { %4396 = vmatpush.bf16.msrb.mxu3 %v12801_v60 }
 0x7ae   :  { %4409 = vmatpush.bf16.msrb.mxu0 %v12929_v3 }
 0x7af   :  { %4381 = vmatpush.bf16.msrb.mxu2 %v12705_v50  ;;  %4368 = vmatpush.bf16.msrb.mxu1 %v12577_v13  ;;  %v13288_v13 = vld [vmem:[%s26324_s13 + $0x2a0] sm:$0xf] }
 0x7b0   :  { %v13289_v59 = vor.u32 %v16807_v15, %v13288_v13 }
 0x7b1   :  { %4397 = vmatpush.bf16.msrb.mxu3 %v12785_v12  ;;  %12948 = vmatmul.msk.bf16.vlgmr.msra.gmra.mxu1 %vm157_vm1, %v20394_v49  ;;  %v16933_v12 = vld [vmem:[%s26324_s13 + $0x6c4] sm:$0xf0] }
 0x7b2   :  { %4410 = vmatpush.bf16.msrb.mxu0 %v12913_v48  ;;  %v13793_v19 = vor.u32 %v16933_v12, %v13792_v11  ;;  %v16919_v48 = vld [vmem:[%s26324_s13 + $0x654] sm:$0xf0] }
 0x7b3   :  { %4382 = vmatpush.bf16.msrb.mxu2 %v12689_v24  ;;  %4369 = vmatpush.bf16.msrb.mxu1 %v12561_v18  ;;  %v13736_v24 = vld [vmem:[%s26324_s13 + $0x620] sm:$0xf]  ;;  %v16793_v18 = vld [vmem:[%s26324_s13 + $0x264] sm:$0xf0] }
 0x7b4   :  { %v13737_v20 = vor.u32 %v16919_v48, %v13736_v24  ;;  %v13064_v24 = vld [vmem:[%s26324_s13 + $0xe0] sm:$0xf] }
 0x7b5   :  { %4398 = vmatpush.bf16.msrb.mxu3 %v12769_v21  ;;  %v13232_v21 = vld [vmem:[%s26324_s13 + $0x230] sm:$0xf] }
 0x7b6   :  { %4411 = vmatpush.bf16.msrb.mxu0 %v12897_v28  ;;  %v16905_v28 = vld [vmem:[%s26324_s13 + $0x5e4] sm:$0xf0]  ;;  %v13233_v8 = vor.u32 %v16793_v18, %v13232_v21 }
 0x7b7   :  { %4383 = vmatpush.bf16.msrb.mxu2 %v12673_v27  ;;  %4370 = vmatpush.bf16.msrb.mxu1 %v12545_v40  ;;  %v13680_v27 = vld [vmem:[%s26324_s13 + $0x5b0] sm:$0xf] }
 0x7b8   :  { %4399 = vmatmul.bf16.vlgmr.msrb.gmra.mxu3 %v20425_v10  ;;  %v14464_v40 = vld [vmem:[%s26324_s13 + $0xbd0] sm:$0xf]  ;;  %v13681_v44 = vor.u32 %v16905_v28, %v13680_v27 }
 0x7b9   :  { %12949 = vmatmul.msk.bf16.vlgmr.msrb.gmra.mxu0 %vm157_vm1, %v20394_v49 }
 0x7ba   :  { %6921 = vmatpush.bf16.msra.mxu0 %v13345_v32 }
 0x7bb   :  { %4384 = vmatpush.bf16.msrb.mxu2 %v12657_v54  ;;  %4371 = vmatpush.bf16.msrb.mxu1 %v12529_v26  ;;  %v14241_v26 = vor.u32 %v17045_v36, %v14240_v31 }
 0x7be   :  { %6922 = vmatpush.bf16.msra.mxu0 %v13289_v59 }
 0x7bf   :  { %4385 = vmatpush.bf16.msrb.mxu2 %v12641_v9  ;;  %4372 = vmatpush.bf16.msrb.mxu1 %v12513_v51  ;;  %v17101_v9 = vld [vmem:[%s26324_s13 + $0xc04] sm:$0x10]  ;;  %v16891_v51 = vld [vmem:[%s26324_s13 + $0x574] sm:$0xf0] }
 0x7c2   :  { %4386 = vmatmul.bf16.vlgmr.msrb.gmra.mxu2 %v20514_v37  ;;  %4373 = vmatmul.bf16.vlgmr.msrb.gmra.mxu1 %v20457_v1 }
 0x7c3   :  { %6934 = vmatpush.bf16.msra.mxu1 %v13793_v19  ;;  %6947 = vmatpush.bf16.msra.mxu2 %v14241_v26 }
 0x7c4   :  { %6923 = vmatpush.bf16.msra.mxu0 %v13233_v8 }
 0x7c7   :  { %6935 = vmatpush.bf16.msra.mxu1 %v13737_v20 }
 0x7cb   :  { %6936 = vmatpush.bf16.msra.mxu1 %v13681_v44 }
 0x7fb   :  { %v20761_v10 = vpop.f32.mrf.mxu3 }
 0x803   :  { %v4259_v14 = vpop.f32.mrf.mxu3 }
 0x804   :  { %v4244_v52 = vpop.f32.mrf.mxu2  ;;  %v14465_v14 = vor.u32 %v17101_v9, %v14464_v40 }
 0x805   :  { %v4218_v53 = vpop.f32.mrf.mxu0 }
 0x80b   :  { %v4270_v17 = vpop.f32.mrf.mxu3 }
 0x80c   :  { %v4246_v7 = vpop.f32.mrf.mxu2 }
 0x80d   :  { %v4220_v22 = vpop.f32.mrf.mxu0  ;;  %v17087_v7 = vld [vmem:[%s26324_s13 + $0xb94] sm:$0xf0] }
 0x80e   :  { %v4231_v45 = vpop.f32.mrf.mxu1 }
 0x80f   :  { %v4232_v25 = vadd.f32 %v4231_v45, %v4218_v53  ;;  %v17031_v53 = vld [vmem:[%s26324_s13 + $0x9d4] sm:$0xf0] }
 0x811   :  { %v4245_v54 = vadd.f32 %v4244_v52, %v4232_v25  ;;  %v14184_v52 = vld [vmem:[%s26324_s13 + $0x9a0] sm:$0xf] }
 0x813   :  { %v4272_v56 = vpop.f32.mrf.mxu3 }
 0x814   :  { %v6880_v56 = vand.u32 %v14465_v14, %v17990_v4  ;;  %v14128_v14 = vld [vmem:[%s26324_s13 + $0x930] sm:$0xf] }
 0x815   :  { %v4309_v57 = vpop.f32.mrf.mxu2  ;;  %v4283_v49 = vpop.f32.mrf.mxu0 }
 0x816   :  { %v4233_v55 = vpop.f32.mrf.mxu1  ;;  %v4284_v47 = vadd.f32 %v4283_v49, %v4270_v17  ;;  %v14408_v17 = vld [vmem:[%s26324_s13 + $0xb60] sm:$0xf]  ;;  %v14185_v49 = vor.u32 %v17031_v53, %v14184_v52  ;;  %6964 = vmatpush.bf16.msra.mxu3 %v6880_v56  ;;  %v17017_v53 = vld [vmem:[%s26324_s13 + $0x964] sm:$0xf0]  ;;  %v13456_v56 = vld [vmem:[%s26324_s13 + $0x3f0] sm:$0xf] }
 0x817   :  { %v4258_v55 = vadd.f32 %v20761_v10, %v4245_v54  ;;  %v14409_v10 = vor.u32 %v17087_v7, %v14408_v17  ;;  %v14352_v17 = vld [vmem:[%s26324_s13 + $0xaf0] sm:$0xf]  ;;  %v17073_v7 = vld [vmem:[%s26324_s13 + $0xb24] sm:$0xf0] }
 0x818   :  { %6948 = vmatpush.bf16.msra.mxu2 %v14185_v49  ;;  %v16849_v49 = vld [vmem:[%s26324_s13 + $0x424] sm:$0xf0] }
 0x819   :  { %v4417_v32 = vadd.f32 %v4258_v55, %v18018_v35  ;;  %v13512_v35 = vld [vmem:[%s26324_s13 + $0x460] sm:$0xf]  ;;  %v13457_v55 = vor.u32 %v16849_v49, %v13456_v56 }
 0x81a   :  { %6965 = vmatpush.bf16.msra.mxu3 %v14409_v10  ;;  %v13848_v49 = vld [vmem:[%s26324_s13 + $0x700] sm:$0xf] }
 0x81b   :  { %v4335_v58 = vpop.f32.mrf.mxu3 }
 0x81d   :  { %v4311_v60 = vpop.f32.mrf.mxu2  ;;  %v4285_v61 = vpop.f32.mrf.mxu0 }
 0x81e   :  { %v4296_v37 = vpop.f32.mrf.mxu1  ;;  %v4421_v60 = vld [vmem:[%s26320_s9] sm:$0xf] }
 0x81f   :  { %v4297_v29 = vadd.f32 %v4296_v37, %v4284_v47  ;;  %v4423_v5 = vperm.slane %v4421_v60, 0  ;;  %v4425_v13 = vperm.slane %v4421_v60, 2  ;;  %v4426_v27 = vperm.slane %v4421_v60, 3 }
 0x821   :  { %v4310_v22 = vadd.f32 %v4309_v57, %v4297_v29  ;;  %v13120_v57 = vld [vmem:[%s26324_s13 + $0x150] sm:$0xf] }
 0x823   :  { %v4337_v62 = vpop.f32.mrf.mxu3 }
 0x824   :  { %v13625_v62 = vor.u32 %v16891_v51, %v13624_v46  ;;  %v13008_v46 = vld [vmem:[%s26324_s13 + $0x70] sm:$0xf]  ;;  %v16737_v51 = vld [vmem:[%s26324_s13 + $0xa4] sm:$0xf0] }
 0x825   :  { %v4322_v0 = vpop.f32.mrf.mxu2  ;;  %v13009_v52 = vor.u32 %v16737_v51, %v13008_v46  ;;  %v16772_v46 = vld [vmem:[%s26324_s13 + $0x1c4] sm:$0xf]  ;;  %v13178_v51 = vld [vmem:[%s26324_s13 + $0x1f8] sm:$0xf0] }
 0x826   :  { %v4348_v1 = vpop.f32.mrf.mxu0  ;;  %v4298_v50 = vpop.f32.mrf.mxu1  ;;  %v4336_v30 = vadd.f32 %v4335_v58, %v4322_v0  ;;  %v13177_v58 = vor.u32 %v16779_v16, %v13176_v63  ;;  %v16765_v0 = vld [vmem:[%s26324_s13 + $0x184] sm:$0xf0]  ;;  %6937 = vmatpush.bf16.msra.mxu1 %v13625_v62  ;;  %v17003_v62 = vld [vmem:[%s26324_s13 + $0x8f4] sm:$0xf0] }
 0x827   :  { %v13568_v50 = vld [vmem:[%s26324_s13 + $0x4d0] sm:$0xf]  ;;  %v13121_v11 = vor.u32 %v16765_v0, %v13120_v57  ;;  %v14296_v57 = vld [vmem:[%s26324_s13 + $0xa80] sm:$0xf]  ;;  %v17059_v0 = vld [vmem:[%s26324_s13 + $0xab4] sm:$0xf0] }
 0x828   :  { %v4349_v45 = vadd.f32 %v4348_v1, %v4336_v30  ;;  %6924 = vmatpush.bf16.msra.mxu0 %v13177_v58  ;;  %v12952_v58 = vld [vmem:[%s26324_s13] sm:$0xf] }
 0x82c   :  { %6925 = vmatpush.bf16.msra.mxu0 %v13121_v11  ;;  %v16835_v11 = vld [vmem:[%s26324_s13 + $0x3b4] sm:$0xf0] }
 0x82d   :  { %v4324_v3 = vpop.f32.mrf.mxu2 }
 0x82e   :  { %v4350_v23 = vpop.f32.mrf.mxu0  ;;  %v4361_v43 = vpop.f32.mrf.mxu1  ;;  %v16877_v3 = vld [vmem:[%s26324_s13 + $0x504] sm:$0xf0] }
 0x82f   :  { %v4362_v61 = vadd.f32 %v4361_v43, %v4349_v45  ;;  %v4418_v23 = vadd.f32 %v4310_v22, %v18021_v38  ;;  %v4424_v43 = vperm.slane %v4421_v60, 1  ;;  %v13569_v19 = vor.u32 %v16877_v3, %v13568_v50  ;;  %v16751_v38 = vld [vmem:[%s26324_s13 + $0x114] sm:$0xf0]  ;;  %v16814_v50 = vld [vmem:[%s26324_s13 + $0x314] sm:$0xf] }
 0x830   :  { %v13065_v47 = vor.u32 %v16751_v38, %v13064_v24  ;;  %v14129_v22 = vor.u32 %v17017_v53, %v14128_v14  ;;  %v14353_v45 = vor.u32 %v17073_v7, %v14352_v17  ;;  %v16723_v60 = vld [vmem:[%s26324_s13 + $0x34] sm:$0xf0]  ;;  %v13346_v3 = vld [vmem:[%s26324_s13 + $0x348] sm:$0xf0]  ;;  %v16884_v53 = vld [vmem:[%s26324_s13 + $0x544] sm:$0xf]  ;;  %v13181_v7 = vor.u32 %v16772_v46, %v13178_v51 }
 0x831   :  { %v4419_v12 = vadd.f32 %v4362_v61, %v18024_v39  ;;  %v16863_v39 = vld [vmem:[%s26324_s13 + $0x494] sm:$0xf0]  ;;  %v20869_v25 = vadd.f32 %v4424_v43, %v4418_v23  ;;  %6938 = vmatpush.bf16.msra.mxu1 %v13569_v19  ;;  %v14072_v61 = vld [vmem:[%s26324_s13 + $0x8c0] sm:$0xf]  ;;  %v16926_v23 = vld [vmem:[%s26324_s13 + $0x694] sm:$0xf]  ;;  %v13349_v43 = vor.u32 %v16814_v50, %v13346_v3 }
 0x832   :  { %v13513_v21 = vor.u32 %v16863_v39, %v13512_v35  ;;  %6926 = vmatpush.bf16.msra.mxu0 %v13065_v47  ;;  %6949 = vmatpush.bf16.msra.mxu2 %v14129_v22  ;;  %v14073_v10 = vor.u32 %v17003_v62, %v14072_v61  ;;  %v17038_v19 = vld [vmem:[%s26324_s13 + $0xa14] sm:$0xf]  ;;  %v14242_v38 = vld [vmem:[%s26324_s13 + $0xa48] sm:$0xf0]  ;;  %v13290_v35 = vld [vmem:[%s26324_s13 + $0x2d8] sm:$0xf0] }
 0x833   :  { %v20873_v20 = vadd.f32 %v4425_v13, %v4419_v12  ;;  %v4445_v29 = vmul.f32 %v20869_v25, %v20869_v25  ;;  %6966 = vmatpush.bf16.msra.mxu3 %v14353_v45  ;;  %v14016_v13 = vld [vmem:[%s26324_s13 + $0x850] sm:$0xf]  ;;  %v14245_v39 = vor.u32 %v17038_v19, %v14242_v38  ;;  %v16912_v47 = vld [vmem:[%s26324_s13 + $0x624] sm:$0xf]  ;;  %v13626_v17 = vld [vmem:[%s26324_s13 + $0x578] sm:$0xf0] }
 0x834   :  { %v17094_v22 = vld [vmem:[%s26324_s13 + $0xbd4] sm:$0xf]  ;;  %v14466_v45 = vld [vmem:[%s26324_s13 + $0xc08] sm:$0x10]  ;;  %v13629_v56 = vor.u32 %v16884_v53, %v13626_v17  ;;  %v14074_v61 = vld [vmem:[%s26324_s13 + $0x8f8] sm:$0xf0] }
 0x835   :  { %v4446_v54 = vmul.f32 %v20873_v20, %v20873_v20  ;;  %6939 = vmatpush.bf16.msra.mxu1 %v13513_v21  ;;  %v13738_v21 = vld [vmem:[%s26324_s13 + $0x658] sm:$0xf0]  ;;  %v13122_v62 = vld [vmem:[%s26324_s13 + $0x188] sm:$0xf0] }
 0x836   :  { %v20787_v2 = vpop.f32.mrf.mxu0  ;;  %v4363_v33 = vpop.f32.mrf.mxu1  ;;  %6927 = vmatpush.bf16.msra.mxu0 %v13009_v52  ;;  %6950 = vmatpush.bf16.msra.mxu2 %v14073_v10  ;;  %v16870_v10 = vld [vmem:[%s26324_s13 + $0x4d4] sm:$0xf]  ;;  %v14410_v19 = vld [vmem:[%s26324_s13 + $0xb98] sm:$0xf0] }
 0x837   :  { %v20871_v33 = vadd.f32 %v4423_v5, %v4417_v32  ;;  %v13794_v5 = vld [vmem:[%s26324_s13 + $0x6c8] sm:$0xf0]  ;;  %v14298_v46 = vld [vmem:[%s26324_s13 + $0xab8] sm:$0xf0] }
 0x838   :  { %v13797_v32 = vor.u32 %v16926_v23, %v13794_v5  ;;  %v14018_v5 = vld [vmem:[%s26324_s13 + $0x888] sm:$0xf0] }
 0x839   :  { %v4437_v36 = vadd.f32 %v20869_v25, %v20871_v33  ;;  %v4444_v40 = vmul.f32 %v20871_v33, %v20871_v33  ;;  %6940 = vmatpush.bf16.msra.mxu1 %v13457_v55  ;;  %v16947_v55 = vld [vmem:[%s26324_s13 + $0x734] sm:$0xf0] }
 0x83b   :  { %v4400_v42 = vpop.f32.mrf.mxu3  ;;  %v4448_v8 = vadd.f32 %v4445_v29, %v4444_v40  ;;  %v17024_v29 = vld [vmem:[%s26324_s13 + $0x9a4] sm:$0xf]  ;;  %v16786_v40 = vld [vmem:[%s26324_s13 + $0x234] sm:$0xf] }
 0x83d   :  { %v4449_v26 = vadd.f32 %v4448_v8, %v4446_v54  ;;  %v13234_v54 = vld [vmem:[%s26324_s13 + $0x268] sm:$0xf0] }
 0x83e   :  { %v4415_v37 = vpop.f32.mrf.mxu0  ;;  %v13237_v8 = vor.u32 %v16786_v40, %v13234_v54  ;;  %v16954_v40 = vld [vmem:[%s26324_s13 + $0x774] sm:$0xf]  ;;  %v13906_v54 = vld [vmem:[%s26324_s13 + $0x7a8] sm:$0xf0] }
 0x83f   :  { %v4374_v1 = vpop.f32.mrf.mxu1  ;;  %v12953_v37 = vor.u32 %v16723_v60, %v12952_v58  ;;  %v16996_v58 = vld [vmem:[%s26324_s13 + $0x8c4] sm:$0xf]  ;;  %v14469_v60 = vor.u32 %v17094_v22, %v14466_v45 }
 0x840   :  { %v16940_v45 = vld [vmem:[%s26324_s13 + $0x704] sm:$0xf] }
 0x841   :  { %6928 = vmatpush.bf16.msra.mxu0 %v12953_v37  ;;  %v16758_v37 = vld [vmem:[%s26324_s13 + $0x154] sm:$0xf]  ;;  %v6883_v3 = vand.u32 %v14469_v60, %v17990_v4 }
 0x842   :  { %v13125_v50 = vor.u32 %v16758_v37, %v13122_v62  ;;  %v4436_v62 = vld [vmem:[%s26323_s12] sm:$0xf] }
 0x843   :  { %v4402_v6 = vpop.f32.mrf.mxu3 }
 0x844   :  { %v13400_v6 = vld [vmem:[%s26324_s13 + $0x380] sm:$0xf] }
 0x845   :  { %v4387_v15 = vpop.f32.mrf.mxu2  ;;  %v13401_v12 = vor.u32 %v16835_v11, %v13400_v6  ;;  %6986 = vmatpush.bf16.msrb.mxu0 %v13797_v32  ;;  %v16744_v6 = vld [vmem:[%s26324_s13 + $0xe4] sm:$0xf]  ;;  %v13066_v11 = vld [vmem:[%s26324_s13 + $0x118] sm:$0xf0] }
 0x846   :  { %v4388_v48 = vadd.f32 %v4387_v15, %v4374_v1  ;;  %v14297_v1 = vor.u32 %v17059_v0, %v14296_v57  ;;  %v16989_v15 = vld [vmem:[%s26324_s13 + $0x884] sm:$0xf0]  ;;  %v13849_v57 = vor.u32 %v16947_v55, %v13848_v49  ;;  %v14077_v0 = vor.u32 %v16996_v58, %v14074_v61  ;;  %v16856_v32 = vld [vmem:[%s26324_s13 + $0x464] sm:$0xf]  ;;  %v4435_v61 = vld [vmem:[%s26322_s11] sm:$0xf] }
 0x847   :  { %v4376_v28 = vpop.f32.mrf.mxu1  ;;  %v14017_v24 = vor.u32 %v16989_v15, %v14016_v13  ;;  %6941 = vmatpush.bf16.msra.mxu1 %v13401_v12  ;;  %v13514_v13 = vld [vmem:[%s26324_s13 + $0x498] sm:$0xf0]  ;;  %v17080_v15 = vld [vmem:[%s26324_s13 + $0xb64] sm:$0xf] }
 0x848   :  { %v4401_v59 = vadd.f32 %v4400_v42, %v4388_v48  ;;  %v4438_v42 = vadd.f32 %v4437_v36, %v20873_v20  ;;  %6967 = vmatpush.bf16.msra.mxu3 %v14297_v1  ;;  %v16800_v48 = vld [vmem:[%s26324_s13 + $0x2a4] sm:$0xf]  ;;  %v16975_v28 = vld [vmem:[%s26324_s13 + $0x814] sm:$0xf0]  ;;  %v13570_v1 = vld [vmem:[%s26324_s13 + $0x508] sm:$0xf0]  ;;  %v14413_v38 = vor.u32 %v17080_v15, %v14410_v19 }
 0x849   :  { %6951 = vmatpush.bf16.msra.mxu2 %v14017_v24  ;;  %v13573_v23 = vor.u32 %v16870_v10, %v13570_v1  ;;  %v13069_v24 = vor.u32 %v16744_v6, %v13066_v11  ;;  %v4478_v10 = vperm.slane %v4435_v61, 1  ;;  %v4479_v1 = vperm.slane %v4435_v61, 2 }
 0x84a   :  { %v4414_v18 = vadd.f32 %v20787_v2, %v4401_v59  ;;  %v13293_v59 = vor.u32 %v16800_v48, %v13290_v35  ;;  %v13517_v48 = vor.u32 %v16856_v32, %v13514_v13  ;;  %v16968_v35 = vld [vmem:[%s26324_s13 + $0x7e4] sm:$0xf]  ;;  %v4491_v32 = vperm.slane %v4436_v62, 1 }
 0x84b   :  { %6999 = vmatpush.bf16.msrb.mxu1 %v14245_v39  ;;  %v13962_v39 = vld [vmem:[%s26324_s13 + $0x818] sm:$0xf0]  ;;  %v4493_v13 = vperm.slane %v4436_v62, 3 }
 0x84c   :  { %v4420_v30 = vadd.f32 %v4414_v18, %v18029_v41  ;;  %6973 = vmatpush.bf16.msrb.mxu3 %v13349_v43  ;;  %v13960_v18 = vld [vmem:[%s26324_s13 + $0x7e0] sm:$0xf]  ;;  %v16982_v43 = vld [vmem:[%s26324_s13 + $0x854] sm:$0xf] }
 0x84d   :  { %v4389_v31 = vpop.f32.mrf.mxu2  ;;  %v14021_v12 = vor.u32 %v16982_v43, %v14018_v5 }
 0x84e   :  { %v20885_v2 = vadd.f32 %v4426_v27, %v4420_v30  ;;  %v13741_v27 = vor.u32 %v16912_v47, %v13738_v21  ;;  %v14186_v30 = vld [vmem:[%s26324_s13 + $0x9d8] sm:$0xf0]  ;;  %v13961_v31 = vor.u32 %v16975_v28, %v13960_v18  ;;  %v13010_v47 = vld [vmem:[%s26324_s13 + $0xa8] sm:$0xf0]  ;;  %v16842_v21 = vld [vmem:[%s26324_s13 + $0x3f4] sm:$0xf]  ;;  %v13965_v18 = vor.u32 %v16968_v35, %v13962_v39 }
 0x84f   :  { %v14189_v36 = vor.u32 %v17024_v29, %v14186_v30  ;;  %v17066_v28 = vld [vmem:[%s26324_s13 + $0xaf4] sm:$0xf]  ;;  %v14354_v29 = vld [vmem:[%s26324_s13 + $0xb28] sm:$0xf0]  ;;  %v14472_v35 = vld [vmem:[%s26324_s13 + $0xbd8] sm:$0xf] }
 0x850   :  { %v4439_v41 = vsel %vm157_vm1, %v20885_v2, 0.0  ;;  %v4447_v63 = vmul.f32 %v20885_v2, %v20885_v2  ;;  %6974 = vmatpush.bf16.msrb.mxu3 %v13293_v59  ;;  %6987 = vmatpush.bf16.msrb.mxu0 %v13741_v27  ;;  %v16730_v59 = vld [vmem:[%s26324_s13 + $0x74] sm:$0xf]  ;;  %v13458_v27 = vld [vmem:[%s26324_s13 + $0x428] sm:$0xf0] }
 0x851   :  { %v4440_v16 = vadd.f32 %v4439_v41, %v4438_v42  ;;  %v16898_v42 = vld [vmem:[%s26324_s13 + $0x5b4] sm:$0xf]  ;;  %v13682_v41 = vld [vmem:[%s26324_s13 + $0x5e8] sm:$0xf0]  ;;  %6952 = vmatpush.bf16.msra.mxu2 %v13961_v31  ;;  %7000 = vmatpush.bf16.msrb.mxu1 %v14189_v36  ;;  %v13013_v30 = vor.u32 %v16730_v59, %v13010_v47  ;;  %v14357_v31 = vor.u32 %v17066_v28, %v14354_v29  ;;  %v17102_v39 = vld [vmem:[%s26324_s13 + $0xc0c] sm:$0x10] }
 0x852   :  { %v4450_v9 = vsel %vm157_vm1, %v4447_v63, 0.0  ;;  %v13685_v63 = vor.u32 %v16898_v42, %v13682_v41  ;;  %v13461_v36 = vor.u32 %v16842_v21, %v13458_v27  ;;  %v12954_v41 = vld [vmem:[%s26324_s13 + $0x38] sm:$0xf0]  ;;  %v13352_v59 = vld [vmem:[%s26324_s13 + $0x318] sm:$0xf] }
 0x853   :  { %4441 = vadd.xlane.f32.xlu0 %v4440_v16  ;;  %v4451_v44 = vadd.f32 %v4450_v9, %v4449_v26  ;;  %v13904_v16 = vld [vmem:[%s26324_s13 + $0x770] sm:$0xf]  ;;  %v16961_v26 = vld [vmem:[%s26324_s13 + $0x7a4] sm:$0xf0]  ;;  %v17010_v9 = vld [vmem:[%s26324_s13 + $0x934] sm:$0xf] }
 0x854   :  { %v13905_v14 = vor.u32 %v16961_v26, %v13904_v16  ;;  %6975 = vmatpush.bf16.msrb.mxu3 %v13237_v8  ;;  %6988 = vmatpush.bf16.msrb.mxu0 %v13685_v63  ;;  %v16716_v8 = vld [vmem:[%s26324_s13 + $0x4] sm:$0xf]  ;;  %v13909_v26 = vor.u32 %v16954_v40, %v13906_v54  ;;  %v16822_v28 = vld [vmem:[%s26324_s13 + $0x34c] sm:$0xf0]  ;;  %v13800_v29 = vld [vmem:[%s26324_s13 + $0x698] sm:$0xf] }
 0x855   :  { %4452 = vadd.xlane.f32.xlu2 %v4451_v44  ;;  %v14130_v44 = vld [vmem:[%s26324_s13 + $0x968] sm:$0xf0]  ;;  %v16828_v63 = vld [vmem:[%s26324_s13 + $0x384] sm:$0xf] }
 0x856   :  { %v14133_v52 = vor.u32 %v17010_v9, %v14130_v44  ;;  %6953 = vmatpush.bf16.msra.mxu2 %v13905_v14  ;;  %v13402_v9 = vld [vmem:[%s26324_s13 + $0x3b8] sm:$0xf0]  ;;  %v17052_v44 = vld [vmem:[%s26324_s13 + $0xa84] sm:$0xf]  ;;  %v12957_v14 = vor.u32 %v16716_v8, %v12954_v41  ;;  %v14248_v8 = vld [vmem:[%s26324_s13 + $0xa18] sm:$0xf] }
 0x857   :  { %v13405_v53 = vor.u32 %v16828_v63, %v13402_v9  ;;  %v17046_v41 = vld [vmem:[%s26324_s13 + $0xa4c] sm:$0xf0]  ;;  %v13353_v63 = vor.u32 %v16822_v28, %v13352_v59 }
 0x858   :  { %7001 = vmatpush.bf16.msrb.mxu1 %v14133_v52  ;;  %6976 = vmatpush.bf16.msrb.mxu3 %v13181_v7  ;;  %v14301_v52 = vor.u32 %v17052_v44, %v14298_v46  ;;  %v16990_v28 = vld [vmem:[%s26324_s13 + $0x88c] sm:$0xf0] }
 0x859   :  { %6989 = vmatpush.bf16.msrb.mxu0 %v13629_v56  ;;  %v13850_v56 = vld [vmem:[%s26324_s13 + $0x738] sm:$0xf0] }
 0x85a   :  { %6954 = vmatpush.bf16.msra.mxu2 %v13849_v57  ;;  %v13853_v49 = vor.u32 %v16940_v45, %v13850_v56  ;;  %v17032_v45 = vld [vmem:[%s26324_s13 + $0x9dc] sm:$0xf0]  ;;  %v14416_v56 = vld [vmem:[%s26324_s13 + $0xb68] sm:$0xf] }
 0x85c   :  { %7002 = vmatpush.bf16.msrb.mxu1 %v14077_v0  ;;  %6977 = vmatpush.bf16.msrb.mxu3 %v13125_v50  ;;  %v4477_v0 = vperm.slane %v4435_v61, 0  ;;  %v4480_v50 = vperm.slane %v4435_v61, 3 }
 0x85d   :  { %6990 = vmatpush.bf16.msrb.mxu0 %v13573_v23 }
 0x85e   :  { %7016 = vmatpush.bf16.msrb.mxu2 %v6883_v3  ;;  %v4490_v3 = vperm.slane %v4436_v62, 0 }
 0x860   :  { %7003 = vmatpush.bf16.msrb.mxu1 %v14021_v12  ;;  %6978 = vmatpush.bf16.msrb.mxu3 %v13069_v24  ;;  %v4492_v12 = vperm.slane %v4436_v62, 2  ;;  %v13688_v62 = vld [vmem:[%s26324_s13 + $0x5b8] sm:$0xf] }
 0x861   :  { %6991 = vmatpush.bf16.msrb.mxu0 %v13517_v48 }
 0x862   :  { %7017 = vmatpush.bf16.msrb.mxu2 %v14413_v38 }
 0x864   :  { %7004 = vmatpush.bf16.msrb.mxu1 %v13965_v18  ;;  %6979 = vmatpush.bf16.msrb.mxu3 %v13013_v30  ;;  %v16934_v30 = vld [vmem:[%s26324_s13 + $0x6cc] sm:$0xf0] }
 0x865   :  { %6992 = vmatpush.bf16.msrb.mxu0 %v13461_v36 }
 0x866   :  { %7018 = vmatpush.bf16.msrb.mxu2 %v14357_v31  ;;  %v14473_v31 = vor.u32 %v17102_v39, %v14472_v35  ;;  %v13128_v35 = vld [vmem:[%s26324_s13 + $0x158] sm:$0xf]  ;;  %v16766_v39 = vld [vmem:[%s26324_s13 + $0x18c] sm:$0xf0] }
 0x868   :  { %7005 = vmatpush.bf16.msrb.mxu1 %v13909_v26  ;;  %6980 = vmatpush.bf16.msrb.mxu3 %v12957_v14  ;;  %v16808_v14 = vld [vmem:[%s26324_s13 + $0x2dc] sm:$0xf0] }
 0x869   :  { %6993 = vmatpush.bf16.msrb.mxu0 %v13405_v53  ;;  %v6886_v53 = vand.u32 %v14473_v31, %v17990_v4  ;;  %v13129_v31 = vor.u32 %v16766_v39, %v13128_v35 }
 0x86a   :  { %7019 = vmatpush.bf16.msrb.mxu2 %v14301_v52  ;;  %v14249_v52 = vor.u32 %v17046_v41, %v14248_v8  ;;  %v13520_v41 = vld [vmem:[%s26324_s13 + $0x468] sm:$0xf] }
 0x86c   :  { %7006 = vmatpush.bf16.msrb.mxu1 %v13853_v49  ;;  %v17088_v49 = vld [vmem:[%s26324_s13 + $0xb9c] sm:$0xf0] }
 0x8c6   :  { %v4442_v42 = vpop.xlane.xlu0 %4441 }
 0x8c7   :  { %v4443_v16 = vmul.f32 %v4442_v42, %v17882_v34 }
 0x8c8   :  { %v4453_v51 = vpop.xlane.xlu2 %4452 }
 0x8c9   :  { %v4454_v17 = vmul.f32 %v4453_v51, %v17882_v34  ;;  %v4455_v7 = vmul.f32 %v4443_v16, %v4443_v16  ;;  %v4457_v43 = vsub.f32 %v20871_v33, %v4443_v16  ;;  %v4458_v5 = vsub.f32 %v20869_v25, %v4443_v16  ;;  %v13296_v51 = vld [vmem:[%s26324_s13 + $0x2a8] sm:$0xf] }
 0x8ca   :  { %v4459_v6 = vsub.f32 %v20873_v20, %v4443_v16  ;;  %v4460_v11 = vsub.f32 %v20885_v2, %v4443_v16  ;;  %v13801_v16 = vor.u32 %v16934_v30, %v13800_v29  ;;  %v16815_v29 = vld [vmem:[%s26324_s13 + $0x31c] sm:$0xf]  ;;  %v13354_v30 = vld [vmem:[%s26324_s13 + $0x350] sm:$0xf0] }
 0x8cb   :  { %v4456_v22 = vsub.f32 %v4454_v17, %v4455_v7  ;;  %v13744_v17 = vld [vmem:[%s26324_s13 + $0x628] sm:$0xf]  ;;  %v16920_v7 = vld [vmem:[%s26324_s13 + $0x65c] sm:$0xf0]  ;;  %v13357_v8 = vor.u32 %v16815_v29, %v13354_v30  ;;  %v13746_v29 = vld [vmem:[%s26324_s13 + $0x660] sm:$0xf0] }
 0x8cc   :  { %v17025_v30 = vld [vmem:[%s26324_s13 + $0x9ac] sm:$0xf] }
 0x8cd   :  { %v4461_v55 = vadd.f32 1e-06, %v4456_v22  ;;  %v14192_v22 = vld [vmem:[%s26324_s13 + $0x9a8] sm:$0xf] }
 0x8ce   :  { %v14193_v61 = vor.u32 %v17032_v45, %v14192_v22  ;;  %v16738_v22 = vld [vmem:[%s26324_s13 + $0xac] sm:$0xf0] }
 0x8cf   :  { %17657 = vrsqrt.f32 %v4461_v55  ;;  %vm4468_vm14 = vweird.f32 %v4461_v55 }
 0x8d5   :  { %v17658_v58 = vpop.eup %17657 }
 0x8d6   :  { %v4463_v34 = vmul.f32 %v17658_v58, %v4461_v55  ;;  %vm4469_vm13 = vweird.f32 %v17658_v58  ;;  %v13297_v55 = vor.u32 %v16808_v14, %v13296_v51  ;;  %v16976_v51 = vld [vmem:[%s26324_s13 + $0x81c] sm:$0xf0]  ;;  %v16801_v14 = vld [vmem:[%s26324_s13 + $0x2ac] sm:$0xf] }
 0x8d7   :  { %vm4470_vm15 = vmor %vm4468_vm14, %vm4469_vm13 }
 0x8d8   :  { %v4464_v60 = vmul.f32 %v17658_v58, %v4463_v34  ;;  %v13240_v34 = vld [vmem:[%s26324_s13 + $0x238] sm:$0xf] }
 0x8da   :  { %v4465_v37 = vmul.f32 0.5, %v4464_v60  ;;  %v16794_v60 = vld [vmem:[%s26324_s13 + $0x26c] sm:$0xf0] }
 0x8dc   :  { %v4466_v57 = vsub.f32 1.5, %v4465_v37  ;;  %v14417_v37 = vor.u32 %v17088_v49, %v14416_v56  ;;  %v13464_v49 = vld [vmem:[%s26324_s13 + $0x3f8] sm:$0xf] }
 0x8de   :  { %v4467_v23 = vmul.f32 %v17658_v58, %v4466_v57  ;;  %v16906_v57 = vld [vmem:[%s26324_s13 + $0x5ec] sm:$0xf0] }
 0x8e0   :  { %v4471_v15 = vsel %vm4470_vm15, %v17658_v58, %v4467_v23  ;;  %v13745_v58 = vor.u32 %v16920_v7, %v13744_v17  ;;  %v13689_v23 = vor.u32 %v16906_v57, %v13688_v62  ;;  %v13016_v7 = vld [vmem:[%s26324_s13 + $0x78] sm:$0xf]  ;;  %v16724_v62 = vld [vmem:[%s26324_s13 + $0x3c] sm:$0xf0] }
 0x8e1   :  { %v4472_v19 = vmul.f32 %v4471_v15, %v4457_v43  ;;  %v4473_v24 = vmul.f32 %v4471_v15, %v4458_v5  ;;  %v4474_v38 = vmul.f32 %v4471_v15, %v4459_v6  ;;  %v4475_v48 = vmul.f32 %v4471_v15, %v4460_v11  ;;  %v13184_v43 = vld [vmem:[%s26324_s13 + $0x1c8] sm:$0xf]  ;;  %v16780_v5 = vld [vmem:[%s26324_s13 + $0x1fc] sm:$0xf0] }
 0x8e2   :  { %v17004_v15 = vld [vmem:[%s26324_s13 + $0x8fc] sm:$0xf0]  ;;  %v13017_v57 = vor.u32 %v16738_v22, %v13016_v7  ;;  %v14362_v7 = vld [vmem:[%s26324_s13 + $0xb30] sm:$0xf0] }
 0x8e3   :  { %v4485_v47 = vmul.f32 %v4477_v0, %v4472_v19  ;;  %v4486_v21 = vmul.f32 %v4478_v10, %v4473_v24  ;;  %v4487_v18 = vmul.f32 %v4479_v1, %v4474_v38  ;;  %v4488_v27 = vmul.f32 %v4480_v50, %v4475_v48  ;;  %v14136_v0 = vld [vmem:[%s26324_s13 + $0x938] sm:$0xf]  ;;  %v17018_v10 = vld [vmem:[%s26324_s13 + $0x96c] sm:$0xf0]  ;;  %v14304_v19 = vld [vmem:[%s26324_s13 + $0xa88] sm:$0xf] }
 0x8e4   :  { %v14360_v1 = vld [vmem:[%s26324_s13 + $0xaf8] sm:$0xf]  ;;  %v17074_v50 = vld [vmem:[%s26324_s13 + $0xb2c] sm:$0xf0]  ;;  %v14137_v6 = vor.u32 %v17018_v10, %v14136_v0  ;;  %v17060_v24 = vld [vmem:[%s26324_s13 + $0xabc] sm:$0xf0]  ;;  %v13185_v38 = vor.u32 %v16780_v5, %v13184_v43 }
 0x8e5   :  { %v4498_v36 = vadd.f32 %v4490_v3, %v4485_v47  ;;  %v4499_v40 = vadd.f32 %v4491_v32, %v4486_v21  ;;  %v4500_v54 = vadd.f32 %v4492_v12, %v4487_v18  ;;  %v4501_v42 = vadd.f32 %v4493_v13, %v4488_v27  ;;  %v13632_v32 = vld [vmem:[%s26324_s13 + $0x548] sm:$0xf]  ;;  %v16892_v12 = vld [vmem:[%s26324_s13 + $0x57c] sm:$0xf0]  ;;  %v13576_v21 = vld [vmem:[%s26324_s13 + $0x4d8] sm:$0xf] }
 0x8e6   :  { %v13241_v3 = vor.u32 %v16794_v60, %v13240_v34  ;;  %v14361_v11 = vor.u32 %v17074_v50, %v14360_v1  ;;  %v14080_v13 = vld [vmem:[%s26324_s13 + $0x8c8] sm:$0xf]  ;;  %v13633_v48 = vor.u32 %v16892_v12, %v13632_v32  ;;  %v14305_v47 = vor.u32 %v17060_v24, %v14304_v19  ;;  %v16878_v18 = vld [vmem:[%s26324_s13 + $0x50c] sm:$0xf0]  ;;  %v14024_v27 = vld [vmem:[%s26324_s13 + $0x858] sm:$0xf] }
 0x8e7   :  { %v21170_v26 = vpack.c.bf16 %v4498_v36, %v4498_v36  ;;  %v21172_v9 = vpack.c.bf16 %v4499_v40, %v4499_v40  ;;  %v21174_v44 = vpack.c.bf16 %v4500_v54, %v4500_v54  ;;  %v21176_v46 = vpack.c.bf16 %v4501_v42, %v4501_v42  ;;  %v13072_v40 = vld [vmem:[%s26324_s13 + $0xe8] sm:$0xf]  ;;  %v16752_v54 = vld [vmem:[%s26324_s13 + $0x11c] sm:$0xf0]  ;;  %v16962_v34 = vld [vmem:[%s26324_s13 + $0x7ac] sm:$0xf0] }
 0x8e8   :  { %v14081_v59 = vor.u32 %v17004_v15, %v14080_v13  ;;  %v13577_v36 = vor.u32 %v16878_v18, %v13576_v21  ;;  %v14025_v42 = vor.u32 %v16990_v28, %v14024_v27  ;;  %v16787_v60 = vld [vmem:[%s26324_s13 + $0x23c] sm:$0xf]  ;;  %v13408_v10 = vld [vmem:[%s26324_s13 + $0x388] sm:$0xf]  ;;  %v14474_v50 = vld [vmem:[%s26324_s13 + $0xc10] sm:$0x10] }
 0x8e9   :  { %6929 = vmatmul.bf16.vlgmr.msra.gmra.mxu0 %v21170_v26  ;;  %6942 = vmatmul.bf16.vlgmr.msra.gmra.mxu1 %v21172_v9  ;;  %v17095_v1 = vld [vmem:[%s26324_s13 + $0xbdc] sm:$0xf]  ;;  %v16836_v43 = vld [vmem:[%s26324_s13 + $0x3bc] sm:$0xf0]  ;;  %v13856_v5 = vld [vmem:[%s26324_s13 + $0x708] sm:$0xf] }
 0x8ea   :  { %6955 = vmatmul.bf16.vlgmr.msra.gmra.mxu2 %v21174_v44  ;;  %14518 = vmatmul.msk.bf16.vlgmr.msra.gmra.mxu3 %vm157_vm1, %v21176_v46  ;;  %v13186_v32 = vld [vmem:[%s26324_s13 + $0x200] sm:$0xf0]  ;;  %v16927_v12 = vld [vmem:[%s26324_s13 + $0x69c] sm:$0xf]  ;;  %v13802_v13 = vld [vmem:[%s26324_s13 + $0x6d0] sm:$0xf0]  ;;  %v14477_v24 = vor.u32 %v17095_v1, %v14474_v50 }
 0x8eb   :  { %7025 = vmatpush.bf16.msra.mxu2 %v13353_v63  ;;  %7038 = vmatpush.bf16.msra.mxu3 %v13801_v16  ;;  %v16864_v63 = vld [vmem:[%s26324_s13 + $0x49c] sm:$0xf0]  ;;  %v13968_v16 = vld [vmem:[%s26324_s13 + $0x7e8] sm:$0xf]  ;;  %v17039_v15 = vld [vmem:[%s26324_s13 + $0xa1c] sm:$0xf] }
 0x8ec   :  { %7051 = vmatpush.bf16.msra.mxu0 %v14249_v52  ;;  %7068 = vmatpush.bf16.msra.mxu1 %v6886_v53  ;;  %v13298_v52 = vld [vmem:[%s26324_s13 + $0x2e0] sm:$0xf0]  ;;  %v13073_v53 = vor.u32 %v16752_v54, %v13072_v40  ;;  %v13521_v17 = vor.u32 %v16864_v63, %v13520_v41  ;;  %v13969_v45 = vor.u32 %v16976_v51, %v13968_v16  ;;  %v14250_v19 = vld [vmem:[%s26324_s13 + $0xa50] sm:$0xf0]  ;;  %v16759_v21 = vld [vmem:[%s26324_s13 + $0x15c] sm:$0xf] }
 0x8ed   :  { %v13301_v56 = vor.u32 %v16801_v14, %v13298_v52  ;;  %v13130_v18 = vld [vmem:[%s26324_s13 + $0x190] sm:$0xf0]  ;;  %v6889_v27 = vand.u32 %v14477_v24, %v17990_v4  ;;  %v16913_v28 = vld [vmem:[%s26324_s13 + $0x62c] sm:$0xf]  ;;  %v14418_v40 = vld [vmem:[%s26324_s13 + $0xba0] sm:$0xf0] }
 0x8ee   :  { %v13133_v54 = vor.u32 %v16759_v21, %v13130_v18  ;;  %v13074_v41 = vld [vmem:[%s26324_s13 + $0x120] sm:$0xf0]  ;;  %v16899_v51 = vld [vmem:[%s26324_s13 + $0x5bc] sm:$0xf]  ;;  %v13690_v14 = vld [vmem:[%s26324_s13 + $0x5f0] sm:$0xf0] }
 0x8ef   :  { %7026 = vmatpush.bf16.msra.mxu2 %v13297_v55  ;;  %7039 = vmatpush.bf16.msra.mxu3 %v13745_v58  ;;  %v16850_v55 = vld [vmem:[%s26324_s13 + $0x42c] sm:$0xf0]  ;;  %v13912_v58 = vld [vmem:[%s26324_s13 + $0x778] sm:$0xf]  ;;  %v17011_v52 = vld [vmem:[%s26324_s13 + $0x93c] sm:$0xf] }
 0x8f0   :  { %7052 = vmatpush.bf16.msra.mxu0 %v14193_v61  ;;  %7069 = vmatpush.bf16.msra.mxu1 %v14417_v37  ;;  %v13242_v61 = vld [vmem:[%s26324_s13 + $0x270] sm:$0xf0]  ;;  %v12960_v37 = vld [vmem:[%s26324_s13 + $0x8] sm:$0xf]  ;;  %v13465_v0 = vor.u32 %v16850_v55, %v13464_v49  ;;  %v13304_v24 = vld [vmem:[%s26324_s13 + $0x2b0] sm:$0xf] }
 0x8f1   :  { %v13018_v49 = vld [vmem:[%s26324_s13 + $0xb0] sm:$0xf0]  ;;  %v13522_v21 = vld [vmem:[%s26324_s13 + $0x4a0] sm:$0xf0]  ;;  %v16969_v18 = vld [vmem:[%s26324_s13 + $0x7ec] sm:$0xf] }
 0x8f3   :  { %7027 = vmatpush.bf16.msra.mxu2 %v13241_v3  ;;  %7040 = vmatpush.bf16.msra.mxu3 %v13689_v23  ;;  %v13913_v3 = vor.u32 %v16962_v34, %v13912_v58  ;;  %v13245_v23 = vor.u32 %v16787_v60, %v13242_v61  ;;  %v16885_v34 = vld [vmem:[%s26324_s13 + $0x54c] sm:$0xf]  ;;  %v13634_v60 = vld [vmem:[%s26324_s13 + $0x580] sm:$0xf0] }
 0x8f4   :  { %7053 = vmatpush.bf16.msra.mxu0 %v14137_v6  ;;  %7070 = vmatpush.bf16.msra.mxu1 %v14361_v11  ;;  %v16948_v6 = vld [vmem:[%s26324_s13 + $0x73c] sm:$0xf0]  ;;  %v16773_v11 = vld [vmem:[%s26324_s13 + $0x1cc] sm:$0xf]  ;;  %v13637_v50 = vor.u32 %v16885_v34, %v13634_v60  ;;  %v13858_v60 = vld [vmem:[%s26324_s13 + $0x740] sm:$0xf0] }
 0x8f5   :  { %v13857_v35 = vor.u32 %v16948_v6, %v13856_v5  ;;  %v13189_v39 = vor.u32 %v16773_v11, %v13186_v32  ;;  %v16997_v61 = vld [vmem:[%s26324_s13 + $0x8cc] sm:$0xf]  ;;  %v16871_v6 = vld [vmem:[%s26324_s13 + $0x4dc] sm:$0xf]  ;;  %v13578_v11 = vld [vmem:[%s26324_s13 + $0x510] sm:$0xf0] }
 0x8f6   :  { %v16983_v32 = vld [vmem:[%s26324_s13 + $0x85c] sm:$0xf]  ;;  %v16941_v34 = vld [vmem:[%s26324_s13 + $0x70c] sm:$0xf] }
 0x8f7   :  { %7028 = vmatpush.bf16.msra.mxu2 %v13185_v38  ;;  %7041 = vmatpush.bf16.msra.mxu3 %v13633_v48  ;;  %v12961_v38 = vor.u32 %v16724_v62, %v12960_v37  ;;  %v13409_v48 = vor.u32 %v16836_v43, %v13408_v10  ;;  %v14082_v37 = vld [vmem:[%s26324_s13 + $0x900] sm:$0xf0]  ;;  %v17053_v62 = vld [vmem:[%s26324_s13 + $0xa8c] sm:$0xf]  ;;  %v16823_v10 = vld [vmem:[%s26324_s13 + $0x354] sm:$0xf0] }
 0x8f8   :  { %7054 = vmatpush.bf16.msra.mxu0 %v14081_v59  ;;  %7071 = vmatpush.bf16.msra.mxu1 %v14305_v47  ;;  %v13805_v59 = vor.u32 %v16927_v12, %v13802_v13  ;;  %v14253_v47 = vor.u32 %v17039_v15, %v14250_v19  ;;  %v14085_v43 = vor.u32 %v16997_v61, %v14082_v37  ;;  %v14026_v13 = vld [vmem:[%s26324_s13 + $0x890] sm:$0xf0]  ;;  %v13808_v15 = vld [vmem:[%s26324_s13 + $0x6a0] sm:$0xf]  ;;  %v16935_v19 = vld [vmem:[%s26324_s13 + $0x6d4] sm:$0xf0] }
 0x8f9   :  { %6994 = vmatmul.bf16.vlgmr.msrb.gmra.mxu0 %v21172_v9  ;;  %7007 = vmatmul.bf16.vlgmr.msrb.gmra.mxu1 %v21174_v44  ;;  %v13640_v37 = vld [vmem:[%s26324_s13 + $0x550] sm:$0xf] }
 0x8fa   :  { %6981 = vmatmul.bf16.vlgmr.msrb.gmra.mxu3 %v21170_v26  ;;  %14519 = vmatmul.msk.bf16.vlgmr.msrb.gmra.mxu2 %vm157_vm1, %v21176_v46 }
 0x8fb   :  { %7029 = vmatpush.bf16.msra.mxu2 %v13129_v31  ;;  %7042 = vmatpush.bf16.msra.mxu3 %v13577_v36  ;;  %v14194_v31 = vld [vmem:[%s26324_s13 + $0x9e0] sm:$0xf0]  ;;  %v17081_v36 = vld [vmem:[%s26324_s13 + $0xb6c] sm:$0xf] }
 0x8fc   :  { %7055 = vmatpush.bf16.msra.mxu0 %v14025_v42  ;;  %7077 = vmatpush.bf16.msrb.mxu1 %v13357_v8  ;;  %v13749_v42 = vor.u32 %v16913_v28, %v13746_v29  ;;  %v16745_v8 = vld [vmem:[%s26324_s13 + $0xec] sm:$0xf]  ;;  %v14197_v63 = vor.u32 %v17025_v30, %v14194_v31  ;;  %v14421_v16 = vor.u32 %v17081_v36, %v14418_v40  ;;  %v13970_v28 = vld [vmem:[%s26324_s13 + $0x820] sm:$0xf0]  ;;  %v13752_v29 = vld [vmem:[%s26324_s13 + $0x630] sm:$0xf] }
 0x8fd   :  { %v13077_v22 = vor.u32 %v16745_v8, %v13074_v41  ;;  %v16921_v30 = vld [vmem:[%s26324_s13 + $0x664] sm:$0xf0]  ;;  %v13248_v31 = vld [vmem:[%s26324_s13 + $0x240] sm:$0xf]  ;;  %v16795_v36 = vld [vmem:[%s26324_s13 + $0x274] sm:$0xf0] }
 0x8fe   :  { %v16843_v8 = vld [vmem:[%s26324_s13 + $0x3fc] sm:$0xf]  ;;  %v13466_v41 = vld [vmem:[%s26324_s13 + $0x430] sm:$0xf0] }
 0x8ff   :  { %7030 = vmatpush.bf16.msra.mxu2 %v13073_v53  ;;  %7043 = vmatpush.bf16.msra.mxu3 %v13521_v17  ;;  %v14138_v53 = vld [vmem:[%s26324_s13 + $0x970] sm:$0xf0]  ;;  %v17067_v17 = vld [vmem:[%s26324_s13 + $0xafc] sm:$0xf] }
 0x900   :  { %7056 = vmatpush.bf16.msra.mxu0 %v13969_v45  ;;  %7078 = vmatpush.bf16.msrb.mxu1 %v13301_v56  ;;  %v13693_v45 = vor.u32 %v16899_v51, %v13690_v14  ;;  %v16731_v56 = vld [vmem:[%s26324_s13 + $0x7c] sm:$0xf]  ;;  %v14141_v55 = vor.u32 %v17011_v52, %v14138_v53  ;;  %v14365_v58 = vor.u32 %v17067_v17, %v14362_v7  ;;  %v13914_v51 = vld [vmem:[%s26324_s13 + $0x7b0] sm:$0xf0]  ;;  %v13696_v14 = vld [vmem:[%s26324_s13 + $0x5c0] sm:$0xf] }
 0x901   :  { %v13021_v1 = vor.u32 %v16731_v56, %v13018_v49  ;;  %v16907_v52 = vld [vmem:[%s26324_s13 + $0x5f4] sm:$0xf0]  ;;  %v13192_v53 = vld [vmem:[%s26324_s13 + $0x1d0] sm:$0xf]  ;;  %v16781_v17 = vld [vmem:[%s26324_s13 + $0x204] sm:$0xf0]  ;;  %v13469_v7 = vor.u32 %v16843_v8, %v13466_v41 }
 0x902   :  { %v17103_v56 = vld [vmem:[%s26324_s13 + $0xc14] sm:$0x10]  ;;  %v13193_v61 = vor.u32 %v16781_v17, %v13192_v53  ;;  %v14312_v53 = vld [vmem:[%s26324_s13 + $0xa90] sm:$0xf]  ;;  %v17061_v17 = vld [vmem:[%s26324_s13 + $0xac4] sm:$0xf0] }
 0x903   :  { %7031 = vmatpush.bf16.msra.mxu2 %v13017_v57  ;;  %7044 = vmatpush.bf16.msra.mxu3 %v13465_v0  ;;  %v14306_v57 = vld [vmem:[%s26324_s13 + $0xac0] sm:$0xf0]  ;;  %v13360_v0 = vld [vmem:[%s26324_s13 + $0x320] sm:$0xf]  ;;  %v16851_v41 = vld [vmem:[%s26324_s13 + $0x434] sm:$0xf0] }
 0x904   :  { %7057 = vmatpush.bf16.msra.mxu0 %v13913_v3  ;;  %7079 = vmatpush.bf16.msrb.mxu1 %v13245_v23  ;;  %v16717_v3 = vld [vmem:[%s26324_s13 + $0xc] sm:$0xf]  ;;  %v12962_v23 = vld [vmem:[%s26324_s13 + $0x40] sm:$0xf0]  ;;  %v14309_v5 = vor.u32 %v17053_v62, %v14306_v57  ;;  %v13361_v12 = vor.u32 %v16823_v10, %v13360_v0  ;;  %v16893_v62 = vld [vmem:[%s26324_s13 + $0x584] sm:$0xf0] }
 0x905   :  { %v13136_v57 = vld [vmem:[%s26324_s13 + $0x160] sm:$0xf]  ;;  %v16767_v0 = vld [vmem:[%s26324_s13 + $0x194] sm:$0xf0] }
 0x906   :  { %v14256_v10 = vld [vmem:[%s26324_s13 + $0xa20] sm:$0xf] }
 0x907   :  { %7032 = vmatpush.bf16.msra.mxu2 %v12961_v38  ;;  %7045 = vmatpush.bf16.msra.mxu3 %v13409_v48  ;;  %v16809_v38 = vld [vmem:[%s26324_s13 + $0x2e4] sm:$0xf0]  ;;  %v12965_v48 = vor.u32 %v16717_v3, %v12962_v23  ;;  %v13861_v23 = vor.u32 %v16941_v34, %v13858_v60  ;;  %v13416_v34 = vld [vmem:[%s26324_s13 + $0x390] sm:$0xf] }
 0x908   :  { %7058 = vmatpush.bf16.msra.mxu0 %v13857_v35  ;;  %7080 = vmatpush.bf16.msrb.mxu1 %v13189_v39  ;;  %v13581_v35 = vor.u32 %v16871_v6, %v13578_v11  ;;  %v14029_v39 = vor.u32 %v16983_v32, %v14026_v13  ;;  %v13584_v11 = vld [vmem:[%s26324_s13 + $0x4e0] sm:$0xf]  ;;  %v16879_v32 = vld [vmem:[%s26324_s13 + $0x514] sm:$0xf0]  ;;  %v16837_v60 = vld [vmem:[%s26324_s13 + $0x3c4] sm:$0xf0] }
 0x909   :  { %14520 = vmatmul.msk.bf16.vlgmr.msra.gmra.mxu1 %vm157_vm1, %v21176_v46 }
 0x90a   :  { %7033 = vmatmul.bf16.vlgmr.msra.gmra.mxu2 %v21170_v26  ;;  %7046 = vmatmul.bf16.vlgmr.msra.gmra.mxu3 %v21172_v9 }
 0x90b   :  { %7090 = vmatpush.bf16.msrb.mxu2 %v13805_v59  ;;  %7103 = vmatpush.bf16.msrb.mxu3 %v14253_v47  ;;  %v13809_v59 = vor.u32 %v16935_v19, %v13808_v15  ;;  %v16857_v47 = vld [vmem:[%s26324_s13 + $0x46c] sm:$0xf]  ;;  %v16753_v15 = vld [vmem:[%s26324_s13 + $0x124] sm:$0xf0]  ;;  %v14200_v19 = vld [vmem:[%s26324_s13 + $0x9b0] sm:$0xf] }
 0x90c   :  { %7120 = vmatpush.bf16.msrb.mxu0 %v6889_v27  ;;  %7081 = vmatpush.bf16.msrb.mxu1 %v13133_v54  ;;  %v13305_v27 = vor.u32 %v16809_v38, %v13304_v24  ;;  %v13525_v40 = vor.u32 %v16857_v47, %v13522_v21  ;;  %v13973_v54 = vor.u32 %v16969_v18, %v13970_v28  ;;  %v17033_v24 = vld [vmem:[%s26324_s13 + $0x9e4] sm:$0xf0]  ;;  %v14424_v38 = vld [vmem:[%s26324_s13 + $0xb70] sm:$0xf]  ;;  %v13024_v18 = vld [vmem:[%s26324_s13 + $0x80] sm:$0xf] }
 0x90d   :  { %7059 = vmatmul.bf16.vlgmr.msra.gmra.mxu0 %v21174_v44  ;;  %v13528_v47 = vld [vmem:[%s26324_s13 + $0x470] sm:$0xf]  ;;  %v16865_v21 = vld [vmem:[%s26324_s13 + $0x4a4] sm:$0xf0]  ;;  %v16739_v28 = vld [vmem:[%s26324_s13 + $0xb4] sm:$0xf0] }
 0x90f   :  { %7091 = vmatpush.bf16.msrb.mxu2 %v13749_v42  ;;  %7104 = vmatpush.bf16.msrb.mxu3 %v14197_v63  ;;  %v13753_v42 = vor.u32 %v16921_v30, %v13752_v29  ;;  %v16955_v63 = vld [vmem:[%s26324_s13 + $0x77c] sm:$0xf]  ;;  %v14144_v29 = vld [vmem:[%s26324_s13 + $0x940] sm:$0xf]  ;;  %v17019_v30 = vld [vmem:[%s26324_s13 + $0x974] sm:$0xf0] }
 0x910   :  { %7121 = vmatpush.bf16.msrb.mxu0 %v14421_v16  ;;  %7082 = vmatpush.bf16.msrb.mxu1 %v13077_v22  ;;  %v13249_v16 = vor.u32 %v16795_v36, %v13248_v31  ;;  %v16829_v22 = vld [vmem:[%s26324_s13 + $0x38c] sm:$0xf]  ;;  %v13917_v49 = vor.u32 %v16955_v63, %v13914_v51  ;;  %v14368_v31 = vld [vmem:[%s26324_s13 + $0xb00] sm:$0xf]  ;;  %v17075_v36 = vld [vmem:[%s26324_s13 + $0xb34] sm:$0xf0]  ;;  %v14145_v8 = vor.u32 %v17019_v30, %v14144_v29 }
 0x911   :  { %v12968_v63 = vld [vmem:[%s26324_s13 + $0x10] sm:$0xf]  ;;  %v14369_v51 = vor.u32 %v17075_v36, %v14368_v31  ;;  %v14146_v29 = vld [vmem:[%s26324_s13 + $0x978] sm:$0xf0]  ;;  %v16886_v30 = vld [vmem:[%s26324_s13 + $0x554] sm:$0xf] }
 0x912   :  { %v13642_v36 = vld [vmem:[%s26324_s13 + $0x588] sm:$0xf0] }
 0x913   :  { %7092 = vmatpush.bf16.msrb.mxu2 %v13693_v45  ;;  %7105 = vmatpush.bf16.msrb.mxu3 %v14141_v55  ;;  %v14480_v45 = vld [vmem:[%s26324_s13 + $0xbe0] sm:$0xf]  ;;  %v13697_v55 = vor.u32 %v16907_v52, %v13696_v14  ;;  %v14088_v14 = vld [vmem:[%s26324_s13 + $0x8d0] sm:$0xf]  ;;  %v17005_v52 = vld [vmem:[%s26324_s13 + $0x904] sm:$0xf0] }
 0x914   :  { %7122 = vmatpush.bf16.msrb.mxu0 %v14365_v58  ;;  %7083 = vmatpush.bf16.msrb.mxu1 %v13021_v1  ;;  %v13410_v58 = vld [vmem:[%s26324_s13 + $0x3c0] sm:$0xf0]  ;;  %v17047_v1 = vld [vmem:[%s26324_s13 + $0xa54] sm:$0xf0] }
 0x915   :  { %v13413_v3 = vor.u32 %v16829_v22, %v13410_v58  ;;  %v14257_v6 = vor.u32 %v17047_v1, %v14256_v10  ;;  %v13810_v22 = vld [vmem:[%s26324_s13 + $0x6d8] sm:$0xf0]  ;;  %v14089_v58 = vor.u32 %v17005_v52, %v14088_v14  ;;  %v16949_v14 = vld [vmem:[%s26324_s13 + $0x744] sm:$0xf0]  ;;  %v16998_v52 = vld [vmem:[%s26324_s13 + $0x8d4] sm:$0xf] }
 0x916   :  { %v14258_v10 = vld [vmem:[%s26324_s13 + $0xa58] sm:$0xf0] }
 0x917   :  { %7093 = vmatpush.bf16.msrb.mxu2 %v13637_v50  ;;  %7106 = vmatpush.bf16.msrb.mxu3 %v14085_v43  ;;  %v14481_v50 = vor.u32 %v17103_v56, %v14480_v45  ;;  %v13641_v43 = vor.u32 %v16893_v62, %v13640_v37  ;;  %v16816_v56 = vld [vmem:[%s26324_s13 + $0x324] sm:$0xf]  ;;  %v14313_v37 = vor.u32 %v17061_v17, %v14312_v53  ;;  %v14090_v53 = vld [vmem:[%s26324_s13 + $0x908] sm:$0xf0] }
 0x918   :  { %7123 = vmatpush.bf16.msrb.mxu0 %v14309_v5  ;;  %7084 = vmatpush.bf16.msrb.mxu1 %v12965_v48  ;;  %v13137_v5 = vor.u32 %v16767_v0, %v13136_v57  ;;  %v17089_v48 = vld [vmem:[%s26324_s13 + $0xba4] sm:$0xf0]  ;;  %v16991_v57 = vld [vmem:[%s26324_s13 + $0x894] sm:$0xf0]  ;;  %v17040_v0 = vld [vmem:[%s26324_s13 + $0xa24] sm:$0xf] }
 0x919   :  { %v6892_v13 = vand.u32 %v14481_v50, %v17990_v4  ;;  %v16914_v50 = vld [vmem:[%s26324_s13 + $0x634] sm:$0xf] }
 0x91b   :  { %7094 = vmatpush.bf16.msrb.mxu2 %v13581_v35  ;;  %7107 = vmatpush.bf16.msrb.mxu3 %v14029_v39  ;;  %v13585_v35 = vor.u32 %v16879_v32, %v13584_v11  ;;  %v14261_v11 = vor.u32 %v17040_v0, %v14258_v10  ;;  %v13976_v32 = vld [vmem:[%s26324_s13 + $0x7f0] sm:$0xf]  ;;  %v13530_v0 = vld [vmem:[%s26324_s13 + $0x4a8] sm:$0xf0]  ;;  %v17082_v10 = vld [vmem:[%s26324_s13 + $0xb74] sm:$0xf] }
 0x91c   :  { %7129 = vmatpush.bf16.msra.mxu0 %v13361_v12  ;;  %7142 = vmatpush.bf16.msra.mxu1 %v13809_v59  ;;  %v13080_v12 = vld [vmem:[%s26324_s13 + $0xf0] sm:$0xf]  ;;  %v14201_v59 = vor.u32 %v17033_v24, %v14200_v19  ;;  %v14202_v19 = vld [vmem:[%s26324_s13 + $0x9e8] sm:$0xf0] }
 0x91d   :  { %7085 = vmatmul.bf16.vlgmr.msrb.gmra.mxu1 %v21170_v26  ;;  %14521 = vmatmul.msk.bf16.vlgmr.msrb.gmra.mxu0 %vm157_vm1, %v21176_v46  ;;  %v13081_v39 = vor.u32 %v16753_v15, %v13080_v12  ;;  %v17026_v15 = vld [vmem:[%s26324_s13 + $0x9b4] sm:$0xf] }
 0x91f   :  { %7095 = vmatpush.bf16.msrb.mxu2 %v13525_v40  ;;  %7108 = vmatpush.bf16.msrb.mxu3 %v13973_v54  ;;  %v13529_v40 = vor.u32 %v16865_v21, %v13528_v47  ;;  %v13472_v54 = vld [vmem:[%s26324_s13 + $0x400] sm:$0xf]  ;;  %v14205_v47 = vor.u32 %v17026_v15, %v14202_v19  ;;  %v17068_v15 = vld [vmem:[%s26324_s13 + $0xb04] sm:$0xf]  ;;  %v14370_v19 = vld [vmem:[%s26324_s13 + $0xb38] sm:$0xf0] }
 0x920   :  { %7130 = vmatpush.bf16.msra.mxu0 %v13305_v27  ;;  %7143 = vmatpush.bf16.msra.mxu1 %v13753_v42  ;;  %v14425_v27 = vor.u32 %v17089_v48, %v14424_v38  ;;  %v13025_v42 = vor.u32 %v16739_v28, %v13024_v18  ;;  %v13473_v45 = vor.u32 %v16851_v41, %v13472_v54  ;;  %v16900_v38 = vld [vmem:[%s26324_s13 + $0x5c4] sm:$0xf]  ;;  %v13698_v48 = vld [vmem:[%s26324_s13 + $0x5f8] sm:$0xf0]  ;;  %v13920_v21 = vld [vmem:[%s26324_s13 + $0x780] sm:$0xf] }
 0x921   :  { %v16963_v18 = vld [vmem:[%s26324_s13 + $0x7b4] sm:$0xf0]  ;;  %v17012_v28 = vld [vmem:[%s26324_s13 + $0x944] sm:$0xf]  ;;  %v14482_v54 = vld [vmem:[%s26324_s13 + $0xc18] sm:$0x10] }
 0x922   :  { %v13921_v41 = vor.u32 %v16963_v18, %v13920_v21  ;;  %v16718_v21 = vld [vmem:[%s26324_s13 + $0x14] sm:$0xf]  ;;  %v12970_v18 = vld [vmem:[%s26324_s13 + $0x48] sm:$0xf0] }
 0x923   :  { %7096 = vmatpush.bf16.msrb.mxu2 %v13469_v7  ;;  %7109 = vmatpush.bf16.msrb.mxu3 %v13917_v49  ;;  %v16928_v7 = vld [vmem:[%s26324_s13 + $0x6a4] sm:$0xf]  ;;  %v13362_v49 = vld [vmem:[%s26324_s13 + $0x358] sm:$0xf0] }
 0x924   :  { %7131 = vmatpush.bf16.msra.mxu0 %v13249_v16  ;;  %7144 = vmatpush.bf16.msra.mxu1 %v13697_v55  ;;  %v16725_v16 = vld [vmem:[%s26324_s13 + $0x44] sm:$0xf0]  ;;  %v13813_v62 = vor.u32 %v16928_v7, %v13810_v22  ;;  %v13365_v1 = vor.u32 %v16816_v56, %v13362_v49  ;;  %v16872_v22 = vld [vmem:[%s26324_s13 + $0x4e4] sm:$0xf]  ;;  %v13138_v49 = vld [vmem:[%s26324_s13 + $0x198] sm:$0xf0] }
 0x925   :  { %v12969_v55 = vor.u32 %v16725_v16, %v12968_v63  ;;  %v14149_v63 = vor.u32 %v17012_v28, %v14146_v29  ;;  %v13864_v16 = vld [vmem:[%s26324_s13 + $0x710] sm:$0xf]  ;;  %v16760_v56 = vld [vmem:[%s26324_s13 + $0x164] sm:$0xf]  ;;  %v13418_v28 = vld [vmem:[%s26324_s13 + $0x3c8] sm:$0xf0] }
 0x926   :  { %v17054_v29 = vld [vmem:[%s26324_s13 + $0xa94] sm:$0xf] }
 0x927   :  { %7097 = vmatpush.bf16.msrb.mxu2 %v13413_v3  ;;  %7110 = vmatpush.bf16.msrb.mxu3 %v13861_v23  ;;  %v13754_v3 = vld [vmem:[%s26324_s13 + $0x668] sm:$0xf0]  ;;  %v13417_v23 = vor.u32 %v16837_v60, %v13416_v34 }
 0x928   :  { %7132 = vmatpush.bf16.msra.mxu0 %v13193_v61  ;;  %7145 = vmatpush.bf16.msra.mxu1 %v13641_v43  ;;  %v14032_v61 = vld [vmem:[%s26324_s13 + $0x860] sm:$0xf]  ;;  %v16802_v43 = vld [vmem:[%s26324_s13 + $0x2b4] sm:$0xf]  ;;  %v13757_v12 = vor.u32 %v16914_v50, %v13754_v3  ;;  %v13082_v3 = vld [vmem:[%s26324_s13 + $0x128] sm:$0xf0] }
 0x929   :  { %v16746_v50 = vld [vmem:[%s26324_s13 + $0xf4] sm:$0xf] }
 0x92a   :  { %7098 = vmatmul.bf16.vlgmr.msrb.gmra.mxu2 %v21172_v9  ;;  %7111 = vmatmul.bf16.vlgmr.msrb.gmra.mxu3 %v21174_v44 }
 0x92b   :  { %7155 = vmatpush.bf16.msra.mxu2 %v14257_v6  ;;  %7172 = vmatpush.bf16.msra.mxu3 %v6892_v13  ;;  %v14033_v6 = vor.u32 %v16991_v57, %v14032_v61  ;;  %v16977_v13 = vld [vmem:[%s26324_s13 + $0x824] sm:$0xf0]  ;;  %v16984_v61 = vld [vmem:[%s26324_s13 + $0x864] sm:$0xf]  ;;  %v13141_v57 = vor.u32 %v16760_v56, %v13138_v49 }
 0x92c   :  { %7133 = vmatpush.bf16.msra.mxu0 %v13137_v5  ;;  %7146 = vmatpush.bf16.msra.mxu1 %v13585_v35  ;;  %v13306_v5 = vld [vmem:[%s26324_s13 + $0x2e8] sm:$0xf0]  ;;  %v16788_v35 = vld [vmem:[%s26324_s13 + $0x244] sm:$0xf] }
 0x92d   :  { %v13309_v24 = vor.u32 %v16802_v43, %v13306_v5 }
 0x92f   :  { %7156 = vmatpush.bf16.msra.mxu2 %v14201_v59  ;;  %7173 = vmatpush.bf16.msra.mxu3 %v14425_v27  ;;  %v13977_v59 = vor.u32 %v16977_v13, %v13976_v32  ;;  %v13701_v27 = vor.u32 %v16900_v38, %v13698_v48  ;;  %v16844_v32 = vld [vmem:[%s26324_s13 + $0x404] sm:$0xf]  ;;  %v13474_v13 = vld [vmem:[%s26324_s13 + $0x438] sm:$0xf0] }
 0x930   :  { %7134 = vmatpush.bf16.msra.mxu0 %v13081_v39  ;;  %7147 = vmatpush.bf16.msra.mxu1 %v13529_v40  ;;  %v13250_v39 = vld [vmem:[%s26324_s13 + $0x278] sm:$0xf0]  ;;  %v17096_v40 = vld [vmem:[%s26324_s13 + $0xbe4] sm:$0xf] }
 0x931   :  { %v13253_v31 = vor.u32 %v16788_v35, %v13250_v39  ;;  %v14485_v17 = vor.u32 %v17096_v40, %v14482_v54  ;;  %v13026_v38 = vld [vmem:[%s26324_s13 + $0xb8] sm:$0xf0]  ;;  %v16956_v35 = vld [vmem:[%s26324_s13 + $0x784] sm:$0xf]  ;;  %v17104_v40 = vld [vmem:[%s26324_s13 + $0xc1c] sm:$0x10] }
 0x932   :  { %v13922_v39 = vld [vmem:[%s26324_s13 + $0x7b8] sm:$0xf0]  ;;  %v13368_v54 = vld [vmem:[%s26324_s13 + $0x328] sm:$0xf] }
 0x933   :  { %7157 = vmatpush.bf16.msra.mxu2 %v14145_v8  ;;  %7174 = vmatpush.bf16.msra.mxu3 %v14369_v51  ;;  %v13194_v8 = vld [vmem:[%s26324_s13 + $0x208] sm:$0xf0]  ;;  %v13645_v51 = vor.u32 %v16886_v30, %v13642_v36  ;;  %v6895_v60 = vand.u32 %v14485_v17, %v17990_v4  ;;  %v14488_v36 = vld [vmem:[%s26324_s13 + $0xbe8] sm:$0xf] }
 0x934   :  { %7135 = vmatpush.bf16.msra.mxu0 %v13025_v42  ;;  %7148 = vmatpush.bf16.msra.mxu1 %v13473_v45  ;;  %v16774_v42 = vld [vmem:[%s26324_s13 + $0x1d4] sm:$0xf]  ;;  %v13586_v45 = vld [vmem:[%s26324_s13 + $0x518] sm:$0xf0]  ;;  %v13866_v17 = vld [vmem:[%s26324_s13 + $0x748] sm:$0xf0] }
 0x935   :  { %v13197_v7 = vor.u32 %v16774_v42, %v13194_v8  ;;  %v13589_v34 = vor.u32 %v16872_v22, %v13586_v45  ;;  %v16824_v42 = vld [vmem:[%s26324_s13 + $0x35c] sm:$0xf0]  ;;  %v13816_v8 = vld [vmem:[%s26324_s13 + $0x6a8] sm:$0xf]  ;;  %v12973_v22 = vor.u32 %v16718_v21, %v12970_v18  ;;  %v17006_v21 = vld [vmem:[%s26324_s13 + $0x90c] sm:$0xf0] }
 0x936   :  { %v13369_v45 = vor.u32 %v16824_v42, %v13368_v54  ;;  %v13592_v54 = vld [vmem:[%s26324_s13 + $0x4e8] sm:$0xf]  ;;  %v16817_v42 = vld [vmem:[%s26324_s13 + $0x32c] sm:$0xf] }
 0x937   :  { %7158 = vmatpush.bf16.msra.mxu2 %v14089_v58  ;;  %7175 = vmatpush.bf16.msra.mxu3 %v14313_v37  ;;  %v14093_v58 = vor.u32 %v16998_v52, %v14090_v53  ;;  %v14034_v37 = vld [vmem:[%s26324_s13 + $0x898] sm:$0xf0]  ;;  %v16942_v53 = vld [vmem:[%s26324_s13 + $0x714] sm:$0xf] }
 0x938   :  { %7136 = vmatpush.bf16.msra.mxu0 %v12969_v55  ;;  %7149 = vmatpush.bf16.msra.mxu1 %v13417_v23  ;;  %v13865_v55 = vor.u32 %v16949_v14, %v13864_v16  ;;  %v14037_v23 = vor.u32 %v16984_v61, %v14034_v37  ;;  %v14264_v16 = vld [vmem:[%s26324_s13 + $0xa28] sm:$0xf]  ;;  %v16922_v61 = vld [vmem:[%s26324_s13 + $0x66c] sm:$0xf0]  ;;  %v14208_v37 = vld [vmem:[%s26324_s13 + $0x9b8] sm:$0xf] }
 0x93a   :  { %14522 = vmatmul.msk.bf16.vlgmr.msra.gmra.mxu3 %vm157_vm1, %v21176_v46 }
 0x93b   :  { %7181 = vmatpush.bf16.msrb.mxu3 %v13365_v1  ;;  %7137 = vmatmul.bf16.vlgmr.msra.gmra.mxu0 %v21170_v26  ;;  %v14426_v1 = vld [vmem:[%s26324_s13 + $0xba8] sm:$0xf0] }
 0x93c   :  { %7194 = vmatpush.bf16.msrb.mxu0 %v13813_v62  ;;  %7159 = vmatpush.bf16.msra.mxu2 %v14033_v6  ;;  %v16858_v62 = vld [vmem:[%s26324_s13 + $0x474] sm:$0xf]  ;;  %v14429_v5 = vor.u32 %v17082_v10, %v14426_v1  ;;  %v14432_v10 = vld [vmem:[%s26324_s13 + $0xb78] sm:$0xf]  ;;  %v17090_v1 = vld [vmem:[%s26324_s13 + $0xbac] sm:$0xf0] }
 0x93d   :  { %7207 = vmatpush.bf16.msrb.mxu1 %v14261_v11  ;;  %v13533_v43 = vor.u32 %v16858_v62, %v13530_v0  ;;  %v16970_v6 = vld [vmem:[%s26324_s13 + $0x7f4] sm:$0xf]  ;;  %v13978_v11 = vld [vmem:[%s26324_s13 + $0x828] sm:$0xf0]  ;;  %v17034_v62 = vld [vmem:[%s26324_s13 + $0x9ec] sm:$0xf0] }
 0x93e   :  { %7150 = vmatmul.bf16.vlgmr.msra.gmra.mxu1 %v21172_v9  ;;  %v13981_v48 = vor.u32 %v16970_v6, %v13978_v11  ;;  %v16908_v6 = vld [vmem:[%s26324_s13 + $0x5fc] sm:$0xf0]  ;;  %v14152_v11 = vld [vmem:[%s26324_s13 + $0x948] sm:$0xf] }
 0x93f   :  { %7182 = vmatpush.bf16.msrb.mxu3 %v13309_v24  ;;  %v16732_v24 = vld [vmem:[%s26324_s13 + $0x84] sm:$0xf] }
 0x940   :  { %7195 = vmatpush.bf16.msrb.mxu0 %v13757_v12  ;;  %7160 = vmatpush.bf16.msra.mxu2 %v13977_v59  ;;  %v13085_v12 = vor.u32 %v16746_v50, %v13082_v3  ;;  %v13477_v59 = vor.u32 %v16844_v32, %v13474_v13  ;;  %v13029_v30 = vor.u32 %v16732_v24, %v13026_v38  ;;  %v17020_v32 = vld [vmem:[%s26324_s13 + $0x97c] sm:$0xf0] }
 0x941   :  { %7208 = vmatpush.bf16.msrb.mxu1 %v14205_v47  ;;  %v14373_v47 = vor.u32 %v17068_v15, %v14370_v19  ;;  %v14209_v3 = vor.u32 %v17034_v62, %v14208_v37  ;;  %v14376_v15 = vld [vmem:[%s26324_s13 + $0xb08] sm:$0xf]  ;;  %v17076_v19 = vld [vmem:[%s26324_s13 + $0xb3c] sm:$0xf0]  ;;  %v14153_v38 = vor.u32 %v17020_v32, %v14152_v11  ;;  %v12976_v11 = vld [vmem:[%s26324_s13 + $0x18] sm:$0xf] }
 0x942   :  { %v14377_v18 = vor.u32 %v17076_v19, %v14376_v15  ;;  %v13032_v62 = vld [vmem:[%s26324_s13 + $0x88] sm:$0xf]  ;;  %v16726_v32 = vld [vmem:[%s26324_s13 + $0x4c] sm:$0xf0]  ;;  %v13424_v15 = vld [vmem:[%s26324_s13 + $0x398] sm:$0xf] }
 0x943   :  { %7183 = vmatpush.bf16.msrb.mxu3 %v13253_v31  ;;  %v14314_v31 = vld [vmem:[%s26324_s13 + $0xac8] sm:$0xf0] }
 0x944   :  { %7196 = vmatpush.bf16.msrb.mxu0 %v13701_v27  ;;  %7161 = vmatpush.bf16.msra.mxu2 %v13921_v41  ;;  %v16830_v27 = vld [vmem:[%s26324_s13 + $0x394] sm:$0xf]  ;;  %v13925_v41 = vor.u32 %v16956_v35, %v13922_v39  ;;  %v14317_v52 = vor.u32 %v17054_v29, %v14314_v31  ;;  %v16782_v35 = vld [vmem:[%s26324_s13 + $0x20c] sm:$0xf0]  ;;  %v13648_v39 = vld [vmem:[%s26324_s13 + $0x558] sm:$0xf] }
 0x945   :  { %7209 = vmatpush.bf16.msrb.mxu1 %v14149_v63  ;;  %v16936_v63 = vld [vmem:[%s26324_s13 + $0x6dc] sm:$0xf0]  ;;  %v13421_v14 = vor.u32 %v16830_v27, %v13418_v28  ;;  %v14320_v27 = vld [vmem:[%s26324_s13 + $0xa98] sm:$0xf]  ;;  %v17062_v29 = vld [vmem:[%s26324_s13 + $0xacc] sm:$0xf0] }
 0x946   :  { %v13817_v56 = vor.u32 %v16936_v63, %v13816_v8  ;;  %v16768_v31 = vld [vmem:[%s26324_s13 + $0x19c] sm:$0xf0]  ;;  %v13370_v8 = vld [vmem:[%s26324_s13 + $0x360] sm:$0xf0]  ;;  %v14040_v63 = vld [vmem:[%s26324_s13 + $0x868] sm:$0xf] }
 0x947   :  { %7184 = vmatpush.bf16.msrb.mxu3 %v13197_v7  ;;  %v14489_v7 = vor.u32 %v17104_v40, %v14488_v36  ;;  %v17097_v19 = vld [vmem:[%s26324_s13 + $0xbec] sm:$0xf] }
 0x948   :  { %7197 = vmatpush.bf16.msrb.mxu0 %v13645_v51  ;;  %7162 = vmatpush.bf16.msra.mxu2 %v13865_v55  ;;  %v17048_v51 = vld [vmem:[%s26324_s13 + $0xa5c] sm:$0xf0]  ;;  %v13312_v55 = vld [vmem:[%s26324_s13 + $0x2b8] sm:$0xf] }
 0x949   :  { %7210 = vmatpush.bf16.msrb.mxu1 %v14093_v58  ;;  %v14265_v49 = vor.u32 %v17048_v51, %v14264_v16  ;;  %v16810_v58 = vld [vmem:[%s26324_s13 + $0x2ec] sm:$0xf0]  ;;  %v16992_v16 = vld [vmem:[%s26324_s13 + $0x89c] sm:$0xf0]  ;;  %v14321_v51 = vor.u32 %v17062_v29, %v14320_v27  ;;  %v13872_v27 = vld [vmem:[%s26324_s13 + $0x718] sm:$0xf] }
 0x94a   :  { %v13313_v0 = vor.u32 %v16810_v58, %v13312_v55  ;;  %v16866_v55 = vld [vmem:[%s26324_s13 + $0x4ac] sm:$0xf0]  ;;  %v13984_v58 = vld [vmem:[%s26324_s13 + $0x7f8] sm:$0xf]  ;;  %v16929_v29 = vld [vmem:[%s26324_s13 + $0x6ac] sm:$0xf] }
 0x94b   :  { %7185 = vmatpush.bf16.msrb.mxu3 %v13141_v57  ;;  %7163 = vmatmul.bf16.vlgmr.msra.gmra.mxu2 %v21174_v44  ;;  %v6898_v57 = vand.u32 %v14489_v7, %v17990_v4 }
 0x94c   :  { %7198 = vmatpush.bf16.msrb.mxu0 %v13589_v34  ;;  %7224 = vmatpush.bf16.msrb.mxu2 %v6895_v60  ;;  %v13760_v34 = vld [vmem:[%s26324_s13 + $0x638] sm:$0xf]  ;;  %v13869_v60 = vor.u32 %v16942_v53, %v13866_v17  ;;  %v16754_v17 = vld [vmem:[%s26324_s13 + $0x12c] sm:$0xf0] }
 0x94d   :  { %7211 = vmatpush.bf16.msrb.mxu1 %v14037_v23  ;;  %v13761_v50 = vor.u32 %v16922_v61, %v13760_v34  ;;  %v13256_v23 = vld [vmem:[%s26324_s13 + $0x248] sm:$0xf]  ;;  %v13088_v53 = vld [vmem:[%s26324_s13 + $0xf8] sm:$0xf]  ;;  %v16978_v34 = vld [vmem:[%s26324_s13 + $0x82c] sm:$0xf0] }
 0x94e   :  { %v13089_v61 = vor.u32 %v16754_v17, %v13088_v53  ;;  %v16915_v53 = vld [vmem:[%s26324_s13 + $0x63c] sm:$0xf] }
 0x94f   :  { %7186 = vmatpush.bf16.msrb.mxu3 %v13085_v12  ;;  %v14433_v12 = vor.u32 %v17090_v1, %v14432_v10  ;;  %v13985_v1 = vor.u32 %v16978_v34, %v13984_v58  ;;  %v14434_v58 = vld [vmem:[%s26324_s13 + $0xbb0] sm:$0xf0] }
 0x950   :  { %7199 = vmatpush.bf16.msrb.mxu0 %v13533_v43  ;;  %7225 = vmatpush.bf16.msrb.mxu2 %v14429_v5  ;;  %v16796_v43 = vld [vmem:[%s26324_s13 + $0x27c] sm:$0xf0]  ;;  %v13704_v5 = vld [vmem:[%s26324_s13 + $0x5c8] sm:$0xf] }
 0x951   :  { %7212 = vmatpush.bf16.msrb.mxu1 %v13981_v48  ;;  %v13257_v13 = vor.u32 %v16796_v43, %v13256_v23  ;;  %v13705_v24 = vor.u32 %v16908_v6, %v13704_v5  ;;  %v13200_v48 = vld [vmem:[%s26324_s13 + $0x1d8] sm:$0xf]  ;;  %v13258_v23 = vld [vmem:[%s26324_s13 + $0x280] sm:$0xf0]  ;;  %v13928_v43 = vld [vmem:[%s26324_s13 + $0x788] sm:$0xf] }
 0x952   :  { %v13201_v28 = vor.u32 %v16782_v35, %v13200_v48  ;;  %v16964_v5 = vld [vmem:[%s26324_s13 + $0x7bc] sm:$0xf0] }
 0x953   :  { %7187 = vmatpush.bf16.msrb.mxu3 %v13029_v30  ;;  %v13144_v30 = vld [vmem:[%s26324_s13 + $0x168] sm:$0xf]  ;;  %v13929_v48 = vor.u32 %v16964_v5, %v13928_v43  ;;  %v13706_v43 = vld [vmem:[%s26324_s13 + $0x600] sm:$0xf0]  ;;  %v17013_v5 = vld [vmem:[%s26324_s13 + $0x94c] sm:$0xf] }
 0x954   :  { %7200 = vmatpush.bf16.msrb.mxu0 %v13477_v59  ;;  %7226 = vmatpush.bf16.msrb.mxu2 %v14373_v47  ;;  %v16894_v59 = vld [vmem:[%s26324_s13 + $0x58c] sm:$0xf0]  ;;  %v14096_v47 = vld [vmem:[%s26324_s13 + $0x8d8] sm:$0xf] }
 0x955   :  { %7213 = vmatpush.bf16.msrb.mxu1 %v13925_v41  ;;  %v13649_v36 = vor.u32 %v16894_v59, %v13648_v39  ;;  %v14097_v40 = vor.u32 %v17006_v21, %v14096_v47  ;;  %v16880_v41 = vld [vmem:[%s26324_s13 + $0x51c] sm:$0xf0]  ;;  %v16838_v59 = vld [vmem:[%s26324_s13 + $0x3cc] sm:$0xf0]  ;;  %v16775_v47 = vld [vmem:[%s26324_s13 + $0x1dc] sm:$0xf] }
 0x956   :  { %v13593_v7 = vor.u32 %v16880_v41, %v13592_v54  ;;  %v13202_v21 = vld [vmem:[%s26324_s13 + $0x210] sm:$0xf0]  ;;  %v13425_v41 = vor.u32 %v16838_v59, %v13424_v15 }
 0x957   :  { %7188 = vmatpush.bf16.msrb.mxu3 %v12973_v22  ;;  %v14041_v22 = vor.u32 %v16992_v16, %v14040_v63  ;;  %v14098_v59 = vld [vmem:[%s26324_s13 + $0x910] sm:$0xf0] }
 0x958   :  { %7201 = vmatpush.bf16.msrb.mxu0 %v13421_v14  ;;  %7227 = vmatpush.bf16.msrb.mxu2 %v14317_v52  ;;  %v13145_v14 = vor.u32 %v16768_v31, %v13144_v30  ;;  %v13373_v52 = vor.u32 %v16817_v42, %v13370_v8  ;;  %v13818_v30 = vld [vmem:[%s26324_s13 + $0x6e0] sm:$0xf0]  ;;  %v17041_v31 = vld [vmem:[%s26324_s13 + $0xa2c] sm:$0xf]  ;;  %v12977_v42 = vor.u32 %v16726_v32, %v12976_v11 }
 0x959   :  { %7214 = vmatpush.bf16.msrb.mxu1 %v13869_v60  ;;  %v22008_v60 = vld [vmem:[%s26325_s14] sm:$0xff]  ;;  %v13205_v8 = vor.u32 %v16775_v47, %v13202_v21  ;;  %v13821_v16 = vor.u32 %v16929_v29, %v13818_v30  ;;  %v17069_v11 = vld [vmem:[%s26324_s13 + $0xb0c] sm:$0xf] }
 0x95a   :  { %7189 = vmatmul.bf16.vlgmr.msrb.gmra.mxu3 %v21170_v26  ;;  %v4902_v6 = vperm.slane %v22008_v60, 0  ;;  %v14378_v32 = vld [vmem:[%s26324_s13 + $0xb40] sm:$0xf0] }
 0x95b   :  { %7246 = vmatpush.bf16.msra.mxu3 %v13817_v56  ;;  %7202 = vmatmul.bf16.vlgmr.msrb.gmra.mxu0 %v21172_v9  ;;  %v16803_v56 = vld [vmem:[%s26324_s13 + $0x2bc] sm:$0xf] }
 0x95c   :  { %7233 = vmatpush.bf16.msra.mxu2 %v13369_v45  ;;  %7259 = vmatpush.bf16.msra.mxu0 %v14265_v49  ;;  %v13536_v45 = vld [vmem:[%s26324_s13 + $0x478] sm:$0xf]  ;;  %v13314_v49 = vld [vmem:[%s26324_s13 + $0x2f0] sm:$0xf0] }
 0x95d   :  { %7276 = vmatpush.bf16.msra.mxu1 %v6898_v57  ;;  %14523 = vmatmul.msk.bf16.vlgmr.msrb.gmra.mxu2 %vm157_vm1, %v21176_v46  ;;  %v13317_v37 = vor.u32 %v16803_v56, %v13314_v49  ;;  %v16740_v57 = vld [vmem:[%s26324_s13 + $0xbc] sm:$0xf0]  ;;  %v13537_v10 = vor.u32 %v16866_v55, %v13536_v45  ;;  %v14210_v45 = vld [vmem:[%s26324_s13 + $0x9f0] sm:$0xf0]  ;;  %v17083_v55 = vld [vmem:[%s26324_s13 + $0xb7c] sm:$0xf] }
 0x95e   :  { %7215 = vmatmul.bf16.vlgmr.msrb.gmra.mxu1 %v21174_v44 }
 0x95f   :  { %7247 = vmatpush.bf16.msra.mxu3 %v13761_v50  ;;  %v16852_v50 = vld [vmem:[%s26324_s13 + $0x43c] sm:$0xf0] }
 0x960   :  { %7234 = vmatpush.bf16.msra.mxu2 %v13313_v0  ;;  %7260 = vmatpush.bf16.msra.mxu0 %v14209_v3  ;;  %v13480_v0 = vld [vmem:[%s26324_s13 + $0x408] sm:$0xf]  ;;  %v16789_v3 = vld [vmem:[%s26324_s13 + $0x24c] sm:$0xf] }
 0x961   :  { %7277 = vmatpush.bf16.msra.mxu1 %v14433_v12  ;;  %v13033_v12 = vor.u32 %v16740_v57, %v13032_v62 }
 0x963   :  { %7248 = vmatpush.bf16.msra.mxu3 %v13705_v24  ;;  %v14490_v24 = vld [vmem:[%s26324_s13 + $0xc20] sm:$0x10] }
 0x964   :  { %7235 = vmatpush.bf16.msra.mxu2 %v13257_v13  ;;  %7261 = vmatpush.bf16.msra.mxu0 %v14153_v38  ;;  %v13261_v13 = vor.u32 %v16789_v3, %v13258_v23  ;;  %v13481_v38 = vor.u32 %v16852_v50, %v13480_v0  ;;  %v16901_v50 = vld [vmem:[%s26324_s13 + $0x5cc] sm:$0xf]  ;;  %v14437_v23 = vor.u32 %v17083_v55, %v14434_v58  ;;  %v16859_v58 = vld [vmem:[%s26324_s13 + $0x47c] sm:$0xf] }
 0x965   :  { %7278 = vmatpush.bf16.msra.mxu1 %v14377_v18 }
 0x966   :  { %v6930_v35 = vpop.f32.mrf.mxu0  ;;  %v6943_v39 = vpop.f32.mrf.mxu1 }
 0x967   :  { %7249 = vmatpush.bf16.msra.mxu3 %v13649_v36  ;;  %v6931_v18 = vadd.f32 %v6930_v35, %v4902_v6  ;;  %v14266_v36 = vld [vmem:[%s26324_s13 + $0xa60] sm:$0xf0]  ;;  %v13650_v35 = vld [vmem:[%s26324_s13 + $0x590] sm:$0xf0] }
 0x968   :  { %7236 = vmatpush.bf16.msra.mxu2 %v13201_v28  ;;  %7262 = vmatpush.bf16.msra.mxu0 %v14097_v40  ;;  %v16950_v28 = vld [vmem:[%s26324_s13 + $0x74c] sm:$0xf0]  ;;  %v14493_v40 = vor.u32 %v17097_v19, %v14490_v24  ;;  %v14154_v6 = vld [vmem:[%s26324_s13 + $0x980] sm:$0xf0]  ;;  %v16733_v19 = vld [vmem:[%s26324_s13 + $0x8c] sm:$0xf] }
 0x969   :  { %7279 = vmatpush.bf16.msra.mxu1 %v14321_v51  ;;  %v6944_v54 = vadd.f32 %v6943_v39, %v6931_v18  ;;  %v13873_v63 = vor.u32 %v16950_v28, %v13872_v27  ;;  %v14269_v51 = vor.u32 %v17041_v31, %v14266_v36  ;;  %v14157_v15 = vor.u32 %v17013_v5, %v14154_v6  ;;  %v13034_v24 = vld [vmem:[%s26324_s13 + $0xc0] sm:$0xf0]  ;;  %v16999_v39 = vld [vmem:[%s26324_s13 + $0x8dc] sm:$0xf]  ;;  %v14322_v27 = vld [vmem:[%s26324_s13 + $0xad0] sm:$0xf0] }
 0x96a   :  { %v6901_v17 = vand.u32 %v14493_v40, %v17990_v4  ;;  %v17055_v18 = vld [vmem:[%s26324_s13 + $0xa9c] sm:$0xf]  ;;  %v13037_v28 = vor.u32 %v16733_v19, %v13034_v24  ;;  %v13376_v31 = vld [vmem:[%s26324_s13 + $0x330] sm:$0xf]  ;;  %v16825_v36 = vld [vmem:[%s26324_s13 + $0x364] sm:$0xf0] }
 0x96b   :  { %7250 = vmatpush.bf16.msra.mxu3 %v13593_v7  ;;  %v13762_v7 = vld [vmem:[%s26324_s13 + $0x670] sm:$0xf0]  ;;  %v13264_v6 = vld [vmem:[%s26324_s13 + $0x250] sm:$0xf]  ;;  %v13482_v24 = vld [vmem:[%s26324_s13 + $0x440] sm:$0xf0] }
 0x96c   :  { %7237 = vmatpush.bf16.msra.mxu2 %v13145_v14  ;;  %7263 = vmatpush.bf16.msra.mxu0 %v14041_v22  ;;  %v16761_v14 = vld [vmem:[%s26324_s13 + $0x16c] sm:$0xf]  ;;  %v17027_v22 = vld [vmem:[%s26324_s13 + $0x9bc] sm:$0xf]  ;;  %v13765_v57 = vor.u32 %v16915_v53, %v13762_v7  ;;  %v13824_v53 = vld [vmem:[%s26324_s13 + $0x6b0] sm:$0xf] }
 0x96d   :  { %7285 = vmatpush.bf16.msrb.mxu1 %v13373_v52  ;;  %v13146_v52 = vld [vmem:[%s26324_s13 + $0x1a0] sm:$0xf0]  ;;  %v6956_v56 = vpop.f32.mrf.mxu2  ;;  %v6969_v49 = vpop.f32.mrf.mxu3  ;;  %v14213_v0 = vor.u32 %v17027_v22, %v14210_v45  ;;  %v13320_v22 = vld [vmem:[%s26324_s13 + $0x2c0] sm:$0xf]  ;;  %v16811_v45 = vld [vmem:[%s26324_s13 + $0x2f4] sm:$0xf0] }
 0x96e   :  { %14524 = vmatmul.msk.bf16.vlgmr.msra.gmra.mxu1 %vm157_vm1, %v21176_v46  ;;  %v6957_v34 = vadd.f32 %v6956_v56, %v6944_v54  ;;  %v6945_v62 = vpop.f32.mrf.mxu1  ;;  %v14101_v54 = vor.u32 %v16999_v39, %v14098_v59  ;;  %v4903_v56 = vperm.slane %v22008_v60, 1  ;;  %v13712_v39 = vld [vmem:[%s26324_s13 + $0x5d0] sm:$0xf]  ;;  %v16909_v59 = vld [vmem:[%s26324_s13 + $0x604] sm:$0xf0] }
 0x96f   :  { %7251 = vmatpush.bf16.msra.mxu3 %v13537_v10  ;;  %v16747_v10 = vld [vmem:[%s26324_s13 + $0xfc] sm:$0xf]  ;;  %v13986_v62 = vld [vmem:[%s26324_s13 + $0x830] sm:$0xf0] }
 0x970   :  { %7238 = vmatpush.bf16.msra.mxu2 %v13089_v61  ;;  %7264 = vmatpush.bf16.msra.mxu0 %v13985_v1  ;;  %v13149_v61 = vor.u32 %v16761_v14, %v13146_v52  ;;  %v13090_v1 = vld [vmem:[%s26324_s13 + $0x130] sm:$0xf0]  ;;  %v22113_v3 = vadd.f32 %v6969_v49, %v6957_v34  ;;  %v14042_v14 = vld [vmem:[%s26324_s13 + $0x8a0] sm:$0xf0]  ;;  %v13377_v52 = vor.u32 %v16825_v36, %v13376_v31 }
 0x971   :  { %7286 = vmatpush.bf16.msrb.mxu1 %v13317_v37  ;;  %v6932_v37 = vpop.f32.mrf.mxu0  ;;  %v13426_v36 = vld [vmem:[%s26324_s13 + $0x3d0] sm:$0xf0] }
 0x972   :  { %v16971_v37 = vld [vmem:[%s26324_s13 + $0x7fc] sm:$0xf] }
 0x973   :  { %7252 = vmatpush.bf16.msra.mxu3 %v13481_v38  ;;  %v16887_v38 = vld [vmem:[%s26324_s13 + $0x55c] sm:$0xf] }
 0x974   :  { %7239 = vmatpush.bf16.msra.mxu2 %v13033_v12  ;;  %7265 = vmatpush.bf16.msra.mxu0 %v13929_v48  ;;  %v13093_v12 = vor.u32 %v16747_v10, %v13090_v1  ;;  %v14381_v48 = vor.u32 %v17069_v11, %v14378_v32  ;;  %v13653_v40 = vor.u32 %v16887_v38, %v13650_v35  ;;  %v13768_v1 = vld [vmem:[%s26324_s13 + $0x640] sm:$0xf]  ;;  %v16797_v11 = vld [vmem:[%s26324_s13 + $0x284] sm:$0xf0]  ;;  %v16957_v38 = vld [vmem:[%s26324_s13 + $0x78c] sm:$0xf] }
 0x975   :  { %7287 = vmatpush.bf16.msrb.mxu1 %v13261_v13  ;;  %v13709_v13 = vor.u32 %v16901_v50, %v13706_v43  ;;  %v6958_v47 = vpop.f32.mrf.mxu2  ;;  %v6971_v21 = vpop.f32.mrf.mxu3  ;;  %v16923_v50 = vld [vmem:[%s26324_s13 + $0x674] sm:$0xf0]  ;;  %v13265_v35 = vor.u32 %v16797_v11, %v13264_v6 }
 0x976   :  { %v7008_v30 = vpop.f32.mrf.mxu1  ;;  %v13769_v19 = vor.u32 %v16923_v50, %v13768_v1  ;;  %v13208_v47 = vld [vmem:[%s26324_s13 + $0x1e0] sm:$0xf]  ;;  %v17035_v50 = vld [vmem:[%s26324_s13 + $0x9f4] sm:$0xf0] }
 0x977   :  { %7253 = vmatpush.bf16.msra.mxu3 %v13425_v41  ;;  %v16873_v41 = vld [vmem:[%s26324_s13 + $0x4ec] sm:$0xf]  ;;  %v14216_v1 = vld [vmem:[%s26324_s13 + $0x9c0] sm:$0xf] }
 0x978   :  { %7240 = vmatpush.bf16.msra.mxu2 %v12977_v42  ;;  %7266 = vmatpush.bf16.msra.mxu0 %v13873_v63  ;;  %v16719_v42 = vld [vmem:[%s26324_s13 + $0x1c] sm:$0xf]  ;;  %v14325_v63 = vor.u32 %v17055_v18, %v14322_v27  ;;  %v16783_v18 = vld [vmem:[%s26324_s13 + $0x214] sm:$0xf0]  ;;  %v14496_v27 = vld [vmem:[%s26324_s13 + $0xbf0] sm:$0xf]  ;;  %v14217_v11 = vor.u32 %v17035_v50, %v14216_v1 }
 0x979   :  { %7288 = vmatpush.bf16.msrb.mxu1 %v13205_v8  ;;  %v6995_v29 = vpop.f32.mrf.mxu0  ;;  %v12978_v8 = vld [vmem:[%s26324_s13 + $0x50] sm:$0xf0] }
 0x97a   :  { %7254 = vmatmul.bf16.vlgmr.msra.gmra.mxu3 %v21172_v9  ;;  %v12981_v7 = vor.u32 %v16719_v42, %v12978_v8  ;;  %v16943_v42 = vld [vmem:[%s26324_s13 + $0x71c] sm:$0xf]  ;;  %v13874_v8 = vld [vmem:[%s26324_s13 + $0x750] sm:$0xf0] }
 0x97b   :  { %7311 = vmatpush.bf16.msrb.mxu3 %v14269_v51  ;;  %7241 = vmatmul.bf16.vlgmr.msra.gmra.mxu2 %v21170_v26  ;;  %v16985_v51 = vld [vmem:[%s26324_s13 + $0x86c] sm:$0xf]  ;;  %v17042_v50 = vld [vmem:[%s26324_s13 + $0xa34] sm:$0xf] }
 0x97c   :  { %7298 = vmatpush.bf16.msrb.mxu2 %v13821_v16  ;;  %7328 = vmatpush.bf16.msrb.mxu0 %v6901_v17  ;;  %v13594_v16 = vld [vmem:[%s26324_s13 + $0x520] sm:$0xf0]  ;;  %v16937_v17 = vld [vmem:[%s26324_s13 + $0x6e4] sm:$0xf0]  ;;  %v14045_v55 = vor.u32 %v16985_v51, %v14042_v14  ;;  %v16895_v14 = vld [vmem:[%s26324_s13 + $0x594] sm:$0xf0] }
 0x97d   :  { %7267 = vmatmul.bf16.vlgmr.msra.gmra.mxu0 %v21174_v44  ;;  %7289 = vmatpush.bf16.msrb.mxu1 %v13149_v61  ;;  %v13597_v49 = vor.u32 %v16873_v41, %v13594_v16  ;;  %v13825_v34 = vor.u32 %v16937_v17, %v13824_v53  ;;  %v13538_v61 = vld [vmem:[%s26324_s13 + $0x4b0] sm:$0xf0]  ;;  %v7021_v10 = vpop.f32.mrf.mxu2  ;;  %v13656_v41 = vld [vmem:[%s26324_s13 + $0x560] sm:$0xf]  ;;  %v17049_v53 = vld [vmem:[%s26324_s13 + $0xa64] sm:$0xf0] }
 0x97e   :  { %v7010_v5 = vpop.f32.mrf.mxu1  ;;  %v13541_v32 = vor.u32 %v16859_v58, %v13538_v61  ;;  %v16881_v61 = vld [vmem:[%s26324_s13 + $0x524] sm:$0xf0] }
 0x97f   :  { %7312 = vmatpush.bf16.msrb.mxu3 %v14213_v0  ;;  %v6982_v0 = vpop.f32.mrf.mxu3  ;;  %v4904_v5 = vperm.slane %v22008_v60, 2 }
 0x980   :  { %7299 = vmatpush.bf16.msrb.mxu2 %v13765_v57  ;;  %7329 = vmatpush.bf16.msrb.mxu0 %v14437_v23  ;;  %v13321_v57 = vor.u32 %v16811_v45, %v13320_v22  ;;  %v6983_v23 = vadd.f32 %v6982_v0, %v4903_v56  ;;  %v16769_v22 = vld [vmem:[%s26324_s13 + $0x1a4] sm:$0xf0]  ;;  %v13877_v56 = vor.u32 %v16943_v42, %v13874_v8 }
 0x981   :  { %7290 = vmatpush.bf16.msrb.mxu1 %v13093_v12  ;;  %v6997_v43 = vpop.f32.mrf.mxu0  ;;  %v13989_v12 = vor.u32 %v16971_v37, %v13986_v62  ;;  %v13096_v37 = vld [vmem:[%s26324_s13 + $0x100] sm:$0xf] }
 0x982   :  { %v17091_v43 = vld [vmem:[%s26324_s13 + $0xbb4] sm:$0xf0] }
 0x983   :  { %7313 = vmatpush.bf16.msrb.mxu3 %v14157_v15  ;;  %v6996_v15 = vadd.f32 %v6995_v29, %v6983_v23  ;;  %v14440_v23 = vld [vmem:[%s26324_s13 + $0xb80] sm:$0xf] }
 0x984   :  { %7300 = vmatpush.bf16.msrb.mxu2 %v13709_v13  ;;  %7330 = vmatpush.bf16.msrb.mxu0 %v14381_v48  ;;  %v16845_v13 = vld [vmem:[%s26324_s13 + $0x40c] sm:$0xf]  ;;  %v13930_v48 = vld [vmem:[%s26324_s13 + $0x7c0] sm:$0xf0] }
 0x985   :  { %7291 = vmatpush.bf16.msrb.mxu1 %v13037_v28  ;;  %v7009_v21 = vadd.f32 %v7008_v30, %v6996_v15  ;;  %v17105_v28 = vld [vmem:[%s26324_s13 + $0xc24] sm:$0x10]  ;;  %v13485_v29 = vor.u32 %v16845_v13, %v13482_v24  ;;  %v13933_v31 = vor.u32 %v16957_v38, %v13930_v48  ;;  %v16831_v30 = vld [vmem:[%s26324_s13 + $0x39c] sm:$0xf]  ;;  %v7023_v51 = vpop.f32.mrf.mxu2  ;;  %v14441_v15 = vor.u32 %v17091_v43, %v14440_v23  ;;  %v13040_v24 = vld [vmem:[%s26324_s13 + $0x90] sm:$0xf] }
 0x986   :  { %v14497_v17 = vor.u32 %v17105_v28, %v14496_v27  ;;  %v13429_v45 = vor.u32 %v16831_v30, %v13426_v36  ;;  %v7073_v62 = vpop.f32.mrf.mxu1  ;;  %v14160_v38 = vld [vmem:[%s26324_s13 + $0x950] sm:$0xf]  ;;  %v17021_v48 = vld [vmem:[%s26324_s13 + $0x984] sm:$0xf0]  ;;  %v12984_v36 = vld [vmem:[%s26324_s13 + $0x20] sm:$0xf] }
 0x987   :  { %7314 = vmatpush.bf16.msrb.mxu3 %v14101_v54  ;;  %v13713_v54 = vor.u32 %v16909_v59, %v13712_v39  ;;  %v6984_v16 = vpop.f32.mrf.mxu3  ;;  %v16741_v59 = vld [vmem:[%s26324_s13 + $0xc4] sm:$0xf0]  ;;  %v14274_v23 = vld [vmem:[%s26324_s13 + $0xa68] sm:$0xf0]  ;;  %v16804_v43 = vld [vmem:[%s26324_s13 + $0x2c4] sm:$0xf] }
 0x988   :  { %7301 = vmatpush.bf16.msrb.mxu2 %v13653_v40  ;;  %7331 = vmatpush.bf16.msrb.mxu0 %v14325_v63  ;;  %v22257_v40 = vadd.f32 %v7021_v10, %v7009_v21  ;;  %v13209_v63 = vor.u32 %v16783_v18, %v13208_v47  ;;  %v6904_v0 = vand.u32 %v14497_v17, %v17990_v4  ;;  %v16755_v10 = vld [vmem:[%s26324_s13 + $0x134] sm:$0xf0]  ;;  %v14384_v47 = vld [vmem:[%s26324_s13 + $0xb10] sm:$0xf]  ;;  %v17077_v21 = vld [vmem:[%s26324_s13 + $0xb44] sm:$0xf0] }
 0x989   :  { %7292 = vmatpush.bf16.msrb.mxu1 %v12981_v7  ;;  %v13152_v7 = vld [vmem:[%s26324_s13 + $0x170] sm:$0xf]  ;;  %v13097_v13 = vor.u32 %v16755_v10, %v13096_v37  ;;  %v16853_v30 = vld [vmem:[%s26324_s13 + $0x444] sm:$0xf0]  ;;  %v13041_v42 = vor.u32 %v16741_v59, %v13040_v24  ;;  %v14385_v8 = vor.u32 %v17077_v21, %v14384_v47  ;;  %v17007_v16 = vld [vmem:[%s26324_s13 + $0x914] sm:$0xf0] }
 0x98a   :  { %v13378_v17 = vld [vmem:[%s26324_s13 + $0x368] sm:$0xf0]  ;;  %v16839_v37 = vld [vmem:[%s26324_s13 + $0x3d4] sm:$0xf0]  ;;  %v13992_v24 = vld [vmem:[%s26324_s13 + $0x800] sm:$0xf] }
 0x98b   :  { %7315 = vmatpush.bf16.msrb.mxu3 %v14045_v55  ;;  %v13657_v55 = vor.u32 %v16895_v14, %v13656_v41  ;;  %v16727_v41 = vld [vmem:[%s26324_s13 + $0x54] sm:$0xf0]  ;;  %v14328_v14 = vld [vmem:[%s26324_s13 + $0xaa0] sm:$0xf]  ;;  %v14218_v59 = vld [vmem:[%s26324_s13 + $0x9f8] sm:$0xf0] }
 0x98c   :  { %7337 = vmatpush.bf16.msra.mxu0 %v13377_v52  ;;  %7302 = vmatpush.bf16.msrb.mxu2 %v13597_v49  ;;  %v14272_v52 = vld [vmem:[%s26324_s13 + $0xa30] sm:$0xf]  ;;  %v7060_v49 = vpop.f32.mrf.mxu0  ;;  %v16790_v47 = vld [vmem:[%s26324_s13 + $0x254] sm:$0xf]  ;;  %v13266_v21 = vld [vmem:[%s26324_s13 + $0x288] sm:$0xf0] }
 0x98d   :  { %7350 = vmatpush.bf16.msra.mxu1 %v13825_v34  ;;  %14525 = vmatmul.msk.bf16.vlgmr.msrb.gmra.mxu0 %vm157_vm1, %v21176_v46  ;;  %v14273_v58 = vor.u32 %v17049_v53, %v14272_v52  ;;  %v13600_v34 = vld [vmem:[%s26324_s13 + $0x4f0] sm:$0xf]  ;;  %v17063_v52 = vld [vmem:[%s26324_s13 + $0xad4] sm:$0xf0]  ;;  %v16818_v53 = vld [vmem:[%s26324_s13 + $0x334] sm:$0xf] }
 0x98e   :  { %7293 = vmatmul.bf16.vlgmr.msrb.gmra.mxu1 %v21170_v26  ;;  %v13601_v6 = vor.u32 %v16881_v61, %v13600_v34  ;;  %v14329_v34 = vor.u32 %v17063_v52, %v14328_v14  ;;  %v13381_v10 = vor.u32 %v16818_v53, %v13378_v17  ;;  %v17098_v14 = vld [vmem:[%s26324_s13 + $0xbf4] sm:$0xf]  ;;  %v14498_v52 = vld [vmem:[%s26324_s13 + $0xc28] sm:$0x10] }
 0x98f   :  { %7316 = vmatpush.bf16.msrb.mxu3 %v13989_v12  ;;  %v16867_v12 = vld [vmem:[%s26324_s13 + $0x4b4] sm:$0xf0]  ;;  %v7047_v39 = vpop.f32.mrf.mxu3 }
 0x990   :  { %7338 = vmatpush.bf16.msra.mxu0 %v13321_v57  ;;  %7303 = vmatpush.bf16.msrb.mxu2 %v13541_v32  ;;  %v13153_v57 = vor.u32 %v16769_v22, %v13152_v7  ;;  %v13544_v32 = vld [vmem:[%s26324_s13 + $0x480] sm:$0xf]  ;;  %v16930_v7 = vld [vmem:[%s26324_s13 + $0x6b4] sm:$0xf]  ;;  %v13826_v22 = vld [vmem:[%s26324_s13 + $0x6e8] sm:$0xf0] }
 0x991   :  { %7351 = vmatpush.bf16.msra.mxu1 %v13769_v19  ;;  %v7034_v19 = vpop.f32.mrf.mxu2  ;;  %v13545_v28 = vor.u32 %v16867_v12, %v13544_v32  ;;  %v13829_v1 = vor.u32 %v16930_v7, %v13826_v22 }
 0x993   :  { %7317 = vmatpush.bf16.msrb.mxu3 %v13933_v31  ;;  %v13488_v31 = vld [vmem:[%s26324_s13 + $0x410] sm:$0xf] }
 0x994   :  { %7339 = vmatpush.bf16.msra.mxu0 %v13265_v35  ;;  %7304 = vmatpush.bf16.msrb.mxu2 %v13485_v29  ;;  %v7035_v35 = vadd.f32 %v7034_v19, %v4904_v5  ;;  %v7062_v27 = vpop.f32.mrf.mxu0  ;;  %v14161_v29 = vor.u32 %v17021_v48, %v14160_v38  ;;  %v13322_v5 = vld [vmem:[%s26324_s13 + $0x2f8] sm:$0xf0]  ;;  %v14277_v19 = vor.u32 %v17042_v50, %v14274_v23  ;;  %v16979_v38 = vld [vmem:[%s26324_s13 + $0x834] sm:$0xf0] }
 0x995   :  { %7352 = vmatpush.bf16.msra.mxu1 %v13713_v54  ;;  %v7075_v54 = vpop.f32.mrf.mxu1  ;;  %v13325_v48 = vor.u32 %v16804_v43, %v13322_v5  ;;  %v13714_v27 = vld [vmem:[%s26324_s13 + $0x608] sm:$0xf0] }
 0x996   :  { %v7048_v18 = vadd.f32 %v7047_v39, %v7035_v35  ;;  %v17028_v39 = vld [vmem:[%s26324_s13 + $0x9c4] sm:$0xf] }
 0x997   :  { %7318 = vmatpush.bf16.msrb.mxu3 %v13877_v56  ;;  %v13489_v56 = vor.u32 %v16853_v30, %v13488_v31  ;;  %v13936_v31 = vld [vmem:[%s26324_s13 + $0x790] sm:$0xf]  ;;  %v16965_v30 = vld [vmem:[%s26324_s13 + $0x7c4] sm:$0xf0] }
 0x998   :  { %7340 = vmatpush.bf16.msra.mxu0 %v13209_v63  ;;  %7305 = vmatpush.bf16.msrb.mxu2 %v13429_v45  ;;  %v14104_v63 = vld [vmem:[%s26324_s13 + $0x8e0] sm:$0xf]  ;;  %v7061_v51 = vadd.f32 %v7060_v49, %v7048_v18  ;;  %v16902_v18 = vld [vmem:[%s26324_s13 + $0x5d4] sm:$0xf]  ;;  %v13937_v7 = vor.u32 %v16965_v30, %v13936_v31 }
 0x999   :  { %7353 = vmatpush.bf16.msra.mxu1 %v13657_v55  ;;  %v14105_v49 = vor.u32 %v17007_v16, %v14104_v63  ;;  %v13432_v55 = vld [vmem:[%s26324_s13 + $0x3a0] sm:$0xf]  ;;  %v7036_v61 = vpop.f32.mrf.mxu2  ;;  %v13717_v54 = vor.u32 %v16902_v18, %v13714_v27  ;;  %v13210_v63 = vld [vmem:[%s26324_s13 + $0x218] sm:$0xf0]  ;;  %v16888_v16 = vld [vmem:[%s26324_s13 + $0x564] sm:$0xf] }
 0x99a   :  { %7319 = vmatmul.bf16.vlgmr.msrb.gmra.mxu3 %v21174_v44  ;;  %v22371_v45 = vadd.f32 %v7073_v62, %v7061_v51  ;;  %v14048_v62 = vld [vmem:[%s26324_s13 + $0x870] sm:$0xf]  ;;  %v13433_v32 = vor.u32 %v16839_v37, %v13432_v55  ;;  %v13658_v51 = vld [vmem:[%s26324_s13 + $0x598] sm:$0xf0]  ;;  %v16762_v37 = vld [vmem:[%s26324_s13 + $0x174] sm:$0xf] }
 0x99b   :  { %7380 = vmatpush.bf16.msra.mxu3 %v6904_v0  ;;  %7306 = vmatmul.bf16.vlgmr.msrb.gmra.mxu2 %v21172_v9  ;;  %v7049_v0 = vpop.f32.mrf.mxu3  ;;  %v14106_v61 = vld [vmem:[%s26324_s13 + $0x918] sm:$0xf0] }
 0x99c   :  { %7363 = vmatpush.bf16.msra.mxu2 %v14273_v58  ;;  %7341 = vmatpush.bf16.msra.mxu0 %v13153_v57  ;;  %v12985_v58 = vor.u32 %v16727_v41, %v12984_v36  ;;  %v16993_v57 = vld [vmem:[%s26324_s13 + $0x8a4] sm:$0xf0]  ;;  %v13269_v36 = vor.u32 %v16790_v47, %v13266_v21  ;;  %v16776_v41 = vld [vmem:[%s26324_s13 + $0x1e4] sm:$0xf]  ;;  %v13602_v0 = vld [vmem:[%s26324_s13 + $0x528] sm:$0xf0] }
 0x99d   :  { %7354 = vmatpush.bf16.msra.mxu1 %v13601_v6  ;;  %v16916_v6 = vld [vmem:[%s26324_s13 + $0x644] sm:$0xf]  ;;  %v22403_v12 = vpop.f32.mrf.mxu1  ;;  %v13213_v55 = vor.u32 %v16776_v41, %v13210_v63  ;;  %v13994_v27 = vld [vmem:[%s26324_s13 + $0x838] sm:$0xf0]  ;;  %v14386_v41 = vld [vmem:[%s26324_s13 + $0xb48] sm:$0xf0] }
 0x99e   :  { %v16958_v63 = vld [vmem:[%s26324_s13 + $0x794] sm:$0xf] }
 0x99f   :  { %7381 = vmatpush.bf16.msra.mxu3 %v14441_v15  ;;  %v14049_v15 = vor.u32 %v16993_v57, %v14048_v62  ;;  %v13154_v62 = vld [vmem:[%s26324_s13 + $0x1a8] sm:$0xf0]  ;;  %v16874_v57 = vld [vmem:[%s26324_s13 + $0x4f4] sm:$0xf] }
 0x9a0   :  { %7364 = vmatpush.bf16.msra.mxu2 %v14217_v11  ;;  %7342 = vmatpush.bf16.msra.mxu0 %v13097_v13  ;;  %v13770_v11 = vld [vmem:[%s26324_s13 + $0x678] sm:$0xf0]  ;;  %v22405_v13 = vpop.f32.mrf.mxu0  ;;  %v13157_v43 = vor.u32 %v16762_v37, %v13154_v62  ;;  %v13605_v5 = vor.u32 %v16874_v57, %v13602_v0  ;;  %v16938_v62 = vld [vmem:[%s26324_s13 + $0x6ec] sm:$0xf0]  ;;  %v14504_v57 = vld [vmem:[%s26324_s13 + $0xbf8] sm:$0xf] }
 0x9a1   :  { %7355 = vmatpush.bf16.msra.mxu1 %v13545_v28  ;;  %v13773_v35 = vor.u32 %v16916_v6, %v13770_v11  ;;  %v13993_v28 = vor.u32 %v16979_v38, %v13992_v24  ;;  %v16986_v6 = vld [vmem:[%s26324_s13 + $0x874] sm:$0xf]  ;;  %v14050_v11 = vld [vmem:[%s26324_s13 + $0x8a8] sm:$0xf0]  ;;  %v16860_v24 = vld [vmem:[%s26324_s13 + $0x484] sm:$0xf] }
 0x9a2   :  { %v13546_v38 = vld [vmem:[%s26324_s13 + $0x4b8] sm:$0xf0]  ;;  %v17106_v0 = vld [vmem:[%s26324_s13 + $0xc2c] sm:$0x10] }
 0x9a3   :  { %7382 = vmatpush.bf16.msra.mxu3 %v14385_v8  ;;  %v14162_v8 = vld [vmem:[%s26324_s13 + $0x988] sm:$0xf0]  ;;  %v13549_v18 = vor.u32 %v16860_v24, %v13546_v38  ;;  %v14505_v24 = vor.u32 %v17106_v0, %v14504_v57  ;;  %v16784_v57 = vld [vmem:[%s26324_s13 + $0x21c] sm:$0xf0]  ;;  %v14112_v0 = vld [vmem:[%s26324_s13 + $0x8e8] sm:$0xf] }
 0x9a4   :  { %7365 = vmatpush.bf16.msra.mxu2 %v14161_v29  ;;  %7343 = vmatpush.bf16.msra.mxu0 %v13041_v42  ;;  %v14221_v29 = vor.u32 %v17028_v39, %v14218_v59  ;;  %v17014_v42 = vld [vmem:[%s26324_s13 + $0x954] sm:$0xf]  ;;  %v14053_v39 = vor.u32 %v16986_v6, %v14050_v11  ;;  %v16972_v59 = vld [vmem:[%s26324_s13 + $0x804] sm:$0xf] }
 0x9a5   :  { %7356 = vmatpush.bf16.msra.mxu1 %v13489_v56  ;;  %v7088_v53 = vpop.f32.mrf.mxu1  ;;  %v14165_v22 = vor.u32 %v17014_v42, %v14162_v8  ;;  %v13880_v56 = vld [vmem:[%s26324_s13 + $0x720] sm:$0xf] }
 0x9a6   :  { %v16832_v53 = vld [vmem:[%s26324_s13 + $0x3a4] sm:$0xf] }
 0x9a7   :  { %7383 = vmatpush.bf16.msra.mxu3 %v14329_v34  ;;  %v17000_v34 = vld [vmem:[%s26324_s13 + $0x8e4] sm:$0xf] }
 0x9a8   :  { %7366 = vmatpush.bf16.msra.mxu2 %v14105_v49  ;;  %7344 = vmatpush.bf16.msra.mxu0 %v12985_v58  ;;  %v7127_v17 = vpop.f32.mrf.mxu0  ;;  %v16951_v49 = vld [vmem:[%s26324_s13 + $0x754] sm:$0xf0]  ;;  %v13661_v58 = vor.u32 %v16888_v16, %v13658_v51  ;;  %v14109_v23 = vor.u32 %v17000_v34, %v14106_v61  ;;  %v13938_v16 = vld [vmem:[%s26324_s13 + $0x7c8] sm:$0xf0]  ;;  %v13997_v51 = vor.u32 %v16972_v59, %v13994_v27  ;;  %v14330_v34 = vld [vmem:[%s26324_s13 + $0xad8] sm:$0xf0] }
 0x9a9   :  { %7357 = vmatpush.bf16.msra.mxu1 %v13433_v32  ;;  %v13881_v50 = vor.u32 %v16951_v49, %v13880_v56  ;;  %v16748_v32 = vld [vmem:[%s26324_s13 + $0x104] sm:$0xf]  ;;  %v4906_v56 = vperm.slane %v22008_v60, 4  ;;  %v13434_v49 = vld [vmem:[%s26324_s13 + $0x3d8] sm:$0xf0] }
 0x9aa   :  { %14526 = vmatmul.msk.bf16.vlgmr.msra.gmra.mxu3 %vm157_vm1, %v21176_v46  ;;  %v13384_v61 = vld [vmem:[%s26324_s13 + $0x338] sm:$0xf]  ;;  %v13328_v59 = vld [vmem:[%s26324_s13 + $0x2c8] sm:$0xf] }
 0x9ab   :  { %7389 = vmatpush.bf16.msrb.mxu3 %v13381_v10  ;;  %7345 = vmatmul.bf16.vlgmr.msra.gmra.mxu0 %v21170_v26  ;;  %v14501_v10 = vor.u32 %v17098_v14, %v14498_v52  ;;  %v16720_v14 = vld [vmem:[%s26324_s13 + $0x24] sm:$0xf]  ;;  %v12986_v52 = vld [vmem:[%s26324_s13 + $0x58] sm:$0xf0]  ;;  %v14224_v27 = vld [vmem:[%s26324_s13 + $0x9c8] sm:$0xf] }
 0x9ac   :  { %7402 = vmatpush.bf16.msrb.mxu0 %v13829_v1  ;;  %7367 = vmatpush.bf16.msra.mxu2 %v14049_v15  ;;  %v4905_v1 = vperm.slane %v22008_v60, 3  ;;  %v13832_v60 = vld [vmem:[%s26324_s13 + $0x6b8] sm:$0xf] }
 0x9ad   :  { %7415 = vmatpush.bf16.msrb.mxu1 %v14277_v19  ;;  %v6907_v15 = vand.u32 %v14501_v10, %v17990_v4  ;;  %v13098_v19 = vld [vmem:[%s26324_s13 + $0x138] sm:$0xf0]  ;;  %v7099_v31 = vpop.f32.mrf.mxu2  ;;  %v7112_v8 = vpop.f32.mrf.mxu3  ;;  %v13941_v10 = vor.u32 %v16958_v63, %v13938_v16  ;;  %v13272_v63 = vld [vmem:[%s26324_s13 + $0x258] sm:$0xf] }
 0x9ae   :  { %7358 = vmatmul.bf16.vlgmr.msra.gmra.mxu1 %v21172_v9  ;;  %v7087_v47 = vadd.f32 %v22403_v12, %v4905_v1  ;;  %v13101_v21 = vor.u32 %v16748_v32, %v13098_v19  ;;  %v16846_v12 = vld [vmem:[%s26324_s13 + $0x414] sm:$0xf]  ;;  %v16826_v1 = vld [vmem:[%s26324_s13 + $0x36c] sm:$0xf0]  ;;  %v13833_v32 = vor.u32 %v16938_v62, %v13832_v60  ;;  %v13882_v19 = vld [vmem:[%s26324_s13 + $0x758] sm:$0xf0] }
 0x9af   :  { %7390 = vmatpush.bf16.msrb.mxu3 %v13325_v48  ;;  %v17084_v48 = vld [vmem:[%s26324_s13 + $0xb84] sm:$0xf]  ;;  %v13720_v16 = vld [vmem:[%s26324_s13 + $0x5d8] sm:$0xf]  ;;  %v16896_v60 = vld [vmem:[%s26324_s13 + $0x59c] sm:$0xf0] }
 0x9b0   :  { %7403 = vmatpush.bf16.msrb.mxu0 %v13773_v35  ;;  %7368 = vmatpush.bf16.msra.mxu2 %v13993_v28  ;;  %v14442_v35 = vld [vmem:[%s26324_s13 + $0xbb8] sm:$0xf0]  ;;  %v16734_v28 = vld [vmem:[%s26324_s13 + $0x94] sm:$0xf]  ;;  %v7100_v42 = vadd.f32 %v7099_v31, %v7087_v47  ;;  %v13776_v47 = vld [vmem:[%s26324_s13 + $0x648] sm:$0xf] }
 0x9b1   :  { %7416 = vmatpush.bf16.msrb.mxu1 %v14221_v29  ;;  %v13042_v29 = vld [vmem:[%s26324_s13 + $0xc8] sm:$0xf0]  ;;  %v14445_v30 = vor.u32 %v17084_v48, %v14442_v35  ;;  %v13385_v35 = vor.u32 %v16826_v1, %v13384_v61  ;;  %v13664_v61 = vld [vmem:[%s26324_s13 + $0x568] sm:$0xf] }
 0x9b2   :  { %v7113_v17 = vadd.f32 %v7112_v8, %v7100_v42  ;;  %v17092_v42 = vld [vmem:[%s26324_s13 + $0xbbc] sm:$0xf0] }
 0x9b3   :  { %7391 = vmatpush.bf16.msrb.mxu3 %v13269_v36  ;;  %v13490_v36 = vld [vmem:[%s26324_s13 + $0x448] sm:$0xf0] }
 0x9b4   :  { %7404 = vmatpush.bf16.msrb.mxu0 %v13717_v54  ;;  %7369 = vmatpush.bf16.msra.mxu2 %v13937_v7  ;;  %v17070_v54 = vld [vmem:[%s26324_s13 + $0xb14] sm:$0xf]  ;;  %v13045_v7 = vor.u32 %v16734_v28, %v13042_v29  ;;  %v22573_v37 = vadd.f32 %v22405_v13, %v7113_v17  ;;  %v14280_v13 = vld [vmem:[%s26324_s13 + $0xa38] sm:$0xf]  ;;  %v17036_v28 = vld [vmem:[%s26324_s13 + $0x9fc] sm:$0xf0] }
 0x9b5   :  { %7417 = vmatpush.bf16.msrb.mxu1 %v14165_v22  ;;  %v13493_v22 = vor.u32 %v16846_v12, %v13490_v36  ;;  %v7101_v6 = vpop.f32.mrf.mxu2  ;;  %v7114_v48 = vpop.f32.mrf.mxu3  ;;  %v6910_v12 = vand.u32 %v14505_v24, %v17990_v4  ;;  %v14056_v24 = vld [vmem:[%s26324_s13 + $0x878] sm:$0xf] }
 0x9b6   :  { %v16819_v48 = vld [vmem:[%s26324_s13 + $0x33c] sm:$0xf] }
 0x9b7   :  { %7392 = vmatpush.bf16.msrb.mxu3 %v13213_v55  ;;  %v17056_v55 = vld [vmem:[%s26324_s13 + $0xaa4] sm:$0xf] }
 0x9b8   :  { %7405 = vmatpush.bf16.msrb.mxu0 %v13661_v58  ;;  %7370 = vmatpush.bf16.msra.mxu2 %v13881_v50  ;;  %v14389_v58 = vor.u32 %v17070_v54, %v14386_v41  ;;  %v17050_v50 = vld [vmem:[%s26324_s13 + $0xa6c] sm:$0xf0]  ;;  %v14333_v11 = vor.u32 %v17056_v55, %v14330_v34  ;;  %v14448_v54 = vld [vmem:[%s26324_s13 + $0xb88] sm:$0xf]  ;;  %v14225_v41 = vor.u32 %v17036_v28, %v14224_v27  ;;  %v16868_v28 = vld [vmem:[%s26324_s13 + $0x4bc] sm:$0xf0] }
 0x9b9   :  { %7418 = vmatpush.bf16.msrb.mxu1 %v14109_v23  ;;  %v12989_v23 = vor.u32 %v16720_v14, %v12986_v52  ;;  %v16798_v14 = vld [vmem:[%s26324_s13 + $0x28c] sm:$0xf0]  ;;  %v14168_v52 = vld [vmem:[%s26324_s13 + $0x958] sm:$0xf]  ;;  %v13216_v34 = vld [vmem:[%s26324_s13 + $0x1e8] sm:$0xf] }
 0x9ba   :  { %v13273_v55 = vor.u32 %v16798_v14, %v13272_v63  ;;  %v13552_v27 = vld [vmem:[%s26324_s13 + $0x488] sm:$0xf]  ;;  %v13496_v14 = vld [vmem:[%s26324_s13 + $0x418] sm:$0xf] }
 0x9bb   :  { %7393 = vmatpush.bf16.msrb.mxu3 %v13157_v43  ;;  %7371 = vmatmul.bf16.vlgmr.msra.gmra.mxu2 %v21174_v44  ;;  %v13437_v43 = vor.u32 %v16832_v53, %v13434_v49  ;;  %v7151_v29 = vpop.f32.mrf.mxu1  ;;  %v17022_v53 = vld [vmem:[%s26324_s13 + $0x98c] sm:$0xf0] }
 0x9bc   :  { %7406 = vmatpush.bf16.msrb.mxu0 %v13605_v5  ;;  %7432 = vmatpush.bf16.msrb.mxu2 %v6907_v15  ;;  %v7138_v5 = vpop.f32.mrf.mxu0  ;;  %v16944_v15 = vld [vmem:[%s26324_s13 + $0x724] sm:$0xf]  ;;  %v17078_v49 = vld [vmem:[%s26324_s13 + $0xb4c] sm:$0xf0] }
 0x9bd   :  { %7419 = vmatpush.bf16.msrb.mxu1 %v14053_v39  ;;  %v7139_v38 = vadd.f32 %v7138_v5, %v4906_v56  ;;  %v14281_v39 = vor.u32 %v17050_v50, %v14280_v13  ;;  %v13885_v31 = vor.u32 %v16944_v15, %v13882_v19  ;;  %v14392_v56 = vld [vmem:[%s26324_s13 + $0xb18] sm:$0xf]  ;;  %v22664_v62 = vpop.f32.mrf.mxu3  ;;  %v13665_v50 = vor.u32 %v16896_v60, %v13664_v61  ;;  %v16882_v15 = vld [vmem:[%s26324_s13 + $0x52c] sm:$0xf0]  ;;  %v12992_v61 = vld [vmem:[%s26324_s13 + $0x28] sm:$0xf] }
 0x9be   :  { %v14393_v13 = vor.u32 %v17078_v49, %v14392_v56  ;;  %v13217_v5 = vor.u32 %v16784_v57, %v13216_v34  ;;  %v16770_v19 = vld [vmem:[%s26324_s13 + $0x1ac] sm:$0xf0]  ;;  %v17099_v60 = vld [vmem:[%s26324_s13 + $0xbfc] sm:$0xf] }
 0x9bf   :  { %7394 = vmatpush.bf16.msrb.mxu3 %v13101_v21  ;;  %v16924_v21 = vld [vmem:[%s26324_s13 + $0x67c] sm:$0xf0]  ;;  %v16966_v56 = vld [vmem:[%s26324_s13 + $0x7cc] sm:$0xf0] }
 0x9c0   :  { %7407 = vmatpush.bf16.msrb.mxu0 %v13549_v18  ;;  %7433 = vmatpush.bf16.msrb.mxu2 %v14445_v30  ;;  %v16812_v18 = vld [vmem:[%s26324_s13 + $0x2fc] sm:$0xf0]  ;;  %v22617_v30 = vadd.f32 %v7151_v29, %v7139_v38  ;;  %v13777_v36 = vor.u32 %v16924_v21, %v13776_v47  ;;  %v16994_v38 = vld [vmem:[%s26324_s13 + $0x8ac] sm:$0xf0] }
 0x9c1   :  { %7420 = vmatpush.bf16.msrb.mxu1 %v13997_v51  ;;  %v13329_v8 = vor.u32 %v16812_v18, %v13328_v59  ;;  %v16910_v51 = vld [vmem:[%s26324_s13 + $0x60c] sm:$0xf0]  ;;  %v14057_v21 = vor.u32 %v16994_v38, %v14056_v24  ;;  %v13104_v18 = vld [vmem:[%s26324_s13 + $0x108] sm:$0xf]  ;;  %v17043_v24 = vld [vmem:[%s26324_s13 + $0xa3c] sm:$0xf] }
 0x9c2   :  { %v14282_v38 = vld [vmem:[%s26324_s13 + $0xa70] sm:$0xf0] }
 0x9c3   :  { %7395 = vmatpush.bf16.msrb.mxu3 %v13045_v7  ;;  %v14449_v7 = vor.u32 %v17092_v42, %v14448_v54  ;;  %v7153_v1 = vpop.f32.mrf.mxu1  ;;  %v16980_v54 = vld [vmem:[%s26324_s13 + $0x83c] sm:$0xf0]  ;;  %v16805_v42 = vld [vmem:[%s26324_s13 + $0x2cc] sm:$0xf] }
 0x9c4   :  { %7408 = vmatpush.bf16.msrb.mxu0 %v13493_v22  ;;  %7434 = vmatpush.bf16.msrb.mxu2 %v14389_v58  ;;  %v7140_v17 = vpop.f32.mrf.mxu0  ;;  %v13721_v22 = vor.u32 %v16910_v51, %v13720_v16  ;;  %v14169_v58 = vor.u32 %v17022_v53, %v14168_v52  ;;  %v13048_v51 = vld [vmem:[%s26324_s13 + $0x98] sm:$0xf]  ;;  %v16854_v52 = vld [vmem:[%s26324_s13 + $0x44c] sm:$0xf0]  ;;  %v16728_v1 = vld [vmem:[%s26324_s13 + $0x5c] sm:$0xf0] }
 0x9c5   :  { %7421 = vmatpush.bf16.msrb.mxu1 %v13941_v10  ;;  %v17008_v10 = vld [vmem:[%s26324_s13 + $0x91c] sm:$0xf0]  ;;  %v7179_v29 = vpop.f32.mrf.mxu3  ;;  %v13497_v34 = vor.u32 %v16854_v52, %v13496_v14  ;;  %v16749_v52 = vld [vmem:[%s26324_s13 + $0x10c] sm:$0xf] }
 0x9c6   :  { %v14113_v6 = vor.u32 %v17008_v10, %v14112_v0 }
 0x9c7   :  { %7396 = vmatpush.bf16.msrb.mxu3 %v12989_v23  ;;  %v14336_v23 = vld [vmem:[%s26324_s13 + $0xaa8] sm:$0xf] }
 0x9c8   :  { %7409 = vmatpush.bf16.msrb.mxu0 %v13437_v43  ;;  %7435 = vmatpush.bf16.msrb.mxu2 %v14333_v11  ;;  %v17064_v43 = vld [vmem:[%s26324_s13 + $0xadc] sm:$0xf0]  ;;  %v13160_v11 = vld [vmem:[%s26324_s13 + $0x178] sm:$0xf] }
 0x9c9   :  { %7422 = vmatpush.bf16.msrb.mxu1 %v13885_v31  ;;  %v13161_v47 = vor.u32 %v16770_v19, %v13160_v11  ;;  %v16931_v11 = vld [vmem:[%s26324_s13 + $0x6bc] sm:$0xf] }
 0x9ca   :  { %7397 = vmatmul.bf16.vlgmr.msrb.gmra.mxu3 %v21170_v26 }
 0x9cb   :  { %7454 = vmatpush.bf16.msra.mxu3 %v13833_v32  ;;  %7410 = vmatmul.bf16.vlgmr.msrb.gmra.mxu0 %v21172_v9  ;;  %v13608_v32 = vld [vmem:[%s26324_s13 + $0x4f8] sm:$0xf] }
 0x9cc   :  { %7441 = vmatpush.bf16.msra.mxu2 %v13385_v35  ;;  %7467 = vmatpush.bf16.msra.mxu0 %v14281_v39  ;;  %v13386_v35 = vld [vmem:[%s26324_s13 + $0x370] sm:$0xf0]  ;;  %v14337_v39 = vor.u32 %v17064_v43, %v14336_v23  ;;  %v13609_v59 = vor.u32 %v16882_v15, %v13608_v32  ;;  %v16952_v43 = vld [vmem:[%s26324_s13 + $0x75c] sm:$0xf0] }
 0x9cd   :  { %7484 = vmatpush.bf16.msra.mxu1 %v6910_v12  ;;  %14527 = vmatmul.msk.bf16.vlgmr.msrb.gmra.mxu2 %vm157_vm1, %v21176_v46  ;;  %v13389_v31 = vor.u32 %v16819_v48, %v13386_v35  ;;  %v16756_v12 = vld [vmem:[%s26324_s13 + $0x13c] sm:$0xf0]  ;;  %v13834_v32 = vld [vmem:[%s26324_s13 + $0x6f0] sm:$0xf0]  ;;  %v12993_v35 = vor.u32 %v16728_v1, %v12992_v61  ;;  %v16735_v1 = vld [vmem:[%s26324_s13 + $0x9c] sm:$0xf] }
 0x9ce   :  { %7423 = vmatmul.bf16.vlgmr.msrb.gmra.mxu1 %v21174_v44  ;;  %v13105_v63 = vor.u32 %v16756_v12, %v13104_v18  ;;  %v7164_v53 = vpop.f32.mrf.mxu2  ;;  %v16763_v18 = vld [vmem:[%s26324_s13 + $0x17c] sm:$0xf]  ;;  %v13778_v12 = vld [vmem:[%s26324_s13 + $0x680] sm:$0xf0]  ;;  %v14394_v61 = vld [vmem:[%s26324_s13 + $0xb50] sm:$0xf0] }
 0x9cf   :  { %7455 = vmatpush.bf16.msra.mxu3 %v13777_v36  ;;  %v14000_v36 = vld [vmem:[%s26324_s13 + $0x808] sm:$0xf]  ;;  %v7165_v49 = vadd.f32 %v7164_v53, %v22617_v30  ;;  %v14506_v30 = vld [vmem:[%s26324_s13 + $0xc30] sm:$0x10]  ;;  %v13106_v53 = vld [vmem:[%s26324_s13 + $0x140] sm:$0xf0] }
 0x9d0   :  { %7442 = vmatpush.bf16.msra.mxu2 %v13329_v8  ;;  %7468 = vmatpush.bf16.msra.mxu0 %v14225_v41  ;;  %v13330_v8 = vld [vmem:[%s26324_s13 + $0x300] sm:$0xf0]  ;;  %v13553_v41 = vor.u32 %v16868_v28, %v13552_v27  ;;  %v14001_v16 = vor.u32 %v16980_v54, %v14000_v36  ;;  %v14509_v15 = vor.u32 %v17099_v60, %v14506_v30  ;;  %v13162_v27 = vld [vmem:[%s26324_s13 + $0x1b0] sm:$0xf0]  ;;  %v17029_v36 = vld [vmem:[%s26324_s13 + $0x9cc] sm:$0xf] }
 0x9d1   :  { %7485 = vmatpush.bf16.msra.mxu1 %v14449_v7  ;;  %v13333_v17 = vor.u32 %v16805_v42, %v13330_v8  ;;  %v16742_v7 = vld [vmem:[%s26324_s13 + $0xcc] sm:$0xf0]  ;;  %v22764_v57 = vadd.f32 %v22664_v62, %v7165_v49  ;;  %v13888_v62 = vld [vmem:[%s26324_s13 + $0x728] sm:$0xf]  ;;  %v14285_v28 = vor.u32 %v17043_v24, %v14282_v38  ;;  %v14226_v54 = vld [vmem:[%s26324_s13 + $0xa00] sm:$0xf0] }
 0x9d2   :  { %v13049_v0 = vor.u32 %v16742_v7, %v13048_v51  ;;  %v6913_v29 = vand.u32 %v14509_v15, %v17990_v4  ;;  %v17085_v42 = vld [vmem:[%s26324_s13 + $0xb8c] sm:$0xf]  ;;  %v14450_v8 = vld [vmem:[%s26324_s13 + $0xbc0] sm:$0xf0]  ;;  %v13165_v51 = vor.u32 %v16763_v18, %v13162_v27  ;;  %v17015_v49 = vld [vmem:[%s26324_s13 + $0x95c] sm:$0xf] }
 0x9d3   :  { %7456 = vmatpush.bf16.msra.mxu3 %v13721_v22  ;;  %v13944_v22 = vld [vmem:[%s26324_s13 + $0x798] sm:$0xf]  ;;  %v14453_v7 = vor.u32 %v17085_v42, %v14450_v8  ;;  %v17057_v15 = vld [vmem:[%s26324_s13 + $0xaac] sm:$0xf]  ;;  %v14058_v42 = vld [vmem:[%s26324_s13 + $0x8b0] sm:$0xf0] }
 0x9d4   :  { %7443 = vmatpush.bf16.msra.mxu2 %v13273_v55  ;;  %7469 = vmatpush.bf16.msra.mxu0 %v14169_v58  ;;  %v16791_v55 = vld [vmem:[%s26324_s13 + $0x25c] sm:$0xf]  ;;  %v13274_v58 = vld [vmem:[%s26324_s13 + $0x290] sm:$0xf0]  ;;  %v13945_v10 = vor.u32 %v16966_v56, %v13944_v22  ;;  %v13840_v8 = vld [vmem:[%s26324_s13 + $0x6c0] sm:$0xf] }
 0x9d5   :  { %7486 = vmatpush.bf16.msra.mxu1 %v14393_v13  ;;  %v13440_v13 = vld [vmem:[%s26324_s13 + $0x3a8] sm:$0xf]  ;;  %v13277_v23 = vor.u32 %v16791_v55, %v13274_v58  ;;  %v16903_v22 = vld [vmem:[%s26324_s13 + $0x5dc] sm:$0xf]  ;;  %v13722_v56 = vld [vmem:[%s26324_s13 + $0x610] sm:$0xf0] }
 0x9d6   :  { %v14170_v58 = vld [vmem:[%s26324_s13 + $0x990] sm:$0xf0] }
 0x9d7   :  { %7457 = vmatpush.bf16.msra.mxu3 %v13665_v50  ;;  %v16840_v50 = vld [vmem:[%s26324_s13 + $0x3dc] sm:$0xf0] }
 0x9d8   :  { %7444 = vmatpush.bf16.msra.mxu2 %v13217_v5  ;;  %7470 = vmatpush.bf16.msra.mxu0 %v14113_v6  ;;  %v16777_v5 = vld [vmem:[%s26324_s13 + $0x1ec] sm:$0xf]  ;;  %v13218_v6 = vld [vmem:[%s26324_s13 + $0x220] sm:$0xf0]  ;;  %v13441_v19 = vor.u32 %v16840_v50, %v13440_v13  ;;  %v7203_v48 = vpop.f32.mrf.mxu0  ;;  %v13050_v13 = vld [vmem:[%s26324_s13 + $0xd0] sm:$0xf0] }
 0x9d9   :  { %7487 = vmatpush.bf16.msra.mxu1 %v14337_v39  ;;  %v13889_v39 = vor.u32 %v16952_v43, %v13888_v62  ;;  %v14173_v62 = vor.u32 %v17015_v49, %v14170_v58  ;;  %v16973_v49 = vld [vmem:[%s26324_s13 + $0x80c] sm:$0xf]  ;;  %v14002_v58 = vld [vmem:[%s26324_s13 + $0x840] sm:$0xf0] }
 0x9db   :  { %7458 = vmatpush.bf16.msra.mxu3 %v13609_v59  ;;  %v7166_v59 = vpop.f32.mrf.mxu2 }
 0x9dc   :  { %7445 = vmatpush.bf16.msra.mxu2 %v13161_v47  ;;  %7471 = vmatpush.bf16.msra.mxu0 %v14057_v21  ;;  %v13221_v47 = vor.u32 %v16777_v5, %v13218_v6  ;;  %v13837_v21 = vor.u32 %v16931_v11, %v13834_v32  ;;  %v16889_v5 = vld [vmem:[%s26324_s13 + $0x56c] sm:$0xf]  ;;  %v13666_v6 = vld [vmem:[%s26324_s13 + $0x5a0] sm:$0xf0] }
 0x9dd   :  { %7493 = vmatpush.bf16.msrb.mxu1 %v13389_v31  ;;  %v16917_v31 = vld [vmem:[%s26324_s13 + $0x64c] sm:$0xf]  ;;  %v7190_v55 = vpop.f32.mrf.mxu3  ;;  %v14114_v32 = vld [vmem:[%s26324_s13 + $0x920] sm:$0xf0]  ;;  %v13669_v59 = vor.u32 %v16889_v5, %v13666_v6  ;;  %v13946_v5 = vld [vmem:[%s26324_s13 + $0x7d0] sm:$0xf0] }
 0x9de   :  { %14528 = vmatmul.msk.bf16.vlgmr.msra.gmra.mxu1 %vm157_vm1, %v21176_v46  ;;  %v13781_v14 = vor.u32 %v16917_v31, %v13778_v12  ;;  %v17001_v11 = vld [vmem:[%s26324_s13 + $0x8ec] sm:$0xf]  ;;  %v13610_v31 = vld [vmem:[%s26324_s13 + $0x530] sm:$0xf0]  ;;  %v16987_v12 = vld [vmem:[%s26324_s13 + $0x87c] sm:$0xf] }
 0x9df   :  { %7459 = vmatpush.bf16.msra.mxu3 %v13553_v41  ;;  %v7216_v41 = vpop.f32.mrf.mxu1  ;;  %v14117_v27 = vor.u32 %v17001_v11, %v14114_v32  ;;  %v13728_v6 = vld [vmem:[%s26324_s13 + $0x5e0] sm:$0xf]  ;;  %v16911_v11 = vld [vmem:[%s26324_s13 + $0x614] sm:$0xf0]  ;;  %v13224_v32 = vld [vmem:[%s26324_s13 + $0x1f0] sm:$0xf] }
 0x9e0   :  { %7446 = vmatpush.bf16.msra.mxu2 %v13105_v63  ;;  %7472 = vmatpush.bf16.msra.mxu0 %v14001_v16  ;;  %v22829_v63 = vld [vmem:[%s26325_s14] sm:$0xff]  ;;  %v7205_v30 = vpop.f32.mrf.mxu0 }
 0x9e1   :  { %7494 = vmatpush.bf16.msrb.mxu1 %v13333_v17  ;;  %v4907_v16 = vperm.slane %v22829_v63, 5  ;;  %v14229_v17 = vor.u32 %v17029_v36, %v14226_v54  ;;  %v13280_v30 = vld [vmem:[%s26324_s13 + $0x260] sm:$0xf] }
 0x9e3   :  { %7460 = vmatpush.bf16.msra.mxu3 %v13497_v34  ;;  %v17071_v34 = vld [vmem:[%s26324_s13 + $0xb1c] sm:$0xf]  ;;  %v7191_v60 = vadd.f32 %v7190_v55, %v4907_v16  ;;  %v13336_v16 = vld [vmem:[%s26324_s13 + $0x2d0] sm:$0xf] }
 0x9e4   :  { %7447 = vmatpush.bf16.msra.mxu2 %v13049_v0  ;;  %7473 = vmatpush.bf16.msra.mxu0 %v13945_v10  ;;  %v13109_v0 = vor.u32 %v16749_v52, %v13106_v53  ;;  %v13725_v10 = vor.u32 %v16903_v22, %v13722_v56  ;;  %v14397_v43 = vor.u32 %v17071_v34, %v14394_v61  ;;  %v16861_v22 = vld [vmem:[%s26324_s13 + $0x48c] sm:$0xf]  ;;  %v13554_v56 = vld [vmem:[%s26324_s13 + $0x4c0] sm:$0xf0]  ;;  %v13784_v34 = vld [vmem:[%s26324_s13 + $0x650] sm:$0xf] }
 0x9e5   :  { %7495 = vmatpush.bf16.msrb.mxu1 %v13277_v23  ;;  %v7204_v50 = vadd.f32 %v7203_v48, %v7191_v60  ;;  %v7229_v23 = vpop.f32.mrf.mxu2  ;;  %v13392_v48 = vld [vmem:[%s26324_s13 + $0x340] sm:$0xf]  ;;  %v7192_v36 = vpop.f32.mrf.mxu3  ;;  %v16925_v61 = vld [vmem:[%s26324_s13 + $0x684] sm:$0xf0] }
 0x9e6   :  { %v16771_v36 = vld [vmem:[%s26324_s13 + $0x1b4] sm:$0xf0] }
 0x9e7   :  { %7461 = vmatpush.bf16.msra.mxu3 %v13441_v19  ;;  %v14338_v19 = vld [vmem:[%s26324_s13 + $0xae0] sm:$0xf0]  ;;  %v7217_v24 = vadd.f32 %v7216_v41, %v7204_v50  ;;  %v7218_v38 = vpop.f32.mrf.mxu1  ;;  %v16939_v41 = vld [vmem:[%s26324_s13 + $0x6f4] sm:$0xf0]  ;;  %v16847_v50 = vld [vmem:[%s26324_s13 + $0x41c] sm:$0xf] }
 0x9e8   :  { %7448 = vmatpush.bf16.msra.mxu2 %v12993_v35  ;;  %7474 = vmatpush.bf16.msra.mxu0 %v13889_v39  ;;  %v16827_v35 = vld [vmem:[%s26324_s13 + $0x374] sm:$0xf0]  ;;  %v13053_v39 = vor.u32 %v16735_v1, %v13050_v13  ;;  %v14005_v1 = vor.u32 %v16973_v49, %v14002_v58  ;;  %v13785_v13 = vor.u32 %v16925_v61, %v13784_v34  ;;  %v14512_v38 = vld [vmem:[%s26324_s13 + $0xc00] sm:$0xf]  ;;  %v14232_v58 = vld [vmem:[%s26324_s13 + $0x9d0] sm:$0xf] }
 0x9e9   :  { %7496 = vmatpush.bf16.msrb.mxu1 %v13221_v47  ;;  %v16721_v47 = vld [vmem:[%s26324_s13 + $0x2c] sm:$0xf]  ;;  %v22895_v18 = vadd.f32 %v7229_v23, %v7217_v24  ;;  %v13393_v54 = vor.u32 %v16827_v35, %v13392_v48  ;;  %v13498_v23 = vld [vmem:[%s26324_s13 + $0x450] sm:$0xf0]  ;;  %v17107_v48 = vld [vmem:[%s26324_s13 + $0xc34] sm:$0x10] }
 0x9ea   :  { %7462 = vmatmul.bf16.vlgmr.msra.gmra.mxu3 %v21172_v9  ;;  %v16833_v24 = vld [vmem:[%s26324_s13 + $0x3ac] sm:$0xf]  ;;  %v17037_v34 = vld [vmem:[%s26324_s13 + $0xa04] sm:$0xf0]  ;;  %v14456_v61 = vld [vmem:[%s26324_s13 + $0xb90] sm:$0xf] }
 0x9eb   :  { %7519 = vmatpush.bf16.msrb.mxu3 %v14285_v28  ;;  %7449 = vmatmul.bf16.vlgmr.msra.gmra.mxu2 %v21170_v26  ;;  %v14341_v28 = vor.u32 %v17057_v15, %v14338_v19  ;;  %v16785_v15 = vld [vmem:[%s26324_s13 + $0x224] sm:$0xf0]  ;;  %v13501_v19 = vor.u32 %v16847_v50, %v13498_v23  ;;  %v13560_v50 = vld [vmem:[%s26324_s13 + $0x490] sm:$0xf] }
 0x9ec   :  { %7506 = vmatpush.bf16.msrb.mxu2 %v13837_v21  ;;  %7536 = vmatpush.bf16.msrb.mxu0 %v6913_v29  ;;  %v12994_v21 = vld [vmem:[%s26324_s13 + $0x60] sm:$0xf0]  ;;  %v16875_v29 = vld [vmem:[%s26324_s13 + $0x4fc] sm:$0xf]  ;;  %v16869_v23 = vld [vmem:[%s26324_s13 + $0x4c4] sm:$0xf0] }
 0x9ed   :  { %7475 = vmatmul.bf16.vlgmr.msra.gmra.mxu0 %v21174_v44  ;;  %7497 = vmatpush.bf16.msrb.mxu1 %v13165_v51  ;;  %v16813_v51 = vld [vmem:[%s26324_s13 + $0x304] sm:$0xf0]  ;;  %v13613_v52 = vor.u32 %v16875_v29, %v13610_v31  ;;  %v7231_v53 = vpop.f32.mrf.mxu2  ;;  %v13168_v31 = vld [vmem:[%s26324_s13 + $0x180] sm:$0xf] }
 0x9ee   :  { %v13337_v55 = vor.u32 %v16813_v51, %v13336_v16  ;;  %v16897_v29 = vld [vmem:[%s26324_s13 + $0x5a4] sm:$0xf0]  ;;  %v13169_v53 = vor.u32 %v16771_v36, %v13168_v31 }
 0x9ef   :  { %7520 = vmatpush.bf16.msrb.mxu3 %v14229_v17  ;;  %v14061_v17 = vor.u32 %v16987_v12, %v14058_v42  ;;  %v22939_v60 = vpop.f32.mrf.mxu1  ;;  %v17051_v42 = vld [vmem:[%s26324_s13 + $0xa74] sm:$0xf0]  ;;  %v17009_v36 = vld [vmem:[%s26324_s13 + $0x924] sm:$0xf0] }
 0x9f0   :  { %7507 = vmatpush.bf16.msrb.mxu2 %v13781_v14  ;;  %7537 = vmatpush.bf16.msrb.mxu0 %v14453_v7  ;;  %v12997_v14 = vor.u32 %v16721_v47, %v12994_v21  ;;  %v13841_v7 = vor.u32 %v16939_v41, %v13840_v8  ;;  %v16945_v47 = vld [vmem:[%s26324_s13 + $0x72c] sm:$0xf]  ;;  %v13890_v21 = vld [vmem:[%s26324_s13 + $0x760] sm:$0xf0]  ;;  %v14513_v8 = vor.u32 %v17107_v48, %v14512_v38 }
 0x9f1   :  { %7498 = vmatpush.bf16.msrb.mxu1 %v13109_v0  ;;  %v16799_v0 = vld [vmem:[%s26324_s13 + $0x294] sm:$0xf0]  ;;  %v13893_v51 = vor.u32 %v16945_v47, %v13890_v21 }
 0x9f2   :  { %v6916_v49 = vand.u32 %v14513_v8, %v17990_v4  ;;  %v16855_v21 = vld [vmem:[%s26324_s13 + $0x454] sm:$0xf0]  ;;  %v16932_v8 = vld [vmem:[%s26324_s13 + $0x6c4] sm:$0xf] }
 0x9f3   :  { %7521 = vmatpush.bf16.msrb.mxu3 %v14173_v62  ;;  %v16959_v62 = vld [vmem:[%s26324_s13 + $0x79c] sm:$0xf] }
 0x9f4   :  { %7508 = vmatpush.bf16.msrb.mxu2 %v13725_v10  ;;  %7538 = vmatpush.bf16.msrb.mxu0 %v14397_v43  ;;  %v13557_v10 = vor.u32 %v16861_v22, %v13554_v56  ;;  %v13281_v43 = vor.u32 %v16799_v0, %v13280_v30  ;;  %v13949_v35 = vor.u32 %v16959_v62, %v13946_v5  ;;  %v13112_v22 = vld [vmem:[%s26324_s13 + $0x110] sm:$0xf]  ;;  %v16757_v56 = vld [vmem:[%s26324_s13 + $0x144] sm:$0xf0]  ;;  %v13056_v62 = vld [vmem:[%s26324_s13 + $0xa0] sm:$0xf] }
 0x9f5   :  { %7499 = vmatpush.bf16.msrb.mxu1 %v13053_v39  ;;  %v13729_v39 = vor.u32 %v16911_v11, %v13728_v6  ;;  %v17093_v30 = vld [vmem:[%s26324_s13 + $0xbc4] sm:$0xf0]  ;;  %v16743_v11 = vld [vmem:[%s26324_s13 + $0xd4] sm:$0xf0] }
 0x9f6   :  { %v14457_v6 = vor.u32 %v17093_v30, %v14456_v61  ;;  %v17044_v61 = vld [vmem:[%s26324_s13 + $0xa44] sm:$0xf]  ;;  %v14290_v30 = vld [vmem:[%s26324_s13 + $0xa78] sm:$0xf0] }
 0x9f7   :  { %7522 = vmatpush.bf16.msrb.mxu3 %v14117_v27  ;;  %v13225_v27 = vor.u32 %v16785_v15, %v13224_v32  ;;  %v7283_v12 = vpop.f32.mrf.mxu1  ;;  %v14176_v32 = vld [vmem:[%s26324_s13 + $0x960] sm:$0xf]  ;;  %v17023_v15 = vld [vmem:[%s26324_s13 + $0x994] sm:$0xf0] }
 0x9f8   :  { %7509 = vmatpush.bf16.msrb.mxu2 %v13669_v59  ;;  %7539 = vmatpush.bf16.msrb.mxu0 %v14341_v28  ;;  %v13442_v59 = vld [vmem:[%s26324_s13 + $0x3e0] sm:$0xf0]  ;;  %v13672_v28 = vld [vmem:[%s26324_s13 + $0x570] sm:$0xf]  ;;  %v14177_v47 = vor.u32 %v17023_v15, %v14176_v32 }
 0x9f9   :  { %7500 = vmatpush.bf16.msrb.mxu1 %v12997_v14  ;;  %v13445_v41 = vor.u32 %v16833_v24, %v13442_v59  ;;  %v13673_v14 = vor.u32 %v16897_v29, %v13672_v28  ;;  %v17079_v24 = vld [vmem:[%s26324_s13 + $0xb54] sm:$0xf0]  ;;  %v13057_v59 = vor.u32 %v16743_v11, %v13056_v62  ;;  %v16729_v28 = vld [vmem:[%s26324_s13 + $0x64] sm:$0xf0]  ;;  %v14120_v12 = vld [vmem:[%s26324_s13 + $0x8f0] sm:$0xf]  ;;  %v14293_v11 = vor.u32 %v17044_v61, %v14290_v30 }
 0x9fa   :  { %v7268_v16 = vpop.f32.mrf.mxu0  ;;  %v16806_v62 = vld [vmem:[%s26324_s13 + $0x2d4] sm:$0xf]  ;;  %v14008_v32 = vld [vmem:[%s26324_s13 + $0x810] sm:$0xf]  ;;  %v16953_v30 = vld [vmem:[%s26324_s13 + $0x764] sm:$0xf0] }
 0x9fb   :  { %7523 = vmatpush.bf16.msrb.mxu3 %v14061_v17 }
 0x9fc   :  { %7545 = vmatpush.bf16.msra.mxu0 %v13393_v54  ;;  %7510 = vmatpush.bf16.msrb.mxu2 %v13613_v52  ;;  %v14288_v54 = vld [vmem:[%s26324_s13 + $0xa40] sm:$0xf] }
 0x9fd   :  { %7558 = vmatpush.bf16.msra.mxu1 %v13841_v7  ;;  %14529 = vmatmul.msk.bf16.vlgmr.msrb.gmra.mxu0 %vm157_vm1, %v21176_v46  ;;  %v13616_v52 = vld [vmem:[%s26324_s13 + $0x500] sm:$0xf]  ;;  %v14289_v17 = vor.u32 %v17051_v42, %v14288_v54  ;;  %v16883_v7 = vld [vmem:[%s26324_s13 + $0x534] sm:$0xf0]  ;;  %v7255_v5 = vpop.f32.mrf.mxu3  ;;  %v14344_v54 = vld [vmem:[%s26324_s13 + $0xab0] sm:$0xf] }
 0x9fe   :  { %7501 = vmatmul.bf16.vlgmr.msrb.gmra.mxu1 %v21170_v26  ;;  %v13617_v0 = vor.u32 %v16883_v7, %v13616_v52  ;;  %v17065_v42 = vld [vmem:[%s26324_s13 + $0xae4] sm:$0xf0]  ;;  %v13394_v52 = vld [vmem:[%s26324_s13 + $0x378] sm:$0xf0]  ;;  %v14121_v7 = vor.u32 %v17009_v36, %v14120_v12  ;;  %v16967_v12 = vld [vmem:[%s26324_s13 + $0x7d4] sm:$0xf0] }
 0x9ff   :  { %7524 = vmatpush.bf16.msrb.mxu3 %v14005_v1  ;;  %v13113_v1 = vor.u32 %v16757_v56, %v13112_v22  ;;  %v16841_v22 = vld [vmem:[%s26324_s13 + $0x3e4] sm:$0xf0]  ;;  %v14064_v56 = vld [vmem:[%s26324_s13 + $0x880] sm:$0xf] }
 0xa00   :  { %7546 = vmatpush.bf16.msra.mxu0 %v13337_v55  ;;  %7511 = vmatpush.bf16.msrb.mxu2 %v13557_v10  ;;  %v4908_v55 = vperm.slane %v22829_v63, 6  ;;  %v7242_v10 = vpop.f32.mrf.mxu2 }
 0xa01   :  { %7559 = vmatpush.bf16.msra.mxu1 %v13785_v13  ;;  %v14233_v13 = vor.u32 %v17037_v34, %v14232_v58  ;;  %v16995_v34 = vld [vmem:[%s26324_s13 + $0x8b4] sm:$0xf0] }
 0xa02   :  { %v7270_v48 = vpop.f32.mrf.mxu0 }
 0xa03   :  { %7525 = vmatpush.bf16.msrb.mxu3 %v13949_v35  ;;  %v13561_v35 = vor.u32 %v16869_v23, %v13560_v50 }
 0xa04   :  { %7547 = vmatpush.bf16.msra.mxu0 %v13281_v43  ;;  %7512 = vmatpush.bf16.msrb.mxu2 %v13501_v19  ;;  %v7243_v43 = vadd.f32 %v7242_v10, %v4908_v55  ;;  %v14400_v19 = vld [vmem:[%s26324_s13 + $0xb20] sm:$0xf]  ;;  %v14345_v55 = vor.u32 %v17065_v42, %v14344_v54  ;;  %v16918_v10 = vld [vmem:[%s26324_s13 + $0x654] sm:$0xf]  ;;  %v17016_v54 = vld [vmem:[%s26324_s13 + $0x964] sm:$0xf] }
 0xa05   :  { %7560 = vmatpush.bf16.msra.mxu1 %v13729_v39  ;;  %v13504_v39 = vld [vmem:[%s26324_s13 + $0x420] sm:$0xf]  ;;  %v14401_v31 = vor.u32 %v17079_v24, %v14400_v19  ;;  %v16981_v19 = vld [vmem:[%s26324_s13 + $0x844] sm:$0xf0]  ;;  %v17030_v24 = vld [vmem:[%s26324_s13 + $0x9d4] sm:$0xf] }
 0xa06   :  { %v7256_v38 = vadd.f32 %v7255_v5, %v7243_v43  ;;  %v13338_v43 = vld [vmem:[%s26324_s13 + $0x308] sm:$0xf0]  ;;  %v14178_v42 = vld [vmem:[%s26324_s13 + $0x998] sm:$0xf0] }
 0xa07   :  { %7526 = vmatpush.bf16.msrb.mxu3 %v13893_v51  ;;  %v13505_v51 = vor.u32 %v16855_v21, %v13504_v39  ;;  %v13341_v48 = vor.u32 %v16806_v62, %v13338_v43  ;;  %v13730_v39 = vld [vmem:[%s26324_s13 + $0x618] sm:$0xf0]  ;;  %v16792_v21 = vld [vmem:[%s26324_s13 + $0x264] sm:$0xf] }
 0xa08   :  { %7548 = vmatpush.bf16.msra.mxu0 %v13225_v27  ;;  %7513 = vmatpush.bf16.msrb.mxu2 %v13445_v41  ;;  %v13000_v27 = vld [vmem:[%s26324_s13 + $0x30] sm:$0xf]  ;;  %v7269_v29 = vadd.f32 %v7268_v16, %v7256_v38  ;;  %v13842_v41 = vld [vmem:[%s26324_s13 + $0x6f8] sm:$0xf0]  ;;  %v14234_v38 = vld [vmem:[%s26324_s13 + $0xa08] sm:$0xf0] }
 0xa09   :  { %7561 = vmatpush.bf16.msra.mxu1 %v13673_v14  ;;  %v16820_v14 = vld [vmem:[%s26324_s13 + $0x344] sm:$0xf]  ;;  %v13845_v58 = vor.u32 %v16932_v8, %v13842_v41  ;;  %v16890_v8 = vld [vmem:[%s26324_s13 + $0x574] sm:$0xf]  ;;  %v13618_v62 = vld [vmem:[%s26324_s13 + $0x538] sm:$0xf0] }
 0xa0a   :  { %7527 = vmatmul.bf16.vlgmr.msrb.gmra.mxu3 %v21174_v44  ;;  %v23093_v16 = vadd.f32 %v22939_v60, %v7269_v29  ;;  %v13448_v60 = vld [vmem:[%s26324_s13 + $0x3b0] sm:$0xf]  ;;  %v23135_v5 = vpop.f32.mrf.mxu0  ;;  %v14237_v29 = vor.u32 %v17030_v24, %v14234_v38 }
 0xa0b   :  { %7588 = vmatpush.bf16.msra.mxu3 %v6916_v49  ;;  %7514 = vmatmul.bf16.vlgmr.msrb.gmra.mxu2 %v21172_v9  ;;  %v7257_v49 = vpop.f32.mrf.mxu3  ;;  %v23127_v50 = vpop.f32.mrf.mxu1  ;;  %v13449_v23 = vor.u32 %v16841_v22, %v13448_v60  ;;  %v16778_v22 = vld [vmem:[%s26324_s13 + $0x1f4] sm:$0xf] }
 0xa0c   :  { %7549 = vmatpush.bf16.msra.mxu0 %v13169_v53  ;;  %7571 = vmatpush.bf16.msra.mxu2 %v14289_v17  ;;  %v7244_v53 = vpop.f32.mrf.mxu2  ;;  %v13001_v17 = vor.u32 %v16729_v28, %v13000_v27  ;;  %v13282_v27 = vld [vmem:[%s26324_s13 + $0x298] sm:$0xf0]  ;;  %v14009_v28 = vor.u32 %v16981_v19, %v14008_v32  ;;  %v16764_v32 = vld [vmem:[%s26324_s13 + $0x184] sm:$0xf]  ;;  %v7652_v19 = vmul.f32 %v22573_v37, %v22573_v37 }
 0xa0d   :  { %7562 = vmatpush.bf16.msra.mxu1 %v13617_v0  ;;  %v13397_v0 = vor.u32 %v16820_v14, %v13394_v52  ;;  %v13285_v41 = vor.u32 %v16792_v21, %v13282_v27  ;;  %v17100_v14 = vld [vmem:[%s26324_s13 + $0xc04] sm:$0xf]  ;;  %v14514_v52 = vld [vmem:[%s26324_s13 + $0xc38] sm:$0x10]  ;;  %v13562_v27 = vld [vmem:[%s26324_s13 + $0x4c8] sm:$0xf0] }
 0xa0f   :  { %7589 = vmatpush.bf16.msra.mxu3 %v14457_v6  ;;  %v14065_v6 = vor.u32 %v16995_v34, %v14064_v56  ;;  %v13226_v56 = vld [vmem:[%s26324_s13 + $0x228] sm:$0xf0]  ;;  %v13896_v34 = vld [vmem:[%s26324_s13 + $0x730] sm:$0xf] }
 0xa10   :  { %7550 = vmatpush.bf16.msra.mxu0 %v13113_v1  ;;  %7572 = vmatpush.bf16.msra.mxu2 %v14233_v13  ;;  %v13786_v1 = vld [vmem:[%s26324_s13 + $0x688] sm:$0xf0]  ;;  %v7649_v13 = vmul.f32 %v22113_v3, %v22113_v3  ;;  %v13897_v24 = vor.u32 %v16953_v30, %v13896_v34  ;;  %v13058_v34 = vld [vmem:[%s26324_s13 + $0xd8] sm:$0xf0] }
 0xa11   :  { %7563 = vmatpush.bf16.msra.mxu1 %v13561_v35  ;;  %v13789_v15 = vor.u32 %v16918_v10, %v13786_v1  ;;  %v16904_v35 = vld [vmem:[%s26324_s13 + $0x5e4] sm:$0xf]  ;;  %v14122_v10 = vld [vmem:[%s26324_s13 + $0x928] sm:$0xf0]  ;;  %v14517_v1 = vor.u32 %v17100_v14, %v14514_v52  ;;  %v16974_v14 = vld [vmem:[%s26324_s13 + $0x814] sm:$0xf] }
 0xa12   :  { %v13733_v36 = vor.u32 %v16904_v35, %v13730_v39  ;;  %v7335_v49 = vpop.f32.mrf.mxu0  ;;  %v16988_v39 = vld [vmem:[%s26324_s13 + $0x884] sm:$0xf]  ;;  %v14010_v52 = vld [vmem:[%s26324_s13 + $0x848] sm:$0xf0] }
 0xa13   :  { %7590 = vmatpush.bf16.msra.mxu3 %v14401_v31  ;;  %v13952_v31 = vld [vmem:[%s26324_s13 + $0x7a0] sm:$0xf]  ;;  %v7296_v60 = vpop.f32.mrf.mxu1  ;;  %v6919_v35 = vand.u32 %v14517_v1, %v17990_v4  ;;  %v17086_v4 = vld [vmem:[%s26324_s13 + $0xb94] sm:$0xf]  ;;  %v14402_v49 = vld [vmem:[%s26324_s13 + $0xb58] sm:$0xf0]  ;;  %v14013_v30 = vor.u32 %v16974_v14, %v14010_v52 }
 0xa14   :  { %7551 = vmatpush.bf16.msra.mxu0 %v13057_v59  ;;  %7573 = vmatpush.bf16.msra.mxu2 %v14177_v47  ;;  %v7663_v59 = vmul.f32 %v7649_v13, %v22113_v3  ;;  %v7650_v47 = vmul.f32 %v22257_v40, %v22257_v40  ;;  %v13229_v13 = vor.u32 %v16778_v22, %v13226_v56  ;;  %v13506_v22 = vld [vmem:[%s26324_s13 + $0x458] sm:$0xf0]  ;;  %v17072_v56 = vld [vmem:[%s26324_s13 + $0xb24] sm:$0xf] }
 0xa15   :  { %7564 = vmatpush.bf16.msra.mxu1 %v13505_v51  ;;  %v13674_v51 = vld [vmem:[%s26324_s13 + $0x5a8] sm:$0xf0] }
 0xa16   :  { %v7677_v53 = vmul.f32 0.044715, %v7663_v59  ;;  %v13677_v61 = vor.u32 %v16890_v8, %v13674_v51  ;;  %v14066_v59 = vld [vmem:[%s26324_s13 + $0x8b8] sm:$0xf0] }
 0xa17   :  { %7591 = vmatpush.bf16.msra.mxu3 %v14345_v55  ;;  %v13953_v55 = vor.u32 %v16967_v12, %v13952_v31  ;;  %v16750_v31 = vld [vmem:[%s26324_s13 + $0x114] sm:$0xf]  ;;  %v13114_v12 = vld [vmem:[%s26324_s13 + $0x148] sm:$0xf0]  ;;  %v14069_v8 = vor.u32 %v16988_v39, %v14066_v59  ;;  %v17170_v39 = vld [vmem:[%s26326_s15 + $0x1ec] sm:$0xf0] }
 0xa18   :  { %7552 = vmatpush.bf16.msra.mxu0 %v13001_v17  ;;  %7574 = vmatpush.bf16.msra.mxu2 %v14121_v7  ;;  %v7664_v17 = vmul.f32 %v7650_v47, %v22257_v40  ;;  %v7651_v7 = vmul.f32 %v22371_v45, %v22371_v45  ;;  %v7691_v43 = vadd.f32 %v7677_v53, %v22113_v3  ;;  %v16862_v47 = vld [vmem:[%s26324_s13 + $0x494] sm:$0xf]  ;;  %v16848_v53 = vld [vmem:[%s26324_s13 + $0x424] sm:$0xf]  ;;  %v14902_v59 = vld [vmem:[%s26326_s15 + $0x2e0] sm:$0xf] }
 0xa19   :  { %7565 = vmatpush.bf16.msra.mxu1 %v13449_v23  ;;  %v16876_v23 = vld [vmem:[%s26324_s13 + $0x504] sm:$0xf]  ;;  %v13117_v60 = vor.u32 %v16750_v31, %v13114_v12 }
 0xa1a   :  { %14530 = vmatmul.msk.bf16.vlgmr.msra.gmra.mxu3 %vm157_vm1, %v21176_v46 }
 0xa1b   :  { %7597 = vmatpush.bf16.msrb.mxu3 %v13397_v0  ;;  %7553 = vmatmul.bf16.vlgmr.msra.gmra.mxu0 %v21170_v26  ;;  %v17002_v0 = vld [vmem:[%s26324_s13 + $0x8f4] sm:$0xf] }
 0xa1c   :  { %7610 = vmatpush.bf16.msrb.mxu0 %v13845_v58  ;;  %7575 = vmatpush.bf16.msra.mxu2 %v14065_v6  ;;  %v14181_v58 = vor.u32 %v17016_v54, %v14178_v42  ;;  %v7678_v6 = vmul.f32 0.044715, %v7664_v17  ;;  %v14125_v38 = vor.u32 %v17002_v0, %v14122_v10  ;;  %v7666_v42 = vmul.f32 %v7652_v19, %v22573_v37  ;;  %v16960_v0 = vld [vmem:[%s26324_s13 + $0x7a4] sm:$0xf]  ;;  %v13954_v10 = vld [vmem:[%s26324_s13 + $0x7d8] sm:$0xf0] }
 0xa1d   :  { %7623 = vmatpush.bf16.msrb.mxu1 %v14293_v11  ;;  %v7665_v11 = vmul.f32 %v7651_v7, %v22371_v45  ;;  %v23269_v7 = vpop.f32.mrf.mxu3  ;;  %v14346_v19 = vld [vmem:[%s26324_s13 + $0xae8] sm:$0xf0] }
 0xa1e   :  { %7566 = vmatmul.bf16.vlgmr.msra.gmra.mxu1 %v21172_v9  ;;  %v23267_v17 = vpop.f32.mrf.mxu2 }
 0xa1f   :  { %7598 = vmatpush.bf16.msrb.mxu3 %v13341_v48  ;;  %v13621_v48 = vor.u32 %v16876_v23, %v13618_v62  ;;  %v7679_v54 = vmul.f32 0.044715, %v7665_v11  ;;  %v14405_v23 = vor.u32 %v17072_v56, %v14402_v49  ;;  %v16722_v62 = vld [vmem:[%s26324_s13 + $0x34] sm:$0xf]  ;;  %v14758_v56 = vld [vmem:[%s26326_s15 + $0x1c0] sm:$0xf] }
 0xa20   :  { %7611 = vmatpush.bf16.msrb.mxu0 %v13789_v15  ;;  %7576 = vmatpush.bf16.msra.mxu2 %v14009_v28  ;;  %v13170_v15 = vld [vmem:[%s26324_s13 + $0x1b8] sm:$0xf0]  ;;  %v14458_v28 = vld [vmem:[%s26324_s13 + $0xbc8] sm:$0xf0] }
 0xa21   :  { %7624 = vmatpush.bf16.msrb.mxu1 %v14237_v29  ;;  %v13173_v21 = vor.u32 %v16764_v32, %v13170_v15  ;;  %v7692_v29 = vadd.f32 %v7678_v6, %v22257_v40  ;;  %v14461_v51 = vor.u32 %v17086_v4, %v14458_v28  ;;  %v7693_v1 = vadd.f32 %v7679_v54, %v22371_v45  ;;  %v16834_v6 = vld [vmem:[%s26324_s13 + $0x3b4] sm:$0xf]  ;;  %v13450_v32 = vld [vmem:[%s26324_s13 + $0x3e8] sm:$0xf0] }
 0xa22   :  { %v17058_v15 = vld [vmem:[%s26324_s13 + $0xab4] sm:$0xf] }
 0xa23   :  { %7599 = vmatpush.bf16.msrb.mxu3 %v13285_v41  ;;  %v13565_v41 = vor.u32 %v16862_v47, %v13562_v27  ;;  %v17202_v47 = vld [vmem:[%s26326_s15 + $0x2ec] sm:$0xf0]  ;;  %v13453_v27 = vor.u32 %v16834_v6, %v13450_v32  ;;  %v14349_v4 = vor.u32 %v17058_v15, %v14346_v19  ;;  %v16946_v28 = vld [vmem:[%s26324_s13 + $0x734] sm:$0xf]  ;;  %v14742_v6 = vld [vmem:[%s26326_s15 + $0x1a0] sm:$0xf] }
 0xa24   :  { %7612 = vmatpush.bf16.msrb.mxu0 %v13733_v36  ;;  %7577 = vmatpush.bf16.msra.mxu2 %v13953_v55  ;;  %v23255_v36 = vmul.f32 0.7978846, %v7691_v43  ;;  %v7706_v55 = vmul.f32 0.7978846, %v7692_v29  ;;  %v13002_v43 = vld [vmem:[%s26324_s13 + $0x68] sm:$0xf0] }
 0xa25   :  { %7625 = vmatpush.bf16.msrb.mxu1 %v14181_v58  ;;  %v16736_v58 = vld [vmem:[%s26324_s13 + $0xa4] sm:$0xf]  ;;  %v13898_v29 = vld [vmem:[%s26324_s13 + $0x768] sm:$0xf0]  ;;  %v7322_v14 = vpop.f32.mrf.mxu3  ;;  %v14870_v32 = vld [vmem:[%s26326_s15 + $0x2a0] sm:$0xf] }
 0xa26   :  { %v13061_v11 = vor.u32 %v16736_v58, %v13058_v34  ;;  %v7309_v54 = vpop.f32.mrf.mxu2  ;;  %17659 = vtanh.f32 %v23255_v36  ;;  %v13901_v49 = vor.u32 %v16946_v28, %v13898_v29  ;;  %v17166_v36 = vld [vmem:[%s26326_s15 + $0x1cc] sm:$0xf0]  ;;  %v14886_v58 = vld [vmem:[%s26326_s15 + $0x2c0] sm:$0xf] }
 0xa27   :  { %7600 = vmatpush.bf16.msrb.mxu3 %v13229_v13  ;;  %v13509_v13 = vor.u32 %v16848_v53, %v13506_v22  ;;  %v14903_v53 = vor.u32 %v17202_v47, %v14902_v59  ;;  %v17134_v22 = vld [vmem:[%s26326_s15 + $0xcc] sm:$0xf0]  ;;  %17661 = vtanh.f32 %v7706_v55  ;;  %v14726_v29 = vld [vmem:[%s26326_s15 + $0x180] sm:$0xf] }
 0xa28   :  { %7613 = vmatpush.bf16.msrb.mxu0 %v13677_v61  ;;  %7578 = vmatpush.bf16.msra.mxu2 %v13897_v24  ;;  %v7680_v61 = vmul.f32 0.044715, %v7666_v42  ;;  %v14646_v24 = vld [vmem:[%s26326_s15 + $0xe0] sm:$0xf]  ;;  %v23337_v12 = vpop.f32.mrf.mxu0  ;;  %v13005_v42 = vor.u32 %v16722_v62, %v13002_v43  ;;  %v17198_v34 = vld [vmem:[%s26326_s15 + $0x2cc] sm:$0xf0] }
 0xa29   :  { %7626 = vmatpush.bf16.msrb.mxu1 %v14125_v38  ;;  %v17138_v38 = vld [vmem:[%s26326_s15 + $0xec] sm:$0xf0]  ;;  %v14614_v62 = vld [vmem:[%s26326_s15 + $0xa0] sm:$0xf] }
 0xa2a   :  { %v7694_v31 = vadd.f32 %v7680_v61, %v22573_v37  ;;  %v4909_v61 = vperm.slane %v22829_v63, 7  ;;  %v14759_v63 = vor.u32 %v17166_v36, %v14758_v56  ;;  %v17130_v43 = vld [vmem:[%s26326_s15 + $0xac] sm:$0xf0]  ;;  %v14982_v14 = vld [vmem:[%s26326_s15 + $0x380] sm:$0xf] }
 0xa2b   :  { %7601 = vmatpush.bf16.msrb.mxu3 %v13173_v21  ;;  %7579 = vmatmul.bf16.vlgmr.msra.gmra.mxu2 %v21174_v44  ;;  %v7707_v21 = vmul.f32 0.7978846, %v7693_v1  ;;  %v23365_v55 = vpop.f32.mrf.mxu1  ;;  %v15014_v1 = vld [vmem:[%s26326_s15 + $0x3c0] sm:$0xf]  ;;  %v17194_v15 = vld [vmem:[%s26326_s15 + $0x2ac] sm:$0xf0] }
 0xa2c   :  { %7614 = vmatpush.bf16.msrb.mxu0 %v13621_v48  ;;  %7640 = vmatpush.bf16.msrb.mxu2 %v6919_v35  ;;  %v14774_v48 = vld [vmem:[%s26326_s15 + $0x1e0] sm:$0xf]  ;;  %v13957_v35 = vor.u32 %v16960_v0, %v13954_v10  ;;  %v7708_v0 = vmul.f32 0.7978846, %v7694_v31  ;;  %v17660_v19 = vpop.eup %17659  ;;  %v17226_v59 = vld [vmem:[%s26326_s15 + $0x3ac] sm:$0xf0] }
 0xa2d   :  { %7627 = vmatpush.bf16.msrb.mxu1 %v14069_v8  ;;  %v14647_v8 = vor.u32 %v17138_v38, %v14646_v24  ;;  %v14775_v52 = vor.u32 %v17170_v39, %v14774_v48  ;;  %17663 = vtanh.f32 %v7707_v21  ;;  %v7295_v24 = vadd.f32 %v23127_v50, %v4909_v61  ;;  %v17662_v38 = vpop.eup %17661  ;;  %v14998_v39 = vld [vmem:[%s26326_s15 + $0x3a0] sm:$0xf]  ;;  %v17126_v28 = vld [vmem:[%s26326_s15 + $0x8c] sm:$0xf0] }
 0xa2e   :  { %17665 = vtanh.f32 %v7708_v0  ;;  %v14854_v31 = vld [vmem:[%s26326_s15 + $0x280] sm:$0xf]  ;;  %v17190_v54 = vld [vmem:[%s26326_s15 + $0x28c] sm:$0xf0]  ;;  %v7654_v0 = vmul.f32 %v22895_v18, %v22895_v18 }
 0xa2f   :  { %7602 = vmatpush.bf16.msrb.mxu3 %v13117_v60  ;;  %v14630_v60 = vld [vmem:[%s26326_s15 + $0xc0] sm:$0xf]  ;;  %v7308_v21 = vadd.f32 %v23267_v17, %v7295_v24  ;;  %v17158_v17 = vld [vmem:[%s26326_s15 + $0x18c] sm:$0xf0]  ;;  %v14855_v56 = vor.u32 %v17190_v54, %v14854_v31 }
 0xa30   :  { %7615 = vmatpush.bf16.msrb.mxu0 %v13565_v41  ;;  %7641 = vmatpush.bf16.msrb.mxu2 %v14461_v51  ;;  %v15030_v41 = vld [vmem:[%s26326_s15 + $0x3e0] sm:$0xf]  ;;  %v17234_v51 = vld [vmem:[%s26326_s15 + $0x3ec] sm:$0xf0]  ;;  %v14631_v10 = vor.u32 %v17134_v22, %v14630_v60  ;;  %v7348_v48 = vpop.f32.mrf.mxu0  ;;  %v14727_v22 = vor.u32 %v17158_v17, %v14726_v29 }
 0xa31   :  { %7628 = vmatpush.bf16.msrb.mxu1 %v14013_v30  ;;  %v15031_v30 = vor.u32 %v17234_v51, %v15030_v41  ;;  %v14999_v41 = vor.u32 %v17226_v59, %v14998_v39  ;;  %v7321_v60 = vadd.f32 %v23269_v7, %v7308_v21  ;;  %v17122_v36 = vld [vmem:[%s26326_s15 + $0x6c] sm:$0xf0]  ;;  %v14694_v48 = vld [vmem:[%s26326_s15 + $0x140] sm:$0xf] }
 0xa32   :  { %v17154_v7 = vld [vmem:[%s26326_s15 + $0x16c] sm:$0xf0] }
 0xa33   :  { %7603 = vmatpush.bf16.msrb.mxu3 %v13061_v11  ;;  %v17162_v11 = vld [vmem:[%s26326_s15 + $0x1ac] sm:$0xf0]  ;;  %v17664_v47 = vpop.eup %17663 }
 0xa34   :  { %7616 = vmatpush.bf16.msrb.mxu0 %v13509_v13  ;;  %7642 = vmatpush.bf16.msrb.mxu2 %v14405_v23  ;;  %v17230_v13 = vld [vmem:[%s26326_s15 + $0x3cc] sm:$0xf0]  ;;  %v14887_v23 = vor.u32 %v17198_v34, %v14886_v58  ;;  %v14743_v50 = vor.u32 %v17162_v11, %v14742_v6  ;;  %v14710_v58 = vld [vmem:[%s26326_s15 + $0x160] sm:$0xf] }
 0xa35   :  { %7629 = vmatpush.bf16.msrb.mxu1 %v13957_v35  ;;  %v14615_v35 = vor.u32 %v17130_v43, %v14614_v62  ;;  %v14838_v34 = vld [vmem:[%s26326_s15 + $0x260] sm:$0xf]  ;;  %v17186_v61 = vld [vmem:[%s26326_s15 + $0x26c] sm:$0xf0] }
 0xa36   :  { %v14966_v43 = vld [vmem:[%s26326_s15 + $0x360] sm:$0xf]  ;;  %v17218_v6 = vld [vmem:[%s26326_s15 + $0x36c] sm:$0xf0]  ;;  %v14839_v24 = vor.u32 %v17186_v61, %v14838_v34 }
 0xa37   :  { %7604 = vmatpush.bf16.msrb.mxu3 %v13005_v42  ;;  %v7733_v42 = vadd.f32 1.0, %v17660_v19  ;;  %v14711_v19 = vor.u32 %v17154_v7, %v14710_v58  ;;  %v17182_v39 = vld [vmem:[%s26326_s15 + $0x24c] sm:$0xf0]  ;;  %v14534_v58 = vld [vmem:[%s26326_s15] sm:$0xf] }
 0xa38   :  { %7617 = vmatpush.bf16.msrb.mxu0 %v13453_v27  ;;  %7643 = vmatpush.bf16.msrb.mxu2 %v14349_v4  ;;  %v14871_v27 = vor.u32 %v17194_v15, %v14870_v32  ;;  %v14598_v4 = vld [vmem:[%s26326_s15 + $0x80] sm:$0xf]  ;;  %v23469_v32 = vadd.f32 %v23135_v5, %v7321_v60  ;;  %v17150_v5 = vld [vmem:[%s26326_s15 + $0x14c] sm:$0xf0]  ;;  %v23522_v60 = vld [vmem:[%s26325_s14 + $0x8] sm:$0x3f] }
 0xa39   :  { %7630 = vmatpush.bf16.msrb.mxu1 %v13901_v49  ;;  %v14599_v51 = vor.u32 %v17126_v28, %v14598_v4  ;;  %v14582_v49 = vld [vmem:[%s26326_s15 + $0x60] sm:$0xf]  ;;  %v17214_v29 = vld [vmem:[%s26326_s15 + $0x34c] sm:$0xf0]  ;;  %v14695_v31 = vor.u32 %v17150_v5, %v14694_v48 }
 0xa3a   :  { %7605 = vmatmul.bf16.vlgmr.msrb.gmra.mxu3 %v21170_v26  ;;  %v23401_v26 = vpop.f32.mrf.mxu3  ;;  %v14583_v62 = vor.u32 %v17122_v36, %v14582_v49  ;;  %v14950_v28 = vld [vmem:[%s26326_s15 + $0x340] sm:$0xf]  ;;  %v7656_v17 = vmul.f32 %v23469_v32, %v23469_v32  ;;  %v17210_v36 = vld [vmem:[%s26326_s15 + $0x32c] sm:$0xf0] }
 0xa3b   :  { %10481 = vmatpush.bf16.msra.mxu3 %v14775_v52  ;;  %7618 = vmatmul.bf16.vlgmr.msrb.gmra.mxu0 %v21172_v9  ;;  %v15015_v9 = vor.u32 %v17230_v13, %v15014_v1  ;;  %v17222_v52 = vld [vmem:[%s26326_s15 + $0x38c] sm:$0xf0]  ;;  %v17666_v13 = vpop.eup %17665  ;;  %v14934_v49 = vld [vmem:[%s26326_s15 + $0x320] sm:$0xf] }
 0xa3c   :  { %10468 = vmatpush.bf16.msra.mxu2 %v14647_v8  ;;  %10494 = vmatpush.bf16.msra.mxu0 %v14903_v53  ;;  %v7361_v8 = vpop.f32.mrf.mxu1  ;;  %v7735_v53 = vadd.f32 1.0, %v17664_v47  ;;  %v14983_v1 = vor.u32 %v17222_v52, %v14982_v14  ;;  %v7736_v59 = vadd.f32 1.0, %v17666_v13  ;;  %v7668_v47 = vmul.f32 %v7654_v0, %v22895_v18  ;;  %v17178_v14 = vld [vmem:[%s26326_s15 + $0x22c] sm:$0xf0]  ;;  %v14790_v13 = vld [vmem:[%s26326_s15 + $0x200] sm:$0xf] }
 0xa3d   :  { %10507 = vmatpush.bf16.msra.mxu1 %v15031_v30  ;;  %14531 = vmatmul.msk.bf16.vlgmr.msrb.gmra.mxu2 %vm157_vm1, %v21176_v46  ;;  %v7653_v46 = vmul.f32 %v22764_v57, %v22764_v57  ;;  %v23451_v30 = vmul.f32 0.5, %v7733_v42  ;;  %v14550_v42 = vld [vmem:[%s26326_s15 + $0x20] sm:$0xf]  ;;  %v17114_v8 = vld [vmem:[%s26326_s15 + $0x2c] sm:$0xf0]  ;;  %v7670_v7 = vmul.f32 %v7656_v17, %v23469_v32 }
 0xa3e   :  { %7631 = vmatmul.bf16.vlgmr.msrb.gmra.mxu1 %v21174_v44  ;;  %v7734_v44 = vadd.f32 1.0, %v17662_v38  ;;  %v23466_v11 = vmul.f32 0.5, %v7735_v53  ;;  %v17118_v38 = vld [vmem:[%s26326_s15 + $0x4c] sm:$0xf0]  ;;  %v7682_v52 = vmul.f32 0.044715, %v7668_v47 }
 0xa3f   :  { %10482 = vmatpush.bf16.msra.mxu3 %v14759_v63  ;;  %v17110_v0 = vld [vmem:[%s26326_s15 + $0xc] sm:$0xf0]  ;;  %v15414_v48 = vld [vmem:[%s26326_s15 + $0x6e0] sm:$0xf] }
 0xa40   :  { %10469 = vmatpush.bf16.msra.mxu2 %v14631_v10  ;;  %10495 = vmatpush.bf16.msra.mxu0 %v14887_v23  ;;  %v7655_v10 = vmul.f32 %v23093_v16, %v23093_v16  ;;  %v23457_v63 = vmul.f32 0.5, %v7734_v44  ;;  %v7667_v23 = vmul.f32 %v7653_v46, %v22764_v57  ;;  %v23508_v44 = vpop.f32.mrf.mxu2  ;;  %v17146_v46 = vld [vmem:[%s26326_s15 + $0x12c] sm:$0xf0]  ;;  %v14918_v47 = vld [vmem:[%s26326_s15 + $0x300] sm:$0xf] }
 0xa41   :  { %10508 = vmatpush.bf16.msra.mxu1 %v15015_v9  ;;  %v14566_v9 = vld [vmem:[%s26326_s15 + $0x40] sm:$0xf]  ;;  %v17330_v5 = vld [vmem:[%s26326_s15 + $0x6ec] sm:$0xf0] }
 0xa42   :  { %v7387_v15 = vpop.f32.mrf.mxu3  ;;  %v7669_v21 = vmul.f32 %v7655_v10, %v23093_v16  ;;  %v14567_v4 = vor.u32 %v17118_v38, %v14566_v9  ;;  %v14662_v10 = vld [vmem:[%s26326_s15 + $0x100] sm:$0xf]  ;;  %v17298_v9 = vld [vmem:[%s26326_s15 + $0x5ec] sm:$0xf0]  ;;  %v14535_v38 = vor.u32 %v17110_v0, %v14534_v58 }
 0xa43   :  { %10483 = vmatpush.bf16.msra.mxu3 %v14743_v50  ;;  %v14967_v50 = vor.u32 %v17218_v6, %v14966_v43  ;;  %v7761_v43 = vmul.f32 %v23451_v30, %v22113_v3  ;;  %v7762_v6 = vmul.f32 %v23457_v63, %v22257_v40  ;;  %v14935_v15 = vor.u32 %v17210_v36, %v14934_v49  ;;  %v17362_v17 = vld [vmem:[%s26326_s15 + $0x7ec] sm:$0xf0] }
 0xa44   :  { %10470 = vmatpush.bf16.msra.mxu2 %v14615_v35  ;;  %10496 = vmatpush.bf16.msra.mxu0 %v14871_v27  ;;  %v14822_v35 = vld [vmem:[%s26326_s15 + $0x240] sm:$0xf]  ;;  %v7681_v27 = vmul.f32 0.044715, %v7667_v23  ;;  %v7683_v53 = vmul.f32 0.044715, %v7669_v21  ;;  %v7763_v3 = vmul.f32 %v23466_v11, %v22371_v45 }
 0xa45   :  { %10509 = vmatpush.bf16.msra.mxu1 %v14999_v41  ;;  %v14823_v54 = vor.u32 %v17182_v39, %v14822_v35  ;;  %v14678_v41 = vld [vmem:[%s26326_s15 + $0x120] sm:$0xf]  ;;  %v17174_v23 = vld [vmem:[%s26326_s15 + $0x20c] sm:$0xf0]  ;;  %v7750_v30 = vmul.f32 0.5, %v7736_v59  ;;  %v4910_v63 = vperm.slane %v23522_v60, 0  ;;  %v7696_v35 = vadd.f32 %v7682_v52, %v22895_v18 }
 0xa46   :  { %v14679_v34 = vor.u32 %v17146_v46, %v14678_v41  ;;  %v7695_v40 = vadd.f32 %v7681_v27, %v22764_v57  ;;  %v7684_v39 = vmul.f32 0.044715, %v7670_v7  ;;  %v14791_v59 = vor.u32 %v17174_v23, %v14790_v13  ;;  %v17206_v21 = vld [vmem:[%s26326_s15 + $0x30c] sm:$0xf0]  ;;  %v15270_v41 = vld [vmem:[%s26326_s15 + $0x5c0] sm:$0xf] }
 0xa47   :  { %10484 = vmatpush.bf16.msra.mxu3 %v14727_v22  ;;  %v14951_v22 = vor.u32 %v17214_v29, %v14950_v28  ;;  %v15542_v29 = vld [vmem:[%s26326_s15 + $0x7e0] sm:$0xf]  ;;  %v17294_v46 = vld [vmem:[%s26326_s15 + $0x5cc] sm:$0xf0]  ;;  %v23608_v52 = vpack.c.bf16 %v7763_v3, %v7763_v3  ;;  %v7710_v36 = vmul.f32 0.7978846, %v7696_v35  ;;  %v7347_v58 = vadd.f32 %v23337_v12, %v4910_v63 }
 0xa48   :  { %10471 = vmatpush.bf16.msra.mxu2 %v14599_v51  ;;  %10497 = vmatpush.bf16.msra.mxu0 %v14855_v56  ;;  %v14806_v51 = vld [vmem:[%s26326_s15 + $0x220] sm:$0xf]  ;;  %v14551_v56 = vor.u32 %v17114_v8, %v14550_v42  ;;  %v23576_v45 = vpop.f32.mrf.mxu0  ;;  %v7374_v27 = vpop.f32.mrf.mxu2  ;;  %v15415_v42 = vor.u32 %v17330_v5, %v15414_v48  ;;  %v17262_v8 = vld [vmem:[%s26326_s15 + $0x4cc] sm:$0xf0]  ;;  %v7709_v49 = vmul.f32 0.7978846, %v7695_v40  ;;  %v14919_v7 = vor.u32 %v17206_v21, %v14918_v47 }
 0xa49   :  { %10510 = vmatpush.bf16.msra.mxu1 %v14983_v1  ;;  %v14807_v61 = vor.u32 %v17178_v14, %v14806_v51  ;;  %v17142_v1 = vld [vmem:[%s26326_s15 + $0x10c] sm:$0xf0]  ;;  %v23605_v51 = vpack.c.bf16 %v7762_v6, %v7762_v6  ;;  %v7764_v14 = vmul.f32 %v7750_v30, %v22573_v37  ;;  %v15543_v0 = vor.u32 %v17362_v17, %v15542_v29  ;;  %v15510_v35 = vld [vmem:[%s26326_s15 + $0x7a0] sm:$0xf] }
 0xa4a   :  { %v14663_v11 = vor.u32 %v17142_v1, %v14662_v10  ;;  %v15526_v1 = vld [vmem:[%s26326_s15 + $0x7c0] sm:$0xf]  ;;  %v17358_v12 = vld [vmem:[%s26326_s15 + $0x7cc] sm:$0xf0]  ;;  %v15271_v23 = vor.u32 %v17294_v46, %v15270_v41  ;;  %17667 = vtanh.f32 %v7709_v49 }
 0xa4b   :  { %10485 = vmatpush.bf16.msra.mxu3 %v14711_v19  ;;  %v17266_v19 = vld [vmem:[%s26326_s15 + $0x4ec] sm:$0xf0]  ;;  %v23618_v37 = vpop.f32.mrf.mxu1  ;;  %v23648_v30 = vpack.c.bf16 %v7764_v14, %v7764_v14  ;;  %v15527_v48 = vor.u32 %v17358_v12, %v15526_v1  ;;  %17669 = vtanh.f32 %v7710_v36  ;;  %v15366_v29 = vld [vmem:[%s26326_s15 + $0x680] sm:$0xf] }
 0xa4c   :  { %10472 = vmatpush.bf16.msra.mxu2 %v14583_v62  ;;  %10498 = vmatpush.bf16.msra.mxu0 %v14839_v24  ;;  %v15158_v62 = vld [vmem:[%s26326_s15 + $0x4e0] sm:$0xf]  ;;  %v17258_v6 = vld [vmem:[%s26326_s15 + $0x4ac] sm:$0xf0] }
 0xa4d   :  { %10511 = vmatpush.bf16.msra.mxu1 %v14967_v50  ;;  %v15286_v24 = vld [vmem:[%s26326_s15 + $0x5e0] sm:$0xf]  ;;  %v7697_v50 = vadd.f32 %v7683_v53, %v23093_v16  ;;  %v4911_v53 = vperm.slane %v23522_v60, 1  ;;  %v7398_v13 = vpop.f32.mrf.mxu3  ;;  %v17322_v3 = vld [vmem:[%s26326_s15 + $0x6ac] sm:$0xf0] }
 0xa4e   :  { %v15287_v28 = vor.u32 %v17298_v9, %v15286_v24  ;;  %v17290_v24 = vld [vmem:[%s26326_s15 + $0x5ac] sm:$0xf0]  ;;  %v15382_v9 = vld [vmem:[%s26326_s15 + $0x6a0] sm:$0xf] }
 0xa4f   :  { %10486 = vmatpush.bf16.msra.mxu3 %v14695_v31  ;;  %v15142_v31 = vld [vmem:[%s26326_s15 + $0x4c0] sm:$0xf]  ;;  %v15383_v47 = vor.u32 %v17322_v3, %v15382_v9  ;;  %v17254_v21 = vld [vmem:[%s26326_s15 + $0x48c] sm:$0xf0] }
 0xa50   :  { %10473 = vmatpush.bf16.msra.mxu2 %v14567_v4  ;;  %10499 = vmatpush.bf16.msra.mxu0 %v14823_v54  ;;  %v15159_v4 = vor.u32 %v17266_v19, %v15158_v62  ;;  %v23594_v54 = vpack.c.bf16 %v7761_v43, %v7761_v43  ;;  %v15143_v10 = vor.u32 %v17262_v8, %v15142_v31  ;;  %v15126_v43 = vld [vmem:[%s26326_s15 + $0x4a0] sm:$0xf]  ;;  %v7413_v40 = vpop.f32.mrf.mxu0  ;;  %v17318_v17 = vld [vmem:[%s26326_s15 + $0x68c] sm:$0xf0]  ;;  %v17668_v41 = vpop.eup %17667 }
 0xa51   :  { %10512 = vmatpush.bf16.msra.mxu1 %v14951_v22  ;;  %v15398_v22 = vld [vmem:[%s26326_s15 + $0x6c0] sm:$0xf]  ;;  %v7399_v19 = vadd.f32 %v7398_v13, %v4911_v53  ;;  %v15127_v5 = vor.u32 %v17258_v6, %v15126_v43  ;;  %v17350_v8 = vld [vmem:[%s26326_s15 + $0x78c] sm:$0xf0]  ;;  %v15367_v53 = vor.u32 %v17318_v17, %v15366_v29 }
 0xa52   :  { %v15222_v49 = vld [vmem:[%s26326_s15 + $0x560] sm:$0xf]  ;;  %v17346_v12 = vld [vmem:[%s26326_s15 + $0x76c] sm:$0xf0] }
 0xa53   :  { %10487 = vmatpush.bf16.msra.mxu3 %v14679_v34  ;;  %v7711_v34 = vmul.f32 0.7978846, %v7697_v50  ;;  %v15238_v50 = vld [vmem:[%s26326_s15 + $0x580] sm:$0xf]  ;;  %v7426_v31 = vpop.f32.mrf.mxu1  ;;  %v17246_v6 = vld [vmem:[%s26326_s15 + $0x44c] sm:$0xf0] }
 0xa54   :  { %10474 = vmatpush.bf16.msra.mxu2 %v14551_v56  ;;  %10500 = vmatpush.bf16.msra.mxu0 %v14807_v61  ;;  %v17326_v56 = vld [vmem:[%s26326_s15 + $0x6cc] sm:$0xf0]  ;;  %v7698_v61 = vadd.f32 %v7684_v39, %v23469_v32  ;;  %v15078_v43 = vld [vmem:[%s26326_s15 + $0x440] sm:$0xf] }
 0xa55   :  { %10513 = vmatpush.bf16.msra.mxu1 %v14935_v15  ;;  %v15399_v62 = vor.u32 %v17326_v56, %v15398_v22  ;;  %v15254_v15 = vld [vmem:[%s26326_s15 + $0x5a0] sm:$0xf]  ;;  %v17354_v39 = vld [vmem:[%s26326_s15 + $0x7ac] sm:$0xf0]  ;;  %17671 = vtanh.f32 %v7711_v34  ;;  %v7400_v46 = vpop.f32.mrf.mxu3 }
 0xa56   :  { %v7712_v63 = vmul.f32 0.7978846, %v7698_v61  ;;  %v15094_v22 = vld [vmem:[%s26326_s15 + $0x460] sm:$0xf]  ;;  %v17250_v56 = vld [vmem:[%s26326_s15 + $0x46c] sm:$0xf0] }
 0xa57   :  { %10488 = vmatpush.bf16.msra.mxu3 %v14663_v11  ;;  %v7437_v11 = vpop.f32.mrf.mxu2  ;;  %v15350_v34 = vld [vmem:[%s26326_s15 + $0x660] sm:$0xf]  ;;  %v17314_v61 = vld [vmem:[%s26326_s15 + $0x66c] sm:$0xf0]  ;;  %v15095_v1 = vor.u32 %v17250_v56, %v15094_v22 }
 0xa58   :  { %10475 = vmatpush.bf16.msra.mxu2 %v14535_v38  ;;  %10501 = vmatpush.bf16.msra.mxu0 %v14791_v59  ;;  %v7360_v38 = vadd.f32 %v23365_v55, %v7347_v58  ;;  %v15255_v59 = vor.u32 %v17290_v24, %v15254_v15  ;;  %v15110_v55 = vld [vmem:[%s26326_s15 + $0x480] sm:$0xf]  ;;  %17673 = vtanh.f32 %v7712_v63  ;;  %v17278_v9 = vld [vmem:[%s26326_s15 + $0x54c] sm:$0xf0]  ;;  %v7737_v63 = vadd.f32 1.0, %v17668_v41 }
 0xa59   :  { %10514 = vmatpush.bf16.msra.mxu1 %v14919_v7  ;;  %v17282_v7 = vld [vmem:[%s26326_s15 + $0x56c] sm:$0xf0]  ;;  %v15206_v15 = vld [vmem:[%s26326_s15 + $0x540] sm:$0xf] }
 0xa5a   :  { %10489 = vmatmul.bf16.vlgmr.msra.gmra.mxu3 %v23605_v51  ;;  %v7373_v27 = vadd.f32 %v23508_v44, %v7360_v38  ;;  %v15511_v44 = vor.u32 %v17354_v39, %v15510_v35  ;;  %v15334_v3 = vld [vmem:[%s26326_s15 + $0x640] sm:$0xf]  ;;  %v17310_v40 = vld [vmem:[%s26326_s15 + $0x64c] sm:$0xf0] }
 0xa5b   :  { %10533 = vmatpush.bf16.msrb.mxu3 %v15287_v28  ;;  %10476 = vmatmul.bf16.vlgmr.msra.gmra.mxu2 %v23594_v54  ;;  %v17286_v28 = vld [vmem:[%s26326_s15 + $0x58c] sm:$0xf0]  ;;  %v23734_v35 = vpop.f32.mrf.mxu1  ;;  %v15318_v31 = vld [vmem:[%s26326_s15 + $0x620] sm:$0xf] }
 0xa5c   :  { %10520 = vmatpush.bf16.msrb.mxu2 %v15159_v4  ;;  %10546 = vmatpush.bf16.msrb.mxu0 %v15415_v42  ;;  %v7412_v4 = vadd.f32 %v23576_v45, %v7399_v19  ;;  %v15111_v42 = vor.u32 %v17254_v21, %v15110_v55  ;;  %v15494_v45 = vld [vmem:[%s26326_s15 + $0x780] sm:$0xf]  ;;  %v15239_v14 = vor.u32 %v17286_v28, %v15238_v50  ;;  %v17274_v17 = vld [vmem:[%s26326_s15 + $0x52c] sm:$0xf0] }
 0xa5d   :  { %10502 = vmatmul.bf16.vlgmr.msra.gmra.mxu0 %v23608_v52  ;;  %10559 = vmatpush.bf16.msrb.mxu1 %v15543_v0  ;;  %v23694_v36 = vadd.f32 %v23401_v26, %v7373_v27  ;;  %v17670_v0 = vpop.eup %17669  ;;  %v15495_v26 = vor.u32 %v17350_v8, %v15494_v45  ;;  %v15207_v55 = vor.u32 %v17278_v9, %v15206_v15  ;;  %v15062_v50 = vld [vmem:[%s26326_s15 + $0x420] sm:$0xf]  ;;  %v17242_v27 = vld [vmem:[%s26326_s15 + $0x42c] sm:$0xf0] }
 0xa5e   :  { %10515 = vmatmul.bf16.vlgmr.msra.gmra.mxu1 %v23648_v30  ;;  %v7425_v58 = vadd.f32 %v23618_v37, %v7412_v4  ;;  %v15478_v37 = vld [vmem:[%s26326_s15 + $0x760] sm:$0xf]  ;;  %v7738_v38 = vadd.f32 1.0, %v17670_v0  ;;  %v15335_v21 = vor.u32 %v17310_v40, %v15334_v3  ;;  %v17338_v22 = vld [vmem:[%s26326_s15 + $0x72c] sm:$0xf0] }
 0xa5f   :  { %10534 = vmatpush.bf16.msrb.mxu3 %v15271_v23  ;;  %v7439_v13 = vpop.f32.mrf.mxu2  ;;  %v15223_v23 = vor.u32 %v17282_v7, %v15222_v49  ;;  %v7657_v19 = vmul.f32 %v23694_v36, %v23694_v36  ;;  %v15479_v39 = vor.u32 %v17346_v12, %v15478_v37  ;;  %v15190_v4 = vld [vmem:[%s26326_s15 + $0x520] sm:$0xf]  ;;  %v17238_v49 = vld [vmem:[%s26326_s15 + $0x40c] sm:$0xf0] }
 0xa60   :  { %10521 = vmatpush.bf16.msrb.mxu2 %v15143_v10  ;;  %10547 = vmatpush.bf16.msrb.mxu0 %v15399_v62  ;;  %v17672_v10 = vpop.eup %17671  ;;  %v15351_v62 = vor.u32 %v17314_v61, %v15350_v34  ;;  %v23723_v24 = vadd.f32 %v7437_v11, %v7425_v58  ;;  %v15079_v11 = vor.u32 %v17246_v6, %v15078_v43  ;;  %v7752_v45 = vmul.f32 0.5, %v7738_v38  ;;  %v15446_v41 = vld [vmem:[%s26326_s15 + $0x720] sm:$0xf]  ;;  %v17270_v61 = vld [vmem:[%s26326_s15 + $0x50c] sm:$0xf0] }
 0xa61   :  { %10560 = vmatpush.bf16.msrb.mxu1 %v15527_v48  ;;  %v7739_v48 = vadd.f32 1.0, %v17672_v10  ;;  %v7671_v28 = vmul.f32 %v7657_v19, %v23694_v36  ;;  %v15046_v56 = vld [vmem:[%s26326_s15 + $0x400] sm:$0xf]  ;;  %v15191_v58 = vor.u32 %v17274_v17, %v15190_v4  ;;  %v17394_v13 = vld [vmem:[%s26326_s15 + $0x8ec] sm:$0xf0]  ;;  %v15447_v19 = vor.u32 %v17338_v22, %v15446_v41 }
 0xa62   :  { %v7658_v29 = vmul.f32 %v23723_v24, %v23723_v24  ;;  %v15174_v34 = vld [vmem:[%s26326_s15 + $0x500] sm:$0xf]  ;;  %v7766_v43 = vmul.f32 %v7752_v45, %v22895_v18  ;;  %v17458_v3 = vld [vmem:[%s26326_s15 + $0xaec] sm:$0xf0] }
 0xa63   :  { %10535 = vmatpush.bf16.msrb.mxu3 %v15255_v59  ;;  %v15462_v59 = vld [vmem:[%s26326_s15 + $0x740] sm:$0xf]  ;;  %v7753_v46 = vmul.f32 0.5, %v7739_v48  ;;  %v7685_v10 = vmul.f32 0.044715, %v7671_v28  ;;  %v7491_v15 = vpop.f32.mrf.mxu1  ;;  %v15175_v40 = vor.u32 %v17270_v61, %v15174_v34 }
 0xa64   :  { %10522 = vmatpush.bf16.msrb.mxu2 %v15127_v5  ;;  %10548 = vmatpush.bf16.msrb.mxu0 %v15383_v47  ;;  %v17674_v5 = vpop.eup %17673  ;;  %v17342_v47 = vld [vmem:[%s26326_s15 + $0x74c] sm:$0xf0]  ;;  %v15302_v0 = vld [vmem:[%s26326_s15 + $0x600] sm:$0xf]  ;;  %v23836_v17 = vpack.c.bf16 %v7766_v43, %v7766_v43 }
 0xa65   :  { %10561 = vmatpush.bf16.msrb.mxu1 %v15511_v44  ;;  %v17306_v44 = vld [vmem:[%s26326_s15 + $0x62c] sm:$0xf0]  ;;  %v7740_v8 = vadd.f32 1.0, %v17674_v5  ;;  %v15670_v37 = vld [vmem:[%s26326_s15 + $0x8e0] sm:$0xf]  ;;  %v7767_v18 = vmul.f32 %v7753_v46, %v23093_v16 }
 0xa66   :  { %v15319_v7 = vor.u32 %v17306_v44, %v15318_v31  ;;  %v15926_v9 = vld [vmem:[%s26326_s15 + $0xae0] sm:$0xf]  ;;  %v17334_v48 = vld [vmem:[%s26326_s15 + $0x70c] sm:$0xf0] }
 0xa67   :  { %10536 = vmatpush.bf16.msrb.mxu3 %v15239_v14  ;;  %v15463_v14 = vor.u32 %v17342_v47, %v15462_v59  ;;  %v7754_v6 = vmul.f32 0.5, %v7740_v8  ;;  %v15430_v38 = vld [vmem:[%s26326_s15 + $0x700] sm:$0xf]  ;;  %v15671_v47 = vor.u32 %v17394_v13, %v15670_v37  ;;  %v17390_v16 = vld [vmem:[%s26326_s15 + $0x8cc] sm:$0xf0]  ;;  %v23848_v8 = vpack.c.bf16 %v7767_v18, %v7767_v18 }
 0xa68   :  { %10523 = vmatpush.bf16.msrb.mxu2 %v15111_v42  ;;  %10549 = vmatpush.bf16.msrb.mxu0 %v15367_v53  ;;  %v7751_v42 = vmul.f32 0.5, %v7737_v63  ;;  %v15063_v53 = vor.u32 %v17242_v27, %v15062_v50  ;;  %v15654_v5 = vld [vmem:[%s26326_s15 + $0x8c0] sm:$0xf]  ;;  %v15927_v50 = vor.u32 %v17458_v3, %v15926_v9  ;;  %v4912_v27 = vperm.slane %v23522_v60, 2  ;;  %v17422_v4 = vld [vmem:[%s26326_s15 + $0x9cc] sm:$0xf0] }
 0xa69   :  { %10562 = vmatpush.bf16.msrb.mxu1 %v15495_v26  ;;  %v7672_v26 = vmul.f32 %v7658_v29, %v23723_v24  ;;  %v15910_v28 = vld [vmem:[%s26326_s15 + $0xac0] sm:$0xf]  ;;  %v17454_v31 = vld [vmem:[%s26326_s15 + $0xacc] sm:$0xf0]  ;;  %v7768_v45 = vmul.f32 %v7754_v6, %v23469_v32  ;;  %v15431_v41 = vor.u32 %v17334_v48, %v15430_v38 }
 0xa6a   :  { %v7765_v12 = vmul.f32 %v7751_v42, %v22764_v57  ;;  %v15047_v57 = vor.u32 %v17238_v49, %v15046_v56  ;;  %v23819_v59 = vpop.f32.mrf.mxu0  ;;  %v16054_v44 = vld [vmem:[%s26326_s15 + $0xbe0] sm:$0xf]  ;;  %v17490_v42 = vld [vmem:[%s26326_s15 + $0xbec] sm:$0xf0] }
 0xa6b   :  { %10537 = vmatpush.bf16.msrb.mxu3 %v15223_v23  ;;  %v15798_v23 = vld [vmem:[%s26326_s15 + $0x9e0] sm:$0xf]  ;;  %v17386_v32 = vld [vmem:[%s26326_s15 + $0x8ac] sm:$0xf0]  ;;  %v16055_v34 = vor.u32 %v17490_v42, %v16054_v44  ;;  %v23878_v13 = vpack.c.bf16 %v7768_v45, %v7768_v45 }
 0xa6c   :  { %10524 = vmatpush.bf16.msrb.mxu2 %v15095_v1  ;;  %10550 = vmatpush.bf16.msrb.mxu0 %v15351_v62  ;;  %v17302_v1 = vld [vmem:[%s26326_s15 + $0x60c] sm:$0xf0]  ;;  %v23834_v29 = vpack.c.bf16 %v7765_v12, %v7765_v12  ;;  %v15638_v56 = vld [vmem:[%s26326_s15 + $0x8a0] sm:$0xf] }
 0xa6d   :  { %10563 = vmatpush.bf16.msrb.mxu1 %v15479_v39  ;;  %v17426_v62 = vld [vmem:[%s26326_s15 + $0x9ec] sm:$0xf0]  ;;  %v15303_v63 = vor.u32 %v17302_v1, %v15302_v0  ;;  %v7699_v39 = vadd.f32 %v7685_v10, %v23694_v36  ;;  %v15766_v61 = vld [vmem:[%s26326_s15 + $0x9a0] sm:$0xf]  ;;  %v15639_v6 = vor.u32 %v17386_v32, %v15638_v56 }
 0xa6e   :  { %v7450_v49 = vpop.f32.mrf.mxu2  ;;  %v17418_v0 = vld [vmem:[%s26326_s15 + $0x9ac] sm:$0xf0]  ;;  %v15894_v10 = vld [vmem:[%s26326_s15 + $0xaa0] sm:$0xf] }
 0xa6f   :  { %10538 = vmatpush.bf16.msrb.mxu3 %v15207_v55  ;;  %v15799_v55 = vor.u32 %v17426_v62, %v15798_v23  ;;  %v7713_v46 = vmul.f32 0.7978846, %v7699_v39  ;;  %v17450_v1 = vld [vmem:[%s26326_s15 + $0xaac] sm:$0xf0]  ;;  %v16038_v37 = vld [vmem:[%s26326_s15 + $0xbc0] sm:$0xf]  ;;  %v15767_v15 = vor.u32 %v17418_v0, %v15766_v61 }
 0xa70   :  { %10525 = vmatpush.bf16.msrb.mxu2 %v15079_v11  ;;  %10551 = vmatpush.bf16.msrb.mxu0 %v15335_v21  ;;  %v7686_v11 = vmul.f32 0.044715, %v7672_v26  ;;  %v15782_v21 = vld [vmem:[%s26326_s15 + $0x9c0] sm:$0xf]  ;;  %v7451_v26 = vadd.f32 %v7450_v49, %v4912_v27  ;;  %v17486_v12 = vld [vmem:[%s26326_s15 + $0xbcc] sm:$0xf0]  ;;  %v15895_v9 = vor.u32 %v17450_v1, %v15894_v10 }
 0xa71   :  { %10564 = vmatpush.bf16.msrb.mxu1 %v15463_v14  ;;  %v15783_v22 = vor.u32 %v17422_v4, %v15782_v21  ;;  %v16039_v3 = vor.u32 %v17486_v12, %v16038_v37  ;;  %v15878_v18 = vld [vmem:[%s26326_s15 + $0xa80] sm:$0xf]  ;;  %17675 = vtanh.f32 %v7713_v46  ;;  %v17446_v48 = vld [vmem:[%s26326_s15 + $0xa8c] sm:$0xf0] }
 0xa72   :  { %v7700_v14 = vadd.f32 %v7686_v11, %v23723_v24  ;;  %v7478_v43 = vpop.f32.mrf.mxu0  ;;  %v17482_v39 = vld [vmem:[%s26326_s15 + $0xbac] sm:$0xf0]  ;;  %v15879_v27 = vor.u32 %v17446_v48, %v15878_v18  ;;  %v16006_v45 = vld [vmem:[%s26326_s15 + $0xb80] sm:$0xf] }
 0xa73   :  { %10539 = vmatpush.bf16.msrb.mxu3 %v15191_v58  ;;  %v7463_v58 = vpop.f32.mrf.mxu3  ;;  %v17442_v42 = vld [vmem:[%s26326_s15 + $0xa6c] sm:$0xf0]  ;;  %v15590_v49 = vld [vmem:[%s26326_s15 + $0x840] sm:$0xf] }
 0xa74   :  { %10526 = vmatpush.bf16.msrb.mxu2 %v15063_v53  ;;  %10552 = vmatpush.bf16.msrb.mxu0 %v15319_v7  ;;  %v15655_v53 = vor.u32 %v17390_v16, %v15654_v5  ;;  %v15911_v7 = vor.u32 %v17454_v31, %v15910_v28  ;;  %v7714_v23 = vmul.f32 0.7978846, %v7700_v14  ;;  %v7464_v62 = vadd.f32 %v7463_v58, %v7451_v26  ;;  %v16022_v5 = vld [vmem:[%s26326_s15 + $0xba0] sm:$0xf]  ;;  %v17378_v16 = vld [vmem:[%s26326_s15 + $0x86c] sm:$0xf0] }
 0xa75   :  { %10565 = vmatpush.bf16.msrb.mxu1 %v15447_v19  ;;  %v15622_v19 = vld [vmem:[%s26326_s15 + $0x880] sm:$0xf]  ;;  %v16023_v4 = vor.u32 %v17482_v39, %v16022_v5  ;;  %v17410_v28 = vld [vmem:[%s26326_s15 + $0x96c] sm:$0xf0] }
 0xa76   :  { %v7477_v38 = vadd.f32 %v23819_v59, %v7464_v62  ;;  %17677 = vtanh.f32 %v7714_v23  ;;  %v7452_v21 = vpop.f32.mrf.mxu2  ;;  %v15862_v31 = vld [vmem:[%s26326_s15 + $0xa60] sm:$0xf]  ;;  %v17374_v58 = vld [vmem:[%s26326_s15 + $0x84c] sm:$0xf0] }
 0xa77   :  { %10540 = vmatpush.bf16.msrb.mxu3 %v15175_v40  ;;  %v15750_v40 = vld [vmem:[%s26326_s15 + $0x980] sm:$0xf]  ;;  %v17676_v46 = vpop.eup %17675  ;;  %v17406_v0 = vld [vmem:[%s26326_s15 + $0x94c] sm:$0xf0] }
 0xa78   :  { %10527 = vmatpush.bf16.msrb.mxu2 %v15047_v57  ;;  %10553 = vmatpush.bf16.msrb.mxu0 %v15303_v63  ;;  %v17382_v57 = vld [vmem:[%s26326_s15 + $0x88c] sm:$0xf0]  ;;  %v23907_v11 = vadd.f32 %v23734_v35, %v7477_v38  ;;  %v15734_v35 = vld [vmem:[%s26326_s15 + $0x960] sm:$0xf]  ;;  %v7741_v62 = vadd.f32 1.0, %v17676_v46 }
 0xa79   :  { %10566 = vmatpush.bf16.msrb.mxu1 %v15431_v41  ;;  %v17414_v63 = vld [vmem:[%s26326_s15 + $0x98c] sm:$0xf0]  ;;  %v15623_v59 = vor.u32 %v17382_v57, %v15622_v19  ;;  %v15735_v32 = vor.u32 %v17410_v28, %v15734_v35  ;;  %v15846_v10 = vld [vmem:[%s26326_s15 + $0xa40] sm:$0xf] }
 0xa7a   :  { %10541 = vmatmul.bf16.vlgmr.msrb.gmra.mxu3 %v23836_v17  ;;  %v7659_v44 = vmul.f32 %v23907_v11, %v23907_v11  ;;  %v17478_v41 = vld [vmem:[%s26326_s15 + $0xb8c] sm:$0xf0]  ;;  %v15990_v12 = vld [vmem:[%s26326_s15 + $0xb60] sm:$0xf] }
 0xa7b   :  { %10585 = vmatpush.bf16.msra.mxu3 %v15799_v55  ;;  %10528 = vmatmul.bf16.vlgmr.msrb.gmra.mxu2 %v23834_v29  ;;  %v15606_v55 = vld [vmem:[%s26326_s15 + $0x860] sm:$0xf]  ;;  %v16007_v61 = vor.u32 %v17478_v41, %v16006_v45  ;;  %v17438_v26 = vld [vmem:[%s26326_s15 + $0xa4c] sm:$0xf0] }
 0xa7c   :  { %10572 = vmatpush.bf16.msra.mxu2 %v15671_v47  ;;  %10598 = vmatpush.bf16.msra.mxu0 %v15927_v50  ;;  %v15751_v47 = vor.u32 %v17414_v63, %v15750_v40  ;;  %v7465_v50 = vpop.f32.mrf.mxu3  ;;  %v7673_v14 = vmul.f32 %v7659_v44, %v23907_v11  ;;  %v15607_v56 = vor.u32 %v17378_v16, %v15606_v55  ;;  %v17678_v1 = vpop.eup %17677  ;;  %v17474_v23 = vld [vmem:[%s26326_s15 + $0xb6c] sm:$0xf0]  ;;  %v15574_v43 = vld [vmem:[%s26326_s15 + $0x820] sm:$0xf] }
 0xa7d   :  { %10554 = vmatmul.bf16.vlgmr.msrb.gmra.mxu0 %v23848_v8  ;;  %10611 = vmatpush.bf16.msra.mxu1 %v16055_v34  ;;  %v15863_v34 = vor.u32 %v17442_v42, %v15862_v31  ;;  %v17370_v57 = vld [vmem:[%s26326_s15 + $0x82c] sm:$0xf0]  ;;  %v7742_v40 = vadd.f32 1.0, %v17678_v1  ;;  %v15847_v63 = vor.u32 %v17438_v26, %v15846_v10  ;;  %v15991_v18 = vor.u32 %v17474_v23, %v15990_v12  ;;  %v15830_v38 = vld [vmem:[%s26326_s15 + $0xa20] sm:$0xf] }
 0xa7e   :  { %10567 = vmatmul.bf16.vlgmr.msrb.gmra.mxu1 %v23878_v13  ;;  %v7687_v37 = vmul.f32 0.044715, %v7673_v14  ;;  %v17434_v48 = vld [vmem:[%s26326_s15 + $0xa2c] sm:$0xf0]  ;;  %v15974_v39 = vld [vmem:[%s26326_s15 + $0xb40] sm:$0xf] }
 0xa7f   :  { %10586 = vmatpush.bf16.msra.mxu3 %v15783_v22  ;;  %v23938_v22 = vpop.f32.mrf.mxu0  ;;  %v15558_v55 = vld [vmem:[%s26326_s15 + $0x800] sm:$0xf]  ;;  %v17366_v35 = vld [vmem:[%s26326_s15 + $0x80c] sm:$0xf0]  ;;  %v7756_v44 = vmul.f32 0.5, %v7742_v40  ;;  %v15831_v42 = vor.u32 %v17434_v48, %v15830_v38 }
 0xa80   :  { %10573 = vmatpush.bf16.msra.mxu2 %v15655_v53  ;;  %10599 = vmatpush.bf16.msra.mxu0 %v15911_v7  ;;  %v23936_v53 = vpop.f32.mrf.mxu1  ;;  %v15718_v7 = vld [vmem:[%s26326_s15 + $0x940] sm:$0xf]  ;;  %v17398_v31 = vld [vmem:[%s26326_s15 + $0x90c] sm:$0xf0] }
 0xa81   :  { %10612 = vmatpush.bf16.msra.mxu1 %v16039_v3  ;;  %v15719_v19 = vor.u32 %v17406_v0, %v15718_v7  ;;  %v17402_v3 = vld [vmem:[%s26326_s15 + $0x92c] sm:$0xf0]  ;;  %v23995_v16 = vld [vmem:[%s26326_s15 + $0xdc0] sm:$0x33]  ;;  %v14648_v7 = vld [vmem:[%s26326_s15 + $0xf0] sm:$0xf0]  ;;  %v15559_v0 = vor.u32 %v17366_v35, %v15558_v55  ;;  %v7770_v1 = vmul.f32 %v7756_v44, %v23723_v24 }
 0xa82   :  { %v15686_v28 = vld [vmem:[%s26326_s15 + $0x900] sm:$0xf]  ;;  %v17430_v46 = vld [vmem:[%s26326_s15 + $0xa0c] sm:$0xf0]  ;;  %v9563_v14 = vunpack.c.l.b16 %v23995_v16  ;;  %v17132_v24 = vld [vmem:[%s26326_s15 + $0xc4] sm:$0xf] }
 0xa83   :  { %10587 = vmatpush.bf16.msra.mxu3 %v15767_v15  ;;  %v15591_v15 = vor.u32 %v17374_v58, %v15590_v49  ;;  %v15814_v41 = vld [vmem:[%s26326_s15 + $0xa00] sm:$0xf]  ;;  %v17466_v49 = vld [vmem:[%s26326_s15 + $0xb2c] sm:$0xf0]  ;;  %v15687_v10 = vor.u32 %v17398_v31, %v15686_v28  ;;  %v24060_v38 = vpack.c.bf16 %v7770_v1, %v7770_v1  ;;  %v14616_v35 = vld [vmem:[%s26326_s15 + $0xb0] sm:$0xf0] }
 0xa84   :  { %10574 = vmatpush.bf16.msra.mxu2 %v15639_v6  ;;  %10600 = vmatpush.bf16.msra.mxu0 %v15895_v9  ;;  %v7701_v6 = vadd.f32 %v7687_v37, %v23907_v11  ;;  %v15702_v9 = vld [vmem:[%s26326_s15 + $0x920] sm:$0xf]  ;;  %v15815_v26 = vor.u32 %v17430_v46, %v15814_v41  ;;  %v17462_v23 = vld [vmem:[%s26326_s15 + $0xb0c] sm:$0xf0]  ;;  %v17164_v44 = vld [vmem:[%s26326_s15 + $0x1c4] sm:$0xf] }
 0xa85   :  { %10613 = vmatpush.bf16.msra.mxu1 %v16023_v4  ;;  %v15703_v4 = vor.u32 %v17402_v3, %v15702_v9  ;;  %v15942_v12 = vld [vmem:[%s26326_s15 + $0xb00] sm:$0xf]  ;;  %v17514_v41 = vld [vmem:[%s26326_s15 + $0xcac] sm:$0xf0] }
 0xa86   :  { %v7715_v5 = vmul.f32 0.7978846, %v7701_v6  ;;  %v15943_v40 = vor.u32 %v17462_v23, %v15942_v12  ;;  %v17510_v1 = vld [vmem:[%s26326_s15 + $0xc8c] sm:$0xf0]  ;;  %v16246_v12 = vld [vmem:[%s26326_s15 + $0xd60] sm:$0xf] }
 0xa87   :  { %10588 = vmatpush.bf16.msra.mxu3 %v15751_v47  ;;  %v7755_v47 = vmul.f32 0.5, %v7741_v62  ;;  %v7543_v50 = vpop.f32.mrf.mxu0  ;;  %v10007_v62 = vpack.c.b16 %v9563_v14, %v9563_v14  ;;  %v17538_v23 = vld [vmem:[%s26326_s15 + $0xd6c] sm:$0xf0] }
 0xa88   :  { %10575 = vmatpush.bf16.msra.mxu2 %v15623_v59  ;;  %10601 = vmatpush.bf16.msra.mxu0 %v15879_v27  ;;  %v17470_v59 = vld [vmem:[%s26326_s15 + $0xb4c] sm:$0xf0]  ;;  %17679 = vtanh.f32 %v7715_v5  ;;  %v7504_v21 = vpop.f32.mrf.mxu1  ;;  %v15575_v27 = vor.u32 %v17370_v57, %v15574_v43  ;;  %v14776_v57 = vld [vmem:[%s26326_s15 + $0x1f0] sm:$0xf0] }
 0xa89   :  { %10614 = vmatpush.bf16.msra.mxu1 %v16007_v61  ;;  %v15975_v45 = vor.u32 %v17470_v59, %v15974_v39  ;;  %v7769_v58 = vmul.f32 %v7755_v47, %v23694_v36  ;;  %v17522_v61 = vld [vmem:[%s26326_s15 + $0xcec] sm:$0xf0]  ;;  %v4913_v36 = vperm.slane %v23522_v60, 3  ;;  %v14632_v60 = vld [vmem:[%s26326_s15 + $0xd0] sm:$0xf0]  ;;  %v10457_v39 = vsel %vm10455_vm2, %v10007_v62, 0 }
 0xa8a   :  { %v16278_v59 = vld [vmem:[%s26326_s15 + $0xda0] sm:$0xf]  ;;  %v17546_v47 = vld [vmem:[%s26326_s15 + $0xdac] sm:$0xf0]  ;;  %v14635_v21 = vor.u32 %v17132_v24, %v14632_v60  ;;  %v17120_v60 = vld [vmem:[%s26326_s15 + $0x64] sm:$0xf] }
 0xa8b   :  { %10589 = vmatpush.bf16.msra.mxu3 %v15735_v32  ;;  %v15958_v32 = vld [vmem:[%s26326_s15 + $0xb20] sm:$0xf]  ;;  %v24052_v3 = vpack.c.bf16 %v7769_v58, %v7769_v58  ;;  %v7503_v48 = vadd.f32 %v23936_v53, %v4913_v36  ;;  %v17128_v53 = vld [vmem:[%s26326_s15 + $0xa4] sm:$0xf]  ;;  %v16279_v46 = vor.u32 %v17546_v47, %v16278_v59 }
 0xa8c   :  { %10576 = vmatpush.bf16.msra.mxu2 %v15607_v56  ;;  %10602 = vmatpush.bf16.msra.mxu0 %v15863_v34  ;;  %v17136_v56 = vld [vmem:[%s26326_s15 + $0xe4] sm:$0xf]  ;;  %v16182_v34 = vld [vmem:[%s26326_s15 + $0xce0] sm:$0xf]  ;;  %v15959_v37 = vor.u32 %v17466_v49, %v15958_v32  ;;  %v17542_v32 = vld [vmem:[%s26326_s15 + $0xd8c] sm:$0xf0]  ;;  %v14619_v49 = vor.u32 %v17128_v53, %v14616_v35 }
 0xa8d   :  { %10615 = vmatpush.bf16.msra.mxu1 %v15991_v18  ;;  %v14651_v6 = vor.u32 %v17136_v56, %v14648_v7  ;;  %v17518_v18 = vld [vmem:[%s26326_s15 + $0xccc] sm:$0xf0]  ;;  %v16262_v56 = vld [vmem:[%s26326_s15 + $0xd80] sm:$0xf]  ;;  %v17124_v7 = vld [vmem:[%s26326_s15 + $0x84] sm:$0xf] }
 0xa8e   :  { %v17680_v43 = vpop.eup %17679  ;;  %v7515_v55 = vpop.f32.mrf.mxu2  ;;  %v16263_v36 = vor.u32 %v17542_v32, %v16262_v56  ;;  %v16230_v47 = vld [vmem:[%s26326_s15 + $0xd40] sm:$0xf]  ;;  %v17116_v53 = vld [vmem:[%s26326_s15 + $0x44] sm:$0xf] }
 0xa8f   :  { %10590 = vmatpush.bf16.msra.mxu3 %v15719_v19  ;;  %v17168_v19 = vld [vmem:[%s26326_s15 + $0x1e4] sm:$0xf]  ;;  %v7743_v9 = vadd.f32 1.0, %v17680_v43 }
 0xa90   :  { %10577 = vmatpush.bf16.msra.mxu2 %v15591_v15  ;;  %10603 = vmatpush.bf16.msra.mxu0 %v15847_v63  ;;  %v16183_v15 = vor.u32 %v17522_v61, %v16182_v34  ;;  %v16166_v63 = vld [vmem:[%s26326_s15 + $0xcc0] sm:$0xf]  ;;  %v14779_v50 = vor.u32 %v17168_v19, %v14776_v57  ;;  %v14600_v61 = vld [vmem:[%s26326_s15 + $0x90] sm:$0xf0] }
 0xa91   :  { %10616 = vmatpush.bf16.msra.mxu1 %v15975_v45  ;;  %v7757_v5 = vmul.f32 0.5, %v7743_v9  ;;  %v16167_v31 = vor.u32 %v17518_v18, %v16166_v63  ;;  %v16150_v45 = vld [vmem:[%s26326_s15 + $0xca0] sm:$0xf]  ;;  %v14584_v57 = vld [vmem:[%s26326_s15 + $0x70] sm:$0xf0] }
 0xa92   :  { %v14728_v63 = vld [vmem:[%s26326_s15 + $0x190] sm:$0xf0]  ;;  %v16118_v18 = vld [vmem:[%s26326_s15 + $0xc60] sm:$0xf] }
 0xa93   :  { %10591 = vmatpush.bf16.msra.mxu3 %v15703_v4  ;;  %v7528_v4 = vpop.f32.mrf.mxu3  ;;  %v7771_v28 = vmul.f32 %v7757_v5, %v23907_v11  ;;  %v16247_v5 = vor.u32 %v17538_v23, %v16246_v12 }
 0xa94   :  { %10578 = vmatpush.bf16.msra.mxu2 %v15575_v27  ;;  %10604 = vmatpush.bf16.msra.mxu0 %v15831_v42  ;;  %v7516_v27 = vadd.f32 %v7515_v55, %v7503_v48  ;;  %v14760_v42 = vld [vmem:[%s26326_s15 + $0x1d0] sm:$0xf0]  ;;  %v17506_v48 = vld [vmem:[%s26326_s15 + $0xc6c] sm:$0xf0] }
 0xa95   :  { %10617 = vmatpush.bf16.msra.mxu1 %v15959_v37  ;;  %v24091_v14 = vpack.c.bf16 %v7771_v28, %v7771_v28  ;;  %v14763_v58 = vor.u32 %v17164_v44, %v14760_v42  ;;  %v17534_v55 = vld [vmem:[%s26326_s15 + $0xd4c] sm:$0xf0]  ;;  %v16119_v35 = vor.u32 %v17506_v48, %v16118_v18  ;;  %v17152_v28 = vld [vmem:[%s26326_s15 + $0x164] sm:$0xf]  ;;  %v16102_v44 = vld [vmem:[%s26326_s15 + $0xc40] sm:$0xf] }
 0xa96   :  { %v7529_v11 = vadd.f32 %v7528_v4, %v7516_v27  ;;  %v7517_v43 = vpop.f32.mrf.mxu2  ;;  %v14568_v4 = vld [vmem:[%s26326_s15 + $0x50] sm:$0xf0]  ;;  %v17502_v42 = vld [vmem:[%s26326_s15 + $0xc4c] sm:$0xf0]  ;;  %v17144_v18 = vld [vmem:[%s26326_s15 + $0x124] sm:$0xf] }
 0xa97   :  { %10592 = vmatpush.bf16.msra.mxu3 %v15687_v10  ;;  %v17160_v10 = vld [vmem:[%s26326_s15 + $0x1a4] sm:$0xf]  ;;  %v14571_v32 = vor.u32 %v17116_v53, %v14568_v4  ;;  %v14680_v48 = vld [vmem:[%s26326_s15 + $0x130] sm:$0xf0] }
 0xa98   :  { %10579 = vmatpush.bf16.msra.mxu2 %v15559_v0  ;;  %10605 = vmatpush.bf16.msra.mxu0 %v15815_v26  ;;  %v24103_v34 = vadd.f32 %v23938_v22, %v7529_v11  ;;  %v16151_v0 = vor.u32 %v17514_v41, %v16150_v45  ;;  %v14744_v26 = vld [vmem:[%s26326_s15 + $0x1b0] sm:$0xf0]  ;;  %v16134_v22 = vld [vmem:[%s26326_s15 + $0xc80] sm:$0xf]  ;;  %v24129_v62 = vpop.f32.mrf.mxu0  ;;  %v16231_v45 = vor.u32 %v17534_v55, %v16230_v47  ;;  %v17530_v11 = vld [vmem:[%s26326_s15 + $0xd2c] sm:$0xf0] }
 0xa99   :  { %10618 = vmatpush.bf16.msra.mxu1 %v15943_v40  ;;  %v14747_v24 = vor.u32 %v17160_v10, %v14744_v26  ;;  %v16135_v9 = vor.u32 %v17510_v1, %v16134_v22  ;;  %v17156_v40 = vld [vmem:[%s26326_s15 + $0x184] sm:$0xf]  ;;  %v14696_v10 = vld [vmem:[%s26326_s15 + $0x150] sm:$0xf0]  ;;  %v24198_v26 = vld [vmem:[%s26325_s14 + $0x8] sm:$0x3f] }
 0xa9a   :  { %10593 = vmatmul.bf16.vlgmr.msra.gmra.mxu3 %v24060_v38  ;;  %v7660_v37 = vmul.f32 %v24103_v34, %v24103_v34  ;;  %v4914_v22 = vperm.slane %v24198_v26, 4  ;;  %v17108_v43 = vld [vmem:[%s26326_s15 + $0x4] sm:$0xf]  ;;  %v17494_v47 = vld [vmem:[%s26326_s15 + $0xc0c] sm:$0xf0] }
 0xa9b   :  { %10580 = vmatmul.bf16.vlgmr.msra.gmra.mxu2 %v24052_v3  ;;  %10638 = vmatpush.bf16.msrb.mxu3 %v10457_v39  ;;  %v7530_v19 = vpop.f32.mrf.mxu3  ;;  %v24150_v59 = vpop.f32.mrf.mxu1  ;;  %v15032_v53 = vld [vmem:[%s26326_s15 + $0x3f0] sm:$0xf0] }
 0xa9c   :  { %10650 = vmatpush.bf16.msrb.mxu0 %v14651_v6  ;;  %10624 = vmatpush.bf16.msrb.mxu2 %v16183_v15  ;;  %v14603_v6 = vor.u32 %v17124_v7, %v14600_v61  ;;  %v7674_v15 = vmul.f32 %v7660_v37, %v24103_v34  ;;  %v14552_v7 = vld [vmem:[%s26326_s15 + $0x30] sm:$0xf0]  ;;  %v16103_v61 = vor.u32 %v17502_v42, %v16102_v44  ;;  %v17498_v37 = vld [vmem:[%s26326_s15 + $0xc2c] sm:$0xf0] }
 0xa9d   :  { %10663 = vmatpush.bf16.msrb.mxu1 %v14779_v50  ;;  %10606 = vmatmul.bf16.vlgmr.msra.gmra.mxu0 %v24091_v14  ;;  %v14731_v50 = vor.u32 %v17156_v40, %v14728_v63  ;;  %v14536_v19 = vld [vmem:[%s26326_s15 + $0x10] sm:$0xf0]  ;;  %v17264_v63 = vld [vmem:[%s26326_s15 + $0x4e4] sm:$0xf]  ;;  %v7555_v42 = vadd.f32 %v24129_v62, %v4914_v22 }
 0xa9e   :  { %v7688_v39 = vmul.f32 0.044715, %v7674_v15  ;;  %v14888_v44 = vld [vmem:[%s26326_s15 + $0x2d0] sm:$0xf0] }
 0xa9f   :  { %10639 = vmatpush.bf16.msrb.mxu3 %v16279_v46  ;;  %v16214_v46 = vld [vmem:[%s26326_s15 + $0xd20] sm:$0xf]  ;;  %v15144_v62 = vld [vmem:[%s26326_s15 + $0x4d0] sm:$0xf0] }
 0xaa0   :  { %10651 = vmatpush.bf16.msrb.mxu0 %v14635_v21  ;;  %10625 = vmatpush.bf16.msrb.mxu2 %v16167_v31  ;;  %v14587_v21 = vor.u32 %v17120_v60, %v14584_v57  ;;  %v7702_v27 = vadd.f32 %v7688_v39, %v24103_v34  ;;  %v14712_v31 = vld [vmem:[%s26326_s15 + $0x170] sm:$0xf0]  ;;  %v7556_v56 = vpop.f32.mrf.mxu0  ;;  %v16215_v12 = vor.u32 %v17530_v11, %v16214_v46  ;;  %v17200_v57 = vld [vmem:[%s26326_s15 + $0x2e4] sm:$0xf]  ;;  %v16070_v39 = vld [vmem:[%s26326_s15 + $0xc00] sm:$0xf] }
 0xaa1   :  { %10664 = vmatpush.bf16.msrb.mxu1 %v14763_v58  ;;  %v17112_v58 = vld [vmem:[%s26326_s15 + $0x24] sm:$0xf]  ;;  %v14664_v56 = vld [vmem:[%s26326_s15 + $0x110] sm:$0xf0] }
 0xaa2   :  { %v7716_v41 = vmul.f32 0.7978846, %v7702_v27  ;;  %v14555_v60 = vor.u32 %v17112_v58, %v14552_v7  ;;  %v17260_v46 = vld [vmem:[%s26326_s15 + $0x4c4] sm:$0xf] }
 0xaa3   :  { %10640 = vmatpush.bf16.msrb.mxu3 %v16263_v36  ;;  %v24201_v1 = vpop.f32.mrf.mxu3  ;;  %v16086_v36 = vld [vmem:[%s26326_s15 + $0xc20] sm:$0xf]  ;;  %v7569_v23 = vpop.f32.mrf.mxu1  ;;  %v17140_v11 = vld [vmem:[%s26326_s15 + $0x104] sm:$0xf] }
 0xaa4   :  { %10652 = vmatpush.bf16.msrb.mxu0 %v14619_v49  ;;  %10626 = vmatpush.bf16.msrb.mxu2 %v16151_v0  ;;  %v14715_v49 = vor.u32 %v17152_v28, %v14712_v31  ;;  %17681 = vtanh.f32 %v7716_v41  ;;  %v17148_v0 = vld [vmem:[%s26326_s15 + $0x144] sm:$0xf]  ;;  %v16087_v40 = vor.u32 %v17498_v37, %v16086_v36  ;;  %v14683_v28 = vor.u32 %v17144_v18, %v14680_v48  ;;  %v14872_v23 = vld [vmem:[%s26326_s15 + $0x2b0] sm:$0xf0] }
 0xaa5   :  { %10665 = vmatpush.bf16.msrb.mxu1 %v14747_v24  ;;  %v17526_v24 = vld [vmem:[%s26326_s15 + $0xd0c] sm:$0xf0]  ;;  %v14699_v15 = vor.u32 %v17148_v0, %v14696_v10  ;;  %v17196_v31 = vld [vmem:[%s26326_s15 + $0x2c4] sm:$0xf]  ;;  %v16071_v41 = vor.u32 %v17494_v47, %v16070_v39  ;;  %v15016_v10 = vld [vmem:[%s26326_s15 + $0x3d0] sm:$0xf0]  ;;  %v14667_v37 = vor.u32 %v17140_v11, %v14664_v56 }
 0xaa6   :  { %v17296_v7 = vld [vmem:[%s26326_s15 + $0x5e4] sm:$0xf]  ;;  %v14891_v22 = vor.u32 %v17196_v31, %v14888_v44  ;;  %v15000_v18 = vld [vmem:[%s26326_s15 + $0x3b0] sm:$0xf0] }
 0xaa7   :  { %10641 = vmatpush.bf16.msrb.mxu3 %v16247_v5  ;;  %v15160_v5 = vld [vmem:[%s26326_s15 + $0x4f0] sm:$0xf0]  ;;  %v17228_v0 = vld [vmem:[%s26326_s15 + $0x3c4] sm:$0xf] }
 0xaa8   :  { %10653 = vmatpush.bf16.msrb.mxu0 %v14603_v6  ;;  %10627 = vmatpush.bf16.msrb.mxu2 %v16135_v9  ;;  %v16198_v6 = vld [vmem:[%s26326_s15 + $0xd00] sm:$0xf]  ;;  %v14904_v9 = vld [vmem:[%s26326_s15 + $0x2f0] sm:$0xf0]  ;;  %v17248_v56 = vld [vmem:[%s26326_s15 + $0x464] sm:$0xf] }
 0xaa9   :  { %10666 = vmatpush.bf16.msrb.mxu1 %v14731_v50  ;;  %v16199_v55 = vor.u32 %v17526_v24, %v16198_v6  ;;  %v17232_v50 = vld [vmem:[%s26326_s15 + $0x3e4] sm:$0xf]  ;;  %v14907_v27 = vor.u32 %v17200_v57, %v14904_v9  ;;  %v15147_v6 = vor.u32 %v17260_v46, %v15144_v62  ;;  %v15019_v57 = vor.u32 %v17228_v0, %v15016_v10  ;;  %v14856_v39 = vld [vmem:[%s26326_s15 + $0x290] sm:$0xf0] }
 0xaaa   :  { %v15035_v58 = vor.u32 %v17232_v50, %v15032_v53  ;;  %v17252_v50 = vld [vmem:[%s26326_s15 + $0x484] sm:$0xf]  ;;  %v15112_v53 = vld [vmem:[%s26326_s15 + $0x490] sm:$0xf0] }
 0xaab   :  { %10642 = vmatpush.bf16.msrb.mxu3 %v16231_v45  ;;  %v15163_v45 = vor.u32 %v17264_v63, %v15160_v5  ;;  %v17224_v63 = vld [vmem:[%s26326_s15 + $0x3a4] sm:$0xf]  ;;  %v14984_v31 = vld [vmem:[%s26326_s15 + $0x390] sm:$0xf0]  ;;  %v15115_v11 = vor.u32 %v17252_v50, %v15112_v53 }
 0xaac   :  { %10654 = vmatpush.bf16.msrb.mxu0 %v14587_v21  ;;  %10628 = vmatpush.bf16.msrb.mxu2 %v16119_v35  ;;  %v17682_v21 = vpop.eup %17681  ;;  %v14539_v35 = vor.u32 %v17108_v43, %v14536_v19  ;;  %v7568_v43 = vadd.f32 %v24150_v59, %v7555_v42  ;;  %v15128_v19 = vld [vmem:[%s26326_s15 + $0x4b0] sm:$0xf0]  ;;  %v17292_v59 = vld [vmem:[%s26326_s15 + $0x5c4] sm:$0xf] }
 0xaad   :  { %10667 = vmatpush.bf16.msrb.mxu1 %v14715_v49  ;;  %v7744_v4 = vadd.f32 1.0, %v17682_v21  ;;  %v7595_v49 = vpop.f32.mrf.mxu3  ;;  %v17188_v5 = vld [vmem:[%s26326_s15 + $0x284] sm:$0xf]  ;;  %v15096_v62 = vld [vmem:[%s26326_s15 + $0x470] sm:$0xf0] }
 0xaae   :  { %v14859_v44 = vor.u32 %v17188_v5, %v14856_v39  ;;  %v17184_v42 = vld [vmem:[%s26326_s15 + $0x264] sm:$0xf]  ;;  %v14808_v39 = vld [vmem:[%s26326_s15 + $0x230] sm:$0xf0] }
 0xaaf   :  { %10643 = vmatpush.bf16.msrb.mxu3 %v16215_v12  ;;  %v17192_v12 = vld [vmem:[%s26326_s15 + $0x2a4] sm:$0xf] }
 0xab0   :  { %10655 = vmatpush.bf16.msrb.mxu0 %v14571_v32  ;;  %10629 = vmatpush.bf16.msrb.mxu2 %v16103_v61  ;;  %v7758_v32 = vmul.f32 0.5, %v7744_v4  ;;  %v15288_v61 = vld [vmem:[%s26326_s15 + $0x5f0] sm:$0xf0]  ;;  %v14875_v48 = vor.u32 %v17192_v12, %v14872_v23  ;;  %v17216_v10 = vld [vmem:[%s26326_s15 + $0x364] sm:$0xf] }
 0xab1   :  { %10668 = vmatpush.bf16.msrb.mxu1 %v14699_v15  ;;  %v17256_v15 = vld [vmem:[%s26326_s15 + $0x4a4] sm:$0xf]  ;;  %v14824_v12 = vld [vmem:[%s26326_s15 + $0x250] sm:$0xf0] }
 0xab2   :  { %v7772_v36 = vmul.f32 %v7758_v32, %v24103_v34  ;;  %v15291_v34 = vor.u32 %v17296_v7, %v15288_v61  ;;  %v17284_v7 = vld [vmem:[%s26326_s15 + $0x584] sm:$0xf]  ;;  %v15240_v61 = vld [vmem:[%s26326_s15 + $0x590] sm:$0xf0] }
 0xab3   :  { %10644 = vmatpush.bf16.msrb.mxu3 %v16199_v55  ;;  %v15131_v55 = vor.u32 %v17256_v15, %v15128_v19  ;;  %v15243_v15 = vor.u32 %v17284_v7, %v15240_v61  ;;  %v15080_v19 = vld [vmem:[%s26326_s15 + $0x450] sm:$0xf0]  ;;  %v17176_v5 = vld [vmem:[%s26326_s15 + $0x224] sm:$0xf] }
 0xab4   :  { %10656 = vmatpush.bf16.msrb.mxu0 %v14555_v60  ;;  %10630 = vmatpush.bf16.msrb.mxu2 %v16087_v40  ;;  %v24290_v24 = vpack.c.bf16 %v7772_v36, %v7772_v36  ;;  %v7580_v60 = vpop.f32.mrf.mxu2  ;;  %v15272_v40 = vld [vmem:[%s26326_s15 + $0x5d0] sm:$0xf0] }
 0xab5   :  { %10669 = vmatpush.bf16.msrb.mxu1 %v14683_v28  ;;  %v7581_v9 = vadd.f32 %v7580_v60, %v7568_v43  ;;  %v15275_v21 = vor.u32 %v17292_v59, %v15272_v40  ;;  %v17220_v28 = vld [vmem:[%s26326_s15 + $0x384] sm:$0xf]  ;;  %v4915_v60 = vperm.slane %v24198_v26, 5  ;;  %v15224_v26 = vld [vmem:[%s26326_s15 + $0x570] sm:$0xf0] }
 0xab6   :  { %10619 = vmatmul.bf16.vlgmr.msra.gmra.mxu1 %v24290_v24  ;;  %v17280_v59 = vld [vmem:[%s26326_s15 + $0x564] sm:$0xf]  ;;  %v15048_v7 = vld [vmem:[%s26326_s15 + $0x410] sm:$0xf0] }
 0xab7   :  { %10676 = vmatpush.bf16.msra.mxu3 %v14907_v27  ;;  %v24318_v47 = vadd.f32 %v24201_v1, %v7581_v9  ;;  %v15003_v27 = vor.u32 %v17224_v63, %v15000_v18  ;;  %v17288_v1 = vld [vmem:[%s26326_s15 + $0x5a4] sm:$0xf]  ;;  %v14952_v63 = vld [vmem:[%s26326_s15 + $0x350] sm:$0xf0]  ;;  %v15227_v53 = vor.u32 %v17280_v59, %v15224_v26 }
 0xab8   :  { %10657 = vmatpush.bf16.msrb.mxu0 %v14539_v35  ;;  %10631 = vmatpush.bf16.msrb.mxu2 %v16071_v41  ;;  %v15256_v35 = vld [vmem:[%s26326_s15 + $0x5b0] sm:$0xf0]  ;;  %v7619_v46 = vpop.f32.mrf.mxu0  ;;  %v17212_v40 = vld [vmem:[%s26326_s15 + $0x344] sm:$0xf] }
 0xab9   :  { %10670 = vmatpush.bf16.msrb.mxu1 %v14667_v37  ;;  %v7661_v4 = vmul.f32 %v24318_v47, %v24318_v47  ;;  %v15259_v49 = vor.u32 %v17288_v1, %v15256_v35  ;;  %v17180_v37 = vld [vmem:[%s26326_s15 + $0x244] sm:$0xf]  ;;  %v15064_v1 = vld [vmem:[%s26326_s15 + $0x430] sm:$0xf0] }
 0xaba   :  { %v14827_v18 = vor.u32 %v17180_v37, %v14824_v12  ;;  %v17276_v35 = vld [vmem:[%s26326_s15 + $0x544] sm:$0xf]  ;;  %v15192_v12 = vld [vmem:[%s26326_s15 + $0x530] sm:$0xf0] }
 0xabb   :  { %10658 = vmatmul.bf16.vlgmr.msrb.gmra.mxu0 %v23594_v54  ;;  %10677 = vmatpush.bf16.msra.mxu3 %v14891_v22  ;;  %v7675_v41 = vmul.f32 %v7661_v4, %v24318_v47  ;;  %v14968_v22 = vld [vmem:[%s26326_s15 + $0x370] sm:$0xf0]  ;;  %v7632_v43 = vpop.f32.mrf.mxu1  ;;  %v14955_v4 = vor.u32 %v17212_v40, %v14952_v63  ;;  %v17272_v37 = vld [vmem:[%s26326_s15 + $0x524] sm:$0xf] }
 0xabc   :  { %10702 = vmatpush.bf16.msra.mxu0 %v15163_v45  ;;  %10689 = vmatpush.bf16.msra.mxu2 %v15035_v58  ;;  %v14840_v45 = vld [vmem:[%s26326_s15 + $0x270] sm:$0xf0]  ;;  %v7582_v32 = vpop.f32.mrf.mxu2  ;;  %v14987_v58 = vor.u32 %v17220_v28, %v14984_v31  ;;  %v17360_v40 = vld [vmem:[%s26326_s15 + $0x7e4] sm:$0xf] }
 0xabd   :  { %10715 = vmatpush.bf16.msra.mxu1 %v15291_v34  ;;  %v7689_v0 = vmul.f32 0.044715, %v7675_v41  ;;  %v14843_v36 = vor.u32 %v17184_v42, %v14840_v45  ;;  %v17244_v34 = vld [vmem:[%s26326_s15 + $0x444] sm:$0xf]  ;;  %v14936_v45 = vld [vmem:[%s26326_s15 + $0x330] sm:$0xf0]  ;;  %v14811_v41 = vor.u32 %v17176_v5, %v14808_v39 }
 0xabe   :  { %v15083_v50 = vor.u32 %v17244_v34, %v15080_v19  ;;  %v17208_v42 = vld [vmem:[%s26326_s15 + $0x324] sm:$0xf]  ;;  %v14920_v34 = vld [vmem:[%s26326_s15 + $0x310] sm:$0xf0] }
 0xabf   :  { %10678 = vmatpush.bf16.msra.mxu3 %v14875_v48  ;;  %v7703_v23 = vadd.f32 %v7689_v0, %v24318_v47  ;;  %v7606_v48 = vpop.f32.mrf.mxu3  ;;  %v14939_v61 = vor.u32 %v17208_v42, %v14936_v45  ;;  %v17392_v0 = vld [vmem:[%s26326_s15 + $0x8e4] sm:$0xf]  ;;  %v15544_v63 = vld [vmem:[%s26326_s15 + $0x7f0] sm:$0xf0] }
 0xac0   :  { %10703 = vmatpush.bf16.msra.mxu0 %v15147_v6  ;;  %10690 = vmatpush.bf16.msra.mxu2 %v15019_v57  ;;  %v15099_v6 = vor.u32 %v17248_v56, %v15096_v62  ;;  %v14971_v57 = vor.u32 %v17216_v10, %v14968_v22  ;;  %v15656_v39 = vld [vmem:[%s26326_s15 + $0x8d0] sm:$0xf0] }
 0xac1   :  { %10716 = vmatpush.bf16.msra.mxu1 %v15275_v21  ;;  %v7717_v9 = vmul.f32 0.7978846, %v7703_v23  ;;  %v7621_v21 = vpop.f32.mrf.mxu0 }
 0xac2   :  { %v15176_v21 = vld [vmem:[%s26326_s15 + $0x510] sm:$0xf0] }
 0xac3   :  { %10679 = vmatpush.bf16.msra.mxu3 %v14859_v44  ;;  %17683 = vtanh.f32 %v7717_v9  ;;  %v15208_v44 = vld [vmem:[%s26326_s15 + $0x550] sm:$0xf0]  ;;  %v7634_v32 = vpop.f32.mrf.mxu1  ;;  %v15195_v9 = vor.u32 %v17272_v37, %v15192_v12 }
 0xac4   :  { %10704 = vmatpush.bf16.msra.mxu0 %v15131_v55  ;;  %10691 = vmatpush.bf16.msra.mxu2 %v15003_v27  ;;  %v7607_v55 = vadd.f32 %v7606_v48, %v4915_v60  ;;  %v17240_v27 = vld [vmem:[%s26326_s15 + $0x424] sm:$0xf]  ;;  %v7645_v31 = vpop.f32.mrf.mxu2  ;;  %v15211_v62 = vor.u32 %v17276_v35, %v15208_v44  ;;  %v15528_v44 = vld [vmem:[%s26326_s15 + $0x7d0] sm:$0xf0] }
 0xac5   :  { %10717 = vmatpush.bf16.msra.mxu1 %v15259_v49  ;;  %v15067_v49 = vor.u32 %v17240_v27, %v15064_v1  ;;  %v17204_v60 = vld [vmem:[%s26326_s15 + $0x304] sm:$0xf]  ;;  %v15800_v27 = vld [vmem:[%s26326_s15 + $0x9f0] sm:$0xf0] }
 0xac6   :  { %v7620_v28 = vadd.f32 %v7619_v46, %v7607_v55  ;;  %v14792_v46 = vld [vmem:[%s26326_s15 + $0x210] sm:$0xf0]  ;;  %10671 = vmatmul.bf16.vlgmr.msrb.gmra.mxu1 %v23605_v51  ;;  %v14923_v5 = vor.u32 %v17204_v60, %v14920_v34  ;;  %v17268_v55 = vld [vmem:[%s26326_s15 + $0x504] sm:$0xf] }
 0xac7   :  { %10680 = vmatpush.bf16.msra.mxu3 %v14843_v36  ;;  %v15672_v36 = vld [vmem:[%s26326_s15 + $0x8f0] sm:$0xf0] }
 0xac8   :  { %10705 = vmatpush.bf16.msra.mxu0 %v15115_v11  ;;  %10692 = vmatpush.bf16.msra.mxu2 %v14987_v58  ;;  %v17172_v11 = vld [vmem:[%s26326_s15 + $0x204] sm:$0xf]  ;;  %v7633_v56 = vadd.f32 %v7632_v43, %v7620_v28  ;;  %v15675_v26 = vor.u32 %v17392_v0, %v15672_v36  ;;  %v15768_v37 = vld [vmem:[%s26326_s15 + $0x9b0] sm:$0xf0] }
 0xac9   :  { %10718 = vmatpush.bf16.msra.mxu1 %v15243_v15  ;;  %v17236_v58 = vld [vmem:[%s26326_s15 + $0x404] sm:$0xf]  ;;  %v17684_v10 = vpop.eup %17683  ;;  %v14795_v23 = vor.u32 %v17172_v11, %v14792_v46  ;;  %v15640_v11 = vld [vmem:[%s26326_s15 + $0x8b0] sm:$0xf0] }
 0xaca   :  { %v24432_v22 = vadd.f32 %v7645_v31, %v7633_v56  ;;  %v7745_v43 = vadd.f32 1.0, %v17684_v10  ;;  %v15051_v19 = vor.u32 %v17236_v58, %v15048_v7  ;;  %v15179_v31 = vor.u32 %v17268_v55, %v15176_v21  ;;  %v17420_v46 = vld [vmem:[%s26326_s15 + $0x9c4] sm:$0xf]  ;;  %v15784_v56 = vld [vmem:[%s26326_s15 + $0x9d0] sm:$0xf0] }
 0xacb   :  { %10681 = vmatpush.bf16.msra.mxu3 %v14827_v18  ;;  %v17352_v58 = vld [vmem:[%s26326_s15 + $0x7a4] sm:$0xf]  ;;  %v15512_v7 = vld [vmem:[%s26326_s15 + $0x7b0] sm:$0xf0] }
 0xacc   :  { %10706 = vmatpush.bf16.msra.mxu0 %v15099_v6  ;;  %10693 = vmatpush.bf16.msra.mxu2 %v14971_v57  ;;  %v7608_v6 = vpop.f32.mrf.mxu3  ;;  %v7662_v15 = vmul.f32 %v24432_v22, %v24432_v22  ;;  %v17388_v57 = vld [vmem:[%s26326_s15 + $0x8c4] sm:$0xf]  ;;  %v7759_v59 = vmul.f32 0.5, %v7745_v43  ;;  %v7647_v48 = vpop.f32.mrf.mxu2  ;;  %v15624_v10 = vld [vmem:[%s26326_s15 + $0x890] sm:$0xf0]  ;;  %v15515_v12 = vor.u32 %v17352_v58, %v15512_v7 }
 0xacd   :  { %10719 = vmatpush.bf16.msra.mxu1 %v15227_v53  ;;  %v17424_v53 = vld [vmem:[%s26326_s15 + $0x9e4] sm:$0xf]  ;;  %v15659_v28 = vor.u32 %v17388_v57, %v15656_v39  ;;  %v24522_v43 = vld [vmem:[%s26327_s16] sm:$0xf]  ;;  %v15496_v60 = vld [vmem:[%s26326_s15 + $0x790] sm:$0xf0] }
 0xace   :  { %v7676_v18 = vmul.f32 %v7662_v15, %v24432_v22  ;;  %v15803_v45 = vor.u32 %v17424_v53, %v15800_v27  ;;  %v17380_v0 = vld [vmem:[%s26326_s15 + $0x884] sm:$0xf]  ;;  %v15608_v57 = vld [vmem:[%s26326_s15 + $0x870] sm:$0xf0] }
 0xacf   :  { %10682 = vmatpush.bf16.msra.mxu3 %v14811_v41  ;;  %v17384_v41 = vld [vmem:[%s26326_s15 + $0x8a4] sm:$0xf]  ;;  %v15480_v55 = vld [vmem:[%s26326_s15 + $0x770] sm:$0xf0] }
 0xad0   :  { %10707 = vmatpush.bf16.msra.mxu0 %v15083_v50  ;;  %10694 = vmatpush.bf16.msra.mxu2 %v14955_v4  ;;  %v7773_v50 = vmul.f32 %v7759_v59, %v24318_v47  ;;  %v7690_v1 = vmul.f32 0.044715, %v7676_v18  ;;  %v15547_v4 = vor.u32 %v17360_v40, %v15544_v63  ;;  %v17356_v47 = vld [vmem:[%s26326_s15 + $0x7c4] sm:$0xf]  ;;  %v8233_v40 = vperm.slane %v24522_v43, 0 }
 0xad1   :  { %10720 = vmatpush.bf16.msra.mxu1 %v15211_v62  ;;  %v15643_v62 = vor.u32 %v17384_v41, %v15640_v11  ;;  %v17416_v36 = vld [vmem:[%s26326_s15 + $0x9a4] sm:$0xf]  ;;  %v15592_v53 = vld [vmem:[%s26326_s15 + $0x850] sm:$0xf0] }
 0xad2   :  { %v24477_v35 = vpack.c.bf16 %v7773_v50, %v7773_v50  ;;  %v7704_v42 = vadd.f32 %v7690_v1, %v24432_v22  ;;  %v17348_v6 = vld [vmem:[%s26326_s15 + $0x784] sm:$0xf]  ;;  %v15771_v15 = vor.u32 %v17416_v36, %v15768_v37  ;;  %v15416_v1 = vld [vmem:[%s26326_s15 + $0x6f0] sm:$0xf0] }
 0xad3   :  { %10683 = vmatpush.bf16.msra.mxu3 %v14795_v23  ;;  %v15627_v23 = vor.u32 %v17380_v0, %v15624_v10  ;;  %v17412_v59 = vld [vmem:[%s26326_s15 + $0x984] sm:$0xf]  ;;  %v15499_v63 = vor.u32 %v17348_v6, %v15496_v60  ;;  %v15576_v7 = vld [vmem:[%s26326_s15 + $0x830] sm:$0xf0] }
 0xad4   :  { %10708 = vmatpush.bf16.msra.mxu0 %v15067_v49  ;;  %10695 = vmatpush.bf16.msra.mxu2 %v14939_v61  ;;  %v7718_v32 = vmul.f32 0.7978846, %v7704_v42  ;;  %v15531_v49 = vor.u32 %v17356_v47, %v15528_v44  ;;  %v15787_v61 = vor.u32 %v17420_v46, %v15784_v56  ;;  %v17372_v18 = vld [vmem:[%s26326_s15 + $0x844] sm:$0xf]  ;;  %v15736_v47 = vld [vmem:[%s26326_s15 + $0x970] sm:$0xf0] }
 0xad5   :  { %10721 = vmatpush.bf16.msra.mxu1 %v15195_v9  ;;  %10632 = vmatmul.bf16.vlgmr.msrb.gmra.mxu2 %v24477_v35  ;;  %v17344_v39 = vld [vmem:[%s26326_s15 + $0x764] sm:$0xf]  ;;  %v15595_v11 = vor.u32 %v17372_v18, %v15592_v53  ;;  %v15464_v56 = vld [vmem:[%s26326_s15 + $0x750] sm:$0xf0] }
 0xad6   :  { %17685 = vtanh.f32 %v7718_v32  ;;  %v17328_v27 = vld [vmem:[%s26326_s15 + $0x6e4] sm:$0xf]  ;;  %v15400_v10 = vld [vmem:[%s26326_s15 + $0x6d0] sm:$0xf0] }
 0xad7   :  { %v17340_v46 = vld [vmem:[%s26326_s15 + $0x744] sm:$0xf]  ;;  %v15720_v37 = vld [vmem:[%s26326_s15 + $0x950] sm:$0xf0] }
 0xad8   :  { %10709 = vmatpush.bf16.msra.mxu0 %v15051_v19  ;;  %10696 = vmatpush.bf16.msra.mxu2 %v14923_v5  ;;  %v17376_v19 = vld [vmem:[%s26326_s15 + $0x864] sm:$0xf]  ;;  %v16184_v18 = vld [vmem:[%s26326_s15 + $0xcf0] sm:$0xf0] }
 0xad9   :  { %10722 = vmatpush.bf16.msra.mxu1 %v15179_v31  ;;  %v15611_v5 = vor.u32 %v17376_v19, %v15608_v57  ;;  %v17408_v31 = vld [vmem:[%s26326_s15 + $0x964] sm:$0xf] }
 0xada   :  { %v10503_v34 = vpop.f32.mrf.mxu0  ;;  %v15739_v58 = vor.u32 %v17408_v31, %v15736_v47  ;;  %v17404_v36 = vld [vmem:[%s26326_s15 + $0x944] sm:$0xf] }
 0xadb   :  { %10710 = vmatmul.bf16.vlgmr.msra.gmra.mxu0 %v23834_v29  ;;  %v10516_v21 = vpop.f32.mrf.mxu1  ;;  %v17336_v60 = vld [vmem:[%s26326_s15 + $0x724] sm:$0xf] }
 0xadc   :  { %10754 = vmatpush.bf16.msrb.mxu0 %v15675_v26  ;;  %10741 = vmatpush.bf16.msrb.mxu2 %v15547_v4  ;;  %v15752_v26 = vld [vmem:[%s26326_s15 + $0x990] sm:$0xf0]  ;;  %v17686_v9 = vpop.eup %17685  ;;  %v17516_v47 = vld [vmem:[%s26326_s15 + $0xcc4] sm:$0xf] }
 0xadd   :  { %10767 = vmatpush.bf16.msrb.mxu1 %v15803_v45  ;;  %v7746_v48 = vadd.f32 1.0, %v17686_v9  ;;  %v15755_v50 = vor.u32 %v17412_v59, %v15752_v26  ;;  %v10490_v42 = vpop.f32.mrf.mxu3  ;;  %v15483_v45 = vor.u32 %v17344_v39, %v15480_v55  ;;  %v17364_v59 = vld [vmem:[%s26326_s15 + $0x804] sm:$0xf]  ;;  %v15560_v26 = vld [vmem:[%s26326_s15 + $0x810] sm:$0xf0] }
 0xade   :  { %10723 = vmatmul.bf16.vlgmr.msra.gmra.mxu1 %v23836_v17  ;;  %v17520_v9 = vld [vmem:[%s26326_s15 + $0xce4] sm:$0xf]  ;;  %v15563_v53 = vor.u32 %v17364_v59, %v15560_v26 }
 0xadf   :  { %v7760_v4 = vmul.f32 0.5, %v7746_v48  ;;  %v17320_v48 = vld [vmem:[%s26326_s15 + $0x6a4] sm:$0xf] }
 0xae0   :  { %10755 = vmatpush.bf16.msrb.mxu0 %v15659_v28  ;;  %10742 = vmatpush.bf16.msrb.mxu2 %v15531_v49  ;;  %v10477_v28 = vpop.f32.mrf.mxu2  ;;  %v17508_v59 = vld [vmem:[%s26326_s15 + $0xc84] sm:$0xf] }
 0xae1   :  { %10768 = vmatpush.bf16.msrb.mxu1 %v15787_v61  ;;  %v10478_v44 = vadd.f32 %v10477_v28, %v8233_v40  ;;  %v7774_v41 = vmul.f32 %v7760_v4, %v24432_v22  ;;  %v17368_v22 = vld [vmem:[%s26326_s15 + $0x824] sm:$0xf]  ;;  %v9564_v4 = vunpack.c.h.b16 %v23995_v16  ;;  %v16187_v28 = vor.u32 %v17520_v9, %v16184_v18  ;;  %v16168_v16 = vld [vmem:[%s26326_s15 + $0xcd0] sm:$0xf0] }
 0xae2   :  { %v10505_v49 = vpop.f32.mrf.mxu0  ;;  %v17324_v61 = vld [vmem:[%s26326_s15 + $0x6c4] sm:$0xf]  ;;  %v15579_v6 = vor.u32 %v17368_v22, %v15576_v7  ;;  %v16024_v9 = vld [vmem:[%s26326_s15 + $0xbb0] sm:$0xf0] }
 0xae3   :  { %v10491_v32 = vadd.f32 %v10490_v42, %v10478_v44  ;;  %v24583_v0 = vpack.c.bf16 %v7774_v41, %v7774_v41  ;;  %v10518_v19 = vpop.f32.mrf.mxu1  ;;  %v15403_v57 = vor.u32 %v17324_v61, %v15400_v10  ;;  %v17488_v44 = vld [vmem:[%s26326_s15 + $0xbe4] sm:$0xf]  ;;  %v16056_v42 = vld [vmem:[%s26326_s15 + $0xbf0] sm:$0xf0] }
 0xae4   :  { %10756 = vmatpush.bf16.msrb.mxu0 %v15643_v62  ;;  %10743 = vmatpush.bf16.msrb.mxu2 %v15515_v12  ;;  %v15419_v62 = vor.u32 %v17328_v27, %v15416_v1  ;;  %v17332_v27 = vld [vmem:[%s26326_s15 + $0x704] sm:$0xf]  ;;  %v15432_v1 = vld [vmem:[%s26326_s15 + $0x710] sm:$0xf0]  ;;  %v16059_v49 = vor.u32 %v17488_v44, %v16056_v42 }
 0xae5   :  { %10769 = vmatpush.bf16.msrb.mxu1 %v15771_v15  ;;  %10697 = vmatmul.bf16.vlgmr.msra.gmra.mxu2 %v23648_v30  ;;  %v10504_v12 = vadd.f32 %v10503_v34, %v10491_v32  ;;  %v15448_v15 = vld [vmem:[%s26326_s15 + $0x730] sm:$0xf0]  ;;  %v15723_v34 = vor.u32 %v17404_v36, %v15720_v37  ;;  %v10492_v39 = vpop.f32.mrf.mxu3  ;;  %v17316_v41 = vld [vmem:[%s26326_s15 + $0x684] sm:$0xf] }
 0xae6   :  { %16292 = vmatmul.msk.bf16.vlgmr.msrb.gmra.mxu3 %vm10451_vm3, %v24583_v0  ;;  %v15451_v55 = vor.u32 %v17336_v60, %v15448_v15  ;;  %v15688_v32 = vld [vmem:[%s26326_s15 + $0x910] sm:$0xf0]  ;;  %v17512_v7 = vld [vmem:[%s26326_s15 + $0xca4] sm:$0xf] }
 0xae7   :  { %10728 = vmatpush.bf16.msrb.mxu3 %v15419_v62  ;;  %v24612_v40 = vadd.f32 %v10516_v21, %v10504_v12  ;;  %v17400_v21 = vld [vmem:[%s26326_s15 + $0x924] sm:$0xf]  ;;  %v10008_v62 = vpack.c.b16 %v9564_v4, %v9564_v4  ;;  %v16040_v10 = vld [vmem:[%s26326_s15 + $0xbd0] sm:$0xf0] }
 0xae8   :  { %10757 = vmatpush.bf16.msrb.mxu0 %v15627_v23  ;;  %10744 = vmatpush.bf16.msrb.mxu2 %v15499_v63  ;;  %v15467_v23 = vor.u32 %v17340_v46, %v15464_v56  ;;  %v10479_v63 = vpop.f32.mrf.mxu2  ;;  %v15435_v46 = vor.u32 %v17332_v27, %v15432_v1  ;;  %v17396_v56 = vld [vmem:[%s26326_s15 + $0x904] sm:$0xf]  ;;  %v16152_v37 = vld [vmem:[%s26326_s15 + $0xcb0] sm:$0xf0] }
 0xae9   :  { %10770 = vmatpush.bf16.msrb.mxu1 %v15755_v50  ;;  %v15704_v50 = vld [vmem:[%s26326_s15 + $0x930] sm:$0xf0]  ;;  %v17484_v61 = vld [vmem:[%s26326_s15 + $0xbc4] sm:$0xf]  ;;  %v15691_v36 = vor.u32 %v17396_v56, %v15688_v32 }
 0xaea   :  { %v17312_v12 = vld [vmem:[%s26326_s15 + $0x664] sm:$0xf]  ;;  %v16043_v60 = vor.u32 %v17484_v61, %v16040_v10  ;;  %v16280_v19 = vld [vmem:[%s26326_s15 + $0xdb0] sm:$0xf0] }
 0xaeb   :  { %10729 = vmatpush.bf16.msrb.mxu3 %v15403_v57  ;;  %v17544_v15 = vld [vmem:[%s26326_s15 + $0xda4] sm:$0xf]  ;;  %v16155_v57 = vor.u32 %v17512_v7, %v16152_v37  ;;  %v16136_v63 = vld [vmem:[%s26326_s15 + $0xc90] sm:$0xf0] }
 0xaec   :  { %10758 = vmatpush.bf16.msrb.mxu0 %v15611_v5  ;;  %10745 = vmatpush.bf16.msrb.mxu2 %v15483_v45  ;;  %v15384_v5 = vld [vmem:[%s26326_s15 + $0x6b0] sm:$0xf0]  ;;  %v15707_v45 = vor.u32 %v17400_v21, %v15704_v50  ;;  %v17480_v26 = vld [vmem:[%s26326_s15 + $0xba4] sm:$0xf]  ;;  %v16139_v50 = vor.u32 %v17508_v59, %v16136_v63 }
 0xaed   :  { %10771 = vmatpush.bf16.msrb.mxu1 %v15739_v58  ;;  %v15387_v31 = vor.u32 %v17320_v48, %v15384_v5  ;;  %v16171_v58 = vor.u32 %v17516_v47, %v16168_v16  ;;  %v17308_v18 = vld [vmem:[%s26326_s15 + $0x644] sm:$0xf]  ;;  %v15336_v48 = vld [vmem:[%s26326_s15 + $0x650] sm:$0xf0]  ;;  %v16283_v5 = vor.u32 %v17544_v15, %v16280_v19  ;;  %v16027_v39 = vor.u32 %v17480_v26, %v16024_v9 }
 0xaee   :  { %v16264_v21 = vld [vmem:[%s26326_s15 + $0xd90] sm:$0xf0]  ;;  %v17504_v27 = vld [vmem:[%s26326_s15 + $0xc64] sm:$0xf] }
 0xaef   :  { %10730 = vmatpush.bf16.msrb.mxu3 %v15387_v31  ;;  %v17476_v1 = vld [vmem:[%s26326_s15 + $0xb84] sm:$0xf]  ;;  %v16008_v4 = vld [vmem:[%s26326_s15 + $0xb90] sm:$0xf0] }
 0xaf0   :  { %10759 = vmatpush.bf16.msrb.mxu0 %v15595_v11  ;;  %10746 = vmatpush.bf16.msrb.mxu2 %v15467_v23  ;;  %v15368_v11 = vld [vmem:[%s26326_s15 + $0x690] sm:$0xf0]  ;;  %v17304_v31 = vld [vmem:[%s26326_s15 + $0x624] sm:$0xf] }
 0xaf1   :  { %10772 = vmatpush.bf16.msrb.mxu1 %v15723_v34  ;;  %v15371_v22 = vor.u32 %v17316_v41, %v15368_v11  ;;  %v15352_v23 = vld [vmem:[%s26326_s15 + $0x670] sm:$0xf0]  ;;  %v17536_v16 = vld [vmem:[%s26326_s15 + $0xd64] sm:$0xf] }
 0xaf2   :  { %v15355_v34 = vor.u32 %v17312_v12, %v15352_v23  ;;  %v15320_v47 = vld [vmem:[%s26326_s15 + $0x630] sm:$0xf0]  ;;  %v17500_v56 = vld [vmem:[%s26326_s15 + $0xc44] sm:$0xf] }
 0xaf3   :  { %10731 = vmatpush.bf16.msrb.mxu3 %v15371_v22  ;;  %v16248_v41 = vld [vmem:[%s26326_s15 + $0xd70] sm:$0xf0]  ;;  %v17472_v32 = vld [vmem:[%s26326_s15 + $0xb64] sm:$0xf] }
 0xaf4   :  { %10760 = vmatpush.bf16.msrb.mxu0 %v15579_v6  ;;  %10747 = vmatpush.bf16.msrb.mxu2 %v15451_v55  ;;  %v10460_v6 = vsel %vm10455_vm2, %v10008_v62, 0  ;;  %v17540_v55 = vld [vmem:[%s26326_s15 + $0xd84] sm:$0xf]  ;;  %v16104_v62 = vld [vmem:[%s26326_s15 + $0xc50] sm:$0xf0]  ;;  %v16251_v61 = vor.u32 %v17536_v16, %v16248_v41 }
 0xaf5   :  { %10773 = vmatpush.bf16.msrb.mxu1 %v15707_v45  ;;  %v16267_v42 = vor.u32 %v17540_v55, %v16264_v21  ;;  %v16011_v45 = vor.u32 %v17476_v1, %v16008_v4  ;;  %v15304_v22 = vld [vmem:[%s26326_s15 + $0x610] sm:$0xf0]  ;;  %v17456_v10 = vld [vmem:[%s26326_s15 + $0xae4] sm:$0xf]  ;;  %v16107_v19 = vor.u32 %v17500_v56, %v16104_v62  ;;  %v17235_v16 = vld [vmem:[%s26326_s15 + $0x3f4] sm:$0xf0] }
 0xaf6   :  { %10684 = vmatmul.bf16.vlgmr.msra.gmra.mxu3 %v23608_v52  ;;  %v17532_v23 = vld [vmem:[%s26326_s15 + $0xd44] sm:$0xf]  ;;  %v15976_v59 = vld [vmem:[%s26326_s15 + $0xb50] sm:$0xf0] }
 0xaf7   :  { %10732 = vmatpush.bf16.msrb.mxu3 %v15355_v34  ;;  %v17468_v34 = vld [vmem:[%s26326_s15 + $0xb44] sm:$0xf]  ;;  %v15960_v4 = vld [vmem:[%s26326_s15 + $0xb30] sm:$0xf0] }
 0xaf8   :  { %10761 = vmatpush.bf16.msrb.mxu0 %v15563_v53  ;;  %10748 = vmatpush.bf16.msrb.mxu2 %v15435_v46  ;;  %v15339_v53 = vor.u32 %v17308_v18, %v15336_v48  ;;  %v15323_v46 = vor.u32 %v17304_v31, %v15320_v47  ;;  %v17496_v9 = vld [vmem:[%s26326_s15 + $0xc24] sm:$0xf]  ;;  %v15979_v55 = vor.u32 %v17468_v34, %v15976_v59  ;;  %v16072_v47 = vld [vmem:[%s26326_s15 + $0xc10] sm:$0xf0]  ;;  %v14782_v34 = vld [vmem:[%s26326_s15 + $0x1e8] sm:$0xf] }
 0xaf9   :  { %10774 = vmatpush.bf16.msrb.mxu1 %v15691_v36  ;;  %v15928_v36 = vld [vmem:[%s26326_s15 + $0xaf0] sm:$0xf0]  ;;  %v17528_v21 = vld [vmem:[%s26326_s15 + $0xd24] sm:$0xf]  ;;  %v17171_v59 = vld [vmem:[%s26326_s15 + $0x1f4] sm:$0xf0] }
 0xafa   :  { %v10555_v44 = vpop.f32.mrf.mxu0  ;;  %v15931_v26 = vor.u32 %v17456_v10, %v15928_v36  ;;  %v17464_v1 = vld [vmem:[%s26326_s15 + $0xb24] sm:$0xf]  ;;  %v16200_v62 = vld [vmem:[%s26326_s15 + $0xd10] sm:$0xf0] }
 0xafb   :  { %10762 = vmatmul.bf16.vlgmr.msrb.gmra.mxu0 %v24052_v3  ;;  %10749 = vmatmul.bf16.vlgmr.msrb.gmra.mxu2 %v23878_v13  ;;  %v10568_v7 = vpop.f32.mrf.mxu1  ;;  %v17492_v31 = vld [vmem:[%s26326_s15 + $0xc04] sm:$0xf] }
 0xafc   :  { %10806 = vmatpush.bf16.msra.mxu0 %v16187_v28  ;;  %10793 = vmatpush.bf16.msra.mxu2 %v16059_v49  ;;  %v16120_v28 = vld [vmem:[%s26326_s15 + $0xc70] sm:$0xf0]  ;;  %v17448_v41 = vld [vmem:[%s26326_s15 + $0xaa4] sm:$0xf] }
 0xafd   :  { %10820 = vmatpush.bf16.msra.mxu1 %v10460_v6  ;;  %10733 = vmatpush.bf16.msrb.mxu3 %v15339_v53  ;;  %v16123_v11 = vor.u32 %v17504_v27, %v16120_v28  ;;  %v15992_v49 = vld [vmem:[%s26326_s15 + $0xb70] sm:$0xf0]  ;;  %v10542_v15 = vpop.f32.mrf.mxu3 }
 0xafe   :  { %10775 = vmatmul.bf16.vlgmr.msrb.gmra.mxu1 %v24060_v38  ;;  %v10529_v37 = vpop.f32.mrf.mxu2  ;;  %v15995_v12 = vor.u32 %v17472_v32, %v15992_v49  ;;  %v16232_v6 = vld [vmem:[%s26326_s15 + $0xd50] sm:$0xf0]  ;;  %v15963_v32 = vor.u32 %v17464_v1, %v15960_v4  ;;  %v17524_v49 = vld [vmem:[%s26326_s15 + $0xd04] sm:$0xf]  ;;  %v14878_v1 = vld [vmem:[%s26326_s15 + $0x2a8] sm:$0xf] }
 0xaff   :  { %v16235_v48 = vor.u32 %v17532_v23, %v16232_v6  ;;  %v15022_v23 = vld [vmem:[%s26326_s15 + $0x3c8] sm:$0xf]  ;;  %v16203_v6 = vor.u32 %v17524_v49, %v16200_v62  ;;  %v17195_v4 = vld [vmem:[%s26326_s15 + $0x2b4] sm:$0xf0] }
 0xb00   :  { %10807 = vmatpush.bf16.msra.mxu0 %v16171_v58  ;;  %10794 = vmatpush.bf16.msra.mxu2 %v16043_v60  ;;  %v17300_v58 = vld [vmem:[%s26326_s15 + $0x604] sm:$0xf]  ;;  %v10530_v60 = vadd.f32 %v10529_v37, %v24612_v40  ;;  %v16088_v40 = vld [vmem:[%s26326_s15 + $0xc30] sm:$0xf0]  ;;  %v17191_v49 = vld [vmem:[%s26326_s15 + $0x294] sm:$0xf0] }
 0xb01   :  { %10821 = vmatpush.bf16.msra.mxu1 %v16283_v5  ;;  %10734 = vmatpush.bf16.msrb.mxu3 %v15323_v46  ;;  %v17452_v5 = vld [vmem:[%s26326_s15 + $0xac4] sm:$0xf]  ;;  %v16091_v27 = vor.u32 %v17496_v9, %v16088_v40  ;;  %v14894_v9 = vld [vmem:[%s26326_s15 + $0x2c8] sm:$0xf]  ;;  %v17199_v40 = vld [vmem:[%s26326_s15 + $0x2d4] sm:$0xf0] }
 0xb02   :  { %v10543_v63 = vadd.f32 %v10542_v15, %v10530_v60  ;;  %v10557_v18 = vpop.f32.mrf.mxu0  ;;  %v17460_v37 = vld [vmem:[%s26326_s15 + $0xb04] sm:$0xf]  ;;  %v17231_v60 = vld [vmem:[%s26326_s15 + $0x3d4] sm:$0xf0] }
 0xb03   :  { %v17444_v15 = vld [vmem:[%s26326_s15 + $0xa84] sm:$0xf] }
 0xb04   :  { %10808 = vmatpush.bf16.msra.mxu0 %v16155_v57  ;;  %10795 = vmatpush.bf16.msra.mxu2 %v16027_v39  ;;  %v15307_v57 = vor.u32 %v17300_v58, %v15304_v22  ;;  %v15912_v39 = vld [vmem:[%s26326_s15 + $0xad0] sm:$0xf0]  ;;  %v10556_v53 = vadd.f32 %v10555_v44, %v10543_v63  ;;  %v15038_v44 = vld [vmem:[%s26326_s15 + $0x3e8] sm:$0xf]  ;;  %v16075_v22 = vor.u32 %v17492_v31, %v16072_v47 }
 0xb05   :  { %10822 = vmatpush.bf16.msra.mxu1 %v16267_v42  ;;  %v15915_v28 = vor.u32 %v17452_v5, %v15912_v39  ;;  %v10570_v42 = vpop.f32.mrf.mxu1  ;;  %v10544_v58 = vpop.f32.mrf.mxu3  ;;  %v15039_v10 = vor.u32 %v17235_v16, %v15038_v44  ;;  %v15023_v63 = vor.u32 %v17231_v60, %v15022_v23  ;;  %v14783_v5 = vor.u32 %v17171_v59, %v14782_v34  ;;  %v17227_v39 = vld [vmem:[%s26326_s15 + $0x3b4] sm:$0xf0]  ;;  %v14990_v47 = vld [vmem:[%s26326_s15 + $0x388] sm:$0xf]  ;;  %v15848_v16 = vld [vmem:[%s26326_s15 + $0xa50] sm:$0xf0] }
 0xb06   :  { %10735 = vmatpush.bf16.msrb.mxu3 %v15307_v57  ;;  %v24816_v46 = vadd.f32 %v10568_v7, %v10556_v53  ;;  %v10531_v56 = vpop.f32.mrf.mxu2  ;;  %v14910_v7 = vld [vmem:[%s26326_s15 + $0x2e8] sm:$0xf]  ;;  %v17223_v42 = vld [vmem:[%s26326_s15 + $0x394] sm:$0xf0] }
 0xb07   :  { %v14766_v53 = vld [vmem:[%s26326_s15 + $0x1c8] sm:$0xf]  ;;  %v17163_v56 = vld [vmem:[%s26326_s15 + $0x1b4] sm:$0xf0]  ;;  %v14991_v62 = vor.u32 %v17223_v42, %v14990_v47 }
 0xb08   :  { %10809 = vmatpush.bf16.msra.mxu0 %v16139_v50  ;;  %10796 = vmatpush.bf16.msra.mxu2 %v16011_v45  ;;  %v16216_v50 = vld [vmem:[%s26326_s15 + $0xd30] sm:$0xf0]  ;;  %v17159_v23 = vld [vmem:[%s26326_s15 + $0x194] sm:$0xf0]  ;;  %v14942_v47 = vld [vmem:[%s26326_s15 + $0x328] sm:$0xf] }
 0xb09   :  { %10823 = vmatpush.bf16.msra.mxu1 %v16251_v61  ;;  %v16219_v45 = vor.u32 %v17528_v21, %v16216_v50  ;;  %10736 = vmatmul.bf16.vlgmr.msrb.gmra.mxu3 %v23848_v8  ;;  %v17203_v61 = vld [vmem:[%s26326_s15 + $0x2f4] sm:$0xf0]  ;;  %v15864_v21 = vld [vmem:[%s26326_s15 + $0xa70] sm:$0xf0]  ;;  %v14895_v50 = vor.u32 %v17199_v40, %v14894_v9  ;;  %v14718_v40 = vld [vmem:[%s26326_s15 + $0x168] sm:$0xf] }
 0xb0a   :  { %10780 = vmatpush.bf16.msra.mxu3 %v15931_v26  ;;  %v14911_v57 = vor.u32 %v17203_v61, %v14910_v7  ;;  %v17219_v61 = vld [vmem:[%s26326_s15 + $0x374] sm:$0xf0]  ;;  %v15816_v9 = vld [vmem:[%s26326_s15 + $0xa10] sm:$0xf0]  ;;  %v14702_v42 = vld [vmem:[%s26326_s15 + $0x148] sm:$0xf] }
 0xb0b   :  { %v17187_v60 = vld [vmem:[%s26326_s15 + $0x274] sm:$0xf0] }
 0xb0c   :  { %10810 = vmatpush.bf16.msra.mxu0 %v16123_v11  ;;  %10797 = vmatpush.bf16.msra.mxu2 %v15995_v12  ;;  %v15896_v11 = vld [vmem:[%s26326_s15 + $0xab0] sm:$0xf0]  ;;  %v17215_v34 = vld [vmem:[%s26326_s15 + $0x354] sm:$0xf0] }
 0xb0d   :  { %10824 = vmatpush.bf16.msra.mxu1 %v16235_v48  ;;  %v15899_v36 = vor.u32 %v17448_v41, %v15896_v11  ;;  %v15944_v12 = vld [vmem:[%s26326_s15 + $0xb10] sm:$0xf0]  ;;  %v15006_v48 = vld [vmem:[%s26326_s15 + $0x3a8] sm:$0xf]  ;;  %v14879_v41 = vor.u32 %v17195_v4, %v14878_v1 }
 0xb0e   :  { %10781 = vmatpush.bf16.msra.mxu3 %v15915_v28  ;;  %v15947_v26 = vor.u32 %v17460_v37, %v15944_v12  ;;  %v15007_v28 = vor.u32 %v17227_v39, %v15006_v48  ;;  %v14750_v11 = vld [vmem:[%s26326_s15 + $0x1a8] sm:$0xf]  ;;  %v17155_v48 = vld [vmem:[%s26326_s15 + $0x174] sm:$0xf0] }
 0xb0f   :  { %v14751_v7 = vor.u32 %v17163_v56, %v14750_v11  ;;  %v14734_v12 = vld [vmem:[%s26326_s15 + $0x188] sm:$0xf]  ;;  %v17139_v39 = vld [vmem:[%s26326_s15 + $0xf4] sm:$0xf0] }
 0xb10   :  { %10811 = vmatpush.bf16.msra.mxu0 %v16107_v19  ;;  %10798 = vmatpush.bf16.msra.mxu2 %v15979_v55  ;;  %v15880_v19 = vld [vmem:[%s26326_s15 + $0xa90] sm:$0xf0]  ;;  %v17440_v55 = vld [vmem:[%s26326_s15 + $0xa64] sm:$0xf]  ;;  %v14735_v59 = vor.u32 %v17159_v23, %v14734_v12  ;;  %v14814_v56 = vld [vmem:[%s26326_s15 + $0x228] sm:$0xf] }
 0xb11   :  { %10825 = vmatpush.bf16.msra.mxu1 %v16219_v45  ;;  %v15883_v18 = vor.u32 %v17444_v15, %v15880_v19  ;;  %v15867_v31 = vor.u32 %v17440_v55, %v15864_v21  ;;  %v17436_v45 = vld [vmem:[%s26326_s15 + $0xa44] sm:$0xf]  ;;  %v14830_v55 = vld [vmem:[%s26326_s15 + $0x248] sm:$0xf]  ;;  %v17183_v21 = vld [vmem:[%s26326_s15 + $0x254] sm:$0xf0] }
 0xb12   :  { %10782 = vmatpush.bf16.msra.mxu3 %v15899_v36  ;;  %v15851_v58 = vor.u32 %v17436_v45, %v15848_v16  ;;  %v15832_v36 = vld [vmem:[%s26326_s15 + $0xa30] sm:$0xf0]  ;;  %v14831_v45 = vor.u32 %v17183_v21, %v14830_v55  ;;  %v14638_v16 = vld [vmem:[%s26326_s15 + $0xc8] sm:$0xf]  ;;  %v17143_v55 = vld [vmem:[%s26326_s15 + $0x114] sm:$0xf0] }
 0xb13   :  { %v15550_v23 = vld [vmem:[%s26326_s15 + $0x7e8] sm:$0xf] }
 0xb14   :  { %10812 = vmatpush.bf16.msra.mxu0 %v16091_v27  ;;  %10799 = vmatpush.bf16.msra.mxu2 %v15963_v32  ;;  %v17167_v27 = vld [vmem:[%s26326_s15 + $0x1d4] sm:$0xf0]  ;;  %v14862_v32 = vld [vmem:[%s26326_s15 + $0x288] sm:$0xf] }
 0xb15   :  { %10826 = vmatpush.bf16.msra.mxu1 %v16203_v6  ;;  %v14767_v44 = vor.u32 %v17167_v27, %v14766_v53  ;;  %v14863_v37 = vor.u32 %v17191_v49, %v14862_v32  ;;  %v14846_v6 = vld [vmem:[%s26326_s15 + $0x268] sm:$0xf]  ;;  %v17179_v32 = vld [vmem:[%s26326_s15 + $0x234] sm:$0xf0] }
 0xb16   :  { %10783 = vmatpush.bf16.msra.mxu3 %v15883_v18  ;;  %v14847_v18 = vor.u32 %v17187_v60, %v14846_v6  ;;  %v14815_v12 = vor.u32 %v17179_v32, %v14814_v56  ;;  %v17363_v6 = vld [vmem:[%s26326_s15 + $0x7f4] sm:$0xf0]  ;;  %v14622_v60 = vld [vmem:[%s26326_s15 + $0xa8] sm:$0xf] }
 0xb17   :  { %v15534_v21 = vld [vmem:[%s26326_s15 + $0x7c8] sm:$0xf]  ;;  %v17123_v32 = vld [vmem:[%s26326_s15 + $0x74] sm:$0xf0] }
 0xb18   :  { %10813 = vmatpush.bf16.msra.mxu0 %v16075_v22  ;;  %10800 = vmatpush.bf16.msra.mxu2 %v15947_v26  ;;  %v14974_v22 = vld [vmem:[%s26326_s15 + $0x368] sm:$0xf]  ;;  %v17428_v26 = vld [vmem:[%s26326_s15 + $0xa04] sm:$0xf] }
 0xb19   :  { %10858 = vmatpush.bf16.msrb.mxu1 %v14911_v57  ;;  %v14975_v15 = vor.u32 %v17219_v61, %v14974_v22  ;;  %v14958_v57 = vld [vmem:[%s26326_s15 + $0x348] sm:$0xf]  ;;  %v15819_v1 = vor.u32 %v17428_v26, %v15816_v9  ;;  %v17207_v61 = vld [vmem:[%s26326_s15 + $0x314] sm:$0xf0] }
 0xb1a   :  { %16293 = vmatmul.msk.bf16.vlgmr.msra.gmra.mxu1 %vm10451_vm3, %v24583_v0  ;;  %10784 = vmatpush.bf16.msra.mxu3 %v15867_v31  ;;  %v14959_v27 = vor.u32 %v17215_v34, %v14958_v57  ;;  %v17175_v57 = vld [vmem:[%s26326_s15 + $0x214] sm:$0xf0]  ;;  %v15422_v9 = vld [vmem:[%s26326_s15 + $0x6e8] sm:$0xf] }
 0xb1b   :  { %10814 = vmatmul.bf16.vlgmr.msra.gmra.mxu0 %v24477_v35  ;;  %10801 = vmatmul.bf16.vlgmr.msra.gmra.mxu2 %v24290_v24  ;;  %v14590_v56 = vld [vmem:[%s26326_s15 + $0x68] sm:$0xf] }
 0xb1c   :  { %10871 = vmatpush.bf16.msrb.mxu0 %v15039_v10  ;;  %10845 = vmatpush.bf16.msrb.mxu2 %v14783_v5  ;;  %v17432_v10 = vld [vmem:[%s26326_s15 + $0xa24] sm:$0xf]  ;;  %v14654_v5 = vld [vmem:[%s26326_s15 + $0xe8] sm:$0xf] }
 0xb1d   :  { %10859 = vmatpush.bf16.msrb.mxu1 %v14895_v50  ;;  %v15835_v19 = vor.u32 %v17432_v10, %v15832_v36  ;;  %v10594_v53 = vpop.f32.mrf.mxu3  ;;  %v14655_v31 = vor.u32 %v17139_v39, %v14654_v5  ;;  %v14686_v10 = vld [vmem:[%s26326_s15 + $0x128] sm:$0xf]  ;;  %v17147_v36 = vld [vmem:[%s26326_s15 + $0x134] sm:$0xf0] }
 0xb1e   :  { %10785 = vmatpush.bf16.msra.mxu3 %v15851_v58  ;;  %v10581_v50 = vpop.f32.mrf.mxu2 }
 0xb1f   :  { %v10582_v4 = vadd.f32 %v10581_v50, %v24816_v46  ;;  %v17151_v46 = vld [vmem:[%s26326_s15 + $0x154] sm:$0xf0] }
 0xb20   :  { %10872 = vmatpush.bf16.msrb.mxu0 %v15023_v63  ;;  %10846 = vmatpush.bf16.msrb.mxu2 %v14767_v44  ;;  %v10607_v63 = vpop.f32.mrf.mxu0  ;;  %v17211_v44 = vld [vmem:[%s26326_s15 + $0x334] sm:$0xf0]  ;;  %v14703_v22 = vor.u32 %v17151_v46, %v14702_v42  ;;  %v15518_v46 = vld [vmem:[%s26326_s15 + $0x7a8] sm:$0xf] }
 0xb21   :  { %10860 = vmatpush.bf16.msrb.mxu1 %v14879_v41  ;;  %v17135_v41 = vld [vmem:[%s26326_s15 + $0xd4] sm:$0xf0]  ;;  %v10595_v11 = vadd.f32 %v10594_v53, %v10582_v4  ;;  %v14943_v49 = vor.u32 %v17211_v44, %v14942_v47  ;;  %v15294_v4 = vld [vmem:[%s26326_s15 + $0x5e8] sm:$0xf] }
 0xb22   :  { %10786 = vmatpush.bf16.msra.mxu3 %v15835_v19  ;;  %v14798_v19 = vld [vmem:[%s26326_s15 + $0x208] sm:$0xf]  ;;  %v17359_v50 = vld [vmem:[%s26326_s15 + $0x7d4] sm:$0xf0] }
 0xb23   :  { %v24995_v58 = vadd.f32 %v10607_v63, %v10595_v11  ;;  %v14687_v63 = vor.u32 %v17147_v36, %v14686_v10  ;;  %v14799_v39 = vor.u32 %v17175_v57, %v14798_v19  ;;  %v17327_v47 = vld [vmem:[%s26326_s15 + $0x6d4] sm:$0xf0]  ;;  %v15535_v42 = vor.u32 %v17359_v50, %v15534_v21  ;;  %v15502_v36 = vld [vmem:[%s26326_s15 + $0x788] sm:$0xf] }
 0xb24   :  { %10873 = vmatpush.bf16.msrb.mxu0 %v15007_v28  ;;  %10847 = vmatpush.bf16.msrb.mxu2 %v14751_v7  ;;  %v14719_v28 = vor.u32 %v17155_v48, %v14718_v40  ;;  %v14639_v7 = vor.u32 %v17135_v41, %v14638_v16  ;;  %v17331_v40 = vld [vmem:[%s26326_s15 + $0x6f4] sm:$0xf0]  ;;  %v14670_v48 = vld [vmem:[%s26326_s15 + $0x108] sm:$0xf]  ;;  %v14591_v10 = vor.u32 %v17123_v32, %v14590_v56 }
 0xb25   :  { %10861 = vmatpush.bf16.msrb.mxu1 %v14863_v37  ;;  %v15423_v53 = vor.u32 %v17331_v40, %v15422_v9  ;;  %v14671_v44 = vor.u32 %v17143_v55, %v14670_v48  ;;  %v17355_v16 = vld [vmem:[%s26326_s15 + $0x7b4] sm:$0xf0]  ;;  %v15374_v57 = vld [vmem:[%s26326_s15 + $0x688] sm:$0xf] }
 0xb26   :  { %10787 = vmatpush.bf16.msra.mxu3 %v15819_v1  ;;  %v10583_v34 = vpop.f32.mrf.mxu2  ;;  %v17127_v1 = vld [vmem:[%s26326_s15 + $0x94] sm:$0xf0]  ;;  %v15486_v9 = vld [vmem:[%s26326_s15 + $0x768] sm:$0xf] }
 0xb27   :  { %v17291_v19 = vld [vmem:[%s26326_s15 + $0x5b4] sm:$0xf0]  ;;  %v14558_v48 = vld [vmem:[%s26326_s15 + $0x28] sm:$0xf] }
 0xb28   :  { %10874 = vmatpush.bf16.msrb.mxu0 %v14991_v62  ;;  %10848 = vmatpush.bf16.msrb.mxu2 %v14735_v59  ;;  %v14926_v62 = vld [vmem:[%s26326_s15 + $0x308] sm:$0xf]  ;;  %v10609_v37 = vpop.f32.mrf.mxu0  ;;  %v10596_v59 = vpop.f32.mrf.mxu3  ;;  %v17319_v34 = vld [vmem:[%s26326_s15 + $0x694] sm:$0xf0] }
 0xb29   :  { %10862 = vmatpush.bf16.msrb.mxu1 %v14847_v18  ;;  %10788 = vmatmul.bf16.vlgmr.msra.gmra.mxu3 %v24091_v14  ;;  %v14927_v26 = vor.u32 %v17207_v61, %v14926_v62  ;;  %v15551_v18 = vor.u32 %v17363_v6, %v15550_v23  ;;  %v17295_v62 = vld [vmem:[%s26326_s15 + $0x5d4] sm:$0xf0]  ;;  %v15519_v61 = vor.u32 %v17355_v16, %v15518_v46  ;;  %v14574_v6 = vld [vmem:[%s26326_s15 + $0x48] sm:$0xf] }
 0xb2a   :  { %10832 = vmatpush.bf16.msrb.mxu3 %v14655_v31  ;;  %v15406_v31 = vld [vmem:[%s26326_s15 + $0x6c8] sm:$0xf]  ;;  %v17351_v37 = vld [vmem:[%s26326_s15 + $0x794] sm:$0xf0] }
 0xb2b   :  { %v15407_v11 = vor.u32 %v17327_v47, %v15406_v31  ;;  %v15503_v59 = vor.u32 %v17351_v37, %v15502_v36  ;;  %v17347_v40 = vld [vmem:[%s26326_s15 + $0x774] sm:$0xf0]  ;;  %v15358_v50 = vld [vmem:[%s26326_s15 + $0x668] sm:$0xf] }
 0xb2c   :  { %10875 = vmatpush.bf16.msrb.mxu0 %v14975_v15  ;;  %10849 = vmatpush.bf16.msrb.mxu2 %v14719_v28  ;;  %v17131_v15 = vld [vmem:[%s26326_s15 + $0xb4] sm:$0xf0]  ;;  %v15230_v46 = vld [vmem:[%s26326_s15 + $0x568] sm:$0xf] }
 0xb2d   :  { %10863 = vmatpush.bf16.msrb.mxu1 %v14831_v45  ;;  %v14623_v5 = vor.u32 %v17131_v15, %v14622_v60  ;;  %v17299_v28 = vld [vmem:[%s26326_s15 + $0x5f4] sm:$0xf0]  ;;  %v15262_v15 = vld [vmem:[%s26326_s15 + $0x5a8] sm:$0xf] }
 0xb2e   :  { %10833 = vmatpush.bf16.msrb.mxu3 %v14639_v7  ;;  %v15295_v41 = vor.u32 %v17299_v28, %v15294_v4  ;;  %v17323_v7 = vld [vmem:[%s26326_s15 + $0x6b4] sm:$0xf0]  ;;  %v15470_v28 = vld [vmem:[%s26326_s15 + $0x748] sm:$0xf] }
 0xb2f   :  { %v17119_v60 = vld [vmem:[%s26326_s15 + $0x54] sm:$0xf0]  ;;  %v15342_v32 = vld [vmem:[%s26326_s15 + $0x648] sm:$0xf] }
 0xb30   :  { %10876 = vmatpush.bf16.msrb.mxu0 %v14959_v27  ;;  %10850 = vmatpush.bf16.msrb.mxu2 %v14703_v22  ;;  %v14606_v27 = vld [vmem:[%s26326_s15 + $0x88] sm:$0xf]  ;;  %v17287_v21 = vld [vmem:[%s26326_s15 + $0x594] sm:$0xf0] }
 0xb31   :  { %10864 = vmatpush.bf16.msrb.mxu1 %v14815_v12  ;;  %v14607_v45 = vor.u32 %v17127_v1, %v14606_v27  ;;  %v15390_v22 = vld [vmem:[%s26326_s15 + $0x6a8] sm:$0xf]  ;;  %v15487_v27 = vor.u32 %v17347_v40, %v15486_v9  ;;  %v17343_v31 = vld [vmem:[%s26326_s15 + $0x754] sm:$0xf0] }
 0xb32   :  { %10834 = vmatpush.bf16.msrb.mxu3 %v14623_v5  ;;  %v15391_v23 = vor.u32 %v17323_v7, %v15390_v22  ;;  %v17115_v5 = vld [vmem:[%s26326_s15 + $0x34] sm:$0xf0]  ;;  %v15471_v56 = vor.u32 %v17343_v31, %v15470_v28  ;;  %v15454_v22 = vld [vmem:[%s26326_s15 + $0x728] sm:$0xf] }
 0xb33   :  { %v25138_v1 = vpop.f32.mrf.mxu1  ;;  %v14559_v4 = vor.u32 %v17115_v5, %v14558_v48  ;;  %v17283_v16 = vld [vmem:[%s26326_s15 + $0x574] sm:$0xf0]  ;;  %v15214_v36 = vld [vmem:[%s26326_s15 + $0x548] sm:$0xf] }
 0xb34   :  { %10877 = vmatpush.bf16.msrb.mxu0 %v14943_v49  ;;  %10851 = vmatpush.bf16.msrb.mxu2 %v14687_v63  ;;  %v15278_v49 = vld [vmem:[%s26326_s15 + $0x5c8] sm:$0xf]  ;;  %v15263_v63 = vor.u32 %v17291_v19, %v15262_v15  ;;  %v17339_v7 = vld [vmem:[%s26326_s15 + $0x734] sm:$0xf0] }
 0xb35   :  { %10865 = vmatpush.bf16.msrb.mxu1 %v14799_v39  ;;  %v15279_v12 = vor.u32 %v17295_v62, %v15278_v49  ;;  %v15246_v39 = vld [vmem:[%s26326_s15 + $0x588] sm:$0xf]  ;;  %v17311_v49 = vld [vmem:[%s26326_s15 + $0x654] sm:$0xf0]  ;;  %v15455_v15 = vor.u32 %v17339_v7, %v15454_v22 }
 0xb36   :  { %10835 = vmatpush.bf16.msrb.mxu3 %v14607_v45  ;;  %v15247_v47 = vor.u32 %v17287_v21, %v15246_v39  ;;  %v17111_v45 = vld [vmem:[%s26326_s15 + $0x14] sm:$0xf0]  ;;  %v15326_v19 = vld [vmem:[%s26326_s15 + $0x628] sm:$0xf] }
 0xb37   :  { %v17491_v48 = vld [vmem:[%s26326_s15 + $0xbf4] sm:$0xf0]  ;;  %v15134_v21 = vld [vmem:[%s26326_s15 + $0x4a8] sm:$0xf] }
 0xb38   :  { %10878 = vmatpush.bf16.msrb.mxu0 %v14927_v26  ;;  %10852 = vmatpush.bf16.msrb.mxu2 %v14671_v44  ;;  %v14575_v26 = vor.u32 %v17119_v60, %v14574_v6  ;;  %v25127_v55 = vpop.f32.mrf.mxu0  ;;  %v15150_v6 = vld [vmem:[%s26326_s15 + $0x4c8] sm:$0xf]  ;;  %v17263_v60 = vld [vmem:[%s26326_s15 + $0x4d4] sm:$0xf0] }
 0xb39   :  { %10910 = vmatpush.bf16.msra.mxu1 %v15423_v53  ;;  %v17315_v53 = vld [vmem:[%s26326_s15 + $0x674] sm:$0xf0]  ;;  %v15151_v40 = vor.u32 %v17263_v60, %v15150_v6  ;;  %v15806_v22 = vld [vmem:[%s26326_s15 + $0x9e8] sm:$0xf] }
 0xb3a   :  { %10866 = vmatmul.bf16.vlgmr.msrb.gmra.mxu1 %v23608_v52  ;;  %10836 = vmatpush.bf16.msrb.mxu3 %v14591_v10  ;;  %v15359_v44 = vor.u32 %v17315_v53, %v15358_v50  ;;  %v17275_v39 = vld [vmem:[%s26326_s15 + $0x534] sm:$0xf0]  ;;  %v8234_v53 = vperm.slane %v24522_v43, 1  ;;  %v16030_v6 = vld [vmem:[%s26326_s15 + $0xba8] sm:$0xf] }
 0xb3b   :  { %10879 = vmatmul.bf16.vlgmr.msrb.gmra.mxu0 %v23648_v30  ;;  %10853 = vmatmul.bf16.vlgmr.msrb.gmra.mxu2 %v23605_v51  ;;  %v17259_v50 = vld [vmem:[%s26326_s15 + $0x4b4] sm:$0xf0] }
 0xb3c   :  { %10923 = vmatpush.bf16.msra.mxu0 %v15551_v18  ;;  %10897 = vmatpush.bf16.msra.mxu2 %v15295_v41  ;;  %v15375_v18 = vor.u32 %v17319_v34, %v15374_v57  ;;  %v15166_v41 = vld [vmem:[%s26326_s15 + $0x4e8] sm:$0xf]  ;;  %v17307_v57 = vld [vmem:[%s26326_s15 + $0x634] sm:$0xf0]  ;;  %v10622_v34 = vpop.f32.mrf.mxu1 }
 0xb3d   :  { %10911 = vmatpush.bf16.msra.mxu1 %v15407_v11  ;;  %v17267_v11 = vld [vmem:[%s26326_s15 + $0x4f4] sm:$0xf0]  ;;  %v15327_v5 = vor.u32 %v17307_v57, %v15326_v19  ;;  %v15102_v19 = vld [vmem:[%s26326_s15 + $0x468] sm:$0xf] }
 0xb3e   :  { %10837 = vmatpush.bf16.msrb.mxu3 %v14575_v26  ;;  %v15167_v10 = vor.u32 %v17267_v11, %v15166_v41  ;;  %v17335_v26 = vld [vmem:[%s26326_s15 + $0x714] sm:$0xf0] }
 0xb3f   :  { %v17303_v28 = vld [vmem:[%s26326_s15 + $0x614] sm:$0xf0] }
 0xb40   :  { %10924 = vmatpush.bf16.msra.mxu0 %v15535_v42  ;;  %10898 = vmatpush.bf16.msra.mxu2 %v15279_v12  ;;  %v14542_v42 = vld [vmem:[%s26326_s15 + $0x8] sm:$0xf]  ;;  %v10661_v37 = vpop.f32.mrf.mxu0  ;;  %v15343_v12 = vor.u32 %v17311_v49, %v15342_v32  ;;  %v17459_v43 = vld [vmem:[%s26326_s15 + $0xaf4] sm:$0xf0]  ;;  %v10660_v49 = vadd.f32 %v25127_v55, %v8234_v53 }
 0xb41   :  { %10912 = vmatpush.bf16.msra.mxu1 %v15391_v23  ;;  %v14543_v62 = vor.u32 %v17111_v45, %v14542_v42  ;;  %v17279_v23 = vld [vmem:[%s26326_s15 + $0x554] sm:$0xf0]  ;;  %v15135_v42 = vor.u32 %v17259_v50, %v15134_v21  ;;  %v15182_v45 = vld [vmem:[%s26326_s15 + $0x508] sm:$0xf] }
 0xb42   :  { %10838 = vmatpush.bf16.msrb.mxu3 %v14559_v4  ;;  %v15215_v9 = vor.u32 %v17279_v23, %v15214_v36  ;;  %v15310_v4 = vld [vmem:[%s26326_s15 + $0x608] sm:$0xf]  ;;  %v17271_v11 = vld [vmem:[%s26326_s15 + $0x514] sm:$0xf0] }
 0xb43   :  { %v15311_v41 = vor.u32 %v17303_v28, %v15310_v4  ;;  %v17255_v32 = vld [vmem:[%s26326_s15 + $0x494] sm:$0xf0]  ;;  %v15918_v36 = vld [vmem:[%s26326_s15 + $0xac8] sm:$0xf] }
 0xb44   :  { %10925 = vmatpush.bf16.msra.mxu0 %v15519_v61  ;;  %10899 = vmatpush.bf16.msra.mxu2 %v15263_v63  ;;  %v15231_v61 = vor.u32 %v17283_v16, %v15230_v46  ;;  %v15198_v63 = vld [vmem:[%s26326_s15 + $0x528] sm:$0xf]  ;;  %v17487_v16 = vld [vmem:[%s26326_s15 + $0xbd4] sm:$0xf0] }
 0xb45   :  { %10913 = vmatpush.bf16.msra.mxu1 %v15375_v18  ;;  %v16062_v18 = vld [vmem:[%s26326_s15 + $0xbe8] sm:$0xf]  ;;  %v17427_v7 = vld [vmem:[%s26326_s15 + $0x9f4] sm:$0xf0] }
 0xb46   :  { %10839 = vmatpush.bf16.msrb.mxu3 %v14543_v62  ;;  %v16063_v31 = vor.u32 %v17491_v48, %v16062_v18  ;;  %v16046_v46 = vld [vmem:[%s26326_s15 + $0xbc8] sm:$0xf]  ;;  %v17455_v55 = vld [vmem:[%s26326_s15 + $0xad4] sm:$0xf0] }
 0xb47   :  { %v17483_v60 = vld [vmem:[%s26326_s15 + $0xbb4] sm:$0xf0]  ;;  %v15919_v34 = vor.u32 %v17455_v55, %v15918_v36  ;;  %v16014_v48 = vld [vmem:[%s26326_s15 + $0xb88] sm:$0xf] }
 0xb48   :  { %10926 = vmatpush.bf16.msra.mxu0 %v15503_v59  ;;  %10900 = vmatpush.bf16.msra.mxu2 %v15247_v47  ;;  %v15438_v59 = vld [vmem:[%s26326_s15 + $0x708] sm:$0xf]  ;;  %v17251_v57 = vld [vmem:[%s26326_s15 + $0x474] sm:$0xf0] }
 0xb49   :  { %10914 = vmatpush.bf16.msra.mxu1 %v15359_v44  ;;  %10840 = vmatmul.bf16.vlgmr.msrb.gmra.mxu3 %v23594_v54  ;;  %v15934_v47 = vld [vmem:[%s26326_s15 + $0xae8] sm:$0xf]  ;;  %v15199_v44 = vor.u32 %v17275_v39, %v15198_v63  ;;  %v17451_v63 = vld [vmem:[%s26326_s15 + $0xab4] sm:$0xf0]  ;;  %v15103_v18 = vor.u32 %v17251_v57, %v15102_v19 }
 0xb4a   :  { %10884 = vmatpush.bf16.msra.mxu3 %v15167_v10  ;;  %v15935_v62 = vor.u32 %v17459_v43, %v15934_v47  ;;  %v16047_v10 = vor.u32 %v17487_v16, %v16046_v46  ;;  %v15086_v21 = vld [vmem:[%s26326_s15 + $0x448] sm:$0xf]  ;;  %v17247_v50 = vld [vmem:[%s26326_s15 + $0x454] sm:$0xf0] }
 0xb4b   :  { %v17419_v4 = vld [vmem:[%s26326_s15 + $0x9b4] sm:$0xf0]  ;;  %v15886_v47 = vld [vmem:[%s26326_s15 + $0xa88] sm:$0xf] }
 0xb4c   :  { %10927 = vmatpush.bf16.msra.mxu0 %v15487_v27  ;;  %10901 = vmatpush.bf16.msra.mxu2 %v15231_v61  ;;  %v15439_v27 = vor.u32 %v17335_v26, %v15438_v59  ;;  %v10672_v61 = vpop.f32.mrf.mxu1  ;;  %v15790_v59 = vld [vmem:[%s26326_s15 + $0x9c8] sm:$0xf]  ;;  %v17423_v26 = vld [vmem:[%s26326_s15 + $0x9d4] sm:$0xf0] }
 0xb4d   :  { %10915 = vmatpush.bf16.msra.mxu1 %v15343_v12  ;;  %v25263_v37 = vadd.f32 %v10672_v61, %v10660_v49  ;;  %v15183_v12 = vor.u32 %v17271_v11, %v15182_v45  ;;  %v15791_v39 = vor.u32 %v17423_v26, %v15790_v59  ;;  %v17447_v43 = vld [vmem:[%s26326_s15 + $0xa94] sm:$0xf0]  ;;  %v15070_v16 = vld [vmem:[%s26326_s15 + $0x428] sm:$0xf] }
 0xb4e   :  { %10885 = vmatpush.bf16.msra.mxu3 %v15151_v40  ;;  %v15902_v40 = vld [vmem:[%s26326_s15 + $0xaa8] sm:$0xf]  ;;  %v17475_v45 = vld [vmem:[%s26326_s15 + $0xb74] sm:$0xf0] }
 0xb4f   :  { %v15903_v53 = vor.u32 %v17451_v63, %v15902_v40  ;;  %v17415_v49 = vld [vmem:[%s26326_s15 + $0x994] sm:$0xf0]  ;;  %v15678_v19 = vld [vmem:[%s26326_s15 + $0x8e8] sm:$0xf] }
 0xb50   :  { %10928 = vmatpush.bf16.msra.mxu0 %v15471_v56  ;;  %10902 = vmatpush.bf16.msra.mxu2 %v15215_v9  ;;  %v15118_v56 = vld [vmem:[%s26326_s15 + $0x488] sm:$0xf]  ;;  %v16031_v9 = vor.u32 %v17483_v60, %v16030_v6  ;;  %v17471_v36 = vld [vmem:[%s26326_s15 + $0xb54] sm:$0xf0] }
 0xb51   :  { %10916 = vmatpush.bf16.msra.mxu1 %v15327_v5  ;;  %v15119_v23 = vor.u32 %v17255_v32, %v15118_v56  ;;  %v17479_v5 = vld [vmem:[%s26326_s15 + $0xb94] sm:$0xf0]  ;;  %v15887_v56 = vor.u32 %v17447_v43, %v15886_v47  ;;  %v15758_v32 = vld [vmem:[%s26326_s15 + $0x988] sm:$0xf] }
 0xb52   :  { %10886 = vmatpush.bf16.msra.mxu3 %v15135_v42  ;;  %v15998_v42 = vld [vmem:[%s26326_s15 + $0xb68] sm:$0xf]  ;;  %v15759_v55 = vor.u32 %v17415_v49, %v15758_v32  ;;  %v17395_v57 = vld [vmem:[%s26326_s15 + $0x8f4] sm:$0xf0]  ;;  %v14784_v32 = vld [vmem:[%s26326_s15 + $0x1f8] sm:$0xf0] }
 0xb53   :  { %v15742_v6 = vld [vmem:[%s26326_s15 + $0x968] sm:$0xf]  ;;  %v17435_v43 = vld [vmem:[%s26326_s15 + $0xa34] sm:$0xf0] }
 0xb54   :  { %10929 = vmatpush.bf16.msra.mxu0 %v15455_v15  ;;  %10903 = vmatpush.bf16.msra.mxu2 %v15199_v44  ;;  %v15807_v15 = vor.u32 %v17427_v7, %v15806_v22  ;;  %v10674_v28 = vpop.f32.mrf.mxu1  ;;  %v15087_v44 = vor.u32 %v17247_v50, %v15086_v21  ;;  %v15870_v22 = vld [vmem:[%s26326_s15 + $0xa68] sm:$0xf]  ;;  %v17443_v7 = vld [vmem:[%s26326_s15 + $0xa74] sm:$0xf0] }
 0xb55   :  { %10917 = vmatpush.bf16.msra.mxu1 %v15311_v41  ;;  %v17243_v41 = vld [vmem:[%s26326_s15 + $0x434] sm:$0xf0]  ;;  %v15871_v60 = vor.u32 %v17443_v7, %v15870_v22  ;;  %v15854_v26 = vld [vmem:[%s26326_s15 + $0xa48] sm:$0xf] }
 0xb56   :  { %10887 = vmatpush.bf16.msra.mxu3 %v15119_v23  ;;  %v15071_v61 = vor.u32 %v17243_v41, %v15070_v16  ;;  %v17239_v23 = vld [vmem:[%s26326_s15 + $0x414] sm:$0xf0]  ;;  %v15726_v21 = vld [vmem:[%s26326_s15 + $0x948] sm:$0xf] }
 0xb57   :  { %v17391_v28 = vld [vmem:[%s26326_s15 + $0x8d4] sm:$0xf0]  ;;  %v15838_v47 = vld [vmem:[%s26326_s15 + $0xa28] sm:$0xf] }
 0xb58   :  { %10930 = vmatpush.bf16.msra.mxu0 %v15439_v27  ;;  %10904 = vmatpush.bf16.msra.mxu2 %v15183_v12  ;;  %v15774_v27 = vld [vmem:[%s26326_s15 + $0x9a8] sm:$0xf]  ;;  %v25328_v11 = vpop.f32.mrf.mxu0  ;;  %v25374_v40 = vpop.f32.mrf.mxu2  ;;  %v15839_v49 = vor.u32 %v17435_v43, %v15838_v47  ;;  %v17387_v7 = vld [vmem:[%s26326_s15 + $0x8b4] sm:$0xf0]  ;;  %v14752_v47 = vld [vmem:[%s26326_s15 + $0x1b8] sm:$0xf0] }
 0xb59   :  { %10962 = vmatpush.bf16.msrb.mxu1 %v15935_v62  ;;  %v15775_v46 = vor.u32 %v17419_v4, %v15774_v27  ;;  %v15999_v62 = vor.u32 %v17475_v45, %v15998_v42  ;;  %v15054_v12 = vld [vmem:[%s26326_s15 + $0x408] sm:$0xf]  ;;  %v17407_v27 = vld [vmem:[%s26326_s15 + $0x954] sm:$0xf0] }
 0xb5a   :  { %10918 = vmatmul.bf16.vlgmr.msra.gmra.mxu1 %v23848_v8  ;;  %10888 = vmatpush.bf16.msra.mxu3 %v15103_v18  ;;  %v15055_v63 = vor.u32 %v17239_v23, %v15054_v12  ;;  %v15966_v18 = vld [vmem:[%s26326_s15 + $0xb28] sm:$0xf]  ;;  %v17463_v42 = vld [vmem:[%s26326_s15 + $0xb14] sm:$0xf0] }
 0xb5b   :  { %10931 = vmatmul.bf16.vlgmr.msra.gmra.mxu0 %v23878_v13  ;;  %10905 = vmatmul.bf16.vlgmr.msra.gmra.mxu2 %v23836_v17  ;;  %v15662_v4 = vld [vmem:[%s26326_s15 + $0x8c8] sm:$0xf] }
 0xb5c   :  { %10975 = vmatpush.bf16.msrb.mxu0 %v16063_v31  ;;  %10949 = vmatpush.bf16.msrb.mxu2 %v15807_v15  ;;  %v16015_v31 = vor.u32 %v17479_v5, %v16014_v48  ;;  %v17411_v15 = vld [vmem:[%s26326_s15 + $0x974] sm:$0xf0]  ;;  %v25409_v45 = vld [vmem:[%s26326_s15 + $0xdc8] sm:$0x33]  ;;  %v15663_v16 = vor.u32 %v17391_v28, %v15662_v4 }
 0xb5d   :  { %10963 = vmatpush.bf16.msrb.mxu1 %v15919_v34  ;;  %v25366_v34 = vpop.f32.mrf.mxu1  ;;  %v17467_v48 = vld [vmem:[%s26326_s15 + $0xb34] sm:$0xf0]  ;;  %v15743_v5 = vor.u32 %v17411_v15, %v15742_v6  ;;  %v15710_v41 = vld [vmem:[%s26326_s15 + $0x928] sm:$0xf]  ;;  %v9565_v12 = vunpack.c.l.b16 %v25409_v45  ;;  %v14656_v15 = vld [vmem:[%s26326_s15 + $0xf8] sm:$0xf0] }
 0xb5e   :  { %10889 = vmatpush.bf16.msra.mxu3 %v15087_v44  ;;  %v15950_v44 = vld [vmem:[%s26326_s15 + $0xb08] sm:$0xf] }
 0xb5f   :  { %v15646_v22 = vld [vmem:[%s26326_s15 + $0x8a8] sm:$0xf] }
 0xb60   :  { %10976 = vmatpush.bf16.msrb.mxu0 %v16047_v10  ;;  %10950 = vmatpush.bf16.msrb.mxu2 %v15791_v39  ;;  %v15982_v10 = vld [vmem:[%s26326_s15 + $0xb48] sm:$0xf]  ;;  %v15679_v39 = vor.u32 %v17395_v57, %v15678_v19  ;;  %v10713_v50 = vpop.f32.mrf.mxu0  ;;  %v10635_v23 = vpop.f32.mrf.mxu2  ;;  %v15647_v57 = vor.u32 %v17387_v7, %v15646_v22  ;;  %v17157_v7 = vld [vmem:[%s26326_s15 + $0x18c] sm:$0xf] }
 0xb61   :  { %10964 = vmatpush.bf16.msrb.mxu1 %v15903_v53  ;;  %v15983_v59 = vor.u32 %v17471_v36, %v15982_v10  ;;  %v15951_v10 = vor.u32 %v17463_v42, %v15950_v44  ;;  %v15822_v36 = vld [vmem:[%s26326_s15 + $0xa08] sm:$0xf]  ;;  %v17379_v44 = vld [vmem:[%s26326_s15 + $0x874] sm:$0xf0]  ;;  %v10621_v42 = vadd.f32 %v25138_v1, %v24995_v58  ;;  %v17129_v58 = vld [vmem:[%s26326_s15 + $0xac] sm:$0xf] }
 0xb62   :  { %10890 = vmatpush.bf16.msra.mxu3 %v15071_v61  ;;  %v15614_v43 = vld [vmem:[%s26326_s15 + $0x868] sm:$0xf]  ;;  %v14624_v1 = vld [vmem:[%s26326_s15 + $0xb8] sm:$0xf0] }
 0xb63   :  { %v15615_v22 = vor.u32 %v17379_v44, %v15614_v43  ;;  %v14627_v23 = vor.u32 %v17129_v58, %v14624_v1  ;;  %v17149_v44 = vld [vmem:[%s26326_s15 + $0x14c] sm:$0xf]  ;;  %v17535_v1 = vld [vmem:[%s26326_s15 + $0xd54] sm:$0xf0] }
 0xb64   :  { %10977 = vmatpush.bf16.msrb.mxu0 %v16031_v9  ;;  %10951 = vmatpush.bf16.msrb.mxu2 %v15775_v46  ;;  %v17439_v9 = vld [vmem:[%s26326_s15 + $0xa54] sm:$0xf0]  ;;  %v15727_v46 = vor.u32 %v17407_v27, %v15726_v21  ;;  %v10009_v21 = vpack.c.b16 %v9565_v12, %v9565_v12  ;;  %v14640_v27 = vld [vmem:[%s26326_s15 + $0xd8] sm:$0xf0] }
 0xb65   :  { %10965 = vmatpush.bf16.msrb.mxu1 %v15887_v56  ;;  %v15855_v53 = vor.u32 %v17439_v9, %v15854_v26  ;;  %v17169_v56 = vld [vmem:[%s26326_s15 + $0x1ec] sm:$0xf]  ;;  %v10726_v61 = vpop.f32.mrf.mxu1  ;;  %v14768_v9 = vld [vmem:[%s26326_s15 + $0x1d8] sm:$0xf0] }
 0xb66   :  { %10891 = vmatpush.bf16.msra.mxu3 %v15055_v63  ;;  %v14787_v6 = vor.u32 %v17169_v56, %v14784_v32  ;;  %v17165_v26 = vld [vmem:[%s26326_s15 + $0x1cc] sm:$0xf]  ;;  %v17547_v56 = vld [vmem:[%s26326_s15 + $0xdb4] sm:$0xf0]  ;;  %v14736_v61 = vld [vmem:[%s26326_s15 + $0x198] sm:$0xf0] }
 0xb67   :  { %v14771_v50 = vor.u32 %v17165_v26, %v14768_v9  ;;  %v17153_v9 = vld [vmem:[%s26326_s15 + $0x16c] sm:$0xf] }
 0xb68   :  { %10978 = vmatpush.bf16.msrb.mxu0 %v16015_v31  ;;  %10952 = vmatpush.bf16.msrb.mxu2 %v15759_v55  ;;  %v15967_v31 = vor.u32 %v17467_v48, %v15966_v18  ;;  %v17431_v55 = vld [vmem:[%s26326_s15 + $0xa14] sm:$0xf0]  ;;  %v15630_v48 = vld [vmem:[%s26326_s15 + $0x888] sm:$0xf]  ;;  %v25489_v32 = vpop.f32.mrf.mxu2 }
 0xb69   :  { %10966 = vmatpush.bf16.msrb.mxu1 %v15871_v60  ;;  %10892 = vmatmul.bf16.vlgmr.msra.gmra.mxu3 %v23834_v29  ;;  %v17137_v60 = vld [vmem:[%s26326_s15 + $0xec] sm:$0xf]  ;;  %v15823_v63 = vor.u32 %v17431_v55, %v15822_v36  ;;  %v17399_v18 = vld [vmem:[%s26326_s15 + $0x914] sm:$0xf0] }
 0xb6a   :  { %10936 = vmatpush.bf16.msrb.mxu3 %v15679_v39  ;;  %v14659_v39 = vor.u32 %v17137_v60, %v14656_v15  ;;  %v17375_v55 = vld [vmem:[%s26326_s15 + $0x854] sm:$0xf0]  ;;  %v14739_v15 = vor.u32 %v17157_v7, %v14736_v61  ;;  %v17117_v61 = vld [vmem:[%s26326_s15 + $0x4c] sm:$0xf] }
 0xb6b   :  { %v17543_v60 = vld [vmem:[%s26326_s15 + $0xd94] sm:$0xf0] }
 0xb6c   :  { %10979 = vmatpush.bf16.msrb.mxu0 %v15999_v62  ;;  %10953 = vmatpush.bf16.msrb.mxu2 %v15743_v5  ;;  %v17403_v62 = vld [vmem:[%s26326_s15 + $0x934] sm:$0xf0] }
 0xb6d   :  { %10967 = vmatpush.bf16.msrb.mxu1 %v15855_v53  ;;  %v15711_v19 = vor.u32 %v17403_v62, %v15710_v41  ;;  %v17383_v5 = vld [vmem:[%s26326_s15 + $0x894] sm:$0xf0]  ;;  %v17133_v53 = vld [vmem:[%s26326_s15 + $0xcc] sm:$0xf]  ;;  %v16286_v41 = vld [vmem:[%s26326_s15 + $0xda8] sm:$0xf]  ;;  %v10634_v62 = vadd.f32 %v25374_v40, %v10621_v42 }
 0xb6e   :  { %10937 = vmatpush.bf16.msrb.mxu3 %v15663_v16  ;;  %v15631_v28 = vor.u32 %v17383_v5, %v15630_v48  ;;  %v14643_v16 = vor.u32 %v17133_v53, %v14640_v27  ;;  %v16287_v36 = vor.u32 %v17547_v56, %v16286_v41  ;;  %v15598_v40 = vld [vmem:[%s26326_s15 + $0x848] sm:$0xf]  ;;  %v17689_v5 = vld [vmem:[%s26332_s26] sm:$0xff]  ;;  %v17539_v27 = vld [vmem:[%s26326_s15 + $0xd74] sm:$0xf0] }
 0xb6f   :  { %v15599_v26 = vor.u32 %v17375_v55, %v15598_v40  ;;  %v15582_v48 = vld [vmem:[%s26326_s15 + $0x828] sm:$0xf]  ;;  %v14704_v42 = vld [vmem:[%s26326_s15 + $0x158] sm:$0xf0]  ;;  %v17367_v56 = vld [vmem:[%s26326_s15 + $0x814] sm:$0xf0] }
 0xb70   :  { %10980 = vmatpush.bf16.msrb.mxu0 %v15983_v59  ;;  %10954 = vmatpush.bf16.msrb.mxu2 %v15727_v46  ;;  %v15694_v59 = vld [vmem:[%s26326_s15 + $0x908] sm:$0xf]  ;;  %v10463_v46 = vsel %vm10455_vm2, %v10009_v21, 0  ;;  %v14707_v7 = vor.u32 %v17149_v44, %v14704_v42  ;;  %v17145_v40 = vld [vmem:[%s26326_s15 + $0x12c] sm:$0xf] }
 0xb71   :  { %10968 = vmatpush.bf16.msrb.mxu1 %v15839_v49  ;;  %v15695_v4 = vor.u32 %v17399_v18, %v15694_v59  ;;  %v16254_v53 = vld [vmem:[%s26326_s15 + $0xd68] sm:$0xf]  ;;  %v14688_v55 = vld [vmem:[%s26326_s15 + $0x138] sm:$0xf0]  ;;  %v17515_v42 = vld [vmem:[%s26326_s15 + $0xcb4] sm:$0xf0] }
 0xb72   :  { %10938 = vmatpush.bf16.msrb.mxu3 %v15647_v57  ;;  %v14608_v57 = vld [vmem:[%s26326_s15 + $0x98] sm:$0xf0]  ;;  %v15566_v41 = vld [vmem:[%s26326_s15 + $0x808] sm:$0xf] }
 0xb73   :  { %v16158_v44 = vld [vmem:[%s26326_s15 + $0xca8] sm:$0xf] }
 0xb74   :  { %10981 = vmatpush.bf16.msrb.mxu0 %v15967_v31  ;;  %10955 = vmatpush.bf16.msrb.mxu2 %v15711_v19  ;;  %v17161_v31 = vld [vmem:[%s26326_s15 + $0x1ac] sm:$0xf] }
 0xb75   :  { %10969 = vmatpush.bf16.msrb.mxu1 %v15823_v63  ;;  %v14755_v49 = vor.u32 %v17161_v31, %v14752_v47  ;;  %v17125_v19 = vld [vmem:[%s26326_s15 + $0x8c] sm:$0xf]  ;;  %v14720_v63 = vld [vmem:[%s26326_s15 + $0x178] sm:$0xf0] }
 0xb76   :  { %10939 = vmatpush.bf16.msrb.mxu3 %v15631_v28  ;;  %v14723_v28 = vor.u32 %v17153_v9, %v14720_v63  ;;  %v17121_v31 = vld [vmem:[%s26326_s15 + $0x6c] sm:$0xf]  ;;  %v14592_v47 = vld [vmem:[%s26326_s15 + $0x78] sm:$0xf0]  ;;  %v14691_v63 = vor.u32 %v17145_v40, %v14688_v55  ;;  %v16142_v55 = vld [vmem:[%s26326_s15 + $0xc88] sm:$0xf] }
 0xb77   :  { %v14595_v58 = vor.u32 %v17121_v31, %v14592_v47  ;;  %v15296_v31 = vld [vmem:[%s26326_s15 + $0x5f8] sm:$0xf0] }
 0xb78   :  { %10982 = vmatpush.bf16.msrb.mxu0 %v15951_v10  ;;  %10956 = vmatpush.bf16.msrb.mxu2 %v15695_v4  ;;  %v10646_v10 = vpop.f32.mrf.mxu3  ;;  %v25540_v21 = vpop.f32.mrf.mxu0 }
 0xb79   :  { %11014 = vmatpush.bf16.msra.mxu1 %v14659_v39  ;;  %v10647_v12 = vadd.f32 %v10646_v10, %v10634_v62  ;;  %v10700_v4 = vpop.f32.mrf.mxu2  ;;  %v16190_v62 = vld [vmem:[%s26326_s15 + $0xce8] sm:$0xf]  ;;  %v14576_v10 = vld [vmem:[%s26326_s15 + $0x58] sm:$0xf0] }
 0xb7a   :  { %10970 = vmatmul.bf16.vlgmr.msrb.gmra.mxu1 %v24091_v14  ;;  %10940 = vmatpush.bf16.msrb.mxu3 %v15615_v22  ;;  %v17523_v22 = vld [vmem:[%s26326_s15 + $0xcf4] sm:$0xf0] }
 0xb7b   :  { %10983 = vmatmul.bf16.vlgmr.msrb.gmra.mxu0 %v24290_v24  ;;  %10957 = vmatmul.bf16.vlgmr.msrb.gmra.mxu2 %v24060_v38  ;;  %v11196_v59 = vadd.f32 %v10647_v12, %v20871_v33  ;;  %v17371_v33 = vld [vmem:[%s26326_s15 + $0x834] sm:$0xf0]  ;;  %v25590_v12 = vpop.f32.mrf.mxu1 }
 0xb7c   :  { %11027 = vmatpush.bf16.msra.mxu0 %v14787_v6  ;;  %11002 = vmatpush.bf16.msra.mxu2 %v10463_v46  ;;  %v16270_v6 = vld [vmem:[%s26326_s15 + $0xd88] sm:$0xf]  ;;  %v15583_v43 = vor.u32 %v17371_v33, %v15582_v48  ;;  %v14560_v48 = vld [vmem:[%s26326_s15 + $0x38] sm:$0xf0]  ;;  %v17141_v33 = vld [vmem:[%s26326_s15 + $0x10c] sm:$0xf] }
 0xb7d   :  { %11015 = vmatpush.bf16.msra.mxu1 %v14643_v16  ;;  %v16271_v18 = vor.u32 %v17543_v60, %v16270_v6  ;;  %v11200_v39 = vadd.f32 %v17689_v5, %v11196_v59  ;;  %v16255_v16 = vor.u32 %v17539_v27, %v16254_v53  ;;  %v16191_v6 = vor.u32 %v17523_v22, %v16190_v62  ;;  %v16222_v60 = vld [vmem:[%s26326_s15 + $0xd28] sm:$0xf]  ;;  %v14672_v5 = vld [vmem:[%s26326_s15 + $0x118] sm:$0xf0]  ;;  %v17527_v4 = vld [vmem:[%s26326_s15 + $0xd14] sm:$0xf0] }
 0xb7e   :  { %10941 = vmatpush.bf16.msrb.mxu3 %v15599_v26  ;;  %v16174_v59 = vld [vmem:[%s26326_s15 + $0xcc8] sm:$0xf]  ;;  %v17519_v26 = vld [vmem:[%s26326_s15 + $0xcd4] sm:$0xf0]  ;;  %v15168_v62 = vld [vmem:[%s26326_s15 + $0x4f8] sm:$0xf0] }
 0xb7f   :  { %11204 = vst [vmem:[#allocation2] sm:$0xff] %v11200_v39  ;;  %v16206_v39 = vld [vmem:[%s26326_s15 + $0xd08] sm:$0xf]  ;;  %v16175_v27 = vor.u32 %v17519_v26, %v16174_v59  ;;  %v17261_v26 = vld [vmem:[%s26326_s15 + $0x4cc] sm:$0xf] }
 0xb80   :  { %11028 = vmatpush.bf16.msra.mxu0 %v14771_v50  ;;  %11003 = vmatpush.bf16.msra.mxu2 %v16287_v36  ;;  %v14611_v50 = vor.u32 %v17125_v19, %v14608_v57  ;;  %v10648_v46 = vpop.f32.mrf.mxu3  ;;  %v15567_v36 = vor.u32 %v17367_v56, %v15566_v41  ;;  %v14579_v19 = vor.u32 %v17117_v61, %v14576_v10  ;;  %v17531_v57 = vld [vmem:[%s26326_s15 + $0xd34] sm:$0xf0]  ;;  %v17109_v41 = vld [vmem:[%s26326_s15 + $0xc] sm:$0xf]  ;;  %v14544_v56 = vld [vmem:[%s26326_s15 + $0x18] sm:$0xf0] }
 0xb81   :  { %11016 = vmatpush.bf16.msra.mxu1 %v14627_v23  ;;  %v25604_v9 = vpop.f32.mrf.mxu2  ;;  %v16223_v53 = vor.u32 %v17531_v57, %v16222_v60  ;;  %v17201_v46 = vld [vmem:[%s26326_s15 + $0x2ec] sm:$0xf]  ;;  %v16159_v61 = vor.u32 %v17515_v42, %v16158_v44  ;;  %v14547_v40 = vor.u32 %v17109_v41, %v14544_v56  ;;  %v14896_v57 = vld [vmem:[%s26326_s15 + $0x2d8] sm:$0xf0] }
 0xb82   :  { %10942 = vmatpush.bf16.msrb.mxu3 %v15583_v43  ;;  %v17293_v10 = vld [vmem:[%s26326_s15 + $0x5cc] sm:$0xf]  ;;  %v15248_v44 = vld [vmem:[%s26326_s15 + $0x598] sm:$0xf0] }
 0xb83   :  { %v10778_v22 = vpop.f32.mrf.mxu1  ;;  %v14864_v41 = vld [vmem:[%s26326_s15 + $0x298] sm:$0xf0] }
 0xb84   :  { %11029 = vmatpush.bf16.msra.mxu0 %v14755_v49  ;;  %11004 = vmatpush.bf16.msra.mxu2 %v16271_v18  ;;  %v16238_v49 = vld [vmem:[%s26326_s15 + $0xd48] sm:$0xf]  ;;  %v17113_v18 = vld [vmem:[%s26326_s15 + $0x2c] sm:$0xf] }
 0xb85   :  { %11017 = vmatpush.bf16.msra.mxu1 %v14611_v50  ;;  %v16239_v23 = vor.u32 %v17535_v1, %v16238_v49  ;;  %v14563_v43 = vor.u32 %v17113_v18, %v14560_v48  ;;  %v17265_v1 = vld [vmem:[%s26326_s15 + $0x4ec] sm:$0xf] }
 0xb86   :  { %10943 = vmatpush.bf16.msrb.mxu3 %v15567_v36  ;;  %v17281_v22 = vld [vmem:[%s26326_s15 + $0x56c] sm:$0xf] }
 0xb88   :  { %11030 = vmatpush.bf16.msra.mxu0 %v14739_v15  ;;  %11005 = vmatpush.bf16.msra.mxu2 %v16255_v16  ;;  %v10765_v15 = vpop.f32.mrf.mxu0  ;;  %v10685_v50 = vpop.f32.mrf.mxu3  ;;  %v14675_v16 = vor.u32 %v17141_v33, %v14672_v5  ;;  %v17289_v33 = vld [vmem:[%s26326_s15 + $0x5ac] sm:$0xf]  ;;  %v15264_v5 = vld [vmem:[%s26326_s15 + $0x5b8] sm:$0xf0] }
 0xb89   :  { %11018 = vmatpush.bf16.msra.mxu1 %v14595_v58  ;;  %v10686_v47 = vadd.f32 %v10685_v50, %v25263_v37  ;;  %10944 = vmatmul.bf16.vlgmr.msrb.gmra.mxu3 %v24052_v3  ;;  %v14912_v37 = vld [vmem:[%s26326_s15 + $0x2f8] sm:$0xf0]  ;;  %v10752_v60 = vpop.f32.mrf.mxu2  ;;  %v15171_v15 = vor.u32 %v17265_v1, %v15168_v62  ;;  %v17507_v50 = vld [vmem:[%s26326_s15 + $0xc74] sm:$0xf0] }
 0xb8a   :  { %10988 = vmatpush.bf16.msra.mxu3 %v16191_v6  ;;  %v14915_v36 = vor.u32 %v17201_v46, %v14912_v37  ;;  %v16110_v46 = vld [vmem:[%s26326_s15 + $0xc48] sm:$0xf]  ;;  %v17189_v37 = vld [vmem:[%s26326_s15 + $0x28c] sm:$0xf] }
 0xb8b   :  { %v10699_v49 = vadd.f32 %v25489_v32, %v10686_v47  ;;  %v15280_v32 = vld [vmem:[%s26326_s15 + $0x5d8] sm:$0xf0]  ;;  %v17249_v60 = vld [vmem:[%s26326_s15 + $0x46c] sm:$0xf] }
 0xb8c   :  { %11031 = vmatpush.bf16.msra.mxu0 %v14723_v28  ;;  %11006 = vmatpush.bf16.msra.mxu2 %v16239_v23  ;;  %v17297_v28 = vld [vmem:[%s26326_s15 + $0x5ec] sm:$0xf]  ;;  %v17511_v23 = vld [vmem:[%s26326_s15 + $0xc94] sm:$0xf0]  ;;  %v15283_v59 = vor.u32 %v17293_v10, %v15280_v32  ;;  %v16094_v10 = vld [vmem:[%s26326_s15 + $0xc28] sm:$0xf] }
 0xb8d   :  { %11019 = vmatpush.bf16.msra.mxu1 %v14579_v19  ;;  %v15299_v58 = vor.u32 %v17297_v28, %v15296_v31  ;;  %v10712_v6 = vadd.f32 %v25328_v11, %v10699_v49  ;;  %v17197_v19 = vld [vmem:[%s26326_s15 + $0x2cc] sm:$0xf]  ;;  %v15152_v11 = vld [vmem:[%s26326_s15 + $0x4d8] sm:$0xf0]  ;;  %v16143_v48 = vor.u32 %v17511_v23, %v16142_v55  ;;  %v15267_v28 = vor.u32 %v17289_v33, %v15264_v5  ;;  %v17499_v32 = vld [vmem:[%s26326_s15 + $0xc34] sm:$0xf0] }
 0xb8e   :  { %10989 = vmatpush.bf16.msra.mxu3 %v16175_v27  ;;  %v17193_v27 = vld [vmem:[%s26326_s15 + $0x2ac] sm:$0xf]  ;;  %v14848_v23 = vld [vmem:[%s26326_s15 + $0x278] sm:$0xf0] }
 0xb8f   :  { %v17257_v31 = vld [vmem:[%s26326_s15 + $0x4ac] sm:$0xf] }
 0xb90   :  { %11032 = vmatpush.bf16.msra.mxu0 %v14707_v7  ;;  %11007 = vmatpush.bf16.msra.mxu2 %v16223_v53  ;;  %v16207_v7 = vor.u32 %v17527_v4, %v16206_v39  ;;  %v10687_v18 = vpop.f32.mrf.mxu3  ;;  %v14899_v39 = vor.u32 %v17197_v19, %v14896_v57  ;;  %v15155_v53 = vor.u32 %v17261_v26, %v15152_v11  ;;  %v14880_v4 = vld [vmem:[%s26326_s15 + $0x2b8] sm:$0xf0]  ;;  %v17253_v49 = vld [vmem:[%s26326_s15 + $0x48c] sm:$0xf] }
 0xb91   :  { %11020 = vmatpush.bf16.msra.mxu1 %v14563_v43  ;;  %v17285_v43 = vld [vmem:[%s26326_s15 + $0x58c] sm:$0xf]  ;;  %v14883_v42 = vor.u32 %v17193_v27, %v14880_v4  ;;  %v16095_v19 = vor.u32 %v17499_v32, %v16094_v10  ;;  %v16078_v18 = vld [vmem:[%s26326_s15 + $0xc08] sm:$0xf]  ;;  %v15088_v4 = vld [vmem:[%s26326_s15 + $0x458] sm:$0xf0] }
 0xb92   :  { %10990 = vmatpush.bf16.msra.mxu3 %v16159_v61  ;;  %v15251_v56 = vor.u32 %v17285_v43, %v15248_v44  ;;  %v14867_v61 = vor.u32 %v17189_v37, %v14864_v41  ;;  %v17185_v55 = vld [vmem:[%s26326_s15 + $0x26c] sm:$0xf]  ;;  %v15024_v41 = vld [vmem:[%s26326_s15 + $0x3d8] sm:$0xf0] }
 0xb93   :  { %v17277_v57 = vld [vmem:[%s26326_s15 + $0x54c] sm:$0xf]  ;;  %v14851_v11 = vor.u32 %v17185_v55, %v14848_v23  ;;  %v14800_v55 = vld [vmem:[%s26326_s15 + $0x218] sm:$0xf0] }
 0xb94   :  { %11033 = vmatpush.bf16.msra.mxu0 %v14691_v63  ;;  %v25683_v63 = vadd.f32 %v25366_v34, %v10712_v6  ;;  %11008 = vmatpush.bf16.msra.mxu2 %v16207_v7  ;;  %v16126_v34 = vld [vmem:[%s26326_s15 + $0xc68] sm:$0xf]  ;;  %v15232_v7 = vld [vmem:[%s26326_s15 + $0x578] sm:$0xf0]  ;;  %v17181_v33 = vld [vmem:[%s26326_s15 + $0x24c] sm:$0xf] }
 0xb95   :  { %11021 = vmatpush.bf16.msra.mxu1 %v14547_v40  ;;  %v16127_v47 = vor.u32 %v17507_v50, %v16126_v34  ;;  %v15235_v6 = vor.u32 %v17281_v22, %v15232_v7  ;;  %v17233_v34 = vld [vmem:[%s26326_s15 + $0x3ec] sm:$0xf]  ;;  %v15040_v50 = vld [vmem:[%s26326_s15 + $0x3f8] sm:$0xf0] }
 0xb96   :  { %10991 = vmatpush.bf16.msra.mxu3 %v16143_v48  ;;  %v17495_v48 = vld [vmem:[%s26326_s15 + $0xc14] sm:$0xf0]  ;;  %v17245_v27 = vld [vmem:[%s26326_s15 + $0x44c] sm:$0xf]  ;;  %v15043_v44 = vor.u32 %v17233_v34, %v15040_v50  ;;  %v15184_v7 = vld [vmem:[%s26326_s15 + $0x518] sm:$0xf0] }
 0xb97   :  { %16294 = vmatmul.msk.bf16.vlgmr.msra.gmra.mxu2 %vm10451_vm3, %v24583_v0  ;;  %v25771_v26 = vpop.f32.mrf.mxu1  ;;  %v17229_v37 = vld [vmem:[%s26326_s15 + $0x3cc] sm:$0xf]  ;;  %v15680_v34 = vld [vmem:[%s26326_s15 + $0x8f8] sm:$0xf0] }
 0xb98   :  { %11034 = vmatpush.bf16.msra.mxu0 %v14675_v16  ;;  %11040 = vmatpush.bf16.msrb.mxu2 %v14915_v36  ;;  %v17503_v16 = vld [vmem:[%s26326_s15 + $0xc54] sm:$0xf0]  ;;  %v25737_v1 = vpop.f32.mrf.mxu3  ;;  %v25751_v36 = vpop.f32.mrf.mxu0  ;;  %v17269_v22 = vld [vmem:[%s26326_s15 + $0x50c] sm:$0xf] }
 0xb99   :  { %11066 = vmatpush.bf16.msrb.mxu1 %v15171_v15  ;;  %v16111_v62 = vor.u32 %v17503_v16, %v16110_v46  ;;  %v15104_v15 = vld [vmem:[%s26326_s15 + $0x478] sm:$0xf0]  ;;  %v15091_v16 = vor.u32 %v17245_v27, %v15088_v4  ;;  %v17425_v23 = vld [vmem:[%s26326_s15 + $0x9ec] sm:$0xf] }
 0xb9a   :  { %11022 = vmatmul.bf16.vlgmr.msra.gmra.mxu1 %v23594_v54  ;;  %10992 = vmatpush.bf16.msra.mxu3 %v16127_v47  ;;  %v15107_v5 = vor.u32 %v17249_v60, %v15104_v15  ;;  %v15200_v47 = vld [vmem:[%s26326_s15 + $0x538] sm:$0xf0]  ;;  %v17225_v15 = vld [vmem:[%s26326_s15 + $0x3ac] sm:$0xf] }
 0xb9b   :  { %11035 = vmatmul.bf16.vlgmr.msra.gmra.mxu0 %v23605_v51  ;;  %v15136_v51 = vld [vmem:[%s26326_s15 + $0x4b8] sm:$0xf0]  ;;  %v17421_v27 = vld [vmem:[%s26326_s15 + $0x9cc] sm:$0xf] }
 0xb9c   :  { %11079 = vmatpush.bf16.msrb.mxu0 %v15299_v58  ;;  %11041 = vmatpush.bf16.msrb.mxu2 %v14899_v39  ;;  %v15139_v54 = vor.u32 %v17257_v31, %v15136_v51  ;;  %v15120_v58 = vld [vmem:[%s26326_s15 + $0x498] sm:$0xf0]  ;;  %v16079_v31 = vor.u32 %v17495_v48, %v16078_v18  ;;  %v17273_v51 = vld [vmem:[%s26326_s15 + $0x52c] sm:$0xf] }
 0xb9d   :  { %11067 = vmatpush.bf16.msrb.mxu1 %v15155_v53  ;;  %v15123_v40 = vor.u32 %v17253_v49, %v15120_v58  ;;  %v14832_v39 = vld [vmem:[%s26326_s15 + $0x258] sm:$0xf0]  ;;  %v17241_v49 = vld [vmem:[%s26326_s15 + $0x42c] sm:$0xf] }
 0xb9e   :  { %10993 = vmatpush.bf16.msra.mxu3 %v16111_v62  ;;  %v14835_v43 = vor.u32 %v17181_v33, %v14832_v39  ;;  %v15072_v58 = vld [vmem:[%s26326_s15 + $0x438] sm:$0xf0]  ;;  %v25821_v62 = vpop.f32.mrf.mxu2  ;;  %v17237_v18 = vld [vmem:[%s26326_s15 + $0x40c] sm:$0xf]  ;;  %v10738_v33 = vadd.f32 %v25737_v1, %v25683_v63 }
 0xb9f   :  { %v10830_v10 = vpop.f32.mrf.mxu1  ;;  %v15075_v60 = vor.u32 %v17241_v49, %v15072_v58  ;;  %v15056_v48 = vld [vmem:[%s26326_s15 + $0x418] sm:$0xf0]  ;;  %v17393_v39 = vld [vmem:[%s26326_s15 + $0x8ec] sm:$0xf] }
 0xba0   :  { %11080 = vmatpush.bf16.msrb.mxu0 %v15283_v59  ;;  %11042 = vmatpush.bf16.msrb.mxu2 %v14883_v42  ;;  %v15216_v59 = vld [vmem:[%s26326_s15 + $0x558] sm:$0xf0]  ;;  %v17177_v42 = vld [vmem:[%s26326_s15 + $0x22c] sm:$0xf]  ;;  %v10817_v46 = vpop.f32.mrf.mxu0  ;;  %v15059_v4 = vor.u32 %v17237_v18, %v15056_v48 }
 0xba1   :  { %11068 = vmatpush.bf16.msrb.mxu1 %v15139_v54  ;;  %v15219_v53 = vor.u32 %v17277_v57, %v15216_v59  ;;  %v14816_v54 = vld [vmem:[%s26326_s15 + $0x238] sm:$0xf0]  ;;  %v17329_v57 = vld [vmem:[%s26326_s15 + $0x6ec] sm:$0xf]  ;;  %v15187_v59 = vor.u32 %v17269_v22, %v15184_v7 }
 0xba2   :  { %10994 = vmatpush.bf16.msra.mxu3 %v16095_v19  ;;  %v14819_v32 = vor.u32 %v17177_v42, %v14816_v54  ;;  %v15008_v19 = vld [vmem:[%s26326_s15 + $0x3b8] sm:$0xf0]  ;;  %v17217_v49 = vld [vmem:[%s26326_s15 + $0x36c] sm:$0xf] }
 0xba3   :  { %v15792_v63 = vld [vmem:[%s26326_s15 + $0x9d8] sm:$0xf0]  ;;  %v17321_v7 = vld [vmem:[%s26326_s15 + $0x6ac] sm:$0xf] }
 0xba4   :  { %11081 = vmatpush.bf16.msrb.mxu0 %v15267_v28  ;;  %11043 = vmatpush.bf16.msrb.mxu2 %v14867_v61  ;;  %v10739_v28 = vpop.f32.mrf.mxu3  ;;  %v17173_v61 = vld [vmem:[%s26326_s15 + $0x20c] sm:$0xf]  ;;  %v15795_v46 = vor.u32 %v17421_v27, %v15792_v63  ;;  %v15664_v54 = vld [vmem:[%s26326_s15 + $0x8d8] sm:$0xf0] }
 0xba5   :  { %11069 = vmatpush.bf16.msrb.mxu1 %v15123_v40  ;;  %v15027_v40 = vor.u32 %v17229_v37, %v15024_v41  ;;  %v14803_v50 = vor.u32 %v17173_v61, %v14800_v55  ;;  %v17221_v28 = vld [vmem:[%s26326_s15 + $0x38c] sm:$0xf]  ;;  %v14976_v58 = vld [vmem:[%s26326_s15 + $0x378] sm:$0xf0] }
 0xba6   :  { %10995 = vmatpush.bf16.msra.mxu3 %v16079_v31  ;;  %v14992_v31 = vld [vmem:[%s26326_s15 + $0x398] sm:$0xf0]  ;;  %v10804_v42 = vpop.f32.mrf.mxu2  ;;  %v17417_v41 = vld [vmem:[%s26326_s15 + $0x9ac] sm:$0xf]  ;;  %v14979_v55 = vor.u32 %v17217_v49, %v14976_v58 }
 0xba7   :  { %v14995_v37 = vor.u32 %v17221_v28, %v14992_v31  ;;  %v15392_v61 = vld [vmem:[%s26326_s15 + $0x6b8] sm:$0xf0] }
 0xba8   :  { %11082 = vmatpush.bf16.msrb.mxu0 %v15251_v56  ;;  %11044 = vmatpush.bf16.msrb.mxu2 %v14851_v11  ;;  %v15203_v56 = vor.u32 %v17273_v51, %v15200_v47  ;;  %v15424_v11 = vld [vmem:[%s26326_s15 + $0x6f8] sm:$0xf0]  ;;  %v15683_v51 = vor.u32 %v17393_v39, %v15680_v34  ;;  %v17325_v47 = vld [vmem:[%s26326_s15 + $0x6cc] sm:$0xf] }
 0xba9   :  { %11070 = vmatpush.bf16.msrb.mxu1 %v15107_v5  ;;  %10996 = vmatmul.bf16.vlgmr.msra.gmra.mxu3 %v24477_v35  ;;  %v15427_v1 = vor.u32 %v17329_v57, %v15424_v11  ;;  %v17381_v11 = vld [vmem:[%s26326_s15 + $0x88c] sm:$0xf]  ;;  %v15632_v18 = vld [vmem:[%s26326_s15 + $0x898] sm:$0xf0] }
 0xbaa   :  { %11053 = vmatpush.bf16.msrb.mxu3 %v15043_v44  ;;  %v10751_v44 = vadd.f32 %v25604_v9, %v10738_v33  ;;  %v15776_v9 = vld [vmem:[%s26326_s15 + $0x9b8] sm:$0xf0]  ;;  %v15635_v63 = vor.u32 %v17381_v11, %v15632_v18  ;;  %v17397_v18 = vld [vmem:[%s26326_s15 + $0x90c] sm:$0xf] }
 0xbab   :  { %v15779_v10 = vor.u32 %v17417_v41, %v15776_v9  ;;  %v17309_v41 = vld [vmem:[%s26326_s15 + $0x64c] sm:$0xf]  ;;  %v15552_v49 = vld [vmem:[%s26326_s15 + $0x7f8] sm:$0xf0] }
 0xbac   :  { %11083 = vmatpush.bf16.msrb.mxu0 %v15235_v6  ;;  %11045 = vmatpush.bf16.msrb.mxu2 %v14835_v43  ;;  %v15808_v6 = vld [vmem:[%s26326_s15 + $0x9f8] sm:$0xf0]  ;;  %v10789_v48 = vpop.f32.mrf.mxu3 }
 0xbad   :  { %11071 = vmatpush.bf16.msrb.mxu1 %v15091_v16  ;;  %v15811_v5 = vor.u32 %v17425_v23, %v15808_v6  ;;  %v15408_v43 = vld [vmem:[%s26326_s15 + $0x6d8] sm:$0xf0]  ;;  %v17389_v16 = vld [vmem:[%s26326_s15 + $0x8cc] sm:$0xf]  ;;  %v15395_v23 = vor.u32 %v17321_v7, %v15392_v61 }
 0xbae   :  { %11054 = vmatpush.bf16.msrb.mxu3 %v15027_v40  ;;  %v15667_v22 = vor.u32 %v17389_v16, %v15664_v54  ;;  %v15648_v40 = vld [vmem:[%s26326_s15 + $0x8b8] sm:$0xf0]  ;;  %v17213_v6 = vld [vmem:[%s26326_s15 + $0x34c] sm:$0xf] }
 0xbaf   :  { %v17205_v54 = vld [vmem:[%s26326_s15 + $0x30c] sm:$0xf]  ;;  %v15600_v61 = vld [vmem:[%s26326_s15 + $0x858] sm:$0xf0] }
 0xbb0   :  { %11084 = vmatpush.bf16.msrb.mxu0 %v15219_v53  ;;  %11046 = vmatpush.bf16.msrb.mxu2 %v14819_v32  ;;  %v15011_v53 = vor.u32 %v17225_v15, %v15008_v19  ;;  %v10764_v32 = vadd.f32 %v25540_v21, %v10751_v44  ;;  %v15760_v21 = vld [vmem:[%s26326_s15 + $0x998] sm:$0xf0]  ;;  %v17317_v15 = vld [vmem:[%s26326_s15 + $0x68c] sm:$0xf] }
 0xbb1   :  { %11072 = vmatpush.bf16.msrb.mxu1 %v15075_v60  ;;  %v14960_v60 = vld [vmem:[%s26326_s15 + $0x358] sm:$0xf0]  ;;  %v17405_v44 = vld [vmem:[%s26326_s15 + $0x94c] sm:$0xf] }
 0xbb2   :  { %11055 = vmatpush.bf16.msrb.mxu3 %v15011_v53  ;;  %v15376_v19 = vld [vmem:[%s26326_s15 + $0x698] sm:$0xf0]  ;;  %v10777_v57 = vadd.f32 %v25590_v12, %v10764_v32  ;;  %v14963_v33 = vor.u32 %v17213_v6, %v14960_v60  ;;  %v17373_v7 = vld [vmem:[%s26326_s15 + $0x84c] sm:$0xf] }
 0xbb3   :  { %v15744_v12 = vld [vmem:[%s26326_s15 + $0x978] sm:$0xf0]  ;;  %v15379_v34 = vor.u32 %v17317_v15, %v15376_v19  ;;  %v15603_v60 = vor.u32 %v17373_v7, %v15600_v61  ;;  %v17690_v19 = vld [vmem:[%s26332_s26 + $0x8] sm:$0xff] }
 0xbb4   :  { %11085 = vmatpush.bf16.msrb.mxu0 %v15203_v56  ;;  %11047 = vmatpush.bf16.msrb.mxu2 %v14803_v50  ;;  %v15411_v56 = vor.u32 %v17325_v47, %v15408_v43  ;;  %v10790_v39 = vadd.f32 %v10789_v48, %v10777_v57  ;;  %v17209_v50 = vld [vmem:[%s26326_s15 + $0x32c] sm:$0xf]  ;;  %v14944_v53 = vld [vmem:[%s26326_s15 + $0x338] sm:$0xf0] }
 0xbb5   :  { %11073 = vmatpush.bf16.msrb.mxu1 %v15059_v4  ;;  %v15360_v4 = vld [vmem:[%s26326_s15 + $0x678] sm:$0xf0]  ;;  %v14947_v43 = vor.u32 %v17209_v50, %v14944_v53  ;;  %v17517_v61 = vld [vmem:[%s26326_s15 + $0xccc] sm:$0xf] }
 0xbb6   :  { %11056 = vmatpush.bf16.msrb.mxu3 %v14995_v37  ;;  %v10803_v28 = vadd.f32 %v25821_v62, %v10790_v39  ;;  %v15616_v47 = vld [vmem:[%s26326_s15 + $0x878] sm:$0xf0] }
 0xbb7   :  { %11048 = vmatmul.bf16.vlgmr.msrb.gmra.mxu2 %v23608_v52  ;;  %v17413_v52 = vld [vmem:[%s26326_s15 + $0x98c] sm:$0xf]  ;;  %v15728_v62 = vld [vmem:[%s26326_s15 + $0x958] sm:$0xf0] }
 0xbb8   :  { %11086 = vmatpush.bf16.msrb.mxu0 %v15187_v59  ;;  %11092 = vmatpush.bf16.msra.mxu2 %v15427_v1  ;;  %v15763_v59 = vor.u32 %v17413_v52, %v15760_v21  ;;  %v25958_v27 = vpop.f32.mrf.mxu0  ;;  %v17313_v1 = vld [vmem:[%s26326_s15 + $0x66c] sm:$0xf]  ;;  %v10816_v42 = vadd.f32 %v25751_v36, %v10803_v28  ;;  %v14928_v37 = vld [vmem:[%s26326_s15 + $0x318] sm:$0xf0] }
 0xbb9   :  { %11118 = vmatpush.bf16.msra.mxu1 %v15683_v51  ;;  %v17377_v51 = vld [vmem:[%s26326_s15 + $0x86c] sm:$0xf]  ;;  %v15363_v16 = vor.u32 %v17313_v1, %v15360_v4  ;;  %v15344_v36 = vld [vmem:[%s26326_s15 + $0x658] sm:$0xf0]  ;;  %v14931_v32 = vor.u32 %v17205_v54, %v14928_v37 }
 0xbba   :  { %11074 = vmatmul.bf16.vlgmr.msrb.gmra.mxu1 %v23834_v29  ;;  %11057 = vmatpush.bf16.msrb.mxu3 %v14979_v55  ;;  %v15619_v9 = vor.u32 %v17377_v51, %v15616_v47  ;;  %v10829_v58 = vadd.f32 %v25771_v26, %v10816_v42  ;;  %v15712_v26 = vld [vmem:[%s26326_s15 + $0x938] sm:$0xf0]  ;;  %v15347_v55 = vor.u32 %v17309_v41, %v15344_v36  ;;  %v17305_v21 = vld [vmem:[%s26326_s15 + $0x62c] sm:$0xf] }
 0xbbb   :  { %11087 = vmatmul.bf16.vlgmr.msrb.gmra.mxu0 %v23836_v17  ;;  %v17385_v17 = vld [vmem:[%s26326_s15 + $0x8ac] sm:$0xf]  ;;  %v15536_v15 = vld [vmem:[%s26326_s15 + $0x7d8] sm:$0xf0] }
 0xbbc   :  { %11131 = vmatpush.bf16.msra.mxu0 %v15811_v5  ;;  %11093 = vmatpush.bf16.msra.mxu2 %v15411_v56  ;;  %v15651_v29 = vor.u32 %v17385_v17, %v15648_v40  ;;  %v17409_v5 = vld [vmem:[%s26326_s15 + $0x96c] sm:$0xf]  ;;  %v11197_v40 = vadd.f32 %v10829_v58, %v20869_v25  ;;  %v15584_v11 = vld [vmem:[%s26326_s15 + $0x838] sm:$0xf0] }
 0xbbd   :  { %11119 = vmatpush.bf16.msra.mxu1 %v15667_v22  ;;  %v15747_v31 = vor.u32 %v17409_v5, %v15744_v12  ;;  %v17361_v56 = vld [vmem:[%s26326_s15 + $0x7ec] sm:$0xf]  ;;  %v15731_v22 = vor.u32 %v17405_v44, %v15728_v62  ;;  %v15696_v48 = vld [vmem:[%s26326_s15 + $0x918] sm:$0xf0] }
 0xbbe   :  { %11058 = vmatpush.bf16.msrb.mxu3 %v14963_v33  ;;  %v17401_v17 = vld [vmem:[%s26326_s15 + $0x92c] sm:$0xf]  ;;  %v15555_v52 = vor.u32 %v17361_v56, %v15552_v49  ;;  %v26042_v33 = vpop.f32.mrf.mxu2  ;;  %v15312_v50 = vld [vmem:[%s26326_s15 + $0x618] sm:$0xf0] }
 0xbbf   :  { %v17357_v25 = vld [vmem:[%s26326_s15 + $0x7cc] sm:$0xf]  ;;  %v15715_v57 = vor.u32 %v17401_v17, %v15712_v26  ;;  %v15520_v4 = vld [vmem:[%s26326_s15 + $0x7b8] sm:$0xf0] }
 0xbc0   :  { %11132 = vmatpush.bf16.msra.mxu0 %v15795_v46  ;;  %11094 = vmatpush.bf16.msra.mxu2 %v15395_v23  ;;  %v25980_v46 = vpop.f32.mrf.mxu1  ;;  %v9566_v23 = vunpack.c.h.b16 %v25409_v45  ;;  %v10882_v6 = vpop.f32.mrf.mxu0  ;;  %v11201_v45 = vadd.f32 %v17690_v19, %v11197_v40  ;;  %v15539_v39 = vor.u32 %v17357_v25, %v15536_v15  ;;  %v17353_v1 = vld [vmem:[%s26326_s15 + $0x7ac] sm:$0xf]  ;;  %v15936_v51 = vld [vmem:[%s26326_s15 + $0xaf8] sm:$0xf0] }
 0xbc1   :  { %11120 = vmatpush.bf16.msra.mxu1 %v15651_v29  ;;  %v15328_v29 = vld [vmem:[%s26326_s15 + $0x638] sm:$0xf0]  ;;  %v17457_v28 = vld [vmem:[%s26326_s15 + $0xaec] sm:$0xf] }
 0xbc2   :  { %11059 = vmatpush.bf16.msrb.mxu3 %v14947_v43  ;;  %11205 = vst [vmem:[#allocation2 + $0x8] sm:$0xff] %v11201_v45  ;;  %v15331_v12 = vor.u32 %v17305_v21, %v15328_v29  ;;  %v10010_v53 = vpack.c.b16 %v9566_v23, %v9566_v23  ;;  %v17365_v47 = vld [vmem:[%s26326_s15 + $0x80c] sm:$0xf]  ;;  %v15568_v43 = vld [vmem:[%s26326_s15 + $0x818] sm:$0xf0]  ;;  %v15939_v41 = vor.u32 %v17457_v28, %v15936_v51 }
 0xbc3   :  { %v17521_v44 = vld [vmem:[%s26326_s15 + $0xcec] sm:$0xf]  ;;  %v16288_v37 = vld [vmem:[%s26326_s15 + $0xdb8] sm:$0xf0] }
 0xbc4   :  { %11133 = vmatpush.bf16.msra.mxu0 %v15779_v10  ;;  %11095 = vmatpush.bf16.msra.mxu2 %v15379_v34  ;;  %v10791_v10 = vpop.f32.mrf.mxu3  ;;  %v17301_v34 = vld [vmem:[%s26326_s15 + $0x60c] sm:$0xf]  ;;  %v10466_v42 = vsel %vm10455_vm2, %v10010_v53, 0  ;;  %v15504_v56 = vld [vmem:[%s26326_s15 + $0x798] sm:$0xf0] }
 0xbc5   :  { %11121 = vmatpush.bf16.msra.mxu1 %v15635_v63  ;;  %v15315_v62 = vor.u32 %v17301_v34, %v15312_v50  ;;  %v17545_v54 = vld [vmem:[%s26326_s15 + $0xdac] sm:$0xf]  ;;  %v16176_v10 = vld [vmem:[%s26326_s15 + $0xcd8] sm:$0xf0] }
 0xbc6   :  { %11060 = vmatpush.bf16.msrb.mxu3 %v14931_v32  ;;  %v17349_v36 = vld [vmem:[%s26326_s15 + $0x78c] sm:$0xf]  ;;  %v16291_v7 = vor.u32 %v17545_v54, %v16288_v37  ;;  %v10856_v32 = vpop.f32.mrf.mxu2  ;;  %v16272_v40 = vld [vmem:[%s26326_s15 + $0xd98] sm:$0xf0]  ;;  %v16179_v23 = vor.u32 %v17517_v61, %v16176_v10 }
 0xbc7   :  { %v17453_v58 = vld [vmem:[%s26326_s15 + $0xacc] sm:$0xf]  ;;  %v15507_v17 = vor.u32 %v17349_v36, %v15504_v56  ;;  %v15488_v21 = vld [vmem:[%s26326_s15 + $0x778] sm:$0xf0] }
 0xbc8   :  { %11134 = vmatpush.bf16.msra.mxu0 %v15763_v59  ;;  %11096 = vmatpush.bf16.msra.mxu2 %v15363_v16  ;;  %v17369_v59 = vld [vmem:[%s26326_s15 + $0x82c] sm:$0xf]  ;;  %v10869_v5 = vpop.f32.mrf.mxu1  ;;  %v15523_v16 = vor.u32 %v17353_v1, %v15520_v4  ;;  %v16144_v34 = vld [vmem:[%s26326_s15 + $0xc98] sm:$0xf0] }
 0xbc9   :  { %11122 = vmatpush.bf16.msra.mxu1 %v15619_v9  ;;  %v15587_v63 = vor.u32 %v17369_v59, %v15584_v11  ;;  %11061 = vmatmul.bf16.vlgmr.msrb.gmra.mxu3 %v23648_v30  ;;  %v16192_v30 = vld [vmem:[%s26326_s15 + $0xcf8] sm:$0xf0]  ;;  %v15571_v9 = vor.u32 %v17365_v47, %v15568_v43  ;;  %v17541_v26 = vld [vmem:[%s26326_s15 + $0xd8c] sm:$0xf] }
 0xbca   :  { %11105 = vmatpush.bf16.msra.mxu3 %v15555_v52  ;;  %v16195_v49 = vor.u32 %v17521_v44, %v16192_v30  ;;  %v17345_v52 = vld [vmem:[%s26326_s15 + $0x76c] sm:$0xf]  ;;  %v16275_v29 = vor.u32 %v17541_v26, %v16272_v40  ;;  %v15472_v59 = vld [vmem:[%s26326_s15 + $0x758] sm:$0xf0] }
 0xbcb   :  { %v17449_v6 = vld [vmem:[%s26326_s15 + $0xaac] sm:$0xf]  ;;  %v15491_v15 = vor.u32 %v17345_v52, %v15488_v21  ;;  %v15888_v5 = vld [vmem:[%s26326_s15 + $0xa98] sm:$0xf0] }
 0xbcc   :  { %11135 = vmatpush.bf16.msra.mxu0 %v15747_v31  ;;  %11097 = vmatpush.bf16.msra.mxu2 %v15347_v55  ;;  %v15699_v31 = vor.u32 %v17397_v18, %v15696_v48  ;;  %v17513_v25 = vld [vmem:[%s26326_s15 + $0xcac] sm:$0xf]  ;;  %v10841_v1 = vpop.f32.mrf.mxu3  ;;  %v15872_v30 = vld [vmem:[%s26326_s15 + $0xa78] sm:$0xf0] }
 0xbcd   :  { %11123 = vmatpush.bf16.msra.mxu1 %v15603_v60  ;;  %v15904_v60 = vld [vmem:[%s26326_s15 + $0xab8] sm:$0xf0]  ;;  %v17537_v19 = vld [vmem:[%s26326_s15 + $0xd6c] sm:$0xf] }
 0xbce   :  { %11106 = vmatpush.bf16.msra.mxu3 %v15539_v39  ;;  %v15907_v45 = vor.u32 %v17449_v6, %v15904_v60  ;;  %v17445_v48 = vld [vmem:[%s26326_s15 + $0xa8c] sm:$0xf]  ;;  %v16064_v10 = vld [vmem:[%s26326_s15 + $0xbf8] sm:$0xf0] }
 0xbcf   :  { %v17509_v39 = vld [vmem:[%s26326_s15 + $0xc8c] sm:$0xf]  ;;  %v15891_v4 = vor.u32 %v17445_v48, %v15888_v5  ;;  %v16112_v40 = vld [vmem:[%s26326_s15 + $0xc58] sm:$0xf0] }
 0xbd0   :  { %11136 = vmatpush.bf16.msra.mxu0 %v15731_v22  ;;  %11098 = vmatpush.bf16.msra.mxu2 %v15331_v12  ;;  %v15920_v22 = vld [vmem:[%s26326_s15 + $0xad8] sm:$0xf0]  ;;  %v17533_v53 = vld [vmem:[%s26326_s15 + $0xd4c] sm:$0xf]  ;;  %v16147_v43 = vor.u32 %v17509_v39, %v16144_v34 }
 0xbd1   :  { %11124 = vmatpush.bf16.msra.mxu1 %v15587_v63  ;;  %v15923_v55 = vor.u32 %v17453_v58, %v15920_v22  ;;  %v16240_v63 = vld [vmem:[%s26326_s15 + $0xd58] sm:$0xf0]  ;;  %v17337_v28 = vld [vmem:[%s26326_s15 + $0x72c] sm:$0xf] }
 0xbd2   :  { %11107 = vmatpush.bf16.msra.mxu3 %v15523_v16  ;;  %v17441_v44 = vld [vmem:[%s26326_s15 + $0xa6c] sm:$0xf]  ;;  %v16128_v16 = vld [vmem:[%s26326_s15 + $0xc78] sm:$0xf0] }
 0xbd3   :  { %v15875_v36 = vor.u32 %v17441_v44, %v15872_v30  ;;  %v17333_v56 = vld [vmem:[%s26326_s15 + $0x70c] sm:$0xf]  ;;  %v15824_v39 = vld [vmem:[%s26326_s15 + $0xa18] sm:$0xf0] }
 0xbd4   :  { %11137 = vmatpush.bf16.msra.mxu0 %v15715_v57  ;;  %11099 = vmatpush.bf16.msra.mxu2 %v15315_v62  ;;  %v17341_v57 = vld [vmem:[%s26326_s15 + $0x74c] sm:$0xf]  ;;  %v16243_v62 = vor.u32 %v17533_v53, %v16240_v63  ;;  %v16080_v63 = vld [vmem:[%s26326_s15 + $0xc18] sm:$0xf0] }
 0xbd5   :  { %11125 = vmatpush.bf16.msra.mxu1 %v15571_v9  ;;  %v15475_v50 = vor.u32 %v17341_v57, %v15472_v59  ;;  %v16224_v9 = vld [vmem:[%s26326_s15 + $0xd38] sm:$0xf0]  ;;  %v17489_v61 = vld [vmem:[%s26326_s15 + $0xbec] sm:$0xf] }
 0xbd6   :  { %11108 = vmatpush.bf16.msra.mxu3 %v15507_v17  ;;  %v17501_v26 = vld [vmem:[%s26326_s15 + $0xc4c] sm:$0xf]  ;;  %v16067_v60 = vor.u32 %v17489_v61, %v16064_v10  ;;  %v16096_v57 = vld [vmem:[%s26326_s15 + $0xc38] sm:$0xf0] }
 0xbd7   :  { %11100 = vmatmul.bf16.vlgmr.msra.gmra.mxu2 %v23848_v8  ;;  %v16256_v8 = vld [vmem:[%s26326_s15 + $0xd78] sm:$0xf0]  ;;  %v26199_v58 = vpop.f32.mrf.mxu1  ;;  %v17525_v52 = vld [vmem:[%s26326_s15 + $0xd0c] sm:$0xf] }
 0xbd8   :  { %11138 = vmatpush.bf16.msra.mxu0 %v15699_v31  ;;  %11144 = vmatpush.bf16.msrb.mxu2 %v15939_v41  ;;  %v16259_v12 = vor.u32 %v17537_v19, %v16256_v8  ;;  %v15456_v31 = vld [vmem:[%s26326_s15 + $0x738] sm:$0xf0]  ;;  %v26169_v47 = vpop.f32.mrf.mxu0  ;;  %v17529_v41 = vld [vmem:[%s26326_s15 + $0xd2c] sm:$0xf] }
 0xbd9   :  { %11170 = vmatpush.bf16.msrb.mxu1 %v16195_v49  ;;  %v15459_v37 = vor.u32 %v17337_v28, %v15456_v31  ;;  %v17437_v49 = vld [vmem:[%s26326_s15 + $0xa4c] sm:$0xf]  ;;  %v16227_v17 = vor.u32 %v17529_v41, %v16224_v9  ;;  %v16016_v31 = vld [vmem:[%s26326_s15 + $0xb98] sm:$0xf0] }
 0xbda   :  { %11126 = vmatmul.bf16.vlgmr.msra.gmra.mxu1 %v24052_v3  ;;  %v26142_v3 = vld [vmem:[%s26327_s16] sm:$0xf]  ;;  %11109 = vmatpush.bf16.msra.mxu3 %v15491_v15  ;;  %v15840_v15 = vld [vmem:[%s26326_s15 + $0xa38] sm:$0xf0]  ;;  %v17485_v19 = vld [vmem:[%s26326_s15 + $0xbcc] sm:$0xf] }
 0xbdb   :  { %11139 = vmatmul.bf16.vlgmr.msra.gmra.mxu0 %v24060_v38  ;;  %v16160_v38 = vld [vmem:[%s26326_s15 + $0xcb8] sm:$0xf0]  ;;  %v8235_v11 = vperm.slane %v26142_v3, 2  ;;  %v17481_v34 = vld [vmem:[%s26326_s15 + $0xbac] sm:$0xf] }
 0xbdc   :  { %11184 = vmatpush.bf16.msrb.mxu0 %v10466_v42  ;;  %11145 = vmatpush.bf16.msrb.mxu2 %v15923_v55  ;;  %v16163_v18 = vor.u32 %v17513_v25, %v16160_v38  ;;  %v17505_v42 = vld [vmem:[%s26326_s15 + $0xc6c] sm:$0xf]  ;;  %v16115_v38 = vor.u32 %v17501_v26, %v16112_v40 }
 0xbdd   :  { %11171 = vmatpush.bf16.msrb.mxu1 %v16179_v23  ;;  %v10842_v51 = vadd.f32 %v10841_v1, %v8235_v11  ;;  %v16131_v22 = vor.u32 %v17505_v42, %v16128_v16  ;;  %v10843_v23 = vpop.f32.mrf.mxu3  ;;  %v17493_v53 = vld [vmem:[%s26326_s15 + $0xc0c] sm:$0xf]  ;;  %v15984_v42 = vld [vmem:[%s26326_s15 + $0xb58] sm:$0xf0] }
 0xbde   :  { %11110 = vmatpush.bf16.msra.mxu3 %v15475_v50  ;;  %v10906_v48 = vpop.f32.mrf.mxu2  ;;  %v16032_v50 = vld [vmem:[%s26326_s15 + $0xbb8] sm:$0xf0]  ;;  %v16083_v28 = vor.u32 %v17493_v53, %v16080_v63  ;;  %v17473_v44 = vld [vmem:[%s26326_s15 + $0xb6c] sm:$0xf] }
 0xbdf   :  { %v10855_v54 = vadd.f32 %v26042_v33, %v10842_v51  ;;  %v15440_v33 = vld [vmem:[%s26326_s15 + $0x718] sm:$0xf0]  ;;  %v10921_v5 = vpop.f32.mrf.mxu1 }
 0xbe0   :  { %11185 = vmatpush.bf16.msrb.mxu0 %v16291_v7  ;;  %11146 = vmatpush.bf16.msrb.mxu2 %v15907_v45  ;;  %v15856_v7 = vld [vmem:[%s26326_s15 + $0xa58] sm:$0xf0]  ;;  %v15443_v55 = vor.u32 %v17333_v56, %v15440_v33  ;;  %v10934_v25 = vpop.f32.mrf.mxu0  ;;  %v17497_v45 = vld [vmem:[%s26326_s15 + $0xc2c] sm:$0xf] }
 0xbe1   :  { %11172 = vmatpush.bf16.msrb.mxu1 %v16163_v18  ;;  %v10868_v32 = vadd.f32 %v25980_v46, %v10855_v54  ;;  %v16208_v46 = vld [vmem:[%s26326_s15 + $0xd18] sm:$0xf0]  ;;  %v15859_v6 = vor.u32 %v17437_v49, %v15856_v7  ;;  %v17429_v18 = vld [vmem:[%s26326_s15 + $0xa0c] sm:$0xf] }
 0xbe2   :  { %11111 = vmatpush.bf16.msra.mxu3 %v15459_v37  ;;  %v16211_v8 = vor.u32 %v17525_v52, %v16208_v46  ;;  %v15827_v1 = vor.u32 %v17429_v18, %v15824_v39  ;;  %v17465_v37 = vld [vmem:[%s26326_s15 + $0xb2c] sm:$0xf]  ;;  %v15952_v33 = vld [vmem:[%s26326_s15 + $0xb18] sm:$0xf0]  ;;  %v8236_v52 = vperm.slane %v26142_v3, 3 }
 0xbe3   :  { %v10881_v21 = vadd.f32 %v25958_v27, %v10868_v32  ;;  %v16048_v27 = vld [vmem:[%s26326_s15 + $0xbd8] sm:$0xf0]  ;;  %v17461_v56 = vld [vmem:[%s26326_s15 + $0xb0c] sm:$0xf] }
 0xbe4   :  { %11186 = vmatpush.bf16.msrb.mxu0 %v16275_v29  ;;  %11147 = vmatpush.bf16.msrb.mxu2 %v15891_v4  ;;  %v17433_v29 = vld [vmem:[%s26326_s15 + $0xa2c] sm:$0xf]  ;;  %v16051_v11 = vor.u32 %v17485_v19, %v16048_v27  ;;  %v16035_v4 = vor.u32 %v17481_v34, %v16032_v50  ;;  %v15955_v7 = vor.u32 %v17461_v56, %v15952_v33 }
 0xbe5   :  { %11173 = vmatpush.bf16.msrb.mxu1 %v16147_v43  ;;  %v15843_v59 = vor.u32 %v17433_v29, %v15840_v15 }
 0xbe6   :  { %11112 = vmatpush.bf16.msra.mxu3 %v15443_v55  ;;  %v10908_v43 = vpop.f32.mrf.mxu2 }
 0xbe8   :  { %11187 = vmatpush.bf16.msrb.mxu0 %v16259_v12  ;;  %11148 = vmatpush.bf16.msrb.mxu2 %v15875_v36  ;;  %v16099_v12 = vor.u32 %v17497_v45, %v16096_v57 }
 0xbe9   :  { %11174 = vmatpush.bf16.msrb.mxu1 %v16131_v22  ;;  %11113 = vmatmul.bf16.vlgmr.msra.gmra.mxu3 %v23878_v13  ;;  %v17477_v13 = vld [vmem:[%s26326_s15 + $0xb8c] sm:$0xf] }
 0xbea   :  { %11157 = vmatpush.bf16.msrb.mxu3 %v16067_v60  ;;  %v16019_v51 = vor.u32 %v17477_v13, %v16016_v31 }
 0xbec   :  { %11188 = vmatpush.bf16.msrb.mxu0 %v16243_v62  ;;  %11149 = vmatpush.bf16.msrb.mxu2 %v15859_v6  ;;  %v17469_v62 = vld [vmem:[%s26326_s15 + $0xb4c] sm:$0xf]  ;;  %v10893_v54 = vpop.f32.mrf.mxu3 }
 0xbed   :  { %11175 = vmatpush.bf16.msrb.mxu1 %v16115_v38  ;;  %v15987_v16 = vor.u32 %v17469_v62, %v15984_v42 }
 0xbee   :  { %11158 = vmatpush.bf16.msrb.mxu3 %v16051_v11  ;;  %v17692_v11 = vld [vmem:[%s26332_s26 + $0x10] sm:$0xff] }
 0xbf0   :  { %11189 = vmatpush.bf16.msrb.mxu0 %v16227_v17  ;;  %11150 = vmatpush.bf16.msrb.mxu2 %v15843_v59 }
 0xbf1   :  { %11176 = vmatpush.bf16.msrb.mxu1 %v16099_v12 }
 0xbf2   :  { %11159 = vmatpush.bf16.msrb.mxu3 %v16035_v4 }
 0xbf4   :  { %11190 = vmatpush.bf16.msrb.mxu0 %v16211_v8  ;;  %11151 = vmatpush.bf16.msrb.mxu2 %v15827_v1  ;;  %v10895_v10 = vpop.f32.mrf.mxu3 }
 0xbf5   :  { %11177 = vmatpush.bf16.msrb.mxu1 %v16083_v28 }
 0xbf6   :  { %11160 = vmatpush.bf16.msrb.mxu3 %v16019_v51 }
 0xbf7   :  { %16295 = vmatmul.msk.bf16.vlgmr.msrb.gmra.mxu0 %vm10451_vm3, %v24583_v0  ;;  %v16000_v0 = vld [vmem:[%s26326_s15 + $0xb78] sm:$0xf0]  ;;  %11152 = vmatmul.bf16.vlgmr.msrb.gmra.mxu2 %v24091_v14  ;;  %v10971_v49 = vpop.f32.mrf.mxu1 }
 0xbf8   :  { %11178 = vmatmul.bf16.vlgmr.msrb.gmra.mxu1 %v24477_v35  ;;  %v16003_v30 = vor.u32 %v17473_v44, %v16000_v0  ;;  %v15968_v14 = vld [vmem:[%s26326_s15 + $0xb38] sm:$0xf0]  ;;  %v10894_v35 = vadd.f32 %v10893_v54, %v10881_v21  ;;  %v10984_v41 = vpop.f32.mrf.mxu0 }
 0xbf9   :  { %v15971_v36 = vor.u32 %v17465_v37, %v15968_v14 }
 0xbfa   :  { %11161 = vmatpush.bf16.msrb.mxu3 %v16003_v30  ;;  %v10907_v9 = vadd.f32 %v10906_v48, %v10894_v35 }
 0xbfc   :  { %v10920_v22 = vadd.f32 %v26199_v58, %v10907_v9 }
 0xbfe   :  { %11162 = vmatpush.bf16.msrb.mxu3 %v15987_v16  ;;  %v10933_v61 = vadd.f32 %v26169_v47, %v10920_v22  ;;  %v10958_v17 = vpop.f32.mrf.mxu2 }
 0xbff   :  { %v10973_v26 = vpop.f32.mrf.mxu1 }
 0xc00   :  { %v10986_v32 = vpop.f32.mrf.mxu0 }
 0xc01   :  { %v17693_v32 = vld [vmem:[%s26332_s26 + $0x18] sm:$0xff] }
 0xc02   :  { %11163 = vmatpush.bf16.msrb.mxu3 %v15971_v36 }
 0xc06   :  { %11164 = vmatpush.bf16.msrb.mxu3 %v15955_v7  ;;  %v10960_v40 = vpop.f32.mrf.mxu2 }
 0xc09   :  { %11165 = vmatmul.bf16.vlgmr.msrb.gmra.mxu3 %v24290_v24 }
 0xc0c   :  { %v10945_v55 = vpop.f32.mrf.mxu3 }
 0xc0d   :  { %v10946_v47 = vadd.f32 %v10945_v55, %v10933_v61 }
 0xc0f   :  { %v10959_v15 = vadd.f32 %v10958_v17, %v10946_v47 }
 0xc11   :  { %v10972_v19 = vadd.f32 %v10971_v49, %v10959_v15 }
 0xc13   :  { %v10985_v27 = vadd.f32 %v10984_v41, %v10972_v19 }
 0xc14   :  { %v10947_v58 = vpop.f32.mrf.mxu3 }
 0xc17   :  { %v11023_v21 = vpop.f32.mrf.mxu1 }
 0xc18   :  { %v11036_v46 = vpop.f32.mrf.mxu0  ;;  %v11024_v23 = vadd.f32 %v11023_v21, %v8236_v52 }
 0xc1a   :  { %v11037_v6 = vadd.f32 %v11036_v46, %v11024_v23  ;;  %v11010_v60 = vpop.f32.mrf.mxu2 }
 0xc1f   :  { %v11025_v25 = vpop.f32.mrf.mxu1 }
 0xc20   :  { %v11038_v29 = vpop.f32.mrf.mxu0 }
 0xc22   :  { %v11012_v38 = vpop.f32.mrf.mxu2 }
 0xc2c   :  { %v10997_v8 = vpop.f32.mrf.mxu3 }
 0xc2d   :  { %v10998_v45 = vadd.f32 %v10997_v8, %v10985_v27 }
 0xc2f   :  { %v11011_v57 = vadd.f32 %v11010_v60, %v10998_v45 }
 0xc31   :  { %v11198_v3 = vadd.f32 %v11011_v57, %v20873_v20 }
 0xc33   :  { %v11202_v18 = vadd.f32 %v17692_v11, %v11198_v3 }
 0xc34   :  { %v10999_v48 = vpop.f32.mrf.mxu3 }
 0xc35   :  { %11206 = vst [vmem:[#allocation2 + $0x10] sm:$0xff] %v11202_v18 }
 0xc37   :  { %v11075_v59 = vpop.f32.mrf.mxu1 }
 0xc38   :  { %v11088_v24 = vpop.f32.mrf.mxu0 }
 0xc3a   :  { %v11049_v5 = vpop.f32.mrf.mxu2 }
 0xc3b   :  { %v11050_v50 = vadd.f32 %v11049_v5, %v11037_v6 }
 0xc3f   :  { %v11077_v39 = vpop.f32.mrf.mxu1 }
 0xc40   :  { %v11090_v12 = vpop.f32.mrf.mxu0 }
 0xc42   :  { %v11051_v34 = vpop.f32.mrf.mxu2 }
 0xc4c   :  { %v11062_v53 = vpop.f32.mrf.mxu3 }
 0xc4d   :  { %v11063_v63 = vadd.f32 %v11062_v53, %v11050_v50 }
 0xc4f   :  { %v11076_v4 = vadd.f32 %v11075_v59, %v11063_v63 }
 0xc51   :  { %v11089_v13 = vadd.f32 %v11088_v24, %v11076_v4 }
 0xc54   :  { %v11064_v31 = vpop.f32.mrf.mxu3 }
 0xc57   :  { %v11127_v28 = vpop.f32.mrf.mxu1 }
 0xc58   :  { %v11140_v1 = vpop.f32.mrf.mxu0 }
 0xc5a   :  { %v11101_v20 = vpop.f32.mrf.mxu2 }
 0xc5b   :  { %v11102_v14 = vadd.f32 %v11101_v20, %v11089_v13 }
 0xc5f   :  { %v11129_v43 = vpop.f32.mrf.mxu1 }
 0xc60   :  { %v11142_v51 = vpop.f32.mrf.mxu0 }
 0xc62   :  { %v11103_v44 = vpop.f32.mrf.mxu2 }
 0xc6c   :  { %v11114_v30 = vpop.f32.mrf.mxu3 }
 0xc6d   :  { %v11115_v41 = vadd.f32 %v11114_v30, %v11102_v14 }
 0xc6f   :  { %v11128_v9 = vadd.f32 %v11127_v28, %v11115_v41 }
 0xc71   :  { %v11141_v36 = vadd.f32 %v11140_v1, %v11128_v9 }
 0xc74   :  { %v11192_v0 = vpop.f32.mrf.mxu0  ;;  %v11116_v16 = vpop.f32.mrf.mxu3 }
 0xc75   :  { %v11179_v62 = vpop.f32.mrf.mxu1 }
 0xc7a   :  { %v11153_v54 = vpop.f32.mrf.mxu2 }
 0xc7b   :  { %v11154_v56 = vadd.f32 %v11153_v54, %v11141_v36 }
 0xc7c   :  { %v11194_v42 = vpop.f32.mrf.mxu0 }
 0xc7d   :  { %v11181_v37 = vpop.f32.mrf.mxu1 }
 0xc82   :  { %v11155_v35 = vpop.f32.mrf.mxu2 }
 0xc8c   :  { %v11166_v33 = vpop.f32.mrf.mxu3 }
 0xc8d   :  { %v11167_v49 = vadd.f32 %v11166_v33, %v11154_v56 }
 0xc8f   :  { %v11180_v22 = vadd.f32 %v11179_v62, %v11167_v49 }
 0xc91   :  { %v11193_v7 = vadd.f32 %v11192_v0, %v11180_v22 }
 0xc93   :  { %v11199_v61 = vadd.f32 %v11193_v7, %v20885_v2 }
 0xc94   :  { %v11168_v10 = vpop.f32.mrf.mxu3 }
 0xc95   :  { %v11203_v17 = vadd.f32 %v17693_v32, %v11199_v61 }
 0xc97   :  { %11207 = vst.msk [vmem:[#allocation2 + $0x18] sm:$0xff] %vm157_vm1, %v11203_v17 }
 0xc98   :  { %11218 = dma.vmem_to_hbm [thread:$0]  %s11214_s23, 512, %s11216_s3, [#allocation3]  }
 0xc99   :  { %17718 = dma.done.wait [#allocation3], 512  }
 0xc9a   :  { %17719 = vsyncadd [#allocation3], 4294966784 }
 0xc9b   :  { %11223 = vsyncpa [#allocation3], 1 }

</bundles_post_ra>
